<compile_context>
chip_gen: v7x
topology: tpu7x:2x2x1
jax: 0.10.0
libtpu: 0.0.40
codegen_flags: <defaults>
</compile_context>

<pallas_src>
import functools

import jax
import jax.numpy as jnp
from jax.experimental import pallas as pl
from jax.experimental.pallas import tpu as pltpu


def _pick_tile(dim, cap, align):
    """Largest tile <= cap that divides dim and is a multiple of align; else dim."""
    if dim <= cap:
        return dim
    for t in range(cap, 0, -1):
        if dim % t == 0 and t % align == 0:
            return t
    return dim


def _pick_group(bh, n, tm, tk, itemsize, byte_budget=8 * 1024 * 1024):
    """Heads per grid step: lane-dense (G*N % 128 == 0), divides B*H, A-block fits
    the byte budget, and (when possible) leaves >= 2 groups for v7x megacore."""
    cands = [
        g
        for g in range(1, bh + 1)
        if bh % g == 0
        and (g * n) % 128 == 0
        and g * tm * tk * itemsize <= byte_budget
    ]
    if not cands:
        return 1
    multi = [g for g in cands if bh // g >= 2]
    return max(multi) if multi else max(cands)


def _bmm_kernel(a_ref, b_ref, o_ref, acc_ref, *, g_heads):
    # a_ref: (G, tm, tk)   b_ref: (G, tk, N)   o_ref: (1, tm, G*N)
    # acc_ref: (tm, G*N) float32, persists across the K grid axis.
    @pl.when(pl.program_id(2) == 0)
    def _zero():
        acc_ref[...] = jnp.zeros_like(acc_ref)

    parts = [
        jnp.dot(a_ref[g], b_ref[g], preferred_element_type=jnp.float32)
        for g in range(g_heads)
    ]
    acc_ref[...] += parts[0] if g_heads == 1 else jnp.concatenate(parts, axis=-1)

    @pl.when(pl.program_id(2) == pl.num_programs(2) - 1)
    def _store():
        o_ref[0] = acc_ref[...].astype(o_ref.dtype)


def batched_matmul(a, b, *, compute_dtype=None, out_dtype=jnp.float32):
    """a: [B, H, M, K], b: [B, H, K, N] -> [B, H, M, N].

    compute_dtype: optional operand cast (e.g. jnp.bfloat16 for the attention
    P@V pattern); accumulation is always float32.
    """
    B, H, M, K = a.shape
    B2, H2, K2, N = b.shape
    assert (B, H, K) == (B2, H2, K2)
    BH = B * H

    a3 = a.reshape(BH, M, K)
    b3 = b.reshape(BH, K, N)
    if compute_dtype is not None:
        a3 = a3.astype(compute_dtype)
        b3 = b3.astype(compute_dtype)
    in_itemsize = jnp.dtype(a3.dtype).itemsize

    tm = _pick_tile(M, 512, 8)      # non-reduction tile (full M = 384 here)
    tk = _pick_tile(K, 1024, 128)   # reduction tile (full K = 384 here)
    G = _pick_group(BH, N, tm, tk, in_itemsize)

    n_groups = BH // G
    n_m = M // tm
    n_k = K // tk

    kernel = functools.partial(_bmm_kernel, g_heads=G)

    cost = pl.CostEstimate(
        flops=2 * BH * M * K * N,
        transcendentals=0,
        bytes_accessed=(a3.size + b3.size) * in_itemsize
        + BH * M * N * jnp.dtype(out_dtype).itemsize,
    )

    out = pl.pallas_call(
        kernel,
        out_shape=jax.ShapeDtypeStruct((n_groups, M, G * N), out_dtype),
        grid_spec=pltpu.PrefetchScalarGridSpec(
            num_scalar_prefetch=0,
            grid=(n_groups, n_m, n_k),
            in_specs=[
                pl.BlockSpec((G, tm, tk), lambda gi, mi, ki: (gi, mi, ki)),
                pl.BlockSpec((G, tk, N), lambda gi, mi, ki: (gi, ki, 0)),
            ],
            out_specs=pl.BlockSpec((1, tm, G * N), lambda gi, mi, ki: (gi, mi, 0)),
            scratch_shapes=[pltpu.VMEM((tm, G * N), jnp.float32)],
        ),
        compiler_params=pltpu.CompilerParams(
            dimension_semantics=("parallel", "parallel", "arbitrary"),
        ),
        cost_estimate=cost,
    )(a3, b3)

    # (n_groups, M, G*N) -> (B, H, M, N): heads were laid out side by side
    # along the lane axis inside each group (layout plumbing in the wrapper).
    out = jnp.transpose(out.reshape(n_groups, M, G, N), (0, 2, 1, 3))
    return out.reshape(B, H, M, N)


if __name__ == "__main__":
    # Shapes from the module: x179 [1, 12, 384, 384], x167 [1, 12, 384, 64]
    B, H, S, D = 1, 12, 384, 64
    key = jax.random.PRNGKey(0)
    k1, k2 = jax.random.split(key)
    x179 = jax.random.normal(k1, (B, H, S, S), dtype=jnp.float32)  # scores
    x167 = jax.random.normal(k2, (B, H, S, D), dtype=jnp.float32)  # values

    ref = jnp.einsum("bhmk,bhkn->bhmn", x179, x167)

    # Exact path (f32 operands): matches torch.matmul semantics.
    out_f32 = jax.block_until_ready(batched_matmul(x179, x167))
    assert out_f32.shape == (B, H, S, D)
    assert jnp.allclose(out_f32, ref, atol=2e-3, rtol=2e-3)

    # Fast path from the perf review: bf16 operands, f32 accumulation.
    out_bf16 = jax.block_until_ready(
        batched_matmul(x179, x167, compute_dtype=jnp.bfloat16)
    )
    assert out_bf16.shape == (B, H, S, D)
    assert jnp.allclose(out_bf16, ref, atol=1.0, rtol=5e-2)

    print("KERNEL_OK")
</pallas_src>

<mosaic_0001>
module attributes {stable_mosaic.version = 11 : i64} {
  func.func @_bmm_kernel(%arg0: i32, %arg1: i32, %arg2: i32, %arg3: memref<6x384x384xf32, #tpu.memory_space<vmem>>, %arg4: memref<6x384x64xf32, #tpu.memory_space<vmem>>, %arg5: memref<1x384x384xf32, #tpu.memory_space<vmem>>, %arg6: memref<384x384xf32, #tpu.memory_space<vmem>>) attributes {dimension_semantics = [#tpu.dimension_semantics<parallel>, #tpu.dimension_semantics<parallel>, #tpu.dimension_semantics<arbitrary>], iteration_bounds = array<i64: 2, 1, 1>, scalar_prefetch = 0 : i64, scratch_operands = 1 : i64, tpu.core_type = #tpu.core_type<tc>, window_params = [{transform_indices = @transform_0, window_bounds = array<i64: 6, 384, 384>}, {transform_indices = @transform_1, window_bounds = array<i64: 6, 384, 64>}, {transform_indices = @transform_2, window_bounds = array<i64: 1, 384, 384>}]} {
    %c0_i32 = arith.constant 0 : i32
    %0 = arith.cmpi eq, %arg2, %c0_i32 : i32
    %1 = arith.extui %0 : i1 to i32
    %c0_i32_0 = arith.constant 0 : i32
    %2 = arith.cmpi ne, %1, %c0_i32_0 : i32
    scf.if %2 {
      %cst_42 = arith.constant 0.000000e+00 : f32
      %40 = vector.broadcast %cst_42 : f32 to vector<384x384xf32>
      %c0_43 = arith.constant 0 : index
      %c0_44 = arith.constant 0 : index
      %41 = vector.load %arg6[%c0_43, %c0_44] : memref<384x384xf32, #tpu.memory_space<vmem>>, vector<384x384xf32>
      tpu.vector_store %arg6[%c0_43, %c0_44], %40 {strides = array<i32>} : memref<384x384xf32, #tpu.memory_space<vmem>>, vector<384x384xf32>,
    } else {
    }
    %c0 = arith.constant 0 : index
    %c0_1 = arith.constant 0 : index
    %c0_2 = arith.constant 0 : index
    %3 = vector.load %arg3[%c0, %c0_1, %c0_2] : memref<6x384x384xf32, #tpu.memory_space<vmem>>, vector<1x384x384xf32>
    %4 = vector.shape_cast %3 : vector<1x384x384xf32> to vector<384x384xf32>
    %c0_3 = arith.constant 0 : index
    %c0_4 = arith.constant 0 : index
    %c0_5 = arith.constant 0 : index
    %5 = vector.load %arg4[%c0_3, %c0_4, %c0_5] : memref<6x384x64xf32, #tpu.memory_space<vmem>>, vector<1x384x64xf32>
    %6 = vector.shape_cast %5 : vector<1x384x64xf32> to vector<384x64xf32>
    %cst = arith.constant dense<0.000000e+00> : vector<384x64xf32>
    %7 = tpu.matmul %4, %6, %cst {dimension_numbers = #tpu.dot_dimension_numbers<[1], [0], [0], [1], [0, 0, 1, 1], [], []>} : vector<384x384xf32>, vector<384x64xf32>, vector<384x64xf32> -> vector<384x64xf32>
    %c1 = arith.constant 1 : index
    %c0_6 = arith.constant 0 : index
    %c0_7 = arith.constant 0 : index
    %8 = vector.load %arg3[%c1, %c0_6, %c0_7] : memref<6x384x384xf32, #tpu.memory_space<vmem>>, vector<1x384x384xf32>
    %9 = vector.shape_cast %8 : vector<1x384x384xf32> to vector<384x384xf32>
    %c1_8 = arith.constant 1 : index
    %c0_9 = arith.constant 0 : index
    %c0_10 = arith.constant 0 : index
    %10 = vector.load %arg4[%c1_8, %c0_9, %c0_10] : memref<6x384x64xf32, #tpu.memory_space<vmem>>, vector<1x384x64xf32>
    %11 = vector.shape_cast %10 : vector<1x384x64xf32> to vector<384x64xf32>
    %cst_11 = arith.constant dense<0.000000e+00> : vector<384x64xf32>
    %12 = tpu.matmul %9, %11, %cst_11 {dimension_numbers = #tpu.dot_dimension_numbers<[1], [0], [0], [1], [0, 0, 1, 1], [], []>} : vector<384x384xf32>, vector<384x64xf32>, vector<384x64xf32> -> vector<384x64xf32>
    %c2 = arith.constant 2 : index
    %c0_12 = arith.constant 0 : index
    %c0_13 = arith.constant 0 : index
    %13 = vector.load %arg3[%c2, %c0_12, %c0_13] : memref<6x384x384xf32, #tpu.memory_space<vmem>>, vector<1x384x384xf32>
    %14 = vector.shape_cast %13 : vector<1x384x384xf32> to vector<384x384xf32>
    %c2_14 = arith.constant 2 : index
    %c0_15 = arith.constant 0 : index
    %c0_16 = arith.constant 0 : index
    %15 = vector.load %arg4[%c2_14, %c0_15, %c0_16] : memref<6x384x64xf32, #tpu.memory_space<vmem>>, vector<1x384x64xf32>
    %16 = vector.shape_cast %15 : vector<1x384x64xf32> to vector<384x64xf32>
    %cst_17 = arith.constant dense<0.000000e+00> : vector<384x64xf32>
    %17 = tpu.matmul %14, %16, %cst_17 {dimension_numbers = #tpu.dot_dimension_numbers<[1], [0], [0], [1], [0, 0, 1, 1], [], []>} : vector<384x384xf32>, vector<384x64xf32>, vector<384x64xf32> -> vector<384x64xf32>
    %c3 = arith.constant 3 : index
    %c0_18 = arith.constant 0 : index
    %c0_19 = arith.constant 0 : index
    %18 = vector.load %arg3[%c3, %c0_18, %c0_19] : memref<6x384x384xf32, #tpu.memory_space<vmem>>, vector<1x384x384xf32>
    %19 = vector.shape_cast %18 : vector<1x384x384xf32> to vector<384x384xf32>
    %c3_20 = arith.constant 3 : index
    %c0_21 = arith.constant 0 : index
    %c0_22 = arith.constant 0 : index
    %20 = vector.load %arg4[%c3_20, %c0_21, %c0_22] : memref<6x384x64xf32, #tpu.memory_space<vmem>>, vector<1x384x64xf32>
    %21 = vector.shape_cast %20 : vector<1x384x64xf32> to vector<384x64xf32>
    %cst_23 = arith.constant dense<0.000000e+00> : vector<384x64xf32>
    %22 = tpu.matmul %19, %21, %cst_23 {dimension_numbers = #tpu.dot_dimension_numbers<[1], [0], [0], [1], [0, 0, 1, 1], [], []>} : vector<384x384xf32>, vector<384x64xf32>, vector<384x64xf32> -> vector<384x64xf32>
    %c4 = arith.constant 4 : index
    %c0_24 = arith.constant 0 : index
    %c0_25 = arith.constant 0 : index
    %23 = vector.load %arg3[%c4, %c0_24, %c0_25] : memref<6x384x384xf32, #tpu.memory_space<vmem>>, vector<1x384x384xf32>
    %24 = vector.shape_cast %23 : vector<1x384x384xf32> to vector<384x384xf32>
    %c4_26 = arith.constant 4 : index
    %c0_27 = arith.constant 0 : index
    %c0_28 = arith.constant 0 : index
    %25 = vector.load %arg4[%c4_26, %c0_27, %c0_28] : memref<6x384x64xf32, #tpu.memory_space<vmem>>, vector<1x384x64xf32>
    %26 = vector.shape_cast %25 : vector<1x384x64xf32> to vector<384x64xf32>
    %cst_29 = arith.constant dense<0.000000e+00> : vector<384x64xf32>
    %27 = tpu.matmul %24, %26, %cst_29 {dimension_numbers = #tpu.dot_dimension_numbers<[1], [0], [0], [1], [0, 0, 1, 1], [], []>} : vector<384x384xf32>, vector<384x64xf32>, vector<384x64xf32> -> vector<384x64xf32>
    %c5 = arith.constant 5 : index
    %c0_30 = arith.constant 0 : index
    %c0_31 = arith.constant 0 : index
    %28 = vector.load %arg3[%c5, %c0_30, %c0_31] : memref<6x384x384xf32, #tpu.memory_space<vmem>>, vector<1x384x384xf32>
    %29 = vector.shape_cast %28 : vector<1x384x384xf32> to vector<384x384xf32>
    %c5_32 = arith.constant 5 : index
    %c0_33 = arith.constant 0 : index
    %c0_34 = arith.constant 0 : index
    %30 = vector.load %arg4[%c5_32, %c0_33, %c0_34] : memref<6x384x64xf32, #tpu.memory_space<vmem>>, vector<1x384x64xf32>
    %31 = vector.shape_cast %30 : vector<1x384x64xf32> to vector<384x64xf32>
    %cst_35 = arith.constant dense<0.000000e+00> : vector<384x64xf32>
    %32 = tpu.matmul %29, %31, %cst_35 {dimension_numbers = #tpu.dot_dimension_numbers<[1], [0], [0], [1], [0, 0, 1, 1], [], []>} : vector<384x384xf32>, vector<384x64xf32>, vector<384x64xf32> -> vector<384x64xf32>
    %c0_36 = arith.constant 0 : index
    %c0_37 = arith.constant 0 : index
    %33 = vector.load %arg6[%c0_36, %c0_37] : memref<384x384xf32, #tpu.memory_space<vmem>>, vector<384x384xf32>
    %34 = tpu.concatenate %7, %12, %17, %22, %27, %32 in 1 : vector<384x64xf32>, vector<384x64xf32>, vector<384x64xf32>, vector<384x64xf32>, vector<384x64xf32>, vector<384x64xf32> -> vector<384x384xf32>
    %35 = arith.addf %33, %34 : vector<384x384xf32>
    %c0_38 = arith.constant 0 : index
    %c0_39 = arith.constant 0 : index
    %36 = vector.load %arg6[%c0_38, %c0_39] : memref<384x384xf32, #tpu.memory_space<vmem>>, vector<384x384xf32>
    tpu.vector_store %arg6[%c0_38, %c0_39], %35 {strides = array<i32>} : memref<384x384xf32, #tpu.memory_space<vmem>>, vector<384x384xf32>,
    %c0_i32_40 = arith.constant 0 : i32
    %37 = arith.cmpi eq, %arg2, %c0_i32_40 : i32
    %38 = arith.extui %37 : i1 to i32
    %c0_i32_41 = arith.constant 0 : i32
    %39 = arith.cmpi ne, %38, %c0_i32_41 : i32
    scf.if %39 {
      %c0_42 = arith.constant 0 : index
      %c0_43 = arith.constant 0 : index
      %40 = vector.load %arg6[%c0_42, %c0_43] : memref<384x384xf32, #tpu.memory_space<vmem>>, vector<384x384xf32>
      %c0_44 = arith.constant 0 : index
      %c0_45 = arith.constant 0 : index
      %c0_46 = arith.constant 0 : index
      %41 = vector.load %arg5[%c0_44, %c0_45, %c0_46] : memref<1x384x384xf32, #tpu.memory_space<vmem>>, vector<1x384x384xf32>
      %42 = vector.shape_cast %41 : vector<1x384x384xf32> to vector<384x384xf32>
      %43 = vector.shape_cast %40 : vector<384x384xf32> to vector<1x384x384xf32>
      tpu.vector_store %arg5[%c0_44, %c0_45, %c0_46], %43 {strides = array<i32>} : memref<1x384x384xf32, #tpu.memory_space<vmem>>, vector<1x384x384xf32>,
    } else {
    }
    return
  }
  func.func @transform_0(%arg0: i32, %arg1: i32, %arg2: i32) -> (i32, i32, i32) {
    %c0_i32 = arith.constant 0 : i32
    return %arg0, %arg1, %arg2 : i32, i32, i32
  }
  func.func @transform_1(%arg0: i32, %arg1: i32, %arg2: i32) -> (i32, i32, i32) {
    %c0_i32 = arith.constant 0 : i32
    %c0_i32_0 = arith.constant 0 : i32
    return %arg0, %arg2, %c0_i32 : i32, i32, i32
  }
  func.func @transform_2(%arg0: i32, %arg1: i32, %arg2: i32) -> (i32, i32, i32) {
    %c0_i32 = arith.constant 0 : i32
    %c0_i32_0 = arith.constant 0 : i32
    return %arg0, %arg1, %c0_i32 : i32, i32, i32
  }
}

</mosaic_0001>

<bundles_post_ra>
// kernel: tpu_custom_call.1
= control target key start
LH: loop header
LB: loop body
LE: loop exit
PB: predicated region body
PF: predicated region fallthrough
CT: control target
= control target key end

     0   :  { %7 = vsyncpa [#allocation4], 0  ;;  %s12407_s0 = inlined_call_operand.hbm [shape: f32[12,384,384], index: 0, kind: input, shape index: {}]   ;;  %s12408_s1 = inlined_call_operand.vmem [shape: f32[12,384,64], index: 1, kind: input, shape index: {}]   ;;  %s12409_s2 = inlined_call_operand.hbm [shape: f32[2,384,384], index: 2, kind: output, shape index: {}]  }
   0x1   :  { %9 = vsyncpa [#allocation4 + $0x1], 0 }
   0x2   :  { %10 = vsyncpa [#allocation5], 0 }
   0x3   :  { %12 = vsyncpa [#allocation5 + $0x1], 0  ;;  %s9449_s9 = smov 0   ;;  %s9451_s10 = smov 0  }
   0x4   :  { %s9453_s11 = smov 0   ;;  %s9455_s12 = smov 0  }
   0x5   :  { %s9457_s13 = smov 0   ;;  %s9459_s14 = smov 0  }
   0x6 LB: > { %s6779_s15 = sadd.s32 4294967295, %s9424_s14   ;;  %s6780_s16 = sadd.s32 4294967294, %s9424_s14   ;;  %s9424_s14 = sphi %s9459_s14, %s18_s14   ;;  %s9420_s13 = sphi %s9457_s13, %s12544_s13   ;;  %s9416_s12 = sphi %s9455_s12, %s12543_s12   ;;  %s9412_s11 = sphi %s9453_s11, %s12542_s11   ;;  %s9408_s10 = sphi %s9451_s10, %s12541_s10   ;;  %s9404_s9 = sphi %s9449_s9, %s12540_s9  }
   0x7   : > { %s37_s17 = sadd.s32 1, %s9420_s13  ;;  %s48_s18 = sadd.s32 1, %s9412_s11 }
   0x8   : > { %p39_p0 = scmp.ge.s32.totalorder %s37_s17, 2  ;;  %p55_p1 = scmp.ne.s32.totalorder %s9412_s11, %s9408_s10 }
   0x9   : > { %p56_p2 = scmp.eq.s32.totalorder %s9424_s14, 0  ;;  %p61_p3 = scmp.ne.s32.totalorder %s9408_s10, %s9404_s9 }
   0xa   : > { %s12546_s17 = smov (%p39_p0, %s37_s17), 0  ;;  %p62_p5 = scmp.eq.s32.totalorder %s6779_s15, 0 }
   0xb   : > { %p9490_p4 = por %p56_p2, %p55_p1  ;;  %s41_s20 = ssub.s32 %s9420_s13, %s12546_s17 }
   0xc   : > { %p115_p6 = scmp.eq.s32.totalorder %s6779_s15, 1  ;;  %p46_p7 = scmp.eq.s32.totalorder %s41_s20, 0 }
   0xd   : > { %p9496_p8 = por %p62_p5, %p61_p3  ;;  %p121_p10 = scmp.eq.s32.totalorder %s6780_s16, 1 }
   0xe   : > { %p9500_p9 = por %p115_p6, %p55_p1  ;;  %p9255_p13 = scmp.lt.s32.totalorder %s9424_s14, 2 }
   0xf   : > { %s9505_s23 = scalar_select %p46_p7, %s9412_s11, %s48_s18  }
  0x10   : > { %s12415_s22 = scalar_select %p9500_p9, 1, 0 }
  0x11   : > { %p9507_p11 = por %p121_p10, %p61_p3  ;;  %s141_s25 = sand.u32 1, %s9412_s11  }
  0x12   : > { %s9237_s26 = smul.u32 6912, %s141_s25  ;;  %p9516_p0 = pnand %p9255_p13, %p9490_p4 }
  0x13   : > { %s12416_s24 = scalar_select %p9507_p11, 1, 0 }
  0x14   : > { %s9256_s28 = smul.u32 110592, %s9420_s13  ;;  %s145_s29 = scalar_lea.vmem [#allocation3], %s9237_s26 }
  0x15   : > { %s158_s30 = sshll.u32 %s145_s29, 4  ;;  %s9528_s6 = scalar_lea.sflag [#allocation4], %s141_s25  ;;  %s9526_s30 = int_to_ptr.vmem [resolvable:$true] %s158_s30 }
  0x16   : > { %s9524_s5 = scalar_lea.hbm %s12407_s0, %s9256_s28  ;;  %p9314_p2 = pneg %p9516_p0 }
  0x17   : > { %s9312_s7 = scalar_lea.hbm %s9524_s5, 110592  ;;  %s9317_s16 = scalar_lea.hbm %s12407_s0, 221184 }
  0x18   : > { %p9313_p1 = scmp.ne.s32.totalorder %s9524_s5, %s9312_s7  ;;  %p9318_p5 = scmp.lt.u32.totalorder %s9524_s5, %s12407_s0 }
  0x19   : > { %p9319_p6 = scmp.lt.u32.totalorder %s9317_s16, %s9312_s7  ;;  %p9321_p10 = scmp.lt.u32.totalorder %s9312_s7, %s9524_s5 }
  0x1a   : > { %p9315_p3 = pnand %p9314_p2, %p9313_p1 }
  0x1b   : > { %p9320_p7 = por %p9319_p6, %p9318_p5 }
  0x1c   : > { %p9316_p4 = pneg %p9315_p3 }
  0x1d   : > { %p9322_p13 = por %p9321_p10, %p9320_p7 }
  0x1f   : > { %p9323_p12 = pnand %p9322_p13, %p9316_p4 }
  0x21   : > { %9326 = shalt.err (!%p9323_p12)
}
  0x22   : > { %s9327_s20 = scalar_lea.vmem %s9526_s30, 110592  ;;  %s9426_s25 = smov [#allocation3]  }
  0x23   : > { %p9328_p1 = scmp.ne.s32.totalorder %s9526_s30, %s9327_s20  ;;  %s9332_s26 = sshll.u32 %s9426_s25, 4  ;;  %s9333_s26 = int_to_ptr.vmem [resolvable:$false] %s9332_s26 }
  0x24   : > { %s9334_s28 = scalar_lea.vmem %s9333_s26, 221184  ;;  %p9335_p9 = scmp.lt.s32.totalorder %s9526_s30, %s9333_s26 }
  0x25   : > { %p9330_p3 = pnand %p9328_p1, %p9314_p2  ;;  %p9336_p5 = scmp.lt.s32.totalorder %s9334_s28, %s9327_s20 }
  0x27   : > { %p9331_p11 = pneg %p9330_p3  ;;  %p9337_p6 = por %p9336_p5, %p9335_p9 }
  0x29   : > { %p9338_p7 = pnand %p9337_p6, %p9331_p11 }
  0x2b   : > { %9341 = shalt.err (!%p9338_p7)
}
  0x2c   : > { %s9427_s29 = smov 384   ;;  %s9428_s3 = smov 24  }
  0x2d   : > { %9250 = dma.hbm_to_vmem [thread:$0]  (!%p9516_p0), %s9524_s5, 110592, %s9526_s30, %s9528_s6, %s9427_s29, %s9427_s29, %s9428_s3  }
  0x2e   : > { %p6784_p12 = scmp.ge.s32.totalorder %s9424_s14, 1  ;;  %p181_p2 = scmp.lt.s32.totalorder %s9424_s14, 3 }
  0x30   : > { %p182_p4 = pnand %p6784_p12, %p181_p2 }
  0x32   : > { %185 = sbr.rel (%p182_p4) target bundleno = 1341 (0x53d), region = 28 }
  0x39   : > { %s9559_s4 = sand.u32 1, %s9408_s10  }
  0x3a   : > { %s9239_s7 = smul.u32 6912, %s9559_s4  ;;  %s188_s8 = scalar_lea.sflag [#allocation4], %s9559_s4 }
  0x3c   : > { %s9563_s15 = scalar_lea.vmem [#allocation3], %s9239_s7 }
  0x3d   : > { %9395 = dma.done.wait (%p9496_p8), %s188_s8, 110592  }
  0x3e   : > { %9397 = vsyncadd (%p9496_p8), %s188_s8, 4294856704  ;;  %s225_s27 = smul.u32 6, %s9416_s12  ;;  %v12411_v0 = vmov 0.0|0.0   ;;  %v388_v1 = vld [vmem:[%s9563_s15 + $0x10] sm:$0xff]  ;;  %v387_v40 = vld [vmem:[%s9563_s15 + $0x8] sm:$0xff]  ;;  %s9430_s21 = smov 64  }
  0x3f   : > { %8757 = vmatprep.subr.bf16.mxu0 %v12411_v0  ;;  %8165 = vmatprep.mubr.f32.mxu1 %v388_v1  ;;  %v391_v58 = vld [vmem:[%s9563_s15 + $0x28] sm:$0xff]  ;;  %v394_v60 = vld [vmem:[%s9563_s15 + $0x40] sm:$0xff]  ;;  %s9240_s18 = smul.u32 1152, %s9559_s4  ;;  %vm5928_vm0 = vcmask 523264   ;;  %p12537_p11 = scmp.ne.s32.totalorder %s12415_s22, 0 }
  0x40   : > { %p227_p9 = scmp.lt.s32.totalorder %s225_s27, 11  ;;  %642 = vmatprep.mubr.f32.mxu0 %v387_v40  ;;  %s9242_s20 = smul.u32 18432, %s9416_s12 }
  0x41   : > { %s10942_s19 = scalar_lea.vmem [#allocation6], %s9240_s18  ;;  %s6653_s12 = scalar_lea.sflag [#allocation5], %s9559_s4 }
  0x42   : > { %s12548_s27 = smov (!%p227_p9, %s225_s27), 11  ;;  %s6669_s25 = sshll.u32 %s10942_s19, 4  ;;  %s12355_s25 = int_to_ptr.vmem [resolvable:$true] %s6669_s25 }
  0x43   : > { %s9241_s30 = smul.u32 384, %s12548_s27  ;;  %s12353_s29 = scalar_lea.hbm %s12409_s2, %s9242_s20 }
  0x44   : > { %s9342_s3 = scalar_lea.vmem %s12355_s25, 18432  ;;  %s9431_s7 = smov [#allocation6]  }
  0x45   : > { %s9575_s16 = scalar_lea.vmem %s12408_s1, %s9241_s30  ;;  %p9343_p8 = scmp.ne.s32.totalorder %s12355_s25, %s9342_s3 }
  0x46   : > { %v530_v2 = vld [vmem:[%s9575_s16] sm:$0xff]  ;;  %v531_v3 = vld [vmem:[%s9575_s16 + $0x8] sm:$0xff]  ;;  %v532_v7 = vld [vmem:[%s9575_s16 + $0x10] sm:$0xff]  ;;  %s9346_s8 = sshll.u32 %s9431_s7, 4  ;;  %s9347_s8 = int_to_ptr.vmem [resolvable:$false] %s9346_s8 }
  0x47   : > { %v562_v4 = vld [vmem:[%s9575_s16 + $0x100] sm:$0xff]  ;;  %v8758_v5 = vpack.c.bf16 %v531_v3, %v530_v2  ;;  %v563_v6 = vld [vmem:[%s9575_s16 + $0x108] sm:$0xff]  ;;  %v533_v8 = vld [vmem:[%s9575_s16 + $0x18] sm:$0xff]  ;;  %p9344_p0 = pnand %p9343_p8, %p12537_p11  ;;  %p9349_p13 = scmp.lt.s32.totalorder %s12355_s25, %s9347_s8 }
  0x48   : > { %v8805_v9 = vpack.c.bf16 %v563_v6, %v562_v4  ;;  %v564_v10 = vld [vmem:[%s9575_s16 + $0x110] sm:$0xff]  ;;  %v565_v11 = vld [vmem:[%s9575_s16 + $0x118] sm:$0xff]  ;;  %v8761_v12 = vpack.c.bf16 %v533_v8, %v532_v7  ;;  %v566_v14 = vld [vmem:[%s9575_s16 + $0x120] sm:$0xff] }
  0x49   : > { %8759 = vmatpush1.bf16.msra.mxu0 %v8758_v5  ;;  %v8809_v13 = vpack.c.bf16 %v565_v11, %v564_v10  ;;  %v567_v15 = vld [vmem:[%s9575_s16 + $0x128] sm:$0xff]  ;;  %v534_v16 = vld [vmem:[%s9575_s16 + $0x20] sm:$0xff]  ;;  %v568_v20 = vld [vmem:[%s9575_s16 + $0x130] sm:$0xff]  ;;  %p9345_p10 = pneg %p9344_p0 }
  0x4a   : > { %8806 = vmatprep.subr.bf16.mxu1 %v8805_v9  ;;  %8760 = vmatprep.subr.bf16.mxu0 %v12411_v0  ;;  %v535_v17 = vld [vmem:[%s9575_s16 + $0x28] sm:$0xff]  ;;  %v8813_v18 = vpack.c.bf16 %v567_v15, %v566_v14  ;;  %v569_v21 = vld [vmem:[%s9575_s16 + $0x138] sm:$0xff]  ;;  %v536_v22 = vld [vmem:[%s9575_s16 + $0x30] sm:$0xff] }
  0x4b   : > { %8808 = vmatpush3.bf16.msra.mxu1 %v8805_v9  ;;  %v8764_v19 = vpack.c.bf16 %v535_v17, %v534_v16  ;;  %v537_v23 = vld [vmem:[%s9575_s16 + $0x38] sm:$0xff]  ;;  %v8817_v24 = vpack.c.bf16 %v569_v21, %v568_v20  ;;  %v570_v26 = vld [vmem:[%s9575_s16 + $0x140] sm:$0xff]  ;;  %v571_v27 = vld [vmem:[%s9575_s16 + $0x148] sm:$0xff] }
  0x4c   : > { %8810 = vmatprep.subr.bf16.mxu1 %v8809_v13  ;;  %v8767_v25 = vpack.c.bf16 %v537_v23, %v536_v22  ;;  %v538_v28 = vld [vmem:[%s9575_s16 + $0x40] sm:$0xff]  ;;  %v539_v29 = vld [vmem:[%s9575_s16 + $0x48] sm:$0xff]  ;;  %v8821_v30 = vpack.c.bf16 %v571_v27, %v570_v26  ;;  %v572_v32 = vld [vmem:[%s9575_s16 + $0x150] sm:$0xff] }
  0x4d   : > { %8762 = vmatpush1.bf16.msra.mxu0 %v8761_v12  ;;  %v8770_v31 = vpack.c.bf16 %v539_v29, %v538_v28  ;;  %v573_v33 = vld [vmem:[%s9575_s16 + $0x158] sm:$0xff]  ;;  %v540_v34 = vld [vmem:[%s9575_s16 + $0x50] sm:$0xff]  ;;  %v574_v38 = vld [vmem:[%s9575_s16 + $0x160] sm:$0xff] }
  0x4e   : > { %8763 = vmatprep.subr.bf16.mxu0 %v12411_v0  ;;  %v541_v35 = vld [vmem:[%s9575_s16 + $0x58] sm:$0xff]  ;;  %v8825_v36 = vpack.c.bf16 %v573_v33, %v572_v32  ;;  %v575_v39 = vld [vmem:[%s9575_s16 + $0x168] sm:$0xff]  ;;  %v542_v41 = vld [vmem:[%s9575_s16 + $0x60] sm:$0xff] }
  0x4f   : > { %8812 = vmatpush3.bf16.msra.mxu1 %v8809_v13  ;;  %v8773_v37 = vpack.c.bf16 %v541_v35, %v540_v34  ;;  %v543_v42 = vld [vmem:[%s9575_s16 + $0x68] sm:$0xff]  ;;  %v8829_v43 = vpack.c.bf16 %v575_v39, %v574_v38  ;;  %v576_v45 = vld [vmem:[%s9575_s16 + $0x170] sm:$0xff]  ;;  %v577_v46 = vld [vmem:[%s9575_s16 + $0x178] sm:$0xff] }
  0x50   : > { %8814 = vmatprep.subr.bf16.mxu1 %v8813_v18  ;;  %v8776_v44 = vpack.c.bf16 %v543_v42, %v542_v41  ;;  %v544_v47 = vld [vmem:[%s9575_s16 + $0x70] sm:$0xff]  ;;  %v545_v48 = vld [vmem:[%s9575_s16 + $0x78] sm:$0xff]  ;;  %v8833_v49 = vpack.c.bf16 %v577_v46, %v576_v45  ;;  %v546_v51 = vld [vmem:[%s9575_s16 + $0x80] sm:$0xff] }
  0x51   : > { %8765 = vmatpush1.bf16.msra.mxu0 %v8764_v19  ;;  %v8779_v50 = vpack.c.bf16 %v545_v48, %v544_v47  ;;  %v547_v52 = vld [vmem:[%s9575_s16 + $0x88] sm:$0xff]  ;;  %v6930_v53 = vld [vmem:[%s9575_s16 + $0x180] sm:$0xff]  ;;  %v548_v56 = vld [vmem:[%s9575_s16 + $0x90] sm:$0xff] }
  0x52   : > { %8766 = vmatprep.subr.bf16.mxu0 %v12411_v0  ;;  %v6931_v54 = vld [vmem:[%s9575_s16 + $0x188] sm:$0xff]  ;;  %v8782_v55 = vpack.c.bf16 %v547_v52, %v546_v51  ;;  %v549_v57 = vld [vmem:[%s9575_s16 + $0x98] sm:$0xff]  ;;  %v6932_v61 = vld [vmem:[%s9575_s16 + $0x190] sm:$0xff] }
  0x53   : > { %8816 = vmatpush3.bf16.msra.mxu1 %v8813_v18  ;;  %v8838_v59 = vpack.c.bf16 %v6931_v54, %v6930_v53  ;;  %v6933_v62 = vld [vmem:[%s9575_s16 + $0x198] sm:$0xff]  ;;  %v8785_v63 = vpack.c.bf16 %v549_v57, %v548_v56  ;;  %v550_v1 = vld [vmem:[%s9575_s16 + $0xa0] sm:$0xff]  ;;  %v551_v2 = vld [vmem:[%s9575_s16 + $0xa8] sm:$0xff] }
  0x54   : > { %8818 = vmatprep.subr.bf16.mxu1 %v8817_v24  ;;  %v397_v3 = vld [vmem:[%s9563_s15 + $0x58] sm:$0xff]  ;;  %v8841_v4 = vpack.c.bf16 %v6933_v62, %v6932_v61  ;;  %v400_v5 = vld [vmem:[%s9563_s15 + $0x70] sm:$0xff]  ;;  %v6934_v6 = vld [vmem:[%s9575_s16 + $0x1a0] sm:$0xff]  ;;  %v8788_v8 = vpack.c.bf16 %v551_v2, %v550_v1 }
  0x55   : > { %8768 = vmatpush1.bf16.msra.mxu0 %v8767_v25  ;;  %v6935_v7 = vld [vmem:[%s9575_s16 + $0x1a8] sm:$0xff]  ;;  %v552_v9 = vld [vmem:[%s9575_s16 + $0xb0] sm:$0xff]  ;;  %v553_v10 = vld [vmem:[%s9575_s16 + $0xb8] sm:$0xff] }
  0x56   : > { %8769 = vmatprep.subr.bf16.mxu0 %v12411_v0  ;;  %v403_v11 = vld [vmem:[%s9563_s15 + $0x88] sm:$0xff]  ;;  %v8844_v12 = vpack.c.bf16 %v6935_v7, %v6934_v6  ;;  %v406_v13 = vld [vmem:[%s9563_s15 + $0xa0] sm:$0xff]  ;;  %v6936_v14 = vld [vmem:[%s9575_s16 + $0x1b0] sm:$0xff]  ;;  %v8791_v16 = vpack.c.bf16 %v553_v10, %v552_v9 }
  0x57   : > { %8820 = vmatpush3.bf16.msra.mxu1 %v8817_v24  ;;  %v6937_v15 = vld [vmem:[%s9575_s16 + $0x1b8] sm:$0xff]  ;;  %v554_v17 = vld [vmem:[%s9575_s16 + $0xc0] sm:$0xff]  ;;  %v555_v18 = vld [vmem:[%s9575_s16 + $0xc8] sm:$0xff] }
  0x58   : > { %8822 = vmatprep.subr.bf16.mxu1 %v8821_v30  ;;  %v409_v19 = vld [vmem:[%s9563_s15 + $0xb8] sm:$0xff]  ;;  %v8847_v20 = vpack.c.bf16 %v6937_v15, %v6936_v14  ;;  %v412_v21 = vld [vmem:[%s9563_s15 + $0xd0] sm:$0xff]  ;;  %v6938_v22 = vld [vmem:[%s9575_s16 + $0x1c0] sm:$0xff]  ;;  %v8794_v24 = vpack.c.bf16 %v555_v18, %v554_v17 }
  0x59   : > { %8771 = vmatpush1.bf16.msra.mxu0 %v8770_v31  ;;  %v6939_v23 = vld [vmem:[%s9575_s16 + $0x1c8] sm:$0xff]  ;;  %v556_v25 = vld [vmem:[%s9575_s16 + $0xd0] sm:$0xff]  ;;  %v557_v26 = vld [vmem:[%s9575_s16 + $0xd8] sm:$0xff] }
  0x5a   : > { %8772 = vmatprep.subr.bf16.mxu0 %v12411_v0  ;;  %v415_v27 = vld [vmem:[%s9563_s15 + $0xe8] sm:$0xff]  ;;  %v8850_v28 = vpack.c.bf16 %v6939_v23, %v6938_v22  ;;  %v418_v29 = vld [vmem:[%s9563_s15 + $0x100] sm:$0xff]  ;;  %v6941_v31 = vld [vmem:[%s9575_s16 + $0x1d8] sm:$0xff]  ;;  %v8797_v32 = vpack.c.bf16 %v557_v26, %v556_v25 }
  0x5b   : > { %8824 = vmatpush3.bf16.msra.mxu1 %v8821_v30  ;;  %v6940_v30 = vld [vmem:[%s9575_s16 + $0x1d0] sm:$0xff]  ;;  %v558_v33 = vld [vmem:[%s9575_s16 + $0xe0] sm:$0xff]  ;;  %v559_v34 = vld [vmem:[%s9575_s16 + $0xe8] sm:$0xff] }
  0x5c   : > { %8826 = vmatprep.subr.bf16.mxu1 %v8825_v36  ;;  %v421_v35 = vld [vmem:[%s9563_s15 + $0x118] sm:$0xff]  ;;  %v6942_v38 = vld [vmem:[%s9575_s16 + $0x1e0] sm:$0xff]  ;;  %v6943_v39 = vld [vmem:[%s9575_s16 + $0x1e8] sm:$0xff]  ;;  %v8800_v40 = vpack.c.bf16 %v559_v34, %v558_v33 }
  0x5d   : > { %8774 = vmatpush1.bf16.msra.mxu0 %v8773_v37  ;;  %v424_v37 = vld [vmem:[%s9563_s15 + $0x130] sm:$0xff]  ;;  %v561_v42 = vld [vmem:[%s9575_s16 + $0xf8] sm:$0xff]  ;;  %v6963_v45 = vld [vmem:[%s9575_s16 + $0x288] sm:$0xff]  ;;  %v8856_v46 = vpack.c.bf16 %v6943_v39, %v6942_v38 }
  0x5e   : > { %8775 = vmatprep.subr.bf16.mxu0 %v12411_v0  ;;  %v560_v41 = vld [vmem:[%s9575_s16 + $0xf0] sm:$0xff]  ;;  %v430_v47 = vld [vmem:[%s9563_s15 + $0x160] sm:$0xff]  ;;  %v433_v52 = vld [vmem:[%s9563_s15 + $0x178] sm:$0xff] }
  0x5f   : > { %8828 = vmatpush3.bf16.msra.mxu1 %v8825_v36  ;;  %v8853_v36 = vpack.c.bf16 %v6941_v31, %v6940_v30  ;;  %v6944_v48 = vld [vmem:[%s9575_s16 + $0x1f0] sm:$0xff]  ;;  %v6965_v54 = vld [vmem:[%s9575_s16 + $0x298] sm:$0xff]  ;;  %v6946_v57 = vld [vmem:[%s9575_s16 + $0x200] sm:$0xff] }
  0x60   : > { %8830 = vmatprep.subr.bf16.mxu1 %v8829_v43  ;;  %v6964_v53 = vld [vmem:[%s9575_s16 + $0x290] sm:$0xff]  ;;  %v439_v62 = vld [vmem:[%s9563_s15 + $0x1a8] sm:$0xff]  ;;  %v6966_v1 = vld [vmem:[%s9575_s16 + $0x2a0] sm:$0xff] }
  0x61   : > { %8777 = vmatpush1.bf16.msra.mxu0 %v8776_v44  ;;  %v6962_v44 = vld [vmem:[%s9575_s16 + $0x280] sm:$0xff]  ;;  %v436_v56 = vld [vmem:[%s9563_s15 + $0x190] sm:$0xff]  ;;  %v8889_v61 = vpack.c.bf16 %v6965_v54, %v6964_v53  ;;  %v6967_v2 = vld [vmem:[%s9575_s16 + $0x2a8] sm:$0xff] }
  0x62   : > { %8778 = vmatprep.subr.bf16.mxu0 %v12411_v0  ;;  %v8885_v51 = vpack.c.bf16 %v6963_v45, %v6962_v44  ;;  %v389_v6 = vld [vmem:[%s9563_s15 + $0x18] sm:$0xff]  ;;  %v6950_v14 = vld [vmem:[%s9575_s16 + $0x220] sm:$0xff]  ;;  %v6951_v15 = vld [vmem:[%s9575_s16 + $0x228] sm:$0xff] }
  0x63   : > { %8832 = vmatpush3.bf16.msra.mxu1 %v8829_v43  ;;  %v427_v43 = vld [vmem:[%s9563_s15 + $0x148] sm:$0xff]  ;;  %v393_v7 = vld [vmem:[%s9563_s15 + $0x38] sm:$0xff]  ;;  %v396_v17 = vld [vmem:[%s9563_s15 + $0x50] sm:$0xff] }
  0x64   : > { %8834 = vmatprep.subr.bf16.mxu1 %v8833_v49  ;;  %v445_v9 = vld [vmem:[%s9563_s15 + $0x1d8] sm:$0xff]  ;;  %v6971_v22 = vld [vmem:[%s9575_s16 + $0x2c8] sm:$0xff]  ;;  %v454_v23 = vld [vmem:[%s9563_s15 + $0x220] sm:$0xff] }
  0x65   : > { %8780 = vmatpush1.bf16.msra.mxu0 %v8779_v50  ;;  %v8803_v50 = vpack.c.bf16 %v561_v42, %v560_v41  ;;  %v6953_v25 = vld [vmem:[%s9575_s16 + $0x238] sm:$0xff]  ;;  %v395_v26 = vld [vmem:[%s9563_s15 + $0x48] sm:$0xff]  ;;  %v6972_v31 = vld [vmem:[%s9575_s16 + $0x2d0] sm:$0xff] }
  0x66   : > { %8781 = vmatprep.subr.bf16.mxu0 %v12411_v0  ;;  %v460_v33 = vld [vmem:[%s9563_s15 + $0x250] sm:$0xff]  ;;  %v6954_v34 = vld [vmem:[%s9575_s16 + $0x240] sm:$0xff]  ;;  %v463_v39 = vld [vmem:[%s9563_s15 + $0x268] sm:$0xff] }
  0x67   : > { %8836 = vmatpush3.bf16.msra.mxu1 %v8833_v49  ;;  %v6945_v49 = vld [vmem:[%s9575_s16 + $0x1f8] sm:$0xff]  ;;  %v466_v41 = vld [vmem:[%s9563_s15 + $0x280] sm:$0xff]  ;;  %v6956_v42 = vld [vmem:[%s9575_s16 + $0x250] sm:$0xff] }
  0x68   : > { %8837 = vmatprep.subr.bf16.mxu1 %v12411_v0  ;;  %v401_v44 = vld [vmem:[%s9563_s15 + $0x78] sm:$0xff]  ;;  %v404_v53 = vld [vmem:[%s9563_s15 + $0x90] sm:$0xff] }
  0x69   : > { %8783 = vmatpush1.bf16.msra.mxu0 %v8782_v55  ;;  %v8859_v55 = vpack.c.bf16 %v6945_v49, %v6944_v48  ;;  %v405_v45 = vld [vmem:[%s9563_s15 + $0x98] sm:$0xff]  ;;  %v6974_v49 = vld [vmem:[%s9575_s16 + $0x2e0] sm:$0xff] }
  0x6a   : > { %8166 = vmatmul.mubr.f32.vlgmr.msra.gmra.mrb[0].mxu1 %v391_v58  ;;  %8784 = vmatprep.subr.bf16.mxu0 %v12411_v0  ;;  %v6947_v58 = vld [vmem:[%s9575_s16 + $0x208] sm:$0xff] }
  0x6b   : > { %8168 = vmatprep.mubr.f32.mxu1 %v394_v60  ;;  %8839 = vmatpush1.bf16.msra.mxu1 %v8838_v59  ;;  %v386_v59 = vld [vmem:[%s9563_s15] sm:$0xff] }
  0x6c   : > { %8840 = vmatprep.subr.bf16.mxu1 %v12411_v0  ;;  %v390_v60 = vld [vmem:[%s9563_s15 + $0x20] sm:$0xff] }
  0x6d   : > { %8786 = vmatpush1.bf16.msra.mxu0 %v8785_v63  ;;  %v8862_v63 = vpack.c.bf16 %v6947_v58, %v6946_v57  ;;  %v478_v58 = vld [vmem:[%s9563_s15 + $0x2e0] sm:$0xff] }
  0x6e   : > { %8169 = vmatmul.mubr.f32.gmra.mrb[2].mxu1 %v397_v3  ;;  %8787 = vmatprep.subr.bf16.mxu0 %v12411_v0  ;;  %v442_v3 = vld [vmem:[%s9563_s15 + $0x1c0] sm:$0xff] }
  0x6f   : > { %8171 = vmatprep.mubr.f32.mxu1 %v400_v5  ;;  %8842 = vmatpush1.bf16.msra.mxu1 %v8841_v4  ;;  %v6948_v4 = vld [vmem:[%s9575_s16 + $0x210] sm:$0xff]  ;;  %v6949_v5 = vld [vmem:[%s9575_s16 + $0x218] sm:$0xff] }
  0x70   : > { %8843 = vmatprep.subr.bf16.mxu1 %v12411_v0  ;;  %v8865_v10 = vpack.c.bf16 %v6949_v5, %v6948_v4  ;;  %v414_v4 = vld [vmem:[%s9563_s15 + $0xe0] sm:$0xff]  ;;  %v487_v5 = vld [vmem:[%s9563_s15 + $0x328] sm:$0xff] }
  0x71   : > { %8789 = vmatpush1.bf16.msra.mxu0 %v8788_v8  ;;  %v8893_v8 = vpack.c.bf16 %v6967_v2, %v6966_v1  ;;  %v484_v2 = vld [vmem:[%s9563_s15 + $0x310] sm:$0xff] }
  0x72   : > { %8172 = vmatmul.mubr.f32.gmra.mrb[4].mxu1 %v403_v11  ;;  %8790 = vmatprep.subr.bf16.mxu0 %v12411_v0  ;;  %v6968_v11 = vld [vmem:[%s9575_s16 + $0x2b0] sm:$0xff] }
  0x73   : > { %8174 = vmatprep.mubr.f32.mxu1 %v406_v13  ;;  %8845 = vmatpush1.bf16.msra.mxu1 %v8844_v12  ;;  %v6969_v12 = vld [vmem:[%s9575_s16 + $0x2b8] sm:$0xff]  ;;  %v448_v13 = vld [vmem:[%s9563_s15 + $0x1f0] sm:$0xff] }
  0x74   : > { %8846 = vmatprep.subr.bf16.mxu1 %v12411_v0  ;;  %v8897_v18 = vpack.c.bf16 %v6969_v12, %v6968_v11  ;;  %v416_v11 = vld [vmem:[%s9563_s15 + $0xf0] sm:$0xff] }
  0x75   : > { %8792 = vmatpush1.bf16.msra.mxu0 %v8791_v16  ;;  %v392_v16 = vld [vmem:[%s9563_s15 + $0x30] sm:$0xff] }
  0x76   : > { %8175 = vmatmul.mubr.f32.gmra.mrb[6].mxu1 %v409_v19  ;;  %8793 = vmatprep.subr.bf16.mxu0 %v12411_v0  ;;  %v451_v19 = vld [vmem:[%s9563_s15 + $0x208] sm:$0xff]  ;;  %v420_v12 = vld [vmem:[%s9563_s15 + $0x110] sm:$0xff] }
  0x77   : > { %8177 = vmatprep.mubr.f32.mxu1 %v412_v21  ;;  %8848 = vmatpush1.bf16.msra.mxu1 %v8847_v20  ;;  %v8868_v20 = vpack.c.bf16 %v6951_v15, %v6950_v14  ;;  %v6970_v21 = vld [vmem:[%s9575_s16 + $0x2c0] sm:$0xff]  ;;  %v6976_v15 = vld [vmem:[%s9575_s16 + $0x2f0] sm:$0xff] }
  0x78   : > { %8849 = vmatprep.subr.bf16.mxu1 %v12411_v0  ;;  %v502_v14 = vld [vmem:[%s9563_s15 + $0x3a0] sm:$0xff] }
  0x79   : > { %8795 = vmatpush1.bf16.msra.mxu0 %v8794_v24  ;;  %v6952_v24 = vld [vmem:[%s9575_s16 + $0x230] sm:$0xff] }
  0x7a   : > { %8178 = vmatmul.mubr.f32.gmra.mrb[8].mxu1 %v415_v27  ;;  %8796 = vmatprep.subr.bf16.mxu0 %v12411_v0  ;;  %v399_v27 = vld [vmem:[%s9563_s15 + $0x68] sm:$0xff]  ;;  %v8871_v30 = vpack.c.bf16 %v6953_v25, %v6952_v24  ;;  %v514_v25 = vld [vmem:[%s9563_s15 + $0x400] sm:$0xff] }
  0x7b   : > { %8180 = vmatprep.mubr.f32.mxu1 %v418_v29  ;;  %8851 = vmatpush1.bf16.msra.mxu1 %v8850_v28  ;;  %v8901_v28 = vpack.c.bf16 %v6971_v22, %v6970_v21  ;;  %v457_v29 = vld [vmem:[%s9563_s15 + $0x238] sm:$0xff]  ;;  %v508_v21 = vld [vmem:[%s9563_s15 + $0x3d0] sm:$0xff]  ;;  %v422_v22 = vld [vmem:[%s9563_s15 + $0x120] sm:$0xff] }
  0x7c   : > { %8852 = vmatprep.subr.bf16.mxu1 %v12411_v0  ;;  %v511_v24 = vld [vmem:[%s9563_s15 + $0x3e8] sm:$0xff] }
  0x7d   : > { %8798 = vmatpush1.bf16.msra.mxu0 %v8797_v32  ;;  %v6973_v32 = vld [vmem:[%s9575_s16 + $0x2d8] sm:$0xff] }
  0x7e   : > { %8181 = vmatmul.mubr.f32.gmra.mrb[10].mxu1 %v421_v35  ;;  %8799 = vmatprep.subr.bf16.mxu0 %v12411_v0  ;;  %v6955_v35 = vld [vmem:[%s9575_s16 + $0x248] sm:$0xff]  ;;  %v8905_v38 = vpack.c.bf16 %v6973_v32, %v6972_v31  ;;  %v432_v31 = vld [vmem:[%s9563_s15 + $0x170] sm:$0xff] }
  0x7f   : > { %8183 = vmatprep.mubr.f32.mxu1 %v424_v37  ;;  %8854 = vmatpush1.bf16.msra.mxu1 %v8853_v36  ;;  %v398_v36 = vld [vmem:[%s9563_s15 + $0x60] sm:$0xff]  ;;  %v523_v32 = vld [vmem:[%s9563_s15 + $0x448] sm:$0xff] }
  0x80   : > { %8855 = vmatprep.subr.bf16.mxu1 %v12411_v0  ;;  %v402_v37 = vld [vmem:[%s9563_s15 + $0x80] sm:$0xff] }
  0x81   : > { %8801 = vmatpush1.bf16.msra.mxu0 %v8800_v40  ;;  %v8874_v40 = vpack.c.bf16 %v6955_v35, %v6954_v34  ;;  %v431_v34 = vld [vmem:[%s9563_s15 + $0x168] sm:$0xff] }
  0x82   : > { %8184 = vmatmul.mubr.f32.gmra.mrb[12].mxu1 %v427_v43  ;;  %8802 = vmatprep.subr.bf16.mxu0 %v12411_v0  ;;  %v6957_v43 = vld [vmem:[%s9575_s16 + $0x258] sm:$0xff]  ;;  %v435_v35 = vld [vmem:[%s9563_s15 + $0x188] sm:$0xff] }
  0x83   : > { %8186 = vmatprep.mubr.f32.mxu1 %v430_v47  ;;  %8857 = vmatpush1.bf16.msra.mxu1 %v8856_v46  ;;  %v469_v46 = vld [vmem:[%s9563_s15 + $0x298] sm:$0xff]  ;;  %v472_v47 = vld [vmem:[%s9563_s15 + $0x2b0] sm:$0xff]  ;;  %v8877_v48 = vpack.c.bf16 %v6957_v43, %v6956_v42  ;;  %v6786_v42 = vld [vmem:[%s9563_s15 + $0x480] sm:$0xff] }
  0x84   : > { %8858 = vmatprep.subr.bf16.mxu1 %v12411_v0  ;;  %v6790_v43 = vld [vmem:[%s9563_s15 + $0x4a0] sm:$0xff] }
  0x85   : > { %8804 = vmatpush1.bf16.msra.mxu0 %v8803_v50  ;;  %v6958_v50 = vld [vmem:[%s9575_s16 + $0x260] sm:$0xff] }
  0x86   : > { %8187 = vmatmul.mubr.f32.gmra.mrb[14].mxu1 %v433_v52  ;;  %8886 = vmatprep.subr.bf16.mxu0 %v8885_v51  ;;  %v6975_v52 = vld [vmem:[%s9575_s16 + $0x2e8] sm:$0xff] }
  0x87   : > { %8189 = vmatprep.mubr.f32.mxu1 %v436_v56  ;;  %8860 = vmatpush1.bf16.msra.mxu1 %v8859_v55  ;;  %v8909_v54 = vpack.c.bf16 %v6975_v52, %v6974_v49  ;;  %v408_v55 = vld [vmem:[%s9563_s15 + $0xb0] sm:$0xff]  ;;  %v475_v56 = vld [vmem:[%s9563_s15 + $0x2c8] sm:$0xff]  ;;  %v6789_v52 = vld [vmem:[%s9563_s15 + $0x498] sm:$0xff] }
  0x88   : > { %643 = vmatmul.mubr.f32.vlgmr.msra.gmra.mrb[0].mxu0 %v386_v59  ;;  %8861 = vmatprep.subr.bf16.mxu1 %v12411_v0  ;;  %v6960_v59 = vld [vmem:[%s9575_s16 + $0x270] sm:$0xff]  ;;  %v7155_v49 = vld [vmem:[%s9575_s16 + $0x408] sm:$0xff] }
  0x89   : > { %8888 = vmatpush3.bf16.msra.mxu0 %v8885_v51  ;;  %647 = vmatprep.mubr.f32.mxu0 %v390_v60  ;;  %v6959_v51 = vld [vmem:[%s9575_s16 + $0x268] sm:$0xff]  ;;  %v6961_v60 = vld [vmem:[%s9575_s16 + $0x278] sm:$0xff] }
  0x8a   : > { %8190 = vmatmul.mubr.f32.gmra.mrb[16].mxu1 %v439_v62  ;;  %8890 = vmatprep.subr.bf16.mxu0 %v8889_v61  ;;  %v8880_v57 = vpack.c.bf16 %v6959_v51, %v6958_v50  ;;  %v411_v62 = vld [vmem:[%s9563_s15 + $0xc8] sm:$0xff]  ;;  %v8883_v1 = vpack.c.bf16 %v6961_v60, %v6960_v59  ;;  %v441_v50 = vld [vmem:[%s9563_s15 + $0x1b8] sm:$0xff]  ;;  %v6792_v59 = vld [vmem:[%s9563_s15 + $0x4b0] sm:$0xff] }
  0x8b   : > { %8192 = vmatprep.mubr.f32.mxu1 %v442_v3  ;;  %8863 = vmatpush1.bf16.msra.mxu1 %v8862_v63  ;;  %v481_v63 = vld [vmem:[%s9563_s15 + $0x2f8] sm:$0xff]  ;;  %v410_v3 = vld [vmem:[%s9563_s15 + $0xc0] sm:$0xff] }
  0x8c   : > { %648 = vmatmul.mubr.f32.gmra.mrb[2].mxu0 %v389_v6  ;;  %8864 = vmatprep.subr.bf16.mxu1 %v12411_v0  ;;  %v490_v6 = vld [vmem:[%s9563_s15 + $0x340] sm:$0xff] }
  0x8d   : > { %652 = vmatprep.mubr.f32.mxu0 %v393_v7  ;;  %8892 = vmatpush3.bf16.msra.mxu0 %v8889_v61  ;;  %v407_v61 = vld [vmem:[%s9563_s15 + $0xa8] sm:$0xff]  ;;  %v413_v7 = vld [vmem:[%s9563_s15 + $0xd8] sm:$0xff] }
  0x8e   : > { %8193 = vmatmul.mubr.f32.gmra.mrb[18].mxu1 %v445_v9  ;;  %8894 = vmatprep.subr.bf16.mxu0 %v8893_v8  ;;  %v493_v9 = vld [vmem:[%s9563_s15 + $0x358] sm:$0xff] }
  0x8f   : > { %8195 = vmatprep.mubr.f32.mxu1 %v448_v13  ;;  %8866 = vmatpush1.bf16.msra.mxu1 %v8865_v10  ;;  %v496_v10 = vld [vmem:[%s9563_s15 + $0x370] sm:$0xff]  ;;  %v499_v13 = vld [vmem:[%s9563_s15 + $0x388] sm:$0xff] }
  0x90   : > { %653 = vmatmul.mubr.f32.gmra.mrb[4].mxu0 %v392_v16  ;;  %8867 = vmatprep.subr.bf16.mxu1 %v12411_v0  ;;  %v6977_v16 = vld [vmem:[%s9575_s16 + $0x2f8] sm:$0xff] }
  0x91   : > { %657 = vmatprep.mubr.f32.mxu0 %v396_v17  ;;  %8896 = vmatpush3.bf16.msra.mxu0 %v8893_v8  ;;  %v417_v8 = vld [vmem:[%s9563_s15 + $0xf8] sm:$0xff]  ;;  %v419_v17 = vld [vmem:[%s9563_s15 + $0x108] sm:$0xff] }
  0x92   : > { %8196 = vmatmul.mubr.f32.gmra.mrb[20].mxu1 %v451_v19  ;;  %8898 = vmatprep.subr.bf16.mxu0 %v8897_v18  ;;  %v423_v19 = vld [vmem:[%s9563_s15 + $0x128] sm:$0xff] }
  0x93   : > { %8198 = vmatprep.mubr.f32.mxu1 %v454_v23  ;;  %8869 = vmatpush1.bf16.msra.mxu1 %v8868_v20  ;;  %v505_v20 = vld [vmem:[%s9563_s15 + $0x3b8] sm:$0xff]  ;;  %v426_v23 = vld [vmem:[%s9563_s15 + $0x140] sm:$0xff] }
  0x94   : > { %658 = vmatmul.mubr.f32.gmra.mrb[6].mxu0 %v395_v26  ;;  %8870 = vmatprep.subr.bf16.mxu1 %v12411_v0  ;;  %v425_v26 = vld [vmem:[%s9563_s15 + $0x138] sm:$0xff] }
  0x95   : > { %662 = vmatprep.mubr.f32.mxu0 %v399_v27  ;;  %8900 = vmatpush3.bf16.msra.mxu0 %v8897_v18  ;;  %v8913_v18 = vpack.c.bf16 %v6977_v16, %v6976_v15  ;;  %v429_v27 = vld [vmem:[%s9563_s15 + $0x158] sm:$0xff] }
  0x96   : > { %8199 = vmatmul.mubr.f32.gmra.mrb[22].mxu1 %v457_v29  ;;  %8902 = vmatprep.subr.bf16.mxu0 %v8901_v28  ;;  %v520_v29 = vld [vmem:[%s9563_s15 + $0x430] sm:$0xff]  ;;  %v449_v15 = vld [vmem:[%s9563_s15 + $0x1f8] sm:$0xff] }
  0x97   : > { %8201 = vmatprep.mubr.f32.mxu1 %v460_v33  ;;  %8872 = vmatpush1.bf16.msra.mxu1 %v8871_v30  ;;  %v428_v30 = vld [vmem:[%s9563_s15 + $0x150] sm:$0xff]  ;;  %v526_v33 = vld [vmem:[%s9563_s15 + $0x460] sm:$0xff]  ;;  %v453_v16 = vld [vmem:[%s9563_s15 + $0x218] sm:$0xff] }
  0x98   : > { %663 = vmatmul.mubr.f32.gmra.mrb[8].mxu0 %v398_v36  ;;  %8873 = vmatprep.subr.bf16.mxu1 %v12411_v0  ;;  %v529_v36 = vld [vmem:[%s9563_s15 + $0x478] sm:$0xff] }
  0x99   : > { %667 = vmatprep.mubr.f32.mxu0 %v402_v37  ;;  %8904 = vmatpush3.bf16.msra.mxu0 %v8901_v28  ;;  %v517_v28 = vld [vmem:[%s9563_s15 + $0x418] sm:$0xff]  ;;  %v6787_v37 = vld [vmem:[%s9563_s15 + $0x488] sm:$0xff] }
  0x9a   : > { %8202 = vmatmul.mubr.f32.gmra.mrb[24].mxu1 %v463_v39  ;;  %8906 = vmatprep.subr.bf16.mxu0 %v8905_v38  ;;  %v7123_v39 = vld [vmem:[%s9575_s16 + $0x308] sm:$0xff] }
  0x9b   : > { %8204 = vmatprep.mubr.f32.mxu1 %v466_v41  ;;  %8875 = vmatpush1.bf16.msra.mxu1 %v8874_v40  ;;  %v434_v40 = vld [vmem:[%s9563_s15 + $0x180] sm:$0xff] }
  0x9c   : > { %668 = vmatmul.mubr.f32.gmra.mrb[10].mxu0 %v401_v44  ;;  %8876 = vmatprep.subr.bf16.mxu1 %v12411_v0  ;;  %v438_v41 = vld [vmem:[%s9563_s15 + $0x1a0] sm:$0xff] }
  0x9d   : > { %672 = vmatprep.mubr.f32.mxu0 %v405_v45  ;;  %8908 = vmatpush3.bf16.msra.mxu0 %v8905_v38  ;;  %v7122_v38 = vld [vmem:[%s9575_s16 + $0x300] sm:$0xff]  ;;  %v7124_v45 = vld [vmem:[%s9575_s16 + $0x310] sm:$0xff] }
  0x9e   : > { %8205 = vmatmul.mubr.f32.gmra.mrb[26].mxu1 %v469_v46  ;;  %8910 = vmatprep.subr.bf16.mxu0 %v8909_v54  ;;  %v8918_v44 = vpack.c.bf16 %v7123_v39, %v7122_v38  ;;  %v7125_v46 = vld [vmem:[%s9575_s16 + $0x318] sm:$0xff]  ;;  %v6810_v38 = vld [vmem:[%s9563_s15 + $0x540] sm:$0xff] }
  0x9f   : > { %8207 = vmatprep.mubr.f32.mxu1 %v472_v47  ;;  %8878 = vmatpush1.bf16.msra.mxu1 %v8877_v48  ;;  %v7154_v47 = vld [vmem:[%s9575_s16 + $0x400] sm:$0xff]  ;;  %v437_v48 = vld [vmem:[%s9563_s15 + $0x198] sm:$0xff] }
  0xa0   : > { %673 = vmatmul.mubr.f32.gmra.mrb[12].mxu0 %v404_v53  ;;  %8879 = vmatprep.subr.bf16.mxu1 %v12411_v0  ;;  %v9798_v51 = vpack.c.bf16 %v7155_v49, %v7154_v47  ;;  %v8921_v53 = vpack.c.bf16 %v7125_v46, %v7124_v45  ;;  %v6813_v45 = vld [vmem:[%s9563_s15 + $0x558] sm:$0xff]  ;;  %v7143_v49 = vld [vmem:[%s9575_s16 + $0x3a8] sm:$0xff] }
  0xa1   : > { %677 = vmatprep.mubr.f32.mxu0 %v408_v55  ;;  %8912 = vmatpush3.bf16.msra.mxu0 %v8909_v54  ;;  %v6793_v54 = vld [vmem:[%s9563_s15 + $0x4b8] sm:$0xff]  ;;  %v7126_v55 = vld [vmem:[%s9575_s16 + $0x320] sm:$0xff] }
  0xa2   : > { %8208 = vmatmul.mubr.f32.gmra.mrb[28].mxu1 %v475_v56  ;;  %8914 = vmatprep.subr.bf16.mxu0 %v8913_v18  ;;  %v7127_v56 = vld [vmem:[%s9575_s16 + $0x328] sm:$0xff]  ;;  %v6817_v47 = vld [vmem:[%s9563_s15 + $0x578] sm:$0xff] }
  0xa3   : > { %8210 = vmatprep.mubr.f32.mxu1 %v478_v58  ;;  %8881 = vmatpush1.bf16.msra.mxu1 %v8880_v57  ;;  %v440_v57 = vld [vmem:[%s9563_s15 + $0x1b0] sm:$0xff]  ;;  %v8924_v60 = vpack.c.bf16 %v7127_v56, %v7126_v55 }
  0xa4   : > { %678 = vmatmul.mubr.f32.gmra.mrb[14].mxu0 %v407_v61  ;;  %8882 = vmatprep.subr.bf16.mxu1 %v12411_v0  ;;  %v444_v58 = vld [vmem:[%s9563_s15 + $0x1d0] sm:$0xff] }
  0xa5   : > { %682 = vmatprep.mubr.f32.mxu0 %v411_v62  ;;  %8916 = vmatpush3.bf16.msra.mxu0 %v8913_v18  ;;  %v6796_v61 = vld [vmem:[%s9563_s15 + $0x4d0] sm:$0xff] }
  0xa6   : > { %8211 = vmatmul.mubr.f32.gmra.mrb[30].mxu1 %v481_v63  ;;  %8966 = vmatprep.subr.bf16.mxu0 %v9798_v51  ;;  %v7128_v62 = vld [vmem:[%s9575_s16 + $0x330] sm:$0xff]  ;;  %v7129_v63 = vld [vmem:[%s9575_s16 + $0x338] sm:$0xff] }
  0xa7   : > { %8213 = vmatprep.mubr.f32.mxu1 %v484_v2  ;;  %8884 = vmatpush1.bf16.msra.mxu1 %v8883_v1  ;;  %v443_v1 = vld [vmem:[%s9563_s15 + $0x1c8] sm:$0xff]  ;;  %v6820_v55 = vld [vmem:[%s9563_s15 + $0x590] sm:$0xff] }
  0xa8   : > { %683 = vmatmul.mubr.f32.gmra.mrb[16].mxu0 %v410_v3  ;;  %8917 = vmatprep.subr.bf16.mxu1 %v12411_v0  ;;  %v447_v2 = vld [vmem:[%s9563_s15 + $0x1e8] sm:$0xff]  ;;  %v7144_v56 = vld [vmem:[%s9575_s16 + $0x3b0] sm:$0xff] }
  0xa9   : > { %687 = vmatprep.mubr.f32.mxu0 %v414_v4  ;;  %v6795_v3 = vld [vmem:[%s9563_s15 + $0x4c8] sm:$0xff]  ;;  %v8927_v4 = vpack.c.bf16 %v7129_v63, %v7128_v62  ;;  %v470_v63 = vld [vmem:[%s9563_s15 + $0x2a0] sm:$0xff] }
  0xaa   : > { %8214 = vmatmul.mubr.f32.gmra.mrb[32].mxu1 %v487_v5  ;;  %v6799_v5 = vld [vmem:[%s9563_s15 + $0x4e8] sm:$0xff] }
  0xab   : > { %8216 = vmatprep.mubr.f32.mxu1 %v490_v6  ;;  %v7130_v6 = vld [vmem:[%s9575_s16 + $0x340] sm:$0xff]  ;;  %v6823_v62 = vld [vmem:[%s9563_s15 + $0x5a8] sm:$0xff] }
  0xac   : > { %688 = vmatmul.mubr.f32.gmra.mrb[18].mxu0 %v413_v7  ;;  %v7131_v7 = vld [vmem:[%s9575_s16 + $0x348] sm:$0xff] }
  0xad   : > { %692 = vmatprep.mubr.f32.mxu0 %v417_v8  ;;  %v446_v8 = vld [vmem:[%s9563_s15 + $0x1e0] sm:$0xff] }
  0xae   : > { %8217 = vmatmul.mubr.f32.gmra.mrb[34].mxu1 %v493_v9  ;;  %v450_v9 = vld [vmem:[%s9563_s15 + $0x200] sm:$0xff] }
  0xaf   : > { %8219 = vmatprep.mubr.f32.mxu1 %v496_v10  ;;  %v6798_v10 = vld [vmem:[%s9563_s15 + $0x4e0] sm:$0xff] }
  0xb0   : > { %693 = vmatmul.mubr.f32.gmra.mrb[20].mxu0 %v416_v11  ;;  %v8930_v11 = vpack.c.bf16 %v7131_v7, %v7130_v6  ;;  %v7147_v6 = vld [vmem:[%s9575_s16 + $0x3c8] sm:$0xff]  ;;  %v477_v7 = vld [vmem:[%s9563_s15 + $0x2d8] sm:$0xff] }
  0xb1   : > { %697 = vmatprep.mubr.f32.mxu0 %v420_v12  ;;  %v6802_v12 = vld [vmem:[%s9563_s15 + $0x500] sm:$0xff] }
  0xb2   : > { %8220 = vmatmul.mubr.f32.gmra.mrb[36].mxu1 %v499_v13  ;;  %v7132_v13 = vld [vmem:[%s9575_s16 + $0x350] sm:$0xff] }
  0xb3   : > { %8222 = vmatprep.mubr.f32.mxu1 %v502_v14  ;;  %v7133_v14 = vld [vmem:[%s9575_s16 + $0x358] sm:$0xff] }
  0xb4   : > { %698 = vmatmul.mubr.f32.gmra.mrb[22].mxu0 %v419_v17  ;;  %v6801_v17 = vld [vmem:[%s9563_s15 + $0x4f8] sm:$0xff]  ;;  %v8933_v18 = vpack.c.bf16 %v7133_v14, %v7132_v13  ;;  %v480_v14 = vld [vmem:[%s9563_s15 + $0x2f0] sm:$0xff] }
  0xb5   : > { %702 = vmatprep.mubr.f32.mxu0 %v423_v19  ;;  %v6805_v19 = vld [vmem:[%s9563_s15 + $0x518] sm:$0xff] }
  0xb6   : > { %8223 = vmatmul.mubr.f32.gmra.mrb[38].mxu1 %v505_v20  ;;  %v7134_v20 = vld [vmem:[%s9575_s16 + $0x360] sm:$0xff]  ;;  %v7149_v13 = vld [vmem:[%s9575_s16 + $0x3d8] sm:$0xff] }
  0xb7   : > { %8225 = vmatprep.mubr.f32.mxu1 %v508_v21  ;;  %v7135_v21 = vld [vmem:[%s9575_s16 + $0x368] sm:$0xff] }
  0xb8   : > { %703 = vmatmul.mubr.f32.gmra.mrb[24].mxu0 %v422_v22  ;;  %v452_v22 = vld [vmem:[%s9563_s15 + $0x210] sm:$0xff] }
  0xb9   : > { %707 = vmatprep.mubr.f32.mxu0 %v426_v23  ;;  %v456_v23 = vld [vmem:[%s9563_s15 + $0x230] sm:$0xff] }
  0xba   : > { %8226 = vmatmul.mubr.f32.gmra.mrb[40].mxu1 %v511_v24  ;;  %v6804_v24 = vld [vmem:[%s9563_s15 + $0x510] sm:$0xff] }
  0xbb   : > { %8228 = vmatprep.mubr.f32.mxu1 %v514_v25  ;;  %v8936_v25 = vpack.c.bf16 %v7135_v21, %v7134_v20  ;;  %v7151_v20 = vld [vmem:[%s9575_s16 + $0x3e8] sm:$0xff] }
  0xbc   : > { %708 = vmatmul.mubr.f32.gmra.mrb[26].mxu0 %v425_v26  ;;  %v6808_v26 = vld [vmem:[%s9563_s15 + $0x530] sm:$0xff]  ;;  %v483_v21 = vld [vmem:[%s9563_s15 + $0x308] sm:$0xff] }
  0xbd   : > { %712 = vmatprep.mubr.f32.mxu0 %v429_v27  ;;  %v7136_v27 = vld [vmem:[%s9575_s16 + $0x370] sm:$0xff] }
  0xbe   : > { %8229 = vmatmul.mubr.f32.gmra.mrb[42].mxu1 %v517_v28  ;;  %v7137_v28 = vld [vmem:[%s9575_s16 + $0x378] sm:$0xff] }
  0xbf   : > { %8231 = vmatprep.mubr.f32.mxu1 %v520_v29  ;;  %v455_v29 = vld [vmem:[%s9563_s15 + $0x228] sm:$0xff] }
  0xc0   : > { %713 = vmatmul.mubr.f32.gmra.mrb[28].mxu0 %v428_v30  ;;  %v459_v30 = vld [vmem:[%s9563_s15 + $0x248] sm:$0xff] }
  0xc1   : > { %717 = vmatprep.mubr.f32.mxu0 %v432_v31  ;;  %v6807_v31 = vld [vmem:[%s9563_s15 + $0x528] sm:$0xff] }
  0xc2   : > { %8232 = vmatmul.mubr.f32.gmra.mrb[44].mxu1 %v523_v32  ;;  %v8939_v32 = vpack.c.bf16 %v7137_v28, %v7136_v27  ;;  %v486_v27 = vld [vmem:[%s9563_s15 + $0x320] sm:$0xff]  ;;  %v7153_v28 = vld [vmem:[%s9575_s16 + $0x3f8] sm:$0xff] }
  0xc3   : > { %8234 = vmatprep.mubr.f32.mxu1 %v526_v33  ;;  %v6811_v33 = vld [vmem:[%s9563_s15 + $0x548] sm:$0xff] }
  0xc4   : > { %718 = vmatmul.mubr.f32.gmra.mrb[30].mxu0 %v431_v34  ;;  %v7138_v34 = vld [vmem:[%s9575_s16 + $0x380] sm:$0xff] }
  0xc5   : > { %722 = vmatprep.mubr.f32.mxu0 %v435_v35  ;;  %v7139_v35 = vld [vmem:[%s9575_s16 + $0x388] sm:$0xff] }
  0xc6   : > { %8235 = vmatmul.mubr.f32.gmra.mrb[46].mxu1 %v529_v36  ;;  %v458_v36 = vld [vmem:[%s9563_s15 + $0x240] sm:$0xff]  ;;  %v8942_v39 = vpack.c.bf16 %v7139_v35, %v7138_v34  ;;  %v6837_v34 = vld [vmem:[%s9563_s15 + $0x618] sm:$0xff] }
  0xc7   : > { %1446 = vmatprep.mubr.f32.mxu1 %v6787_v37  ;;  %v462_v37 = vld [vmem:[%s9563_s15 + $0x260] sm:$0xff]  ;;  %v6841_v35 = vld [vmem:[%s9563_s15 + $0x638] sm:$0xff] }
  0xc8   : > { %723 = vmatmul.mubr.f32.gmra.mrb[32].mxu0 %v434_v40  ;;  %v6814_v40 = vld [vmem:[%s9563_s15 + $0x560] sm:$0xff] }
  0xc9   : > { %727 = vmatprep.mubr.f32.mxu0 %v438_v41  ;;  %v7140_v41 = vld [vmem:[%s9575_s16 + $0x390] sm:$0xff] }
  0xca   : > { %1447 = vmatmul.mubr.f32.vlgmr.msra.gmra.mrb[48].mxu1 %v6786_v42  ;;  %v7141_v42 = vld [vmem:[%s9575_s16 + $0x398] sm:$0xff] }
  0xcb   : > { %1451 = vmatprep.mubr.f32.mxu1 %v6790_v43  ;;  %8919 = vmatpush1.bf16.msra.mxu1 %v8918_v44  ;;  %v461_v43 = vld [vmem:[%s9563_s15 + $0x258] sm:$0xff]  ;;  %v8945_v46 = vpack.c.bf16 %v7141_v42, %v7140_v41  ;;  %v495_v41 = vld [vmem:[%s9563_s15 + $0x368] sm:$0xff] }
  0xcc   : > { %728 = vmatmul.mubr.f32.gmra.mrb[34].mxu0 %v437_v48  ;;  %8920 = vmatprep.subr.bf16.mxu1 %v12411_v0  ;;  %v465_v44 = vld [vmem:[%s9563_s15 + $0x278] sm:$0xff]  ;;  %v7142_v48 = vld [vmem:[%s9575_s16 + $0x3a0] sm:$0xff]  ;;  %v6843_v42 = vld [vmem:[%s9563_s15 + $0x648] sm:$0xff] }
  0xcd   : > { %732 = vmatprep.mubr.f32.mxu0 %v441_v50  ;;  %v464_v50 = vld [vmem:[%s9563_s15 + $0x270] sm:$0xff] }
  0xce   : > { %1452 = vmatmul.mubr.f32.gmra.mrb[50].mxu1 %v6789_v52  ;;  %v468_v52 = vld [vmem:[%s9563_s15 + $0x290] sm:$0xff] }
  0xcf   : > { %1456 = vmatprep.mubr.f32.mxu1 %v6793_v54  ;;  %8922 = vmatpush1.bf16.msra.mxu1 %v8921_v53  ;;  %v6816_v53 = vld [vmem:[%s9563_s15 + $0x570] sm:$0xff]  ;;  %v8948_v54 = vpack.c.bf16 %v7143_v49, %v7142_v48  ;;  %v497_v48 = vld [vmem:[%s9563_s15 + $0x378] sm:$0xff] }
  0xd0   : > { %733 = vmatmul.mubr.f32.gmra.mrb[36].mxu0 %v440_v57  ;;  %8923 = vmatprep.subr.bf16.mxu1 %v12411_v0  ;;  %v7145_v57 = vld [vmem:[%s9575_s16 + $0x3b8] sm:$0xff] }
  0xd1   : > { %737 = vmatprep.mubr.f32.mxu0 %v444_v58  ;;  %v467_v58 = vld [vmem:[%s9563_s15 + $0x288] sm:$0xff]  ;;  %v501_v49 = vld [vmem:[%s9563_s15 + $0x398] sm:$0xff] }
  0xd2   : > { %1457 = vmatmul.mubr.f32.gmra.mrb[52].mxu1 %v6792_v59  ;;  %v471_v59 = vld [vmem:[%s9563_s15 + $0x2a8] sm:$0xff] }
  0xd3   : > { %1461 = vmatprep.mubr.f32.mxu1 %v6796_v61  ;;  %8925 = vmatpush1.bf16.msra.mxu1 %v8924_v60  ;;  %v6819_v60 = vld [vmem:[%s9563_s15 + $0x588] sm:$0xff]  ;;  %v8951_v61 = vpack.c.bf16 %v7145_v57, %v7144_v56  ;;  %v6856_v56 = vld [vmem:[%s9563_s15 + $0x6b0] sm:$0xff] }
  0xd4   : > { %738 = vmatmul.mubr.f32.gmra.mrb[38].mxu0 %v443_v1  ;;  %8926 = vmatprep.subr.bf16.mxu1 %v12411_v0  ;;  %v474_v1 = vld [vmem:[%s9563_s15 + $0x2c0] sm:$0xff]  ;;  %v503_v57 = vld [vmem:[%s9563_s15 + $0x3a8] sm:$0xff] }
  0xd5   : > { %742 = vmatprep.mubr.f32.mxu0 %v447_v2  ;;  %v6822_v2 = vld [vmem:[%s9563_s15 + $0x5a0] sm:$0xff] }
  0xd6   : > { %1462 = vmatmul.mubr.f32.gmra.mrb[54].mxu1 %v6795_v3  ;;  %v6826_v3 = vld [vmem:[%s9563_s15 + $0x5c0] sm:$0xff] }
  0xd7   : > { %1466 = vmatprep.mubr.f32.mxu1 %v6799_v5  ;;  %8928 = vmatpush1.bf16.msra.mxu1 %v8927_v4  ;;  %v7146_v4 = vld [vmem:[%s9575_s16 + $0x3c0] sm:$0xff]  ;;  %v473_v5 = vld [vmem:[%s9563_s15 + $0x2b8] sm:$0xff] }
  0xd8   : > { %743 = vmatmul.mubr.f32.gmra.mrb[40].mxu0 %v446_v8  ;;  %8929 = vmatprep.subr.bf16.mxu1 %v12411_v0  ;;  %v8954_v8 = vpack.c.bf16 %v7147_v6, %v7146_v4  ;;  %v509_v4 = vld [vmem:[%s9563_s15 + $0x3d8] sm:$0xff] }
  0xd9   : > { %747 = vmatprep.mubr.f32.mxu0 %v450_v9  ;;  %v6825_v9 = vld [vmem:[%s9563_s15 + $0x5b8] sm:$0xff] }
  0xda   : > { %1467 = vmatmul.mubr.f32.gmra.mrb[56].mxu1 %v6798_v10  ;;  %v6829_v10 = vld [vmem:[%s9563_s15 + $0x5d8] sm:$0xff] }
  0xdb   : > { %1471 = vmatprep.mubr.f32.mxu1 %v6802_v12  ;;  %8931 = vmatpush1.bf16.msra.mxu1 %v8930_v11  ;;  %v476_v11 = vld [vmem:[%s9563_s15 + $0x2d0] sm:$0xff]  ;;  %v513_v6 = vld [vmem:[%s9563_s15 + $0x3f8] sm:$0xff] }
  0xdc   : > { %748 = vmatmul.mubr.f32.gmra.mrb[42].mxu0 %v449_v15  ;;  %8932 = vmatprep.subr.bf16.mxu1 %v12411_v0  ;;  %v7148_v12 = vld [vmem:[%s9575_s16 + $0x3d0] sm:$0xff] }
  0xdd   : > { %752 = vmatprep.mubr.f32.mxu0 %v453_v16  ;;  %v8957_v15 = vpack.c.bf16 %v7149_v13, %v7148_v12  ;;  %v6828_v16 = vld [vmem:[%s9563_s15 + $0x5d0] sm:$0xff]  ;;  %v515_v13 = vld [vmem:[%s9563_s15 + $0x408] sm:$0xff] }
  0xde   : > { %1472 = vmatmul.mubr.f32.gmra.mrb[58].mxu1 %v6801_v17  ;;  %v6832_v17 = vld [vmem:[%s9563_s15 + $0x5f0] sm:$0xff] }
  0xdf   : > { %1476 = vmatprep.mubr.f32.mxu1 %v6805_v19  ;;  %8934 = vmatpush1.bf16.msra.mxu1 %v8933_v18  ;;  %v479_v18 = vld [vmem:[%s9563_s15 + $0x2e8] sm:$0xff]  ;;  %v7150_v19 = vld [vmem:[%s9575_s16 + $0x3e0] sm:$0xff]  ;;  %v6868_v12 = vld [vmem:[%s9563_s15 + $0x710] sm:$0xff] }
  0xe0   : > { %753 = vmatmul.mubr.f32.gmra.mrb[44].mxu0 %v452_v22  ;;  %8935 = vmatprep.subr.bf16.mxu1 %v12411_v0  ;;  %v8960_v22 = vpack.c.bf16 %v7151_v20, %v7150_v19  ;;  %v6870_v19 = vld [vmem:[%s9563_s15 + $0x720] sm:$0xff] }
  0xe1   : > { %757 = vmatprep.mubr.f32.mxu0 %v456_v23  ;;  %v6831_v23 = vld [vmem:[%s9563_s15 + $0x5e8] sm:$0xff]  ;;  %v6874_v20 = vld [vmem:[%s9563_s15 + $0x740] sm:$0xff] }
  0xe2   : > { %1477 = vmatmul.mubr.f32.gmra.mrb[60].mxu1 %v6804_v24  ;;  %v6835_v24 = vld [vmem:[%s9563_s15 + $0x608] sm:$0xff] }
  0xe3   : > { %1481 = vmatprep.mubr.f32.mxu1 %v6808_v26  ;;  %8937 = vmatpush1.bf16.msra.mxu1 %v8936_v25  ;;  %v482_v25 = vld [vmem:[%s9563_s15 + $0x300] sm:$0xff]  ;;  %v7152_v26 = vld [vmem:[%s9575_s16 + $0x3f0] sm:$0xff] }
  0xe4   : > { %758 = vmatmul.mubr.f32.gmra.mrb[46].mxu0 %v455_v29  ;;  %8938 = vmatprep.subr.bf16.mxu1 %v12411_v0  ;;  %v6834_v29 = vld [vmem:[%s9563_s15 + $0x600] sm:$0xff] }
  0xe5   : > { %762 = vmatprep.mubr.f32.mxu0 %v459_v30  ;;  %v8963_v30 = vpack.c.bf16 %v7153_v28, %v7152_v26 }
  0xe6   : > { %1482 = vmatmul.mubr.f32.gmra.mrb[62].mxu1 %v6807_v31  ;;  %v6838_v31 = vld [vmem:[%s9563_s15 + $0x620] sm:$0xff] }
  0xe7   : > { %1486 = vmatprep.mubr.f32.mxu1 %v6811_v33  ;;  %8940 = vmatpush1.bf16.msra.mxu1 %v8939_v32  ;;  %v485_v32 = vld [vmem:[%s9563_s15 + $0x318] sm:$0xff] }
  0xe8   : > { %763 = vmatmul.mubr.f32.gmra.mrb[48].mxu0 %v458_v36  ;;  %8941 = vmatprep.subr.bf16.mxu1 %v12411_v0  ;;  %v489_v33 = vld [vmem:[%s9563_s15 + $0x338] sm:$0xff]  ;;  %v488_v36 = vld [vmem:[%s9563_s15 + $0x330] sm:$0xff] }
  0xe9   : > { %767 = vmatprep.mubr.f32.mxu0 %v462_v37  ;;  %v492_v37 = vld [vmem:[%s9563_s15 + $0x350] sm:$0xff] }
  0xea   : > { %1487 = vmatmul.mubr.f32.gmra.mrb[64].mxu1 %v6810_v38  ;;  %v6840_v38 = vld [vmem:[%s9563_s15 + $0x630] sm:$0xff] }
  0xeb   : > { %1491 = vmatprep.mubr.f32.mxu1 %v6814_v40  ;;  %8943 = vmatpush1.bf16.msra.mxu1 %v8942_v39  ;;  %v6844_v39 = vld [vmem:[%s9563_s15 + $0x650] sm:$0xff]  ;;  %v491_v40 = vld [vmem:[%s9563_s15 + $0x348] sm:$0xff] }
  0xec   : > { %768 = vmatmul.mubr.f32.gmra.mrb[50].mxu0 %v461_v43  ;;  %8944 = vmatprep.subr.bf16.mxu1 %v12411_v0  ;;  %v6847_v43 = vld [vmem:[%s9563_s15 + $0x668] sm:$0xff] }
  0xed   : > { %772 = vmatprep.mubr.f32.mxu0 %v465_v44  ;;  %v494_v44 = vld [vmem:[%s9563_s15 + $0x360] sm:$0xff] }
  0xee   : > { %1492 = vmatmul.mubr.f32.gmra.mrb[66].mxu1 %v6813_v45  ;;  %v498_v45 = vld [vmem:[%s9563_s15 + $0x380] sm:$0xff] }
  0xef   : > { %1496 = vmatprep.mubr.f32.mxu1 %v6817_v47  ;;  %8946 = vmatpush1.bf16.msra.mxu1 %v8945_v46  ;;  %v6846_v46 = vld [vmem:[%s9563_s15 + $0x660] sm:$0xff] }
  0xf0   : > { %773 = vmatmul.mubr.f32.gmra.mrb[52].mxu0 %v464_v50  ;;  %8947 = vmatprep.subr.bf16.mxu1 %v12411_v0  ;;  %v6850_v47 = vld [vmem:[%s9563_s15 + $0x680] sm:$0xff]  ;;  %v6849_v50 = vld [vmem:[%s9563_s15 + $0x678] sm:$0xff] }
  0xf1   : > { %777 = vmatprep.mubr.f32.mxu0 %v468_v52  ;;  %v6853_v52 = vld [vmem:[%s9563_s15 + $0x698] sm:$0xff] }
  0xf2   : > { %1497 = vmatmul.mubr.f32.gmra.mrb[68].mxu1 %v6816_v53  ;;  %v500_v53 = vld [vmem:[%s9563_s15 + $0x390] sm:$0xff] }
  0xf3   : > { %1501 = vmatprep.mubr.f32.mxu1 %v6820_v55  ;;  %8949 = vmatpush1.bf16.msra.mxu1 %v8948_v54  ;;  %v504_v54 = vld [vmem:[%s9563_s15 + $0x3b0] sm:$0xff] }
  0xf4   : > { %778 = vmatmul.mubr.f32.gmra.mrb[54].mxu0 %v467_v58  ;;  %8950 = vmatprep.subr.bf16.mxu1 %v12411_v0  ;;  %v6852_v55 = vld [vmem:[%s9563_s15 + $0x690] sm:$0xff]  ;;  %v507_v58 = vld [vmem:[%s9563_s15 + $0x3c8] sm:$0xff] }
  0xf5   : > { %782 = vmatprep.mubr.f32.mxu0 %v471_v59  ;;  %v6855_v59 = vld [vmem:[%s9563_s15 + $0x6a8] sm:$0xff] }
  0xf6   : > { %1502 = vmatmul.mubr.f32.gmra.mrb[70].mxu1 %v6819_v60  ;;  %v6859_v60 = vld [vmem:[%s9563_s15 + $0x6c8] sm:$0xff] }
  0xf7   : > { %1506 = vmatprep.mubr.f32.mxu1 %v6823_v62  ;;  %8952 = vmatpush1.bf16.msra.mxu1 %v8951_v61  ;;  %v506_v61 = vld [vmem:[%s9563_s15 + $0x3c0] sm:$0xff] }
  0xf8   : > { %783 = vmatmul.mubr.f32.gmra.mrb[56].mxu0 %v470_v63  ;;  %8953 = vmatprep.subr.bf16.mxu1 %v12411_v0  ;;  %v510_v62 = vld [vmem:[%s9563_s15 + $0x3e0] sm:$0xff] }
  0xf9   : > { %787 = vmatprep.mubr.f32.mxu0 %v474_v1  ;;  %v6858_v63 = vld [vmem:[%s9563_s15 + $0x6c0] sm:$0xff] }
  0xfa   : > { %1507 = vmatmul.mubr.f32.gmra.mrb[72].mxu1 %v6822_v2  ;;  %v6862_v1 = vld [vmem:[%s9563_s15 + $0x6e0] sm:$0xff] }
  0xfb   : > { %1511 = vmatprep.mubr.f32.mxu1 %v6826_v3  ;;  %8955 = vmatpush1.bf16.msra.mxu1 %v8954_v8  ;;  %v7346_v2 = vld [vmem:[%s9575_s16 + $0x580] sm:$0xff]  ;;  %v7347_v3 = vld [vmem:[%s9575_s16 + $0x588] sm:$0xff]  ;;  %v6865_v8 = vld [vmem:[%s9563_s15 + $0x6f8] sm:$0xff] }
  0xfc   : > { %788 = vmatmul.mubr.f32.gmra.mrb[58].mxu0 %v473_v5  ;;  %8956 = vmatprep.subr.bf16.mxu1 %v12411_v0  ;;  %v9941_v5 = vpack.c.bf16 %v7347_v3, %v7346_v2  ;;  %v6892_v2 = vld [vmem:[%s9563_s15 + $0x7d0] sm:$0xff]  ;;  %v6809_v3 = vld [vmem:[%s9563_s15 + $0x538] sm:$0xff] }
  0xfd   : > { %792 = vmatprep.mubr.f32.mxu0 %v477_v7  ;;  %v6861_v7 = vld [vmem:[%s9563_s15 + $0x6d8] sm:$0xff] }
  0xfe   : > { %1512 = vmatmul.mubr.f32.gmra.mrb[74].mxu1 %v6825_v9  ;;  %v512_v9 = vld [vmem:[%s9563_s15 + $0x3f0] sm:$0xff] }
  0xff   : > { %1516 = vmatprep.mubr.f32.mxu1 %v6829_v10  ;;  %8958 = vmatpush1.bf16.msra.mxu1 %v8957_v15  ;;  %v516_v10 = vld [vmem:[%s9563_s15 + $0x410] sm:$0xff]  ;;  %v6867_v15 = vld [vmem:[%s9563_s15 + $0x708] sm:$0xff] }
 0x100   : > { %793 = vmatmul.mubr.f32.gmra.mrb[60].mxu0 %v476_v11  ;;  %8959 = vmatprep.subr.bf16.mxu1 %v12411_v0  ;;  %v6864_v11 = vld [vmem:[%s9563_s15 + $0x6f0] sm:$0xff] }
 0x101   : > { %797 = vmatprep.mubr.f32.mxu0 %v480_v14  ;;  %v519_v14 = vld [vmem:[%s9563_s15 + $0x428] sm:$0xff] }
 0x102   : > { %1517 = vmatmul.mubr.f32.gmra.mrb[76].mxu1 %v6828_v16  ;;  %v6871_v16 = vld [vmem:[%s9563_s15 + $0x728] sm:$0xff] }
 0x103   : > { %1521 = vmatprep.mubr.f32.mxu1 %v6832_v17  ;;  %8961 = vmatpush1.bf16.msra.mxu1 %v8960_v22  ;;  %v518_v17 = vld [vmem:[%s9563_s15 + $0x420] sm:$0xff]  ;;  %v525_v22 = vld [vmem:[%s9563_s15 + $0x458] sm:$0xff] }
 0x104   : > { %798 = vmatmul.mubr.f32.gmra.mrb[62].mxu0 %v479_v18  ;;  %8962 = vmatprep.subr.bf16.mxu1 %v12411_v0  ;;  %v522_v18 = vld [vmem:[%s9563_s15 + $0x440] sm:$0xff] }
 0x105   : > { %802 = vmatprep.mubr.f32.mxu0 %v483_v21  ;;  %v521_v21 = vld [vmem:[%s9563_s15 + $0x438] sm:$0xff] }
 0x106   : > { %1522 = vmatmul.mubr.f32.gmra.mrb[78].mxu1 %v6831_v23  ;;  %v6873_v23 = vld [vmem:[%s9563_s15 + $0x738] sm:$0xff] }
 0x107   : > { %1526 = vmatprep.mubr.f32.mxu1 %v6835_v24  ;;  %8964 = vmatpush1.bf16.msra.mxu1 %v8963_v30  ;;  %v6877_v24 = vld [vmem:[%s9563_s15 + $0x758] sm:$0xff]  ;;  %v6880_v30 = vld [vmem:[%s9563_s15 + $0x770] sm:$0xff] }
 0x108   : > { %803 = vmatmul.mubr.f32.gmra.mrb[64].mxu0 %v482_v25  ;;  %9046 = vmatprep.subr.bf16.mxu1 %v9941_v5  ;;  %v524_v25 = vld [vmem:[%s9563_s15 + $0x450] sm:$0xff] }
 0x109   : > { %807 = vmatprep.mubr.f32.mxu0 %v486_v27  ;;  %v528_v27 = vld [vmem:[%s9563_s15 + $0x470] sm:$0xff] }
 0x10a   : > { %1527 = vmatmul.mubr.f32.gmra.mrb[80].mxu1 %v6834_v29  ;;  %v6876_v29 = vld [vmem:[%s9563_s15 + $0x750] sm:$0xff] }
 0x10b   : > { %1531 = vmatprep.mubr.f32.mxu1 %v6838_v31  ;;  %v527_v31 = vld [vmem:[%s9563_s15 + $0x468] sm:$0xff] }
 0x10c   : > { %808 = vmatmul.mubr.f32.gmra.mrb[66].mxu0 %v485_v32 }
 0x10d   : > { %812 = vmatprep.mubr.f32.mxu0 %v489_v33  ;;  %v6788_v33 = vld [vmem:[%s9563_s15 + $0x490] sm:$0xff] }
 0x10e   : > { %1532 = vmatmul.mubr.f32.gmra.mrb[82].mxu1 %v6837_v34 }
 0x10f   : > { %1536 = vmatprep.mubr.f32.mxu1 %v6841_v35  ;;  %v6879_v35 = vld [vmem:[%s9563_s15 + $0x768] sm:$0xff] }
 0x110   : > { %813 = vmatmul.mubr.f32.gmra.mrb[68].mxu0 %v488_v36  ;;  %v7156_v36 = vld [vmem:[%s9575_s16 + $0x410] sm:$0xff] }
 0x111   : > { %817 = vmatprep.mubr.f32.mxu0 %v492_v37  ;;  %v7157_v37 = vld [vmem:[%s9575_s16 + $0x418] sm:$0xff] }
 0x112   : > { %1537 = vmatmul.mubr.f32.gmra.mrb[84].mxu1 %v6840_v38  ;;  %v6883_v38 = vld [vmem:[%s9563_s15 + $0x788] sm:$0xff] }
 0x113   : > { %1541 = vmatprep.mubr.f32.mxu1 %v6844_v39  ;;  %v6791_v39 = vld [vmem:[%s9563_s15 + $0x4a8] sm:$0xff] }
 0x114   : > { %818 = vmatmul.mubr.f32.gmra.mrb[70].mxu0 %v491_v40 }
 0x115   : > { %822 = vmatprep.mubr.f32.mxu0 %v495_v41  ;;  %v6794_v41 = vld [vmem:[%s9563_s15 + $0x4c0] sm:$0xff] }
 0x116   : > { %1542 = vmatmul.mubr.f32.gmra.mrb[86].mxu1 %v6843_v42  ;;  %v8969_v42 = vpack.c.bf16 %v7157_v37, %v7156_v36  ;;  %v6901_v37 = vld [vmem:[%s9563_s15 + $0x818] sm:$0xff] }
 0x117   : > { %1546 = vmatprep.mubr.f32.mxu1 %v6847_v43 }
 0x118   : > { %823 = vmatmul.mubr.f32.gmra.mrb[72].mxu0 %v494_v44  ;;  %v6882_v44 = vld [vmem:[%s9563_s15 + $0x780] sm:$0xff] }
 0x119   : > { %827 = vmatprep.mubr.f32.mxu0 %v498_v45  ;;  %v7158_v45 = vld [vmem:[%s9575_s16 + $0x420] sm:$0xff] }
 0x11a   : > { %1547 = vmatmul.mubr.f32.gmra.mrb[88].mxu1 %v6846_v46  ;;  %v7159_v46 = vld [vmem:[%s9575_s16 + $0x428] sm:$0xff] }
 0x11b   : > { %1551 = vmatprep.mubr.f32.mxu1 %v6850_v47  ;;  %v6886_v47 = vld [vmem:[%s9563_s15 + $0x7a0] sm:$0xff] }
 0x11c   : > { %828 = vmatmul.mubr.f32.gmra.mrb[74].mxu0 %v497_v48  ;;  %v6797_v48 = vld [vmem:[%s9563_s15 + $0x4d8] sm:$0xff] }
 0x11d   : > { %832 = vmatprep.mubr.f32.mxu0 %v501_v49 }
 0x11e   : > { %1552 = vmatmul.mubr.f32.gmra.mrb[90].mxu1 %v6849_v50  ;;  %v6800_v50 = vld [vmem:[%s9563_s15 + $0x4f0] sm:$0xff] }
 0x11f   : > { %1556 = vmatprep.mubr.f32.mxu1 %v6853_v52  ;;  %v8973_v52 = vpack.c.bf16 %v7159_v46, %v7158_v45 }
 0x120   : > { %833 = vmatmul.mubr.f32.gmra.mrb[76].mxu0 %v500_v53 }
 0x121   : > { %837 = vmatprep.mubr.f32.mxu0 %v504_v54  ;;  %v6885_v54 = vld [vmem:[%s9563_s15 + $0x798] sm:$0xff] }
 0x122   : > { %1557 = vmatmul.mubr.f32.gmra.mrb[92].mxu1 %v6852_v55  ;;  %v7160_v55 = vld [vmem:[%s9575_s16 + $0x430] sm:$0xff] }
 0x123   : > { %1561 = vmatprep.mubr.f32.mxu1 %v6856_v56  ;;  %v7161_v56 = vld [vmem:[%s9575_s16 + $0x438] sm:$0xff] }
 0x124   : > { %838 = vmatmul.mubr.f32.gmra.mrb[78].mxu0 %v503_v57  ;;  %v6803_v57 = vld [vmem:[%s9563_s15 + $0x508] sm:$0xff] }
 0x125   : > { %842 = vmatprep.mubr.f32.mxu0 %v507_v58 }
 0x126   : > { %1562 = vmatmul.mubr.f32.gmra.mrb[94].mxu1 %v6855_v59  ;;  %v6806_v59 = vld [vmem:[%s9563_s15 + $0x520] sm:$0xff] }
 0x127   : > { %1566 = vmatprep.mubr.f32.mxu1 %v6859_v60 }
 0x128   : > { %843 = vmatmul.mubr.f32.gmra.mrb[80].mxu0 %v506_v61  ;;  %v8977_v61 = vpack.c.bf16 %v7161_v56, %v7160_v55 }
 0x129   : > { %847 = vmatprep.mubr.f32.mxu0 %v510_v62  ;;  %v6888_v62 = vld [vmem:[%s9563_s15 + $0x7b0] sm:$0xff] }
 0x12a   : > { %1567 = vmatmul.mubr.f32.gmra.mrb[96].mxu1 %v6858_v63  ;;  %v7162_v63 = vld [vmem:[%s9575_s16 + $0x440] sm:$0xff] }
 0x12b   : > { %1571 = vmatprep.mubr.f32.mxu1 %v6862_v1  ;;  %v7163_v1 = vld [vmem:[%s9575_s16 + $0x448] sm:$0xff] }
 0x12c   : > { %848 = vmatmul.mubr.f32.gmra.mrb[82].mxu0 %v509_v4 }
 0x12d   : > { %852 = vmatprep.mubr.f32.mxu0 %v513_v6  ;;  %v6812_v6 = vld [vmem:[%s9563_s15 + $0x550] sm:$0xff] }
 0x12e   : > { %1572 = vmatmul.mubr.f32.gmra.mrb[98].mxu1 %v6861_v7 }
 0x12f   : > { %1576 = vmatprep.mubr.f32.mxu1 %v6865_v8  ;;  %v8981_v8 = vpack.c.bf16 %v7163_v1, %v7162_v63  ;;  %v6842_v63 = vld [vmem:[%s9563_s15 + $0x640] sm:$0xff] }
 0x130   : > { %853 = vmatmul.mubr.f32.gmra.mrb[84].mxu0 %v512_v9  ;;  %v6891_v9 = vld [vmem:[%s9563_s15 + $0x7c8] sm:$0xff] }
 0x131   : > { %857 = vmatprep.mubr.f32.mxu0 %v516_v10  ;;  %v7164_v10 = vld [vmem:[%s9575_s16 + $0x450] sm:$0xff] }
 0x132   : > { %1577 = vmatmul.mubr.f32.gmra.mrb[100].mxu1 %v6864_v11  ;;  %v7165_v11 = vld [vmem:[%s9575_s16 + $0x458] sm:$0xff] }
 0x133   : > { %1581 = vmatprep.mubr.f32.mxu1 %v6868_v12  ;;  %v6895_v12 = vld [vmem:[%s9563_s15 + $0x7e8] sm:$0xff] }
 0x134   : > { %858 = vmatmul.mubr.f32.gmra.mrb[86].mxu0 %v515_v13  ;;  %v6815_v13 = vld [vmem:[%s9563_s15 + $0x568] sm:$0xff] }
 0x135   : > { %862 = vmatprep.mubr.f32.mxu0 %v519_v14 }
 0x136   : > { %1582 = vmatmul.mubr.f32.gmra.mrb[102].mxu1 %v6867_v15  ;;  %v6818_v15 = vld [vmem:[%s9563_s15 + $0x580] sm:$0xff] }
 0x137   : > { %1586 = vmatprep.mubr.f32.mxu1 %v6871_v16 }
 0x138   : > { %863 = vmatmul.mubr.f32.gmra.mrb[88].mxu0 %v518_v17  ;;  %v8985_v17 = vpack.c.bf16 %v7165_v11, %v7164_v10  ;;  %v6848_v11 = vld [vmem:[%s9563_s15 + $0x670] sm:$0xff] }
 0x139   : > { %867 = vmatprep.mubr.f32.mxu0 %v522_v18  ;;  %v6894_v18 = vld [vmem:[%s9563_s15 + $0x7e0] sm:$0xff] }
 0x13a   : > { %1587 = vmatmul.mubr.f32.gmra.mrb[104].mxu1 %v6870_v19  ;;  %v7166_v19 = vld [vmem:[%s9575_s16 + $0x460] sm:$0xff] }
 0x13b   : > { %1591 = vmatprep.mubr.f32.mxu1 %v6874_v20  ;;  %v7167_v20 = vld [vmem:[%s9575_s16 + $0x468] sm:$0xff] }
 0x13c   : > { %868 = vmatmul.mubr.f32.gmra.mrb[90].mxu0 %v521_v21  ;;  %v6898_v21 = vld [vmem:[%s9563_s15 + $0x800] sm:$0xff] }
 0x13d   : > { %872 = vmatprep.mubr.f32.mxu0 %v525_v22  ;;  %v9964_v26 = vpop.f32.mrb[0].mxu1  ;;  %v6821_v22 = vld [vmem:[%s9563_s15 + $0x598] sm:$0xff] }
 0x13e   : > { %1592 = vmatmul.mubr.f32.gmra.mrb[106].mxu1 %v6873_v23  ;;  %v9967_v28 = vpop.f32.mrb[1].mxu1 }
 0x13f   : > { %1596 = vmatprep.mubr.f32.mxu1 %v6877_v24  ;;  %v6824_v24 = vld [vmem:[%s9563_s15 + $0x5b0] sm:$0xff] }
 0x140   : > { %873 = vmatmul.mubr.f32.gmra.mrb[92].mxu0 %v524_v25 }
 0x141   : > { %877 = vmatprep.mubr.f32.mxu0 %v528_v27  ;;  %v9972_v32 = vpop.f32.mrb[2].mxu1  ;;  %v8989_v27 = vpack.c.bf16 %v7167_v20, %v7166_v19  ;;  %v6851_v19 = vld [vmem:[%s9563_s15 + $0x688] sm:$0xff] }
 0x142   : > { %1597 = vmatmul.mubr.f32.gmra.mrb[108].mxu1 %v6876_v29  ;;  %v9975_v34 = vpop.f32.mrb[3].mxu1 }
 0x143   : > { %1601 = vmatprep.mubr.f32.mxu1 %v6880_v30  ;;  %v6897_v30 = vld [vmem:[%s9563_s15 + $0x7f8] sm:$0xff] }
 0x144   : > { %878 = vmatmul.mubr.f32.gmra.mrb[94].mxu0 %v527_v31  ;;  %v7168_v31 = vld [vmem:[%s9575_s16 + $0x470] sm:$0xff] }
 0x145   : > { %8269 = vmatprep.mubr.f32.mxu0 %v6788_v33  ;;  %v9982_v40 = vpop.f32.mrb[4].mxu1  ;;  %v7169_v33 = vld [vmem:[%s9575_s16 + $0x478] sm:$0xff] }
 0x146   : > { %1602 = vmatmul.mubr.f32.gmra.mrb[110].mxu1 %v6879_v35  ;;  %v9985_v43 = vpop.f32.mrb[5].mxu1 }
 0x147   : > { %1606 = vmatprep.mubr.f32.mxu1 %v6883_v38  ;;  %v6827_v38 = vld [vmem:[%s9563_s15 + $0x5c8] sm:$0xff] }
 0x148   : > { %8270 = vmatmul.mubr.f32.vlgmr.msra.gmra.mrb[96].mxu0 %v6791_v39 }
 0x149   : > { %8968 = vmatpush3.bf16.msra.mxu0 %v9798_v51  ;;  %8272 = vmatprep.mubr.f32.mxu0 %v6794_v41  ;;  %v9993_v49 = vpop.f32.mrb[6].mxu1  ;;  %v6889_v51 = vld [vmem:[%s9563_s15 + $0x7b8] sm:$0xff]  ;;  %v6830_v41 = vld [vmem:[%s9563_s15 + $0x5e0] sm:$0xff] }
 0x14a   : > { %1607 = vmatmul.mubr.f32.gmra.mrb[112].mxu1 %v6882_v44  ;;  %8970 = vmatprep.subr.bf16.mxu0 %v8969_v42  ;;  %v9996_v53 = vpop.f32.mrb[7].mxu1  ;;  %v8993_v44 = vpack.c.bf16 %v7169_v33, %v7168_v31  ;;  %v6857_v31 = vld [vmem:[%s9563_s15 + $0x6b8] sm:$0xff] }
 0x14b   : > { %1611 = vmatprep.mubr.f32.mxu1 %v6886_v47 }
 0x14c   : > { %8273 = vmatmul.mubr.f32.gmra.mrb[98].mxu0 %v6797_v48  ;;  %v6904_v48 = vld [vmem:[%s9563_s15 + $0x830] sm:$0xff] }
 0x14d   : > { %8275 = vmatprep.mubr.f32.mxu0 %v6800_v50  ;;  %8972 = vmatpush3.bf16.msra.mxu0 %v8969_v42  ;;  %v10003_v58 = vpop.f32.mrb[8].mxu1  ;;  %v6833_v50 = vld [vmem:[%s9563_s15 + $0x5f8] sm:$0xff] }
 0x14e   : > { %1612 = vmatmul.mubr.f32.gmra.mrb[114].mxu1 %v6885_v54  ;;  %8974 = vmatprep.subr.bf16.mxu0 %v8973_v52  ;;  %v10006_v60 = vpop.f32.mrb[9].mxu1  ;;  %v6836_v54 = vld [vmem:[%s9563_s15 + $0x610] sm:$0xff] }
 0x14f   : > { %1616 = vmatprep.mubr.f32.mxu1 %v6889_v51 }
 0x150   : > { %8276 = vmatmul.mubr.f32.gmra.mrb[100].mxu0 %v6803_v57 }
 0x151   : > { %8278 = vmatprep.mubr.f32.mxu0 %v6806_v59  ;;  %8976 = vmatpush3.bf16.msra.mxu0 %v8973_v52  ;;  %v10013_v4 = vpop.f32.mrb[10].mxu1  ;;  %v6907_v59 = vld [vmem:[%s9563_s15 + $0x848] sm:$0xff] }
 0x152   : > { %1617 = vmatmul.mubr.f32.gmra.mrb[116].mxu1 %v6888_v62  ;;  %8978 = vmatprep.subr.bf16.mxu0 %v8977_v61  ;;  %v10016_v7 = vpop.f32.mrb[11].mxu1 }
 0x153   : > { %1621 = vmatprep.mubr.f32.mxu1 %v6892_v2  ;;  %v6906_v2 = vld [vmem:[%s9563_s15 + $0x840] sm:$0xff] }
 0x154   : > { %8279 = vmatmul.mubr.f32.gmra.mrb[102].mxu0 %v6809_v3 }
 0x155   : > { %8281 = vmatprep.mubr.f32.mxu0 %v6812_v6  ;;  %8980 = vmatpush3.bf16.msra.mxu0 %v8977_v61  ;;  %v10023_v14 = vpop.f32.mrb[12].mxu1  ;;  %v6839_v61 = vld [vmem:[%s9563_s15 + $0x628] sm:$0xff] }
 0x156   : > { %1622 = vmatmul.mubr.f32.gmra.mrb[118].mxu1 %v6891_v9  ;;  %v10026_v16 = vpop.f32.mrb[13].mxu1  ;;  %8982 = vmatprep.subr.bf16.mxu0 %v8981_v8  ;;  %v6845_v9 = vld [vmem:[%s9563_s15 + $0x658] sm:$0xff] }
 0x157   : > { %1626 = vmatprep.mubr.f32.mxu1 %v6895_v12 }
 0x158   : > { %8282 = vmatmul.mubr.f32.gmra.mrb[104].mxu0 %v6815_v13 }
 0x159   : > { %8284 = vmatprep.mubr.f32.mxu0 %v6818_v15  ;;  %v10033_v23 = vpop.f32.mrb[14].mxu1  ;;  %8984 = vmatpush3.bf16.msra.mxu0 %v8981_v8  ;;  %v6910_v8 = vld [vmem:[%s9563_s15 + $0x860] sm:$0xff]  ;;  %v6909_v15 = vld [vmem:[%s9563_s15 + $0x858] sm:$0xff] }
 0x15a   : > { %1627 = vmatmul.mubr.f32.gmra.mrb[120].mxu1 %v6894_v18  ;;  %v10036_v25 = vpop.f32.mrb[15].mxu1  ;;  %8986 = vmatprep.subr.bf16.mxu0 %v8985_v17  ;;  %v6913_v18 = vld [vmem:[%s9563_s15 + $0x878] sm:$0xff] }
 0x15b   : > { %v644_v29 = vpop.f32.mrb[0].mxu0  ;;  %1631 = vmatprep.mubr.f32.mxu1 %v6898_v21  ;;  %v6854_v21 = vld [vmem:[%s9563_s15 + $0x6a0] sm:$0xff] }
 0x15c   : > { %v10042_v35 = vadd.f32 %v9967_v28, %v644_v29  ;;  %v646_v36 = vpop.f32.mrb[1].mxu0  ;;  %8285 = vmatmul.mubr.f32.gmra.mrb[106].mxu0 %v6821_v22  ;;  %v6900_v28 = vld [vmem:[%s9563_s15 + $0x810] sm:$0xff] }
 0x15d   : > { %8287 = vmatprep.mubr.f32.mxu0 %v6824_v24  ;;  %v10046_v39 = vpop.f32.mrb[16].mxu1  ;;  %8988 = vmatpush3.bf16.msra.mxu0 %v8985_v17  ;;  %v6860_v36 = vld [vmem:[%s9563_s15 + $0x6d0] sm:$0xff] }
 0x15e   : > { %1632 = vmatmul.mubr.f32.gmra.mrb[122].mxu1 %v6897_v30  ;;  %v10049_v42 = vpop.f32.mrb[17].mxu1  ;;  %8990 = vmatprep.subr.bf16.mxu0 %v8989_v27  ;;  %v6916_v30 = vld [vmem:[%s9563_s15 + $0x890] sm:$0xff] }
 0x15f   : > { %v649_v45 = vpop.f32.mrb[2].mxu0  ;;  %1636 = vmatprep.mubr.f32.mxu1 %v6901_v37 }
 0x160   : > { %v10053_v46 = vadd.f32 %v9964_v26, %v649_v45  ;;  %v651_v47 = vpop.f32.mrb[3].mxu0  ;;  %8288 = vmatmul.mubr.f32.gmra.mrb[108].mxu0 %v6827_v38  ;;  %v6903_v26 = vld [vmem:[%s9563_s15 + $0x828] sm:$0xff] }
 0x161   : > { %8290 = vmatprep.mubr.f32.mxu0 %v6830_v41  ;;  %v10057_v52 = vpop.f32.mrb[18].mxu1  ;;  %8992 = vmatpush3.bf16.msra.mxu0 %v8989_v27  ;;  %v6912_v27 = vld [vmem:[%s9563_s15 + $0x870] sm:$0xff]  ;;  %v6915_v41 = vld [vmem:[%s9563_s15 + $0x888] sm:$0xff] }
 0x162   : > { %1637 = vmatmul.mubr.f32.gmra.mrb[124].mxu1 %v6900_v28  ;;  %v10060_v55 = vpop.f32.mrb[19].mxu1  ;;  %8994 = vmatprep.subr.bf16.mxu0 %v8993_v44  ;;  %v6919_v45 = vld [vmem:[%s9563_s15 + $0x8a8] sm:$0xff] }
 0x163   : > { %v654_v56 = vpop.f32.mrb[4].mxu0  ;;  %1641 = vmatprep.mubr.f32.mxu1 %v6904_v48  ;;  %v6863_v28 = vld [vmem:[%s9563_s15 + $0x6e8] sm:$0xff]  ;;  %v6866_v48 = vld [vmem:[%s9563_s15 + $0x700] sm:$0xff] }
 0x164   : > { %v10064_v51 = vadd.f32 %v9975_v34, %v654_v56  ;;  %v656_v57 = vpop.f32.mrb[5].mxu0  ;;  %8291 = vmatmul.mubr.f32.gmra.mrb[110].mxu0 %v6833_v50  ;;  %v6918_v56 = vld [vmem:[%s9563_s15 + $0x8a0] sm:$0xff] }
 0x165   : > { %8293 = vmatprep.mubr.f32.mxu0 %v6836_v54  ;;  %v10068_v62 = vpop.f32.mrb[20].mxu1  ;;  %8996 = vmatpush3.bf16.msra.mxu0 %v8993_v44  ;;  %v6922_v57 = vld [vmem:[%s9563_s15 + $0x8c0] sm:$0xff] }
 0x166   : > { %1642 = vmatmul.mubr.f32.gmra.mrb[126].mxu1 %v6903_v26  ;;  %v10071_v1 = vpop.f32.mrb[21].mxu1  ;;  %8997 = vmatprep.subr.bf16.mxu0 %v12411_v0  ;;  %v7315_v0 = vld [vmem:[%s9575_s16 + $0x488] sm:$0xff] }
 0x167   : > { %v659_v34 = vpop.f32.mrb[6].mxu0  ;;  %1646 = vmatprep.mubr.f32.mxu1 %v6907_v59  ;;  %v6869_v59 = vld [vmem:[%s9563_s15 + $0x718] sm:$0xff] }
 0x168   : > { %v10076_v3 = vadd.f32 %v9972_v32, %v659_v34  ;;  %v661_v6 = vpop.f32.mrb[7].mxu0  ;;  %8294 = vmatmul.mubr.f32.gmra.mrb[112].mxu0 %v6839_v61 }
 0x169   : > { %8296 = vmatprep.mubr.f32.mxu0 %v6842_v63  ;;  %v10080_v10 = vpop.f32.mrb[22].mxu1  ;;  %v6872_v63 = vld [vmem:[%s9563_s15 + $0x730] sm:$0xff]  ;;  %v6921_v6 = vld [vmem:[%s9563_s15 + $0x8b8] sm:$0xff] }
 0x16a   : > { %1647 = vmatmul.mubr.f32.gmra.mrb[128].mxu1 %v6906_v2  ;;  %v10083_v12 = vpop.f32.mrb[23].mxu1 }
 0x16b   : > { %v664_v13 = vpop.f32.mrb[8].mxu0  ;;  %1651 = vmatprep.mubr.f32.mxu1 %v6910_v8 }
 0x16c   : > { %v10087_v32 = vadd.f32 %v9985_v43, %v664_v13  ;;  %v666_v17 = vpop.f32.mrb[9].mxu0  ;;  %8297 = vmatmul.mubr.f32.gmra.mrb[114].mxu0 %v6845_v9  ;;  %v6925_v9 = vld [vmem:[%s9563_s15 + $0x8d8] sm:$0xff] }
 0x16d   : > { %8299 = vmatprep.mubr.f32.mxu0 %v6848_v11  ;;  %v10091_v20 = vpop.f32.mrb[24].mxu1  ;;  %v6875_v11 = vld [vmem:[%s9563_s15 + $0x748] sm:$0xff] }
 0x16e   : > { %1652 = vmatmul.mubr.f32.gmra.mrb[130].mxu1 %v6909_v15  ;;  %v10094_v22 = vpop.f32.mrb[25].mxu1  ;;  %v6878_v15 = vld [vmem:[%s9563_s15 + $0x760] sm:$0xff] }
 0x16f   : > { %v669_v24 = vpop.f32.mrb[10].mxu0  ;;  %1656 = vmatprep.mubr.f32.mxu1 %v6913_v18 }
 0x170   : > { %v10098_v43 = vadd.f32 %v9982_v40, %v669_v24  ;;  %v671_v29 = vpop.f32.mrb[11].mxu0  ;;  %8300 = vmatmul.mubr.f32.gmra.mrb[116].mxu0 %v6851_v19  ;;  %v6924_v19 = vld [vmem:[%s9563_s15 + $0x8d0] sm:$0xff] }
 0x171   : > { %8302 = vmatprep.mubr.f32.mxu0 %v6854_v21  ;;  %v10102_v33 = vpop.f32.mrb[26].mxu1  ;;  %v6928_v24 = vld [vmem:[%s9563_s15 + $0x8f0] sm:$0xff] }
 0x172   : > { %1657 = vmatmul.mubr.f32.gmra.mrb[132].mxu1 %v6912_v27  ;;  %v10105_v37 = vpop.f32.mrb[27].mxu1  ;;  %v6881_v27 = vld [vmem:[%s9563_s15 + $0x778] sm:$0xff] }
 0x173   : > { %v674_v38 = vpop.f32.mrb[12].mxu0  ;;  %1661 = vmatprep.mubr.f32.mxu1 %v6916_v30  ;;  %v6884_v30 = vld [vmem:[%s9563_s15 + $0x790] sm:$0xff] }
 0x174   : > { %v10109_v40 = vadd.f32 %v9996_v53, %v674_v38  ;;  %v676_v44 = vpop.f32.mrb[13].mxu0  ;;  %8303 = vmatmul.mubr.f32.gmra.mrb[118].mxu0 %v6857_v31 }
 0x175   : > { %8305 = vmatprep.mubr.f32.mxu0 %v6860_v36  ;;  %v10113_v47 = vpop.f32.mrb[28].mxu1  ;;  %v6979_v44 = vld [vmem:[%s9563_s15 + $0x908] sm:$0xff] }
 0x176   : > { %1662 = vmatmul.mubr.f32.gmra.mrb[134].mxu1 %v6915_v41  ;;  %v10116_v50 = vpop.f32.mrb[29].mxu1 }
 0x177   : > { %v679_v54 = vpop.f32.mrb[14].mxu0  ;;  %1666 = vmatprep.mubr.f32.mxu1 %v6919_v45  ;;  %v6887_v45 = vld [vmem:[%s9563_s15 + $0x7a8] sm:$0xff] }
 0x178   : > { %v10120_v53 = vadd.f32 %v9993_v49, %v679_v54  ;;  %v681_v26 = vpop.f32.mrb[15].mxu0  ;;  %8306 = vmatmul.mubr.f32.gmra.mrb[120].mxu0 %v6863_v28  ;;  %v7349_v54 = vld [vmem:[%s9575_s16 + $0x598] sm:$0xff] }
 0x179   : > { %8308 = vmatprep.mubr.f32.mxu0 %v6866_v48  ;;  %v10124_v61 = vpop.f32.mrb[30].mxu1  ;;  %v7348_v48 = vld [vmem:[%s9575_s16 + $0x590] sm:$0xff] }
 0x17a   : > { %1667 = vmatmul.mubr.f32.gmra.mrb[136].mxu1 %v6918_v56  ;;  %v10127_v34 = vpop.f32.mrb[31].mxu1  ;;  %v6890_v56 = vld [vmem:[%s9563_s15 + $0x7c0] sm:$0xff] }
 0x17b   : > { %v684_v2 = vpop.f32.mrb[16].mxu0  ;;  %1671 = vmatprep.mubr.f32.mxu1 %v6922_v57  ;;  %v6978_v57 = vld [vmem:[%s9563_s15 + $0x900] sm:$0xff] }
 0x17c   : > { %v10131_v49 = vadd.f32 %v10006_v60, %v684_v2  ;;  %v686_v8 = vpop.f32.mrb[17].mxu0  ;;  %8309 = vmatmul.mubr.f32.gmra.mrb[122].mxu0 %v6869_v59  ;;  %v6982_v2 = vld [vmem:[%s9563_s15 + $0x920] sm:$0xff] }
 0x17d   : > { %8311 = vmatprep.mubr.f32.mxu0 %v6872_v63  ;;  %v10135_v13 = vpop.f32.mrb[32].mxu1  ;;  %v6893_v8 = vld [vmem:[%s9563_s15 + $0x7d8] sm:$0xff] }
 0x17e   : > { %1672 = vmatmul.mubr.f32.gmra.mrb[138].mxu1 %v6921_v6  ;;  %v10138_v17 = vpop.f32.mrb[33].mxu1  ;;  %v9049_v6 = vpack.c.bf16 %v7349_v54, %v7348_v48  ;;  %v6984_v54 = vld [vmem:[%s9563_s15 + $0x930] sm:$0xff] }
 0x17f   : > { %v689_v18 = vpop.f32.mrb[18].mxu0  ;;  %1676 = vmatprep.mubr.f32.mxu1 %v6925_v9 }
 0x180   : > { %v10142_v60 = vadd.f32 %v10003_v58, %v689_v18  ;;  %v691_v21 = vpop.f32.mrb[19].mxu0  ;;  %8312 = vmatmul.mubr.f32.gmra.mrb[124].mxu0 %v6875_v11  ;;  %v6927_v58 = vld [vmem:[%s9563_s15 + $0x8e8] sm:$0xff]  ;;  %v7350_v11 = vld [vmem:[%s9575_s16 + $0x5a0] sm:$0xff]  ;;  %v6896_v18 = vld [vmem:[%s9563_s15 + $0x7f0] sm:$0xff] }
 0x181   : > { %8314 = vmatprep.mubr.f32.mxu0 %v6878_v15  ;;  %v10146_v29 = vpop.f32.mrb[34].mxu1  ;;  %v7351_v15 = vld [vmem:[%s9575_s16 + $0x5a8] sm:$0xff]  ;;  %v6981_v21 = vld [vmem:[%s9563_s15 + $0x918] sm:$0xff] }
 0x182   : > { %1677 = vmatmul.mubr.f32.gmra.mrb[140].mxu1 %v6924_v19  ;;  %v10149_v31 = vpop.f32.mrb[35].mxu1 }
 0x183   : > { %v694_v36 = vpop.f32.mrb[20].mxu0  ;;  %1681 = vmatprep.mubr.f32.mxu1 %v6928_v24 }
 0x184   : > { %v10153_v38 = vadd.f32 %v10016_v7, %v694_v36  ;;  %v696_v41 = vpop.f32.mrb[21].mxu0  ;;  %8315 = vmatmul.mubr.f32.gmra.mrb[126].mxu0 %v6881_v27  ;;  %v9053_v36 = vpack.c.bf16 %v7351_v15, %v7350_v11  ;;  %v7354_v11 = vld [vmem:[%s9575_s16 + $0x5c0] sm:$0xff]  ;;  %v7355_v15 = vld [vmem:[%s9575_s16 + $0x5c8] sm:$0xff] }
 0x185   : > { %8317 = vmatprep.mubr.f32.mxu0 %v6884_v30  ;;  %v10157_v28 = vpop.f32.mrb[36].mxu1  ;;  %v6985_v30 = vld [vmem:[%s9563_s15 + $0x938] sm:$0xff] }
 0x186   : > { %1682 = vmatmul.mubr.f32.gmra.mrb[142].mxu1 %v6927_v58  ;;  %v10162_v26 = vpop.f32.mrb[37].mxu1  ;;  %v6899_v58 = vld [vmem:[%s9563_s15 + $0x808] sm:$0xff] }
 0x187   : > { %v699_v7 = vpop.f32.mrb[22].mxu0  ;;  %2250 = vmatprep.mubr.f32.mxu1 %v6979_v44  ;;  %v7352_v44 = vld [vmem:[%s9575_s16 + $0x5b0] sm:$0xff] }
 0x188   : > { %v10166_v59 = vadd.f32 %v10013_v4, %v699_v7  ;;  %v701_v63 = vpop.f32.mrb[23].mxu0  ;;  %8318 = vmatmul.mubr.f32.gmra.mrb[128].mxu0 %v6887_v45  ;;  %v7353_v45 = vld [vmem:[%s9575_s16 + $0x5b8] sm:$0xff] }
 0x189   : > { %8320 = vmatprep.mubr.f32.mxu0 %v6890_v56  ;;  %v10170_v9 = vpop.f32.mrb[38].mxu1  ;;  %v9057_v63 = vpack.c.bf16 %v7353_v45, %v7352_v44  ;;  %v6911_v44 = vld [vmem:[%s9563_s15 + $0x868] sm:$0xff] }
 0x18a   : > { %2251 = vmatmul.mubr.f32.vlgmr.msra.gmra.mrb[144].mxu1 %v6978_v57  ;;  %v10175_v19 = vpop.f32.mrb[39].mxu1  ;;  %v6988_v57 = vld [vmem:[%s9563_s15 + $0x950] sm:$0xff] }
 0x18b   : > { %v704_v4 = vpop.f32.mrb[24].mxu0  ;;  %2255 = vmatprep.mubr.f32.mxu1 %v6982_v2  ;;  %9048 = vmatpush3.bf16.msra.mxu1 %v9941_v5  ;;  %v6902_v5 = vld [vmem:[%s9563_s15 + $0x820] sm:$0xff]  ;;  %v6905_v2 = vld [vmem:[%s9563_s15 + $0x838] sm:$0xff] }
 0x18c   : > { %v10180_v24 = vadd.f32 %v10026_v16, %v704_v4  ;;  %v706_v27 = vpop.f32.mrb[25].mxu0  ;;  %8321 = vmatmul.mubr.f32.gmra.mrb[130].mxu0 %v6893_v8  ;;  %9050 = vmatprep.subr.bf16.mxu1 %v9049_v6  ;;  %v6987_v4 = vld [vmem:[%s9563_s15 + $0x948] sm:$0xff] }
 0x18d   : > { %8323 = vmatprep.mubr.f32.mxu0 %v6896_v18  ;;  %v10184_v41 = vpop.f32.mrb[40].mxu1  ;;  %v6908_v18 = vld [vmem:[%s9563_s15 + $0x850] sm:$0xff] }
 0x18e   : > { %2256 = vmatmul.mubr.f32.gmra.mrb[146].mxu1 %v6981_v21  ;;  %v10189_v16 = vpop.f32.mrb[41].mxu1 }
 0x18f   : > { %v709_v48 = vpop.f32.mrb[26].mxu0  ;;  %2260 = vmatprep.mubr.f32.mxu1 %v6985_v30  ;;  %9052 = vmatpush3.bf16.msra.mxu1 %v9049_v6  ;;  %v6991_v30 = vld [vmem:[%s9563_s15 + $0x968] sm:$0xff] }
 0x190   : > { %v10193_v56 = vadd.f32 %v10023_v14, %v709_v48  ;;  %v711_v7 = vpop.f32.mrb[27].mxu0  ;;  %8324 = vmatmul.mubr.f32.gmra.mrb[132].mxu0 %v6899_v58  ;;  %9054 = vmatprep.subr.bf16.mxu1 %v9053_v36  ;;  %v9061_v58 = vpack.c.bf16 %v7355_v15, %v7354_v11  ;;  %v6920_v15 = vld [vmem:[%s9563_s15 + $0x8b0] sm:$0xff] }
 0x191   : > { %8326 = vmatprep.mubr.f32.mxu0 %v6902_v5  ;;  %v10197_v8 = vpop.f32.mrb[42].mxu1  ;;  %v6914_v5 = vld [vmem:[%s9563_s15 + $0x880] sm:$0xff] }
 0x192   : > { %12418 = vst [vmem:[#allocation9_spill] sm:$0xff] %v10193_v56  ;;  %2261 = vmatmul.mubr.f32.gmra.mrb[148].mxu1 %v6984_v54  ;;  %v10202_v6 = vpop.f32.mrb[43].mxu1  ;;  %v7332_v56 = vld [vmem:[%s9575_s16 + $0x510] sm:$0xff] }
 0x193   : > { %v714_v14 = vpop.f32.mrb[28].mxu0  ;;  %2265 = vmatprep.mubr.f32.mxu1 %v6988_v57  ;;  %9056 = vmatpush3.bf16.msra.mxu1 %v9053_v36  ;;  %v6994_v57 = vld [vmem:[%s9563_s15 + $0x980] sm:$0xff] }
 0x194   : > { %v10206_v21 = vadd.f32 %v10036_v25, %v714_v14  ;;  %v716_v27 = vpop.f32.mrb[29].mxu0  ;;  %8327 = vmatmul.mubr.f32.gmra.mrb[134].mxu0 %v6905_v2  ;;  %9058 = vmatprep.subr.bf16.mxu1 %v9057_v63  ;;  %v6990_v25 = vld [vmem:[%s9563_s15 + $0x960] sm:$0xff]  ;;  %v6917_v2 = vld [vmem:[%s9563_s15 + $0x898] sm:$0xff] }
 0x195   : > { %8329 = vmatprep.mubr.f32.mxu0 %v6908_v18  ;;  %v10210_v45 = vpop.f32.mrb[44].mxu1  ;;  %v6997_v27 = vld [vmem:[%s9563_s15 + $0x998] sm:$0xff] }
 0x196   : > { %12419 = vst [vmem:[#allocation10_spill] sm:$0xff] %v10206_v21  ;;  %2266 = vmatmul.mubr.f32.gmra.mrb[150].mxu1 %v6987_v4  ;;  %v10213_v48 = vpop.f32.mrb[45].mxu1  ;;  %v7016_v21 = vld [vmem:[%s9563_s15 + $0xa30] sm:$0xff] }
 0x197   : > { %v719_v36 = vpop.f32.mrb[30].mxu0  ;;  %2270 = vmatprep.mubr.f32.mxu1 %v6991_v30  ;;  %9060 = vmatpush3.bf16.msra.mxu1 %v9057_v63  ;;  %v6923_v30 = vld [vmem:[%s9563_s15 + $0x8c8] sm:$0xff] }
 0x198   : > { %v10217_v54 = vadd.f32 %v10033_v23, %v719_v36  ;;  %v721_v7 = vpop.f32.mrb[31].mxu0  ;;  %8330 = vmatmul.mubr.f32.gmra.mrb[136].mxu0 %v6911_v44  ;;  %9062 = vmatprep.subr.bf16.mxu1 %v9061_v58  ;;  %v6993_v23 = vld [vmem:[%s9563_s15 + $0x978] sm:$0xff] }
 0x199   : > { %8332 = vmatprep.mubr.f32.mxu0 %v6914_v5  ;;  %v10221_v11 = vpop.f32.mrb[46].mxu1  ;;  %v6926_v5 = vld [vmem:[%s9563_s15 + $0x8e0] sm:$0xff]  ;;  %v7357_v7 = vld [vmem:[%s9575_s16 + $0x5d8] sm:$0xff] }
 0x19a   : > { %12420 = vst [vmem:[#allocation11_spill] sm:$0xff] %v10217_v54  ;;  %2271 = vmatmul.mubr.f32.gmra.mrb[152].mxu1 %v6990_v25  ;;  %v10224_v18 = vpop.f32.mrb[47].mxu1 }
 0x19b   : > { %v724_v14 = vpop.f32.mrb[32].mxu0  ;;  %2275 = vmatprep.mubr.f32.mxu1 %v6994_v57  ;;  %9064 = vmatpush3.bf16.msra.mxu1 %v9061_v58  ;;  %v6996_v58 = vld [vmem:[%s9563_s15 + $0x990] sm:$0xff] }
 0x19c   : > { %v10228_v63 = vadd.f32 %v10049_v42, %v724_v14  ;;  %v726_v4 = vpop.f32.mrb[33].mxu0  ;;  %8333 = vmatmul.mubr.f32.gmra.mrb[138].mxu0 %v6917_v2  ;;  %v7356_v42 = vld [vmem:[%s9575_s16 + $0x5d0] sm:$0xff] }
 0x19d   : > { %8335 = vmatprep.mubr.f32.mxu0 %v6920_v15  ;;  %v10232_v44 = vpop.f32.mrb[48].mxu1  ;;  %v7000_v15 = vld [vmem:[%s9563_s15 + $0x9b0] sm:$0xff]  ;;  %v9065_v14 = vpack.c.bf16 %v7357_v7, %v7356_v42  ;;  %v7003_v42 = vld [vmem:[%s9563_s15 + $0x9c8] sm:$0xff] }
 0x19e   : > { %12421 = vst [vmem:[#allocation12_spill] sm:$0xff] %v10228_v63  ;;  %2276 = vmatmul.mubr.f32.gmra.mrb[154].mxu1 %v6993_v23  ;;  %v1450_v36 = vpop.f32.mrb[49].mxu1  ;;  %v6929_v23 = vld [vmem:[%s9563_s15 + $0x8f8] sm:$0xff] }
 0x19f   : > { %v729_v25 = vpop.f32.mrb[34].mxu0  ;;  %2280 = vmatprep.mubr.f32.mxu1 %v6997_v27  ;;  %v6980_v36 = vld [vmem:[%s9563_s15 + $0x910] sm:$0xff]  ;;  %v7314_v27 = vld [vmem:[%s9575_s16 + $0x480] sm:$0xff]  ;;  %9066 = vmatprep.subr.bf16.mxu1 %v9065_v14 }
 0x1a0   : > { %v10239_v57 = vadd.f32 %v10046_v39, %v729_v25  ;;  %v731_v2 = vpop.f32.mrb[35].mxu0  ;;  %8336 = vmatmul.mubr.f32.gmra.mrb[140].mxu0 %v6923_v30  ;;  %v6999_v30 = vld [vmem:[%s9563_s15 + $0x9a8] sm:$0xff]  ;;  %9068 = vmatpush3.bf16.msra.mxu1 %v9065_v14  ;;  %v8998_v7 = vpack.c.bf16 %v7315_v0, %v7314_v27  ;;  %v7006_v0 = vld [vmem:[%s9563_s15 + $0x9e0] sm:$0xff]  ;;  %v6989_v27 = vld [vmem:[%s9563_s15 + $0x958] sm:$0xff] }
 0x1a1   : > { %8338 = vmatprep.mubr.f32.mxu0 %v6926_v5  ;;  %v10243_v4 = vpop.f32.mrb[50].mxu1  ;;  %v6986_v2 = vld [vmem:[%s9563_s15 + $0x940] sm:$0xff] }
 0x1a2   : > { %12422 = vst [vmem:[#allocation13_spill] sm:$0xff] %v10239_v57  ;;  %2281 = vmatmul.mubr.f32.gmra.mrb[156].mxu1 %v6996_v58  ;;  %v1455_v63 = vpop.f32.mrb[51].mxu1  ;;  %v6983_v58 = vld [vmem:[%s9563_s15 + $0x928] sm:$0xff]  ;;  %v7316_v57 = vld [vmem:[%s9575_s16 + $0x490] sm:$0xff] }
 0x1a3   : > { %v734_v39 = vpop.f32.mrb[36].mxu0  ;;  %2285 = vmatprep.mubr.f32.mxu1 %v7000_v15  ;;  %v7317_v15 = vld [vmem:[%s9575_s16 + $0x498] sm:$0xff] }
 0x1a4   : > { %v10250_v5 = vadd.f32 %v10060_v55, %v734_v39  ;;  %v736_v25 = vpop.f32.mrb[37].mxu0  ;;  %8339 = vmatmul.mubr.f32.gmra.mrb[142].mxu0 %v6929_v23  ;;  %v7002_v55 = vld [vmem:[%s9563_s15 + $0x9c0] sm:$0xff]  ;;  %v9001_v39 = vpack.c.bf16 %v7317_v15, %v7316_v57  ;;  %v6995_v15 = vld [vmem:[%s9563_s15 + $0x988] sm:$0xff] }
 0x1a5   : > { %8373 = vmatprep.mubr.f32.mxu0 %v6980_v36  ;;  %v10254_v63 = vpop.f32.mrb[52].mxu1  ;;  %v12425_v25 = vmov 0.0|0.0  }
 0x1a6   : > { %12423 = vst [vmem:[#allocation14_spill] sm:$0xff] %v10250_v5  ;;  %2286 = vmatmul.mubr.f32.gmra.mrb[158].mxu1 %v6999_v30  ;;  %v1460_v14 = vpop.f32.mrb[53].mxu1 }
 0x1a7   : > { %v739_v54 = vpop.f32.mrb[38].mxu0  ;;  %2290 = vmatprep.mubr.f32.mxu1 %v7003_v42  ;;  %v6992_v42 = vld [vmem:[%s9563_s15 + $0x970] sm:$0xff]  ;;  %v7318_v14 = vld [vmem:[%s9575_s16 + $0x4a0] sm:$0xff] }
 0x1a8   : > { %v10261_v23 = vadd.f32 %v10057_v52, %v739_v54  ;;  %v741_v36 = vpop.f32.mrb[39].mxu0  ;;  %8374 = vmatmul.mubr.f32.vlgmr.msra.gmra.mrb[144].mxu0 %v6983_v58  ;;  %v7319_v52 = vld [vmem:[%s9575_s16 + $0x4a8] sm:$0xff]  ;;  %v7005_v58 = vld [vmem:[%s9563_s15 + $0x9d8] sm:$0xff] }
 0x1a9   : > { %8999 = vmatpush1.bf16.msra.mxu0 %v8998_v7  ;;  %8376 = vmatprep.mubr.f32.mxu0 %v6986_v2  ;;  %v10265_v30 = vpop.f32.mrb[54].mxu1  ;;  %v7009_v2 = vld [vmem:[%s9563_s15 + $0x9f8] sm:$0xff] }
 0x1aa   : > { %12424 = vst [vmem:[#allocation15_spill] sm:$0xff] %v10261_v23  ;;  %2291 = vmatmul.mubr.f32.gmra.mrb[160].mxu1 %v7002_v55  ;;  %9000 = vmatprep.subr.bf16.mxu0 %v12425_v25  ;;  %v1465_v54 = vpop.f32.mrb[55].mxu1  ;;  %v9004_v55 = vpack.c.bf16 %v7319_v52, %v7318_v14  ;;  %v7012_v14 = vld [vmem:[%s9563_s15 + $0xa10] sm:$0xff]  ;;  %v7001_v52 = vld [vmem:[%s9563_s15 + $0x9b8] sm:$0xff] }
 0x1ab   : > { %v744_v36 = vpop.f32.mrb[40].mxu0  ;;  %2295 = vmatprep.mubr.f32.mxu1 %v7006_v0  ;;  %v6998_v54 = vld [vmem:[%s9563_s15 + $0x9a0] sm:$0xff]  ;;  %v7320_v0 = vld [vmem:[%s9575_s16 + $0x4b0] sm:$0xff] }
 0x1ac   : > { %v10273_v7 = vadd.f32 %v10071_v1, %v744_v36  ;;  %v746_v57 = vpop.f32.mrb[41].mxu0  ;;  %8377 = vmatmul.mubr.f32.gmra.mrb[146].mxu0 %v6989_v27  ;;  %v7321_v1 = vld [vmem:[%s9575_s16 + $0x4b8] sm:$0xff]  ;;  %v7008_v27 = vld [vmem:[%s9563_s15 + $0x9f0] sm:$0xff] }
 0x1ad   : > { %8379 = vmatprep.mubr.f32.mxu0 %v6992_v42  ;;  %9002 = vmatpush1.bf16.msra.mxu0 %v9001_v39  ;;  %v10277_v23 = vpop.f32.mrb[56].mxu1 }
 0x1ae   : > { %12426 = vst [vmem:[#allocation16_spill] sm:$0xff] %v10273_v7  ;;  %2296 = vmatmul.mubr.f32.gmra.mrb[162].mxu1 %v7005_v58  ;;  %9003 = vmatprep.subr.bf16.mxu0 %v12425_v25  ;;  %v1470_v36 = vpop.f32.mrb[57].mxu1  ;;  %v9007_v58 = vpack.c.bf16 %v7321_v1, %v7320_v0  ;;  %v7015_v0 = vld [vmem:[%s9563_s15 + $0xa28] sm:$0xff] }
 0x1af   : > { %v749_v57 = vpop.f32.mrb[42].mxu0  ;;  %2300 = vmatprep.mubr.f32.mxu1 %v7009_v2  ;;  %v7004_v36 = vld [vmem:[%s9563_s15 + $0x9d0] sm:$0xff]  ;;  %v7322_v2 = vld [vmem:[%s9575_s16 + $0x4c0] sm:$0xff]  ;;  %v7007_v1 = vld [vmem:[%s9563_s15 + $0x9e8] sm:$0xff] }
 0x1b0   : > { %v10285_v39 = vadd.f32 %v10068_v62, %v749_v57  ;;  %v751_v42 = vpop.f32.mrb[43].mxu0  ;;  %8380 = vmatmul.mubr.f32.gmra.mrb[148].mxu0 %v6995_v15  ;;  %v7323_v62 = vld [vmem:[%s9575_s16 + $0x4c8] sm:$0xff] }
 0x1b1   : > { %8382 = vmatprep.mubr.f32.mxu0 %v6998_v54  ;;  %9005 = vmatpush1.bf16.msra.mxu0 %v9004_v55  ;;  %v10289_v7 = vpop.f32.mrb[58].mxu1  ;;  %v7011_v15 = vld [vmem:[%s9563_s15 + $0xa08] sm:$0xff] }
 0x1b2   : > { %12427 = vst [vmem:[#allocation17_spill] sm:$0xff] %v10285_v39  ;;  %2301 = vmatmul.mubr.f32.gmra.mrb[164].mxu1 %v7008_v27  ;;  %9006 = vmatprep.subr.bf16.mxu0 %v12425_v25  ;;  %v1475_v57 = vpop.f32.mrb[59].mxu1  ;;  %v9010_v27 = vpack.c.bf16 %v7323_v62, %v7322_v2  ;;  %v7018_v2 = vld [vmem:[%s9563_s15 + $0xa40] sm:$0xff]  ;;  %v7013_v39 = vld [vmem:[%s9563_s15 + $0xa18] sm:$0xff] }
 0x1b3   : > { %v754_v42 = vpop.f32.mrb[44].mxu0  ;;  %2305 = vmatprep.mubr.f32.mxu1 %v7012_v14  ;;  %v7010_v14 = vld [vmem:[%s9563_s15 + $0xa00] sm:$0xff] }
 0x1b4   : > { %v10297_v54 = vadd.f32 %v10083_v12, %v754_v42  ;;  %v756_v55 = vpop.f32.mrb[45].mxu0  ;;  %8383 = vmatmul.mubr.f32.gmra.mrb[150].mxu0 %v7001_v52  ;;  %v7324_v12 = vld [vmem:[%s9575_s16 + $0x4d0] sm:$0xff]  ;;  %v7325_v42 = vld [vmem:[%s9575_s16 + $0x4d8] sm:$0xff]  ;;  %v7014_v52 = vld [vmem:[%s9563_s15 + $0xa20] sm:$0xff] }
 0x1b5   : > { %8385 = vmatprep.mubr.f32.mxu0 %v7004_v36  ;;  %9008 = vmatpush1.bf16.msra.mxu0 %v9007_v58  ;;  %v10301_v57 = vpop.f32.mrb[60].mxu1  ;;  %v7358_v62 = vld [vmem:[%s9575_s16 + $0x5e0] sm:$0xff]  ;;  %v9013_v5 = vpack.c.bf16 %v7325_v42, %v7324_v12  ;;  %v7021_v42 = vld [vmem:[%s9563_s15 + $0xa58] sm:$0xff] }
 0x1b6   : > { %12428 = vst [vmem:[#allocation18_spill] sm:$0xff] %v10297_v54  ;;  %2306 = vmatmul.mubr.f32.gmra.mrb[166].mxu1 %v7011_v15  ;;  %9009 = vmatprep.subr.bf16.mxu0 %v12425_v25  ;;  %v1480_v55 = vpop.f32.mrb[61].mxu1  ;;  %v7359_v15 = vld [vmem:[%s9575_s16 + $0x5e8] sm:$0xff] }
 0x1b7   : > { %v759_v54 = vpop.f32.mrb[46].mxu0  ;;  %2310 = vmatprep.mubr.f32.mxu1 %v7015_v0  ;;  %v9069_v0 = vpack.c.bf16 %v7359_v15, %v7358_v62 }
 0x1b8   : > { %v10309_v58 = vadd.f32 %v10080_v10, %v759_v54  ;;  %v761_v36 = vpop.f32.mrb[47].mxu0  ;;  %8386 = vmatmul.mubr.f32.gmra.mrb[152].mxu0 %v7007_v1  ;;  %v7326_v10 = vld [vmem:[%s9575_s16 + $0x4e0] sm:$0xff]  ;;  %v7327_v54 = vld [vmem:[%s9575_s16 + $0x4e8] sm:$0xff] }
 0x1b9   : > { %8388 = vmatprep.mubr.f32.mxu0 %v7010_v14  ;;  %9011 = vmatpush1.bf16.msra.mxu0 %v9010_v27  ;;  %v10315_v55 = vpop.f32.mrb[62].mxu1  ;;  %v7017_v14 = vld [vmem:[%s9563_s15 + $0xa38] sm:$0xff]  ;;  %v9016_v62 = vpack.c.bf16 %v7327_v54, %v7326_v10  ;;  %v7024_v10 = vld [vmem:[%s9563_s15 + $0xa70] sm:$0xff] }
 0x1ba   : > { %12429 = vst [vmem:[#allocation19_spill] sm:$0xff] %v10309_v58  ;;  %2311 = vmatmul.mubr.f32.gmra.mrb[168].mxu1 %v7014_v52  ;;  %9012 = vmatprep.subr.bf16.mxu0 %v12425_v25  ;;  %v1485_v1 = vpop.f32.mrb[63].mxu1  ;;  %v7019_v52 = vld [vmem:[%s9563_s15 + $0xa48] sm:$0xff]  ;;  %v7025_v54 = vld [vmem:[%s9563_s15 + $0xa78] sm:$0xff] }
 0x1bb   : > { %v764_v36 = vpop.f32.mrb[48].mxu0  ;;  %2315 = vmatprep.mubr.f32.mxu1 %v7018_v2  ;;  %9070 = vmatprep.subr.bf16.mxu1 %v9069_v0  ;;  %v7022_v2 = vld [vmem:[%s9563_s15 + $0xa60] sm:$0xff]  ;;  %v7328_v1 = vld [vmem:[%s9575_s16 + $0x4f0] sm:$0xff] }
 0x1bc   : > { %v10323_v27 = vadd.f32 %v10094_v22, %v764_v36  ;;  %v766_v12 = vpop.f32.mrb[49].mxu0  ;;  %8389 = vmatmul.mubr.f32.gmra.mrb[154].mxu0 %v7013_v39  ;;  %9072 = vmatpush3.bf16.msra.mxu1 %v9069_v0  ;;  %v7329_v22 = vld [vmem:[%s9575_s16 + $0x4f8] sm:$0xff] }
 0x1bd   : > { %8391 = vmatprep.mubr.f32.mxu0 %v7016_v21  ;;  %9014 = vmatpush1.bf16.msra.mxu0 %v9013_v5  ;;  %v10327_v15 = vpop.f32.mrb[64].mxu1  ;;  %v7020_v21 = vld [vmem:[%s9563_s15 + $0xa50] sm:$0xff] }
 0x1be   : > { %12430 = vst [vmem:[#allocation20_spill] sm:$0xff] %v10323_v27  ;;  %2316 = vmatmul.mubr.f32.gmra.mrb[170].mxu1 %v7017_v14  ;;  %9015 = vmatprep.subr.bf16.mxu0 %v12425_v25  ;;  %v1490_v36 = vpop.f32.mrb[65].mxu1  ;;  %v9019_v14 = vpack.c.bf16 %v7329_v22, %v7328_v1  ;;  %v7031_v27 = vld [vmem:[%s9563_s15 + $0xaa8] sm:$0xff] }
 0x1bf   : > { %v769_v39 = vpop.f32.mrb[50].mxu0  ;;  %2320 = vmatprep.mubr.f32.mxu1 %v7021_v42  ;;  %v7028_v36 = vld [vmem:[%s9563_s15 + $0xa90] sm:$0xff]  ;;  %v7331_v42 = vld [vmem:[%s9575_s16 + $0x508] sm:$0xff] }
 0x1c0   : > { %v10335_v0 = vadd.f32 %v10091_v20, %v769_v39  ;;  %v771_v5 = vpop.f32.mrb[51].mxu0  ;;  %8392 = vmatmul.mubr.f32.gmra.mrb[156].mxu0 %v7019_v52  ;;  %v7330_v20 = vld [vmem:[%s9575_s16 + $0x500] sm:$0xff]  ;;  %v7023_v52 = vld [vmem:[%s9563_s15 + $0xa68] sm:$0xff] }
 0x1c1   : > { %8394 = vmatprep.mubr.f32.mxu0 %v7022_v2  ;;  %9017 = vmatpush1.bf16.msra.mxu0 %v9016_v62  ;;  %v10339_v12 = vpop.f32.mrb[66].mxu1  ;;  %v7360_v2 = vld [vmem:[%s9575_s16 + $0x5f0] sm:$0xff]  ;;  %v7361_v62 = vld [vmem:[%s9575_s16 + $0x5f8] sm:$0xff] }
 0x1c2   : > { %12431 = vst [vmem:[#allocation21_spill] sm:$0xff] %v10335_v0  ;;  %2321 = vmatmul.mubr.f32.gmra.mrb[172].mxu1 %v7020_v21  ;;  %9018 = vmatprep.subr.bf16.mxu0 %v12425_v25  ;;  %v1495_v39 = vpop.f32.mrb[67].mxu1  ;;  %v7027_v21 = vld [vmem:[%s9563_s15 + $0xa88] sm:$0xff]  ;;  %v9073_v0 = vpack.c.bf16 %v7361_v62, %v7360_v2  ;;  %v7026_v2 = vld [vmem:[%s9563_s15 + $0xa80] sm:$0xff] }
 0x1c3   : > { %v774_v5 = vpop.f32.mrb[52].mxu0  ;;  %2325 = vmatprep.mubr.f32.mxu1 %v7024_v10  ;;  %v9022_v39 = vpack.c.bf16 %v7331_v42, %v7330_v20  ;;  %v7034_v10 = vld [vmem:[%s9563_s15 + $0xac0] sm:$0xff]  ;;  %v7037_v42 = vld [vmem:[%s9563_s15 + $0xad8] sm:$0xff] }
 0x1c4   : > { %v10349_v1 = vadd.f32 %v10105_v37, %v774_v5  ;;  %v776_v22 = vpop.f32.mrb[53].mxu0  ;;  %8395 = vmatmul.mubr.f32.gmra.mrb[158].mxu0 %v7025_v54  ;;  %v7333_v37 = vld [vmem:[%s9575_s16 + $0x518] sm:$0xff]  ;;  %9074 = vmatprep.subr.bf16.mxu1 %v9073_v0  ;;  %v7030_v20 = vld [vmem:[%s9563_s15 + $0xaa0] sm:$0xff] }
 0x1c5   : > { %8397 = vmatprep.mubr.f32.mxu0 %v7028_v36  ;;  %9020 = vmatpush1.bf16.msra.mxu0 %v9019_v14  ;;  %v10353_v58 = vpop.f32.mrb[68].mxu1  ;;  %v7040_v22 = vld [vmem:[%s9563_s15 + $0xaf0] sm:$0xff] }
 0x1c6   : > { %12432 = vst [vmem:[#allocation22_spill] sm:$0xff] %v10349_v1  ;;  %2326 = vmatmul.mubr.f32.gmra.mrb[174].mxu1 %v7023_v52  ;;  %9021 = vmatprep.subr.bf16.mxu0 %v12425_v25  ;;  %v1500_v5 = vpop.f32.mrb[69].mxu1  ;;  %v9025_v52 = vpack.c.bf16 %v7333_v37, %v7332_v56  ;;  %v7043_v37 = vld [vmem:[%s9563_s15 + $0xb08] sm:$0xff]  ;;  %v7542_v1 = vld [vmem:[%s9575_s16 + $0x720] sm:$0xff] }
 0x1c7   : > { %v779_v54 = vpop.f32.mrb[54].mxu0  ;;  %2330 = vmatprep.mubr.f32.mxu1 %v7027_v21  ;;  %9076 = vmatpush3.bf16.msra.mxu1 %v9073_v0  ;;  %v7334_v21 = vld [vmem:[%s9575_s16 + $0x520] sm:$0xff]  ;;  %v7029_v0 = vld [vmem:[%s9563_s15 + $0xa98] sm:$0xff] }
 0x1c8   : > { %v10361_v14 = vadd.f32 %v10102_v33, %v779_v54  ;;  %v781_v36 = vpop.f32.mrb[55].mxu0  ;;  %8398 = vmatmul.mubr.f32.gmra.mrb[160].mxu0 %v7031_v27  ;;  %v7335_v33 = vld [vmem:[%s9575_s16 + $0x528] sm:$0xff]  ;;  %9077 = vmatprep.subr.bf16.mxu1 %v12425_v25 }
 0x1c9   : > { %8400 = vmatprep.mubr.f32.mxu0 %v7034_v10  ;;  %9023 = vmatpush1.bf16.msra.mxu0 %v9022_v39  ;;  %v10365_v62 = vpop.f32.mrb[70].mxu1  ;;  %v7033_v10 = vld [vmem:[%s9563_s15 + $0xab8] sm:$0xff]  ;;  %v9028_v54 = vpack.c.bf16 %v7335_v33, %v7334_v21  ;;  %v7046_v36 = vld [vmem:[%s9563_s15 + $0xb20] sm:$0xff]  ;;  %v7036_v21 = vld [vmem:[%s9563_s15 + $0xad0] sm:$0xff] }
 0x1ca   : > { %12433 = vst [vmem:[#allocation23_spill] sm:$0xff] %v10361_v14  ;;  %2331 = vmatmul.mubr.f32.gmra.mrb[176].mxu1 %v7026_v2  ;;  %9024 = vmatprep.subr.bf16.mxu0 %v12425_v25  ;;  %v1505_v5 = vpop.f32.mrb[71].mxu1  ;;  %v7049_v33 = vld [vmem:[%s9563_s15 + $0xb38] sm:$0xff] }
 0x1cb   : > { %v784_v27 = vpop.f32.mrb[56].mxu0  ;;  %2335 = vmatprep.mubr.f32.mxu1 %v7030_v20  ;;  %v7337_v5 = vld [vmem:[%s9575_s16 + $0x538] sm:$0xff] }
 0x1cc   : > { %v10374_v56 = vadd.f32 %v10116_v50, %v784_v27  ;;  %v786_v39 = vpop.f32.mrb[57].mxu0  ;;  %8401 = vmatmul.mubr.f32.gmra.mrb[162].mxu0 %v7037_v42  ;;  %v7336_v50 = vld [vmem:[%s9575_s16 + $0x530] sm:$0xff] }
 0x1cd   : > { %8403 = vmatprep.mubr.f32.mxu0 %v7040_v22  ;;  %9026 = vmatpush1.bf16.msra.mxu0 %v9025_v52  ;;  %v10378_v2 = vpop.f32.mrb[72].mxu1  ;;  %v7032_v42 = vld [vmem:[%s9563_s15 + $0xab0] sm:$0xff] }
 0x1ce   : > { %12434 = vst [vmem:[#allocation24_spill] sm:$0xff] %v10374_v56  ;;  %2336 = vmatmul.mubr.f32.gmra.mrb[178].mxu1 %v7029_v0  ;;  %9027 = vmatprep.subr.bf16.mxu0 %v12425_v25  ;;  %v1510_v20 = vpop.f32.mrb[73].mxu1  ;;  %v9031_v0 = vpack.c.bf16 %v7337_v5, %v7336_v50  ;;  %v7039_v50 = vld [vmem:[%s9563_s15 + $0xae8] sm:$0xff] }
 0x1cf   : > { %v789_v27 = vpop.f32.mrb[58].mxu0  ;;  %2340 = vmatprep.mubr.f32.mxu1 %v7033_v10  ;;  %v7052_v20 = vld [vmem:[%s9563_s15 + $0xb50] sm:$0xff]  ;;  %v7055_v5 = vld [vmem:[%s9563_s15 + $0xb68] sm:$0xff] }
 0x1d0   : > { %v10386_v22 = vadd.f32 %v10113_v47, %v789_v27  ;;  %v791_v52 = vpop.f32.mrb[59].mxu0  ;;  %8404 = vmatmul.mubr.f32.gmra.mrb[164].mxu0 %v7043_v37  ;;  %v7338_v47 = vld [vmem:[%s9575_s16 + $0x540] sm:$0xff]  ;;  %v7339_v27 = vld [vmem:[%s9575_s16 + $0x548] sm:$0xff] }
 0x1d1   : > { %8406 = vmatprep.mubr.f32.mxu0 %v7046_v36  ;;  %9029 = vmatpush1.bf16.msra.mxu0 %v9028_v54  ;;  %v10390_v39 = vpop.f32.mrb[74].mxu1  ;;  %v7035_v37 = vld [vmem:[%s9563_s15 + $0xac8] sm:$0xff] }
 0x1d2   : > { %12435 = vst [vmem:[#allocation25_spill] sm:$0xff] %v10386_v22  ;;  %2341 = vmatmul.mubr.f32.gmra.mrb[180].mxu1 %v7032_v42  ;;  %9030 = vmatprep.subr.bf16.mxu0 %v12425_v25  ;;  %v1515_v10 = vpop.f32.mrb[75].mxu1  ;;  %v9034_v42 = vpack.c.bf16 %v7339_v27, %v7338_v47  ;;  %v7058_v22 = vld [vmem:[%s9563_s15 + $0xb80] sm:$0xff]  ;;  %v7061_v27 = vld [vmem:[%s9563_s15 + $0xb98] sm:$0xff] }
 0x1d3   : > { %v794_v52 = vpop.f32.mrb[60].mxu0  ;;  %2345 = vmatprep.mubr.f32.mxu1 %v7036_v21  ;;  %v7042_v47 = vld [vmem:[%s9563_s15 + $0xb00] sm:$0xff] }
 0x1d4   : > { %v10398_v36 = vadd.f32 %v10127_v34, %v794_v52  ;;  %v796_v54 = vpop.f32.mrb[61].mxu0  ;;  %8407 = vmatmul.mubr.f32.gmra.mrb[166].mxu0 %v7049_v33  ;;  %v7340_v34 = vld [vmem:[%s9575_s16 + $0x550] sm:$0xff]  ;;  %v7341_v52 = vld [vmem:[%s9575_s16 + $0x558] sm:$0xff]  ;;  %v7038_v33 = vld [vmem:[%s9563_s15 + $0xae0] sm:$0xff] }
 0x1d5   : > { %8409 = vmatprep.mubr.f32.mxu0 %v7052_v20  ;;  %9032 = vmatpush1.bf16.msra.mxu0 %v9031_v0  ;;  %v10402_v10 = vpop.f32.mrb[76].mxu1 }
 0x1d6   : > { %12436 = vst [vmem:[#allocation26_spill] sm:$0xff] %v10398_v36  ;;  %2346 = vmatmul.mubr.f32.gmra.mrb[182].mxu1 %v7035_v37  ;;  %9033 = vmatprep.subr.bf16.mxu0 %v12425_v25  ;;  %v1520_v21 = vpop.f32.mrb[77].mxu1  ;;  %v7064_v36 = vld [vmem:[%s9563_s15 + $0xbb0] sm:$0xff] }
 0x1d7   : > { %v799_v54 = vpop.f32.mrb[62].mxu0  ;;  %2350 = vmatprep.mubr.f32.mxu1 %v7039_v50  ;;  %v9037_v21 = vpack.c.bf16 %v7341_v52, %v7340_v34  ;;  %v7045_v34 = vld [vmem:[%s9563_s15 + $0xb18] sm:$0xff]  ;;  %v7067_v52 = vld [vmem:[%s9563_s15 + $0xbc8] sm:$0xff] }
 0x1d8   : > { %v10410_v20 = vadd.f32 %v10124_v61, %v799_v54  ;;  %v801_v0 = vpop.f32.mrb[63].mxu0  ;;  %8410 = vmatmul.mubr.f32.gmra.mrb[168].mxu0 %v7055_v5  ;;  %v7342_v61 = vld [vmem:[%s9575_s16 + $0x560] sm:$0xff]  ;;  %v7343_v54 = vld [vmem:[%s9575_s16 + $0x568] sm:$0xff] }
 0x1d9   : > { %8412 = vmatprep.mubr.f32.mxu0 %v7058_v22  ;;  %9035 = vmatpush1.bf16.msra.mxu0 %v9034_v42  ;;  %v10414_v37 = vpop.f32.mrb[78].mxu1  ;;  %v7041_v22 = vld [vmem:[%s9563_s15 + $0xaf8] sm:$0xff] }
 0x1da   : > { %12437 = vst [vmem:[#allocation27_spill] sm:$0xff] %v10410_v20  ;;  %2351 = vmatmul.mubr.f32.gmra.mrb[184].mxu1 %v7038_v33  ;;  %9036 = vmatprep.subr.bf16.mxu0 %v12425_v25  ;;  %v1525_v50 = vpop.f32.mrb[79].mxu1 }
 0x1db   : > { %v804_v0 = vpop.f32.mrb[64].mxu0  ;;  %2355 = vmatprep.mubr.f32.mxu1 %v7042_v47  ;;  %v9040_v50 = vpack.c.bf16 %v7343_v54, %v7342_v61  ;;  %v7070_v47 = vld [vmem:[%s9563_s15 + $0xbe0] sm:$0xff]  ;;  %v7048_v61 = vld [vmem:[%s9563_s15 + $0xb30] sm:$0xff] }
 0x1dc   : > { %v10422_v5 = vadd.f32 %v10138_v17, %v804_v0  ;;  %v806_v42 = vpop.f32.mrb[65].mxu0  ;;  %8413 = vmatmul.mubr.f32.gmra.mrb[170].mxu0 %v7061_v27  ;;  %v7344_v17 = vld [vmem:[%s9575_s16 + $0x570] sm:$0xff]  ;;  %v7345_v0 = vld [vmem:[%s9575_s16 + $0x578] sm:$0xff] }
 0x1dd   : > { %8415 = vmatprep.mubr.f32.mxu0 %v7064_v36  ;;  %9038 = vmatpush1.bf16.msra.mxu0 %v9037_v21  ;;  %v10426_v33 = vpop.f32.mrb[80].mxu1  ;;  %v7044_v42 = vld [vmem:[%s9563_s15 + $0xb10] sm:$0xff]  ;;  %v7539_v36 = vld [vmem:[%s9575_s16 + $0x708] sm:$0xff] }
 0x1de   : > { %12438 = vst [vmem:[#allocation28_spill] sm:$0xff] %v10422_v5  ;;  %2356 = vmatmul.mubr.f32.gmra.mrb[186].mxu1 %v7041_v22  ;;  %v1530_v20 = vpop.f32.mrb[81].mxu1  ;;  %9039 = vmatprep.subr.bf16.mxu0 %v12425_v25  ;;  %v7538_v5 = vld [vmem:[%s9575_s16 + $0x700] sm:$0xff]  ;;  %v9043_v22 = vpack.c.bf16 %v7345_v0, %v7344_v17  ;;  %v7079_v17 = vld [vmem:[%s9563_s15 + $0xc28] sm:$0xff] }
 0x1df   : > { %v809_v27 = vpop.f32.mrb[66].mxu0  ;;  %2360 = vmatprep.mubr.f32.mxu1 %v7045_v34  ;;  %v7073_v20 = vld [vmem:[%s9563_s15 + $0xbf8] sm:$0xff]  ;;  %v7076_v34 = vld [vmem:[%s9563_s15 + $0xc10] sm:$0xff] }
 0x1e0   : > { %v10436_v21 = vadd.f32 %v10135_v13, %v809_v27  ;;  %v811_v56 = vpop.f32.mrb[67].mxu0  ;;  %8416 = vmatmul.mubr.f32.gmra.mrb[172].mxu0 %v7067_v52  ;;  %v10444_v13 = vpack.c.bf16 %v7539_v36, %v7538_v5 }
 0x1e1   : > { %8418 = vmatprep.mubr.f32.mxu0 %v7070_v47  ;;  %9041 = vmatpush1.bf16.msra.mxu0 %v9040_v50  ;;  %v10440_v54 = vpop.f32.mrb[82].mxu1  ;;  %v7047_v56 = vld [vmem:[%s9563_s15 + $0xb28] sm:$0xff] }
 0x1e2   : > { %12439 = vst [vmem:[#allocation29_spill] sm:$0xff] %v10436_v21  ;;  %2361 = vmatmul.mubr.f32.gmra.mrb[188].mxu1 %v7044_v42  ;;  %v1535_v14 = vpop.f32.mrb[83].mxu1  ;;  %9042 = vmatprep.subr.bf16.mxu0 %v12425_v25  ;;  %v7051_v47 = vld [vmem:[%s9563_s15 + $0xb48] sm:$0xff]  ;;  %v7074_v21 = vld [vmem:[%s9563_s15 + $0xc00] sm:$0xff] }
 0x1e3   : > { %v814_v27 = vpop.f32.mrb[68].mxu0  ;;  %2365 = vmatprep.mubr.f32.mxu1 %v7048_v61  ;;  %v7082_v14 = vld [vmem:[%s9563_s15 + $0xc40] sm:$0xff] }
 0x1e4   : > { %v10448_v52 = vadd.f32 %v10149_v31, %v814_v27  ;;  %v816_v50 = vpop.f32.mrb[69].mxu0  ;;  %8419 = vmatmul.mubr.f32.gmra.mrb[174].mxu0 %v7073_v20  ;;  %v7050_v31 = vld [vmem:[%s9563_s15 + $0xb40] sm:$0xff]  ;;  %v7088_v27 = vld [vmem:[%s9563_s15 + $0xc70] sm:$0xff] }
 0x1e5   : > { %8421 = vmatprep.mubr.f32.mxu0 %v7076_v34  ;;  %v10452_v0 = vpop.f32.mrb[84].mxu1  ;;  %9044 = vmatpush1.bf16.msra.mxu0 %v9043_v22  ;;  %v7054_v20 = vld [vmem:[%s9563_s15 + $0xb60] sm:$0xff]  ;;  %v7085_v22 = vld [vmem:[%s9563_s15 + $0xc58] sm:$0xff] }
 0x1e6   : > { %12440 = vst [vmem:[#allocation30_spill] sm:$0xff] %v10448_v52  ;;  %2366 = vmatmul.mubr.f32.gmra.mrb[190].mxu1 %v7047_v56  ;;  %v1540_v5 = vpop.f32.mrb[85].mxu1  ;;  %9126 = vmatprep.subr.bf16.mxu0 %v10444_v13 }
 0x1e7   : > { %v819_v42 = vpop.f32.mrb[70].mxu0  ;;  %2370 = vmatprep.mubr.f32.mxu1 %v7051_v47  ;;  %v7053_v47 = vld [vmem:[%s9563_s15 + $0xb58] sm:$0xff] }
 0x1e8   : > { %v10458_v36 = vadd.f32 %v10146_v29, %v819_v42  ;;  %v821_v61 = vpop.f32.mrb[71].mxu0  ;;  %8422 = vmatmul.mubr.f32.gmra.mrb[176].mxu0 %v7079_v17  ;;  %v7057_v17 = vld [vmem:[%s9563_s15 + $0xb78] sm:$0xff] }
 0x1e9   : > { %8424 = vmatprep.mubr.f32.mxu0 %v7082_v14  ;;  %v10462_v34 = vpop.f32.mrb[86].mxu1  ;;  %v7091_v14 = vld [vmem:[%s9563_s15 + $0xc88] sm:$0xff] }
 0x1ea   : > { %12441 = vst [vmem:[#allocation31_spill] sm:$0xff] %v10458_v36  ;;  %2371 = vmatmul.mubr.f32.gmra.mrb[192].mxu1 %v7050_v31  ;;  %v1545_v56 = vpop.f32.mrb[87].mxu1  ;;  %v7094_v31 = vld [vmem:[%s9563_s15 + $0xca0] sm:$0xff]  ;;  %v7540_v36 = vld [vmem:[%s9575_s16 + $0x710] sm:$0xff] }
 0x1eb   : > { %v824_v50 = vpop.f32.mrb[72].mxu0  ;;  %2375 = vmatprep.mubr.f32.mxu1 %v7054_v20  ;;  %v7056_v20 = vld [vmem:[%s9563_s15 + $0xb70] sm:$0xff] }
 0x1ec   : > { %v10467_v29 = vadd.f32 %v10162_v26, %v824_v50  ;;  %v826_v5 = vpop.f32.mrb[73].mxu0  ;;  %8425 = vmatmul.mubr.f32.gmra.mrb[178].mxu0 %v7085_v22  ;;  %v7060_v22 = vld [vmem:[%s9563_s15 + $0xb90] sm:$0xff] }
 0x1ed   : > { %8427 = vmatprep.mubr.f32.mxu0 %v7088_v27  ;;  %v10471_v42 = vpop.f32.mrb[88].mxu1  ;;  %v7097_v27 = vld [vmem:[%s9563_s15 + $0xcb8] sm:$0xff] }
 0x1ee   : > { %12442 = vst [vmem:[#allocation32_spill] sm:$0xff] %v10467_v29  ;;  %2376 = vmatmul.mubr.f32.gmra.mrb[194].mxu1 %v7053_v47  ;;  %v1550_v61 = vpop.f32.mrb[89].mxu1  ;;  %v7100_v47 = vld [vmem:[%s9563_s15 + $0xcd0] sm:$0xff] }
 0x1ef   : > { %v829_v56 = vpop.f32.mrb[74].mxu0  ;;  %2380 = vmatprep.mubr.f32.mxu1 %v7057_v17  ;;  %v7059_v17 = vld [vmem:[%s9563_s15 + $0xb88] sm:$0xff] }
 0x1f0   : > { %v10476_v26 = vadd.f32 %v10157_v28, %v829_v56  ;;  %v831_v50 = vpop.f32.mrb[75].mxu0  ;;  %8428 = vmatmul.mubr.f32.gmra.mrb[180].mxu0 %v7091_v14  ;;  %v7063_v14 = vld [vmem:[%s9563_s15 + $0xba8] sm:$0xff] }
 0x1f1   : > { %8430 = vmatprep.mubr.f32.mxu0 %v7094_v31  ;;  %v10480_v5 = vpop.f32.mrb[90].mxu1  ;;  %v7103_v31 = vld [vmem:[%s9563_s15 + $0xce8] sm:$0xff] }
 0x1f2   : > { %12443 = vst [vmem:[#allocation33_spill] sm:$0xff] %v10476_v26  ;;  %2381 = vmatmul.mubr.f32.gmra.mrb[196].mxu1 %v7056_v20  ;;  %v1555_v61 = vpop.f32.mrb[91].mxu1  ;;  %v7106_v20 = vld [vmem:[%s9563_s15 + $0xd00] sm:$0xff] }
 0x1f3   : > { %v834_v29 = vpop.f32.mrb[76].mxu0  ;;  %2385 = vmatprep.mubr.f32.mxu1 %v7060_v22  ;;  %v7062_v22 = vld [vmem:[%s9563_s15 + $0xba0] sm:$0xff] }
 0x1f4   : > { %v10485_v28 = vadd.f32 %v10175_v19, %v834_v29  ;;  %v836_v56 = vpop.f32.mrb[77].mxu0  ;;  %8431 = vmatmul.mubr.f32.gmra.mrb[182].mxu0 %v7097_v27  ;;  %v7066_v27 = vld [vmem:[%s9563_s15 + $0xbc0] sm:$0xff] }
 0x1f5   : > { %8433 = vmatprep.mubr.f32.mxu0 %v7100_v47  ;;  %v10489_v50 = vpop.f32.mrb[92].mxu1  ;;  %v7109_v47 = vld [vmem:[%s9563_s15 + $0xd18] sm:$0xff] }
 0x1f6   : > { %12444 = vst [vmem:[#allocation34_spill] sm:$0xff] %v10485_v28  ;;  %2386 = vmatmul.mubr.f32.gmra.mrb[198].mxu1 %v7059_v17  ;;  %v1560_v61 = vpop.f32.mrb[93].mxu1  ;;  %v7112_v17 = vld [vmem:[%s9563_s15 + $0xd30] sm:$0xff] }
 0x1f7   : > { %v839_v26 = vpop.f32.mrb[78].mxu0  ;;  %2390 = vmatprep.mubr.f32.mxu1 %v7063_v14  ;;  %v7065_v14 = vld [vmem:[%s9563_s15 + $0xbb8] sm:$0xff] }
 0x1f8   : > { %v10494_v19 = vadd.f32 %v10170_v9, %v839_v26  ;;  %v841_v29 = vpop.f32.mrb[79].mxu0  ;;  %8434 = vmatmul.mubr.f32.gmra.mrb[184].mxu0 %v7103_v31  ;;  %v7069_v31 = vld [vmem:[%s9563_s15 + $0xbd8] sm:$0xff] }
 0x1f9   : > { %8436 = vmatprep.mubr.f32.mxu0 %v7106_v20  ;;  %v10498_v56 = vpop.f32.mrb[94].mxu1  ;;  %v7115_v20 = vld [vmem:[%s9563_s15 + $0xd48] sm:$0xff] }
 0x1fa   : > { %12445 = vst [vmem:[#allocation35_spill] sm:$0xff] %v10494_v19  ;;  %2391 = vmatmul.mubr.f32.gmra.mrb[200].mxu1 %v7062_v22  ;;  %v1565_v61 = vpop.f32.mrb[95].mxu1  ;;  %v7118_v22 = vld [vmem:[%s9563_s15 + $0xd60] sm:$0xff] }
 0x1fb   : > { %v844_v28 = vpop.f32.mrb[80].mxu0  ;;  %2395 = vmatprep.mubr.f32.mxu1 %v7066_v27 }
 0x1fc   : > { %v10503_v9 = vadd.f32 %v10189_v16, %v844_v28  ;;  %v846_v26 = vpop.f32.mrb[81].mxu0  ;;  %8437 = vmatmul.mubr.f32.gmra.mrb[186].mxu0 %v7109_v47  ;;  %v7068_v16 = vld [vmem:[%s9563_s15 + $0xbd0] sm:$0xff] }
 0x1fd   : > { %8439 = vmatprep.mubr.f32.mxu0 %v7112_v17  ;;  %v10507_v29 = vpop.f32.mrb[96].mxu1  ;;  %v7072_v47 = vld [vmem:[%s9563_s15 + $0xbf0] sm:$0xff]  ;;  %v7121_v17 = vld [vmem:[%s9563_s15 + $0xd78] sm:$0xff] }
 0x1fe   : > { %12446 = vst [vmem:[#allocation36_spill] sm:$0xff] %v10503_v9  ;;  %2396 = vmatmul.mubr.f32.gmra.mrb[202].mxu1 %v7065_v14  ;;  %v1570_v61 = vpop.f32.mrb[97].mxu1  ;;  %v7171_v14 = vld [vmem:[%s9563_s15 + $0xd88] sm:$0xff] }
 0x1ff   : > { %v849_v19 = vpop.f32.mrb[82].mxu0  ;;  %2400 = vmatprep.mubr.f32.mxu1 %v7069_v31  ;;  %v7071_v31 = vld [vmem:[%s9563_s15 + $0xbe8] sm:$0xff] }
 0x200   : > { %v10512_v28 = vadd.f32 %v10184_v41, %v849_v19  ;;  %v851_v27 = vpop.f32.mrb[83].mxu0  ;;  %8440 = vmatmul.mubr.f32.gmra.mrb[188].mxu0 %v7115_v20  ;;  %v7541_v41 = vld [vmem:[%s9575_s16 + $0x718] sm:$0xff] }
 0x201   : > { %8442 = vmatprep.mubr.f32.mxu0 %v7118_v22  ;;  %v10516_v26 = vpop.f32.mrb[98].mxu1  ;;  %v7075_v22 = vld [vmem:[%s9563_s15 + $0xc08] sm:$0xff] }
 0x202   : > { %12447 = vst [vmem:[#allocation37_spill] sm:$0xff] %v10512_v28  ;;  %2401 = vmatmul.mubr.f32.gmra.mrb[204].mxu1 %v7068_v16  ;;  %v1575_v61 = vpop.f32.mrb[99].mxu1  ;;  %v7170_v16 = vld [vmem:[%s9563_s15 + $0xd80] sm:$0xff] }
 0x203   : > { %v854_v9 = vpop.f32.mrb[84].mxu0  ;;  %2405 = vmatprep.mubr.f32.mxu1 %v7072_v47  ;;  %v7174_v47 = vld [vmem:[%s9563_s15 + $0xda0] sm:$0xff]  ;;  %v9129_v61 = vpack.c.bf16 %v7541_v41, %v7540_v36  ;;  %v7173_v36 = vld [vmem:[%s9563_s15 + $0xd98] sm:$0xff] }
 0x204   : > { %v10523_v19 = vadd.f32 %v10202_v6, %v854_v9  ;;  %v856_v20 = vpop.f32.mrb[85].mxu0  ;;  %8443 = vmatmul.mubr.f32.gmra.mrb[190].mxu0 %v7121_v17  ;;  %v7543_v6 = vld [vmem:[%s9575_s16 + $0x728] sm:$0xff] }
 0x205   : > { %3054 = vmatprep.mubr.f32.mxu0 %v7171_v14  ;;  %v10527_v27 = vpop.f32.mrb[100].mxu1  ;;  %v7078_v14 = vld [vmem:[%s9563_s15 + $0xc20] sm:$0xff]  ;;  %v7077_v20 = vld [vmem:[%s9563_s15 + $0xc18] sm:$0xff] }
 0x206   : > { %2406 = vmatmul.mubr.f32.gmra.mrb[206].mxu1 %v7071_v31  ;;  %v1580_v28 = vpop.f32.mrb[101].mxu1  ;;  %v7177_v31 = vld [vmem:[%s9563_s15 + $0xdb8] sm:$0xff] }
 0x207   : > { %v859_v52 = vpop.f32.mrb[86].mxu0  ;;  %2410 = vmatprep.mubr.f32.mxu1 %v7075_v22  ;;  %v7544_v22 = vld [vmem:[%s9575_s16 + $0x730] sm:$0xff] }
 0x208   : > { %v10534_v9 = vadd.f32 %v10197_v8, %v859_v52  ;;  %v861_v17 = vpop.f32.mrb[87].mxu0  ;;  %3055 = vmatmul.mubr.f32.vlgmr.msra.gmra.mrb[192].mxu0 %v7170_v16  ;;  %v9133_v8 = vpack.c.bf16 %v7543_v6, %v7542_v1  ;;  %v7545_v16 = vld [vmem:[%s9575_s16 + $0x738] sm:$0xff]  ;;  %v7180_v1 = vld [vmem:[%s9563_s15 + $0xdd0] sm:$0xff] }
 0x209   : > { %9128 = vmatpush3.bf16.msra.mxu0 %v10444_v13  ;;  %3059 = vmatprep.mubr.f32.mxu0 %v7174_v47  ;;  %v10539_v28 = vpop.f32.mrb[102].mxu1  ;;  %v7081_v17 = vld [vmem:[%s9563_s15 + $0xc38] sm:$0xff] }
 0x20a   : > { %12448 = vst [vmem:[#allocation38_spill] sm:$0xff] %v10534_v9  ;;  %2411 = vmatmul.mubr.f32.gmra.mrb[208].mxu1 %v7074_v21  ;;  %9130 = vmatprep.subr.bf16.mxu0 %v9129_v61  ;;  %v1585_v41 = vpop.f32.mrb[103].mxu1  ;;  %v7176_v21 = vld [vmem:[%s9563_s15 + $0xdb0] sm:$0xff]  ;;  %v7087_v9 = vld [vmem:[%s9563_s15 + $0xc68] sm:$0xff] }
 0x20b   : > { %v864_v52 = vpop.f32.mrb[88].mxu0  ;;  %2415 = vmatprep.mubr.f32.mxu1 %v7078_v14  ;;  %v9137_v14 = vpack.c.bf16 %v7545_v16, %v7544_v22  ;;  %v7183_v22 = vld [vmem:[%s9563_s15 + $0xde8] sm:$0xff] }
 0x20c   : > { %v10546_v13 = vadd.f32 %v10213_v48, %v864_v52  ;;  %v866_v47 = vpop.f32.mrb[89].mxu0  ;;  %3060 = vmatmul.mubr.f32.gmra.mrb[194].mxu0 %v7173_v36  ;;  %v7080_v52 = vld [vmem:[%s9563_s15 + $0xc30] sm:$0xff] }
 0x20d   : > { %3064 = vmatprep.mubr.f32.mxu0 %v7177_v31  ;;  %9132 = vmatpush3.bf16.msra.mxu0 %v9129_v61  ;;  %v10550_v41 = vpop.f32.mrb[104].mxu1  ;;  %v7546_v47 = vld [vmem:[%s9575_s16 + $0x740] sm:$0xff]  ;;  %v7084_v31 = vld [vmem:[%s9563_s15 + $0xc50] sm:$0xff] }
 0x20e   : > { %12449 = vst [vmem:[#allocation39_spill] sm:$0xff] %v10546_v13  ;;  %2416 = vmatmul.mubr.f32.gmra.mrb[210].mxu1 %v7077_v20  ;;  %v1590_v6 = vpop.f32.mrb[105].mxu1  ;;  %9134 = vmatprep.subr.bf16.mxu0 %v9133_v8  ;;  %v7547_v13 = vld [vmem:[%s9575_s16 + $0x748] sm:$0xff] }
 0x20f   : > { %v869_v48 = vpop.f32.mrb[90].mxu0  ;;  %2420 = vmatprep.mubr.f32.mxu1 %v7081_v17  ;;  %v7179_v20 = vld [vmem:[%s9563_s15 + $0xdc8] sm:$0xff]  ;;  %v9141_v17 = vpack.c.bf16 %v7547_v13, %v7546_v47  ;;  %v7186_v13 = vld [vmem:[%s9563_s15 + $0xe00] sm:$0xff] }
 0x210   : > { %v10557_v36 = vadd.f32 %v10210_v45, %v869_v48  ;;  %v871_v61 = vpop.f32.mrb[91].mxu0  ;;  %3065 = vmatmul.mubr.f32.gmra.mrb[196].mxu0 %v7176_v21  ;;  %v7083_v48 = vld [vmem:[%s9563_s15 + $0xc48] sm:$0xff] }
 0x211   : > { %3069 = vmatprep.mubr.f32.mxu0 %v7180_v1  ;;  %v10561_v6 = vpop.f32.mrb[106].mxu1  ;;  %9136 = vmatpush3.bf16.msra.mxu0 %v9133_v8  ;;  %v7548_v61 = vld [vmem:[%s9575_s16 + $0x750] sm:$0xff]  ;;  %v7182_v8 = vld [vmem:[%s9563_s15 + $0xde0] sm:$0xff] }
 0x212   : > { %12450 = vst [vmem:[#allocation40_spill] sm:$0xff] %v10557_v36  ;;  %2421 = vmatmul.mubr.f32.gmra.mrb[212].mxu1 %v7080_v52  ;;  %v1595_v16 = vpop.f32.mrb[107].mxu1  ;;  %9138 = vmatprep.subr.bf16.mxu0 %v9137_v14  ;;  %v7549_v36 = vld [vmem:[%s9575_s16 + $0x758] sm:$0xff] }
 0x213   : > { %v874_v45 = vpop.f32.mrb[92].mxu0  ;;  %2425 = vmatprep.mubr.f32.mxu1 %v7084_v31  ;;  %v9145_v31 = vpack.c.bf16 %v7549_v36, %v7548_v61  ;;  %v7189_v36 = vld [vmem:[%s9563_s15 + $0xe18] sm:$0xff] }
 0x214   : > { %v10568_v21 = vadd.f32 %v10224_v18, %v874_v45  ;;  %v876_v1 = vpop.f32.mrb[93].mxu0  ;;  %3070 = vmatmul.mubr.f32.gmra.mrb[198].mxu0 %v7179_v20  ;;  %v7086_v18 = vld [vmem:[%s9563_s15 + $0xc60] sm:$0xff] }
 0x215   : > { %3074 = vmatprep.mubr.f32.mxu0 %v7183_v22  ;;  %v10572_v52 = vpop.f32.mrb[108].mxu1  ;;  %9140 = vmatpush3.bf16.msra.mxu0 %v9137_v14  ;;  %v7090_v45 = vld [vmem:[%s9563_s15 + $0xc80] sm:$0xff]  ;;  %v7185_v14 = vld [vmem:[%s9563_s15 + $0xdf8] sm:$0xff]  ;;  %v7551_v1 = vld [vmem:[%s9575_s16 + $0x768] sm:$0xff] }
 0x216   : > { %2426 = vmatmul.mubr.f32.gmra.mrb[214].mxu1 %v7083_v48  ;;  %v1600_v47 = vpop.f32.mrb[109].mxu1  ;;  %9142 = vmatprep.subr.bf16.mxu0 %v9141_v17 }
 0x217   : > { %v879_v16 = vpop.f32.mrb[94].mxu0  ;;  %2430 = vmatprep.mubr.f32.mxu1 %v7087_v9  ;;  %v7550_v9 = vld [vmem:[%s9575_s16 + $0x760] sm:$0xff] }
 0x218   : > { %v10577_v20 = vadd.f32 %v10221_v11, %v879_v16  ;;  %v881_v22 = vpop.f32.mrb[95].mxu0  ;;  %3075 = vmatmul.mubr.f32.gmra.mrb[200].mxu0 %v7182_v8  ;;  %v7089_v11 = vld [vmem:[%s9563_s15 + $0xc78] sm:$0xff]  ;;  %v9149_v16 = vpack.c.bf16 %v7551_v1, %v7550_v9 }
 0x219   : > { %3079 = vmatprep.mubr.f32.mxu0 %v7186_v13  ;;  %v10581_v48 = vpop.f32.mrb[110].mxu1  ;;  %9144 = vmatpush3.bf16.msra.mxu0 %v9141_v17  ;;  %v7093_v22 = vld [vmem:[%s9563_s15 + $0xc98] sm:$0xff] }
 0x21a   : > { %2431 = vmatmul.mubr.f32.gmra.mrb[216].mxu1 %v7086_v18  ;;  %v1605_v61 = vpop.f32.mrb[111].mxu1  ;;  %9146 = vmatprep.subr.bf16.mxu0 %v9145_v31  ;;  %v7188_v18 = vld [vmem:[%s9563_s15 + $0xe10] sm:$0xff] }
 0x21b   : > { %v8271_v47 = vpop.f32.mrb[96].mxu0  ;;  %2435 = vmatprep.mubr.f32.mxu1 %v7090_v45  ;;  %v7192_v45 = vld [vmem:[%s9563_s15 + $0xe30] sm:$0xff] }
 0x21c   : > { %v1753_v8 = vpop.f32.mrb[97].mxu0  ;;  %3080 = vmatmul.mubr.f32.gmra.mrb[202].mxu0 %v7185_v14  ;;  %v1759_v13 = vadd.f32 %v8271_v47, %v10243_v4  ;;  %v7092_v4 = vld [vmem:[%s9563_s15 + $0xc90] sm:$0xff]  ;;  %v7191_v47 = vld [vmem:[%s9563_s15 + $0xe28] sm:$0xff] }
 0x21d   : > { %v1754_v17 = vadd.f32 %v1753_v8, %v10232_v44  ;;  %3084 = vmatprep.mubr.f32.mxu0 %v7189_v36  ;;  %v10591_v61 = vpop.f32.mrb[112].mxu1  ;;  %9148 = vmatpush3.bf16.msra.mxu0 %v9145_v31  ;;  %v7096_v36 = vld [vmem:[%s9563_s15 + $0xcb0] sm:$0xff]  ;;  %v7195_v8 = vld [vmem:[%s9563_s15 + $0xe48] sm:$0xff] }
 0x21e   : > { %2436 = vmatmul.mubr.f32.gmra.mrb[218].mxu1 %v7089_v11  ;;  %5402 = vrot.lane.b32.xlu0 %v1759_v13, %s9430_s21  ;;  %v1610_v9 = vpop.f32.mrb[113].mxu1 }
 0x21f   : > { %v8274_v14 = vpop.f32.mrb[98].mxu0  ;;  %2440 = vmatprep.mubr.f32.mxu1 %v7093_v22  ;;  %9150 = vmatprep.subr.bf16.mxu0 %v9149_v16  ;;  %v7194_v9 = vld [vmem:[%s9563_s15 + $0xe40] sm:$0xff] }
 0x220   : > { %v1763_v1 = vpop.f32.mrb[99].mxu0  ;;  %3085 = vmatmul.mubr.f32.gmra.mrb[204].mxu0 %v7188_v18  ;;  %v1769_v44 = vadd.f32 %v8274_v14, %v10265_v30  ;;  %v7095_v30 = vld [vmem:[%s9563_s15 + $0xca8] sm:$0xff] }
 0x221   : > { %v1764_v31 = vadd.f32 %v1763_v1, %v10254_v63  ;;  %3089 = vmatprep.mubr.f32.mxu0 %v7192_v45  ;;  %v10600_v11 = vpop.f32.mrb[114].mxu1  ;;  %9152 = vmatpush3.bf16.msra.mxu0 %v9149_v16  ;;  %v7099_v45 = vld [vmem:[%s9563_s15 + $0xcc8] sm:$0xff] }
 0x222   : > { %2441 = vmatmul.mubr.f32.gmra.mrb[220].mxu1 %v7092_v4  ;;  %5406 = vrot.lane.b32.xlu1 %v1769_v44, %s9430_s21  ;;  %v1615_v13 = vpop.f32.mrb[115].mxu1 }
 0x223   : > { %5400 = vrot.lane.b32.xlu0 %v1754_v17, %s9430_s21  ;;  %v8277_v22 = vpop.f32.mrb[100].mxu0  ;;  %2445 = vmatprep.mubr.f32.mxu1 %v7096_v36  ;;  %v7198_v17 = vld [vmem:[%s9563_s15 + $0xe60] sm:$0xff]  ;;  %v7201_v13 = vld [vmem:[%s9563_s15 + $0xe78] sm:$0xff] }
 0x224   : > { %v1779_v63 = vadd.f32 %v8277_v22, %v10289_v7  ;;  %v1773_v18 = vpop.f32.mrb[101].mxu0  ;;  %3090 = vmatmul.mubr.f32.gmra.mrb[206].mxu0 %v7191_v47  ;;  %v7098_v7 = vld [vmem:[%s9563_s15 + $0xcc0] sm:$0xff] }
 0x225   : > { %v1774_v16 = vadd.f32 %v1773_v18, %v10277_v23  ;;  %3094 = vmatprep.mubr.f32.mxu0 %v7195_v8  ;;  %v10610_v14 = vpop.f32.mrb[116].mxu1  ;;  %v7102_v36 = vld [vmem:[%s9563_s15 + $0xce0] sm:$0xff]  ;;  %v7197_v8 = vld [vmem:[%s9563_s15 + $0xe58] sm:$0xff] }
 0x226   : > { %2446 = vmatmul.mubr.f32.gmra.mrb[222].mxu1 %v7095_v30  ;;  %5404 = vrot.lane.b32.xlu1 %v1764_v31, %s9430_s21  ;;  %v1620_v4 = vpop.f32.mrb[117].mxu1 }
 0x227   : > { %v8280_v1 = vpop.f32.mrb[102].mxu0  ;;  %5408 = vrot.lane.b32.xlu0 %v1774_v16, %s9430_s21  ;;  %2450 = vmatprep.mubr.f32.mxu1 %v7099_v45  ;;  %v7105_v45 = vld [vmem:[%s9563_s15 + $0xcf8] sm:$0xff] }
 0x228   : > { %v1789_v44 = vadd.f32 %v8280_v1, %v10315_v55  ;;  %v1783_v23 = vpop.f32.mrb[103].mxu0  ;;  %3095 = vmatmul.mubr.f32.gmra.mrb[208].mxu0 %v7194_v9  ;;  %v7101_v55 = vld [vmem:[%s9563_s15 + $0xcd8] sm:$0xff]  ;;  %v7200_v9 = vld [vmem:[%s9563_s15 + $0xe70] sm:$0xff] }
 0x229   : > { %v1784_v47 = vadd.f32 %v1783_v23, %v10301_v57  ;;  %3099 = vmatprep.mubr.f32.mxu0 %v7198_v17  ;;  %v10620_v31 = vpop.f32.mrb[118].mxu1  ;;  %v7204_v17 = vld [vmem:[%s9563_s15 + $0xe90] sm:$0xff] }
 0x22a   : > { %2451 = vmatmul.mubr.f32.gmra.mrb[224].mxu1 %v7098_v7  ;;  %5410 = vrot.lane.b32.xlu1 %v1779_v63, %s9430_s21  ;;  %v1625_v22 = vpop.f32.mrb[119].mxu1  ;;  %v7108_v23 = vld [vmem:[%s9563_s15 + $0xd10] sm:$0xff] }
 0x22b   : > { %v8283_v30 = vpop.f32.mrb[104].mxu0  ;;  %5412 = vrot.lane.b32.xlu0 %v1784_v47, %s9430_s21  ;;  %2455 = vmatprep.mubr.f32.mxu1 %v7102_v36  ;;  %v7552_v22 = vld [vmem:[%s9575_s16 + $0x770] sm:$0xff] }
 0x22c   : > { %v1799_v18 = vadd.f32 %v8283_v30, %v10339_v12  ;;  %v1793_v57 = vpop.f32.mrb[105].mxu0  ;;  %3100 = vmatmul.mubr.f32.gmra.mrb[210].mxu0 %v7197_v8  ;;  %v7104_v12 = vld [vmem:[%s9563_s15 + $0xcf0] sm:$0xff]  ;;  %v7207_v8 = vld [vmem:[%s9563_s15 + $0xea8] sm:$0xff]  ;;  %v7553_v30 = vld [vmem:[%s9575_s16 + $0x778] sm:$0xff] }
 0x22d   : > { %v1794_v16 = vadd.f32 %v1793_v57, %v10327_v15  ;;  %3104 = vmatprep.mubr.f32.mxu0 %v7201_v13  ;;  %v10630_v63 = vpop.f32.mrb[120].mxu1 }
 0x22e   : > { %2456 = vmatmul.mubr.f32.gmra.mrb[226].mxu1 %v7101_v55  ;;  %5414 = vrot.lane.b32.xlu1 %v1789_v44, %s9430_s21  ;;  %v1630_v4 = vpop.f32.mrb[121].mxu1  ;;  %v7203_v44 = vld [vmem:[%s9563_s15 + $0xe88] sm:$0xff] }
 0x22f   : > { %v8286_v1 = vpop.f32.mrb[106].mxu0  ;;  %5416 = vrot.lane.b32.xlu0 %v1794_v16, %s9430_s21  ;;  %2460 = vmatprep.mubr.f32.mxu1 %v7105_v45  ;;  %v7107_v55 = vld [vmem:[%s9563_s15 + $0xd08] sm:$0xff]  ;;  %v7210_v4 = vld [vmem:[%s9563_s15 + $0xec0] sm:$0xff] }
 0x230   : > { %v1809_v15 = vadd.f32 %v8286_v1, %v10365_v62  ;;  %v1803_v7 = vpop.f32.mrb[107].mxu0  ;;  %3105 = vmatmul.mubr.f32.gmra.mrb[212].mxu0 %v7200_v9  ;;  %v7111_v16 = vld [vmem:[%s9563_s15 + $0xd28] sm:$0xff]  ;;  %v7206_v9 = vld [vmem:[%s9563_s15 + $0xea0] sm:$0xff] }
 0x231   : > { %v1804_v36 = vadd.f32 %v1803_v7, %v10353_v58  ;;  %3109 = vmatprep.mubr.f32.mxu0 %v7204_v17  ;;  %v10640_v47 = vpop.f32.mrb[122].mxu1  ;;  %v9153_v58 = vpack.c.bf16 %v7553_v30, %v7552_v22  ;;  %v7113_v22 = vld [vmem:[%s9563_s15 + $0xd38] sm:$0xff] }
 0x232   : > { %2461 = vmatmul.mubr.f32.gmra.mrb[228].mxu1 %v7104_v12  ;;  %5418 = vrot.lane.b32.xlu1 %v1799_v18, %s9430_s21  ;;  %v1635_v13 = vpop.f32.mrb[123].mxu1  ;;  %v7110_v12 = vld [vmem:[%s9563_s15 + $0xd20] sm:$0xff] }
 0x233   : > { %v8289_v62 = vpop.f32.mrb[108].mxu0  ;;  %5420 = vrot.lane.b32.xlu0 %v1804_v36, %s9430_s21  ;;  %2465 = vmatprep.mubr.f32.mxu1 %v7108_v23  ;;  %v7114_v23 = vld [vmem:[%s9563_s15 + $0xd40] sm:$0xff] }
 0x234   : > { %v1819_v57 = vadd.f32 %v8289_v62, %v10390_v39  ;;  %v1813_v45 = vpop.f32.mrb[109].mxu0  ;;  %3110 = vmatmul.mubr.f32.gmra.mrb[214].mxu0 %v7203_v44  ;;  %9154 = vmatprep.subr.bf16.mxu0 %v9153_v58  ;;  %v7209_v44 = vld [vmem:[%s9563_s15 + $0xeb8] sm:$0xff] }
 0x235   : > { %v1814_v18 = vadd.f32 %v1813_v45, %v10378_v2  ;;  %3114 = vmatprep.mubr.f32.mxu0 %v7207_v8  ;;  %v10652_v17 = vpop.f32.mrb[124].mxu1  ;;  %9156 = vmatpush3.bf16.msra.mxu0 %v9153_v58  ;;  %v7213_v8 = vld [vmem:[%s9563_s15 + $0xed8] sm:$0xff]  ;;  %v7212_v58 = vld [vmem:[%s9563_s15 + $0xed0] sm:$0xff] }
 0x236   : > { %2466 = vmatmul.mubr.f32.gmra.mrb[230].mxu1 %v7107_v55  ;;  %5422 = vrot.lane.b32.xlu1 %v1809_v15, %s9430_s21  ;;  %v1640_v1 = vpop.f32.mrb[125].mxu1  ;;  %v7117_v62 = vld [vmem:[%s9563_s15 + $0xd58] sm:$0xff]  ;;  %v7216_v45 = vld [vmem:[%s9563_s15 + $0xef0] sm:$0xff] }
 0x237   : > { %v8292_v39 = vpop.f32.mrb[110].mxu0  ;;  %5424 = vrot.lane.b32.xlu0 %v1814_v18, %s9430_s21  ;;  %2470 = vmatprep.mubr.f32.mxu1 %v7111_v16  ;;  %v7116_v18 = vld [vmem:[%s9563_s15 + $0xd50] sm:$0xff] }
 0x238   : > { %v1829_v2 = vadd.f32 %v8292_v39, %v10414_v37  ;;  %v1823_v7 = vpop.f32.mrb[111].mxu0  ;;  %3115 = vmatmul.mubr.f32.gmra.mrb[216].mxu0 %v7206_v9  ;;  %9157 = vmatprep.subr.bf16.mxu0 %v12425_v25  ;;  %v7215_v39 = vld [vmem:[%s9563_s15 + $0xee8] sm:$0xff] }
 0x239   : > { %v1824_v36 = vadd.f32 %v1823_v7, %v10402_v10  ;;  %3119 = vmatprep.mubr.f32.mxu0 %v7210_v4  ;;  %v10662_v15 = vpop.f32.mrb[126].mxu1  ;;  %v7120_v4 = vld [vmem:[%s9563_s15 + $0xd70] sm:$0xff] }
 0x23a   : > { %2471 = vmatmul.mubr.f32.gmra.mrb[232].mxu1 %v7110_v12  ;;  %5426 = vrot.lane.b32.xlu1 %v1819_v57, %s9430_s21  ;;  %v1645_v13 = vpop.f32.mrb[127].mxu1 }
 0x23b   : > { %v8295_v37 = vpop.f32.mrb[112].mxu0  ;;  %5428 = vrot.lane.b32.xlu0 %v1824_v36, %s9430_s21  ;;  %2475 = vmatprep.mubr.f32.mxu1 %v7114_v23  ;;  %v7218_v13 = vld [vmem:[%s9563_s15 + $0xf00] sm:$0xff] }
 0x23c   : > { %v1839_v10 = vadd.f32 %v8295_v37, %v10440_v54  ;;  %v1833_v30 = vpop.f32.mrb[113].mxu0  ;;  %3120 = vmatmul.mubr.f32.gmra.mrb[218].mxu0 %v7209_v44  ;;  %v7172_v44 = vld [vmem:[%s9563_s15 + $0xd90] sm:$0xff] }
 0x23d   : > { %v1834_v55 = vadd.f32 %v1833_v30, %v10426_v33  ;;  %3124 = vmatprep.mubr.f32.mxu0 %v7213_v8  ;;  %v10673_v57 = vpop.f32.mrb[128].mxu1  ;;  %v7222_v30 = vld [vmem:[%s9563_s15 + $0xf20] sm:$0xff] }
 0x23e   : > { %2476 = vmatmul.mubr.f32.gmra.mrb[234].mxu1 %v7113_v22  ;;  %5430 = vrot.lane.b32.xlu1 %v1829_v2, %s9430_s21  ;;  %v1650_v54 = vpop.f32.mrb[129].mxu1  ;;  %v7219_v2 = vld [vmem:[%s9563_s15 + $0xf08] sm:$0xff]  ;;  %v7506_v22 = vld [vmem:[%s9575_s16 + $0x600] sm:$0xff] }
 0x23f   : > { %v8298_v16 = vpop.f32.mrb[114].mxu0  ;;  %5432 = vrot.lane.b32.xlu0 %v1834_v55, %s9430_s21  ;;  %2480 = vmatprep.mubr.f32.mxu1 %v7117_v62 }
 0x240   : > { %v1849_v9 = vadd.f32 %v8298_v16, %v10462_v34  ;;  %v1843_v33 = vpop.f32.mrb[115].mxu0  ;;  %3125 = vmatmul.mubr.f32.gmra.mrb[220].mxu0 %v7212_v58  ;;  %v7119_v34 = vld [vmem:[%s9563_s15 + $0xd68] sm:$0xff] }
 0x241   : > { %v1844_v1 = vadd.f32 %v1843_v33, %v10452_v0  ;;  %3129 = vmatprep.mubr.f32.mxu0 %v7216_v45  ;;  %v10683_v12 = vpop.f32.mrb[130].mxu1  ;;  %v7178_v45 = vld [vmem:[%s9563_s15 + $0xdc0] sm:$0xff]  ;;  %v7508_v33 = vld [vmem:[%s9575_s16 + $0x610] sm:$0xff] }
 0x242   : > { %2481 = vmatmul.mubr.f32.gmra.mrb[236].mxu1 %v7116_v18  ;;  %5434 = vrot.lane.b32.xlu1 %v1839_v10, %s9430_s21  ;;  %v1655_v7 = vpop.f32.mrb[131].mxu1  ;;  %v7507_v10 = vld [vmem:[%s9575_s16 + $0x608] sm:$0xff]  ;;  %v7221_v18 = vld [vmem:[%s9563_s15 + $0xf18] sm:$0xff] }
 0x243   : > { %v8301_v23 = vpop.f32.mrb[116].mxu0  ;;  %5436 = vrot.lane.b32.xlu0 %v1844_v1, %s9430_s21  ;;  %2485 = vmatprep.mubr.f32.mxu1 %v7120_v4  ;;  %v9078_v54 = vpack.c.bf16 %v7507_v10, %v7506_v22  ;;  %v7509_v4 = vld [vmem:[%s9575_s16 + $0x618] sm:$0xff] }
 0x244   : > { %v1859_v0 = vadd.f32 %v8301_v23, %v10480_v5  ;;  %v1853_v36 = vpop.f32.mrb[117].mxu0  ;;  %3130 = vmatmul.mubr.f32.gmra.mrb[222].mxu0 %v7215_v39  ;;  %v7225_v1 = vld [vmem:[%s9563_s15 + $0xf38] sm:$0xff]  ;;  %v7184_v23 = vld [vmem:[%s9563_s15 + $0xdf0] sm:$0xff] }
 0x245   : > { %v1854_v8 = vadd.f32 %v1853_v36, %v10471_v42  ;;  %3134 = vmatprep.mubr.f32.mxu0 %v7219_v2  ;;  %v10693_v37 = vpop.f32.mrb[132].mxu1  ;;  %v7175_v42 = vld [vmem:[%s9563_s15 + $0xda8] sm:$0xff]  ;;  %v7224_v36 = vld [vmem:[%s9563_s15 + $0xf30] sm:$0xff] }
 0x246   : > { %2486 = vmatmul.mubr.f32.gmra.mrb[238].mxu1 %v7119_v34  ;;  %5438 = vrot.lane.b32.xlu1 %v1849_v9, %s9430_s21  ;;  %v1660_v5 = vpop.f32.mrb[133].mxu1  ;;  %v9081_v34 = vpack.c.bf16 %v7509_v4, %v7508_v33 }
 0x247   : > { %v8304_v62 = vpop.f32.mrb[118].mxu0  ;;  %5440 = vrot.lane.b32.xlu0 %v1854_v8, %s9430_s21  ;;  %8477 = vmatprep.mubr.f32.mxu1 %v7172_v44  ;;  %v7510_v8 = vld [vmem:[%s9575_s16 + $0x620] sm:$0xff] }
 0x248   : > { %v1869_v55 = vadd.f32 %v8304_v62, %v10498_v56  ;;  %v1863_v58 = vpop.f32.mrb[119].mxu0  ;;  %3135 = vmatmul.mubr.f32.gmra.mrb[224].mxu0 %v7218_v13  ;;  %v7511_v13 = vld [vmem:[%s9575_s16 + $0x628] sm:$0xff]  ;;  %v7190_v62 = vld [vmem:[%s9563_s15 + $0xe20] sm:$0xff] }
 0x249   : > { %v1864_v16 = vadd.f32 %v1863_v58, %v10489_v50  ;;  %3139 = vmatprep.mubr.f32.mxu0 %v7222_v30  ;;  %v10705_v9 = vpop.f32.mrb[134].mxu1  ;;  %v7181_v50 = vld [vmem:[%s9563_s15 + $0xdd8] sm:$0xff]  ;;  %v7227_v58 = vld [vmem:[%s9563_s15 + $0xf48] sm:$0xff] }
 0x24a   : > { %8478 = vmatmul.mubr.f32.vlgmr.msra.gmra.mrb[240].mxu1 %v7175_v42  ;;  %5442 = vrot.lane.b32.xlu1 %v1859_v0, %s9430_s21  ;;  %v1665_v56 = vpop.f32.mrb[135].mxu1  ;;  %v9084_v42 = vpack.c.bf16 %v7511_v13, %v7510_v8 }
 0x24b   : > { %v8307_v39 = vpop.f32.mrb[120].mxu0  ;;  %5444 = vrot.lane.b32.xlu0 %v1864_v16, %s9430_s21  ;;  %8480 = vmatprep.mubr.f32.mxu1 %v7178_v45  ;;  %v7513_v16 = vld [vmem:[%s9575_s16 + $0x638] sm:$0xff]  ;;  %v7196_v56 = vld [vmem:[%s9563_s15 + $0xe50] sm:$0xff] }
 0x24c   : > { %v1879_v2 = vadd.f32 %v8307_v39, %v10516_v26  ;;  %v1873_v7 = vpop.f32.mrb[121].mxu0  ;;  %3140 = vmatmul.mubr.f32.gmra.mrb[226].mxu0 %v7221_v18  ;;  %9079 = vmatpush1.bf16.msra.mxu1 %v9078_v54  ;;  %v7228_v26 = vld [vmem:[%s9563_s15 + $0xf50] sm:$0xff] }
 0x24d   : > { %v1874_v0 = vadd.f32 %v1873_v7, %v10507_v29  ;;  %3144 = vmatprep.mubr.f32.mxu0 %v7225_v1  ;;  %v10717_v44 = vpop.f32.mrb[136].mxu1  ;;  %9080 = vmatprep.subr.bf16.mxu1 %v12425_v25  ;;  %v7187_v29 = vld [vmem:[%s9563_s15 + $0xe08] sm:$0xff]  ;;  %v7512_v54 = vld [vmem:[%s9575_s16 + $0x630] sm:$0xff] }
 0x24e   : > { %8481 = vmatmul.mubr.f32.gmra.mrb[242].mxu1 %v7181_v50  ;;  %5446 = vrot.lane.b32.xlu1 %v1869_v55, %s9430_s21  ;;  %v1670_v22 = vpop.f32.mrb[137].mxu1  ;;  %v9087_v39 = vpack.c.bf16 %v7513_v16, %v7512_v54  ;;  %v7208_v16 = vld [vmem:[%s9563_s15 + $0xeb0] sm:$0xff] }
 0x24f   : > { %v8310_v10 = vpop.f32.mrb[122].mxu0  ;;  %5448 = vrot.lane.b32.xlu0 %v1874_v0, %s9430_s21  ;;  %8483 = vmatprep.mubr.f32.mxu1 %v7184_v23  ;;  %v7514_v23 = vld [vmem:[%s9575_s16 + $0x640] sm:$0xff] }
 0x250   : > { %v1889_v30 = vadd.f32 %v8310_v10, %v10539_v28  ;;  %v1883_v5 = vpop.f32.mrb[123].mxu0  ;;  %3145 = vmatmul.mubr.f32.gmra.mrb[228].mxu0 %v7224_v36  ;;  %9082 = vmatpush1.bf16.msra.mxu1 %v9081_v34  ;;  %v7231_v28 = vld [vmem:[%s9563_s15 + $0xf68] sm:$0xff] }
 0x251   : > { %v1884_v55 = vadd.f32 %v1883_v5, %v10527_v27  ;;  %3149 = vmatprep.mubr.f32.mxu0 %v7228_v26  ;;  %v10730_v45 = vpop.f32.mrb[138].mxu1  ;;  %9083 = vmatprep.subr.bf16.mxu1 %v12425_v25  ;;  %v7193_v27 = vld [vmem:[%s9563_s15 + $0xe38] sm:$0xff]  ;;  %v7515_v34 = vld [vmem:[%s9575_s16 + $0x648] sm:$0xff]  ;;  %v7202_v26 = vld [vmem:[%s9563_s15 + $0xe80] sm:$0xff] }
 0x252   : > { %8484 = vmatmul.mubr.f32.gmra.mrb[244].mxu1 %v7187_v29  ;;  %5450 = vrot.lane.b32.xlu1 %v1879_v2, %s9430_s21  ;;  %v1675_v18 = vpop.f32.mrb[139].mxu1  ;;  %v7230_v2 = vld [vmem:[%s9563_s15 + $0xf60] sm:$0xff]  ;;  %v9090_v22 = vpack.c.bf16 %v7515_v34, %v7514_v23  ;;  %v7233_v29 = vld [vmem:[%s9563_s15 + $0xf78] sm:$0xff]  ;;  %v7516_v5 = vld [vmem:[%s9575_s16 + $0x650] sm:$0xff] }
 0x253   : > { %v8313_v33 = vpop.f32.mrb[124].mxu0  ;;  %5452 = vrot.lane.b32.xlu0 %v1884_v55, %s9430_s21  ;;  %8486 = vmatprep.mubr.f32.mxu1 %v7190_v62  ;;  %v7517_v62 = vld [vmem:[%s9575_s16 + $0x658] sm:$0xff]  ;;  %v7214_v23 = vld [vmem:[%s9563_s15 + $0xee0] sm:$0xff] }
 0x254   : > { %v1899_v4 = vadd.f32 %v8313_v33, %v10561_v6  ;;  %v1893_v1 = vpop.f32.mrb[125].mxu0  ;;  %3150 = vmatmul.mubr.f32.gmra.mrb[230].mxu0 %v7227_v58  ;;  %9085 = vmatpush1.bf16.msra.mxu1 %v9084_v42  ;;  %v7234_v6 = vld [vmem:[%s9563_s15 + $0xf80] sm:$0xff]  ;;  %v7236_v33 = vld [vmem:[%s9563_s15 + $0xf90] sm:$0xff] }
 0x255   : > { %v1894_v50 = vadd.f32 %v1893_v1, %v10550_v41  ;;  %3154 = vmatprep.mubr.f32.mxu0 %v7231_v28  ;;  %v10743_v7 = vpop.f32.mrb[140].mxu1  ;;  %9086 = vmatprep.subr.bf16.mxu1 %v12425_v25  ;;  %v7199_v41 = vld [vmem:[%s9563_s15 + $0xe68] sm:$0xff]  ;;  %v9093_v28 = vpack.c.bf16 %v7517_v62, %v7516_v5 }
 0x256   : > { %8487 = vmatmul.mubr.f32.gmra.mrb[246].mxu1 %v7193_v27  ;;  %5454 = vrot.lane.b32.xlu1 %v1889_v30, %s9430_s21  ;;  %v1680_v0 = vpop.f32.mrb[141].mxu1  ;;  %v7519_v1 = vld [vmem:[%s9575_s16 + $0x668] sm:$0xff] }
 0x257   : > { %v8316_v36 = vpop.f32.mrb[126].mxu0  ;;  %5456 = vrot.lane.b32.xlu0 %v1894_v50, %s9430_s21  ;;  %8489 = vmatprep.mubr.f32.mxu1 %v7196_v56  ;;  %v7239_v0 = vld [vmem:[%s9563_s15 + $0xfa8] sm:$0xff] }
 0x258   : > { %v1909_v8 = vadd.f32 %v8316_v36, %v10581_v48  ;;  %v1903_v13 = vpop.f32.mrb[127].mxu0  ;;  %3155 = vmatmul.mubr.f32.gmra.mrb[232].mxu0 %v7230_v2  ;;  %9088 = vmatpush1.bf16.msra.mxu1 %v9087_v39  ;;  %v7237_v48 = vld [vmem:[%s9563_s15 + $0xf98] sm:$0xff] }
 0x259   : > { %v1904_v10 = vadd.f32 %v1903_v13, %v10572_v52  ;;  %3159 = vmatprep.mubr.f32.mxu0 %v7234_v6  ;;  %v10756_v30 = vpop.f32.mrb[142].mxu1  ;;  %9089 = vmatprep.subr.bf16.mxu1 %v12425_v25  ;;  %v7205_v52 = vld [vmem:[%s9563_s15 + $0xe98] sm:$0xff] }
 0x25a   : > { %8490 = vmatmul.mubr.f32.gmra.mrb[248].mxu1 %v7199_v41  ;;  %5458 = vrot.lane.b32.xlu1 %v1899_v4, %s9430_s21  ;;  %v1685_v42 = vpop.f32.mrb[143].mxu1  ;;  %v7518_v4 = vld [vmem:[%s9575_s16 + $0x660] sm:$0xff]  ;;  %v7520_v41 = vld [vmem:[%s9575_s16 + $0x670] sm:$0xff] }
 0x25b   : > { %v8319_v55 = vpop.f32.mrb[128].mxu0  ;;  %5460 = vrot.lane.b32.xlu0 %v1904_v10, %s9430_s21  ;;  %8492 = vmatprep.mubr.f32.mxu1 %v7202_v26  ;;  %v9096_v34 = vpack.c.bf16 %v7519_v1, %v7518_v4  ;;  %v7245_v1 = vld [vmem:[%s9563_s15 + $0xfd8] sm:$0xff] }
 0x25c   : > { %v1919_v58 = vadd.f32 %v8319_v55, %v10600_v11  ;;  %v1913_v54 = vpop.f32.mrb[129].mxu0  ;;  %3160 = vmatmul.mubr.f32.gmra.mrb[234].mxu0 %v7233_v29  ;;  %9091 = vmatpush1.bf16.msra.mxu1 %v9090_v22  ;;  %v7240_v11 = vld [vmem:[%s9563_s15 + $0xfb0] sm:$0xff]  ;;  %v7522_v55 = vld [vmem:[%s9575_s16 + $0x680] sm:$0xff] }
 0x25d   : > { %v1914_v18 = vadd.f32 %v1913_v54, %v10591_v61  ;;  %3164 = vmatprep.mubr.f32.mxu0 %v7237_v48  ;;  %v10769_v27 = vpop.f32.mrb[144].mxu1  ;;  %9092 = vmatprep.subr.bf16.mxu1 %v12425_v25  ;;  %v7211_v61 = vld [vmem:[%s9563_s15 + $0xec8] sm:$0xff]  ;;  %v7220_v29 = vld [vmem:[%s9563_s15 + $0xf10] sm:$0xff]  ;;  %v7242_v48 = vld [vmem:[%s9563_s15 + $0xfc0] sm:$0xff] }
 0x25e   : > { %8493 = vmatmul.mubr.f32.gmra.mrb[250].mxu1 %v7205_v52  ;;  %5462 = vrot.lane.b32.xlu1 %v1909_v8, %s9430_s21  ;;  %v2254_v56 = vpop.f32.mrb[145].mxu1  ;;  %v7521_v8 = vld [vmem:[%s9575_s16 + $0x678] sm:$0xff]  ;;  %v7523_v52 = vld [vmem:[%s9575_s16 + $0x688] sm:$0xff] }
 0x25f   : > { %v8322_v39 = vpop.f32.mrb[130].mxu0  ;;  %5464 = vrot.lane.b32.xlu0 %v1914_v18, %s9430_s21  ;;  %8495 = vmatprep.mubr.f32.mxu1 %v7208_v16  ;;  %v9099_v5 = vpack.c.bf16 %v7521_v8, %v7520_v41  ;;  %v7226_v18 = vld [vmem:[%s9563_s15 + $0xf40] sm:$0xff]  ;;  %v7524_v56 = vld [vmem:[%s9575_s16 + $0x690] sm:$0xff] }
 0x260   : > { %v1929_v50 = vadd.f32 %v8322_v39, %v10620_v31  ;;  %v1923_v2 = vpop.f32.mrb[131].mxu0  ;;  %3165 = vmatmul.mubr.f32.gmra.mrb[236].mxu0 %v7236_v33  ;;  %9094 = vmatpush1.bf16.msra.mxu1 %v9093_v28  ;;  %v7243_v31 = vld [vmem:[%s9563_s15 + $0xfc8] sm:$0xff]  ;;  %v9102_v33 = vpack.c.bf16 %v7523_v52, %v7522_v55  ;;  %v7525_v39 = vld [vmem:[%s9575_s16 + $0x698] sm:$0xff]  ;;  %v7248_v41 = vld [vmem:[%s9563_s15 + $0xff0] sm:$0xff] }
 0x261   : > { %v1924_v6 = vadd.f32 %v1923_v2, %v10610_v14  ;;  %3169 = vmatprep.mubr.f32.mxu0 %v7240_v11  ;;  %v10782_v36 = vpop.f32.mrb[146].mxu1  ;;  %9095 = vmatprep.subr.bf16.mxu1 %v12425_v25  ;;  %v7217_v14 = vld [vmem:[%s9563_s15 + $0xef8] sm:$0xff]  ;;  %v7528_v52 = vld [vmem:[%s9575_s16 + $0x6b0] sm:$0xff] }
 0x262   : > { %8496 = vmatmul.mubr.f32.gmra.mrb[252].mxu1 %v7211_v61  ;;  %5466 = vrot.lane.b32.xlu1 %v1919_v58, %s9430_s21  ;;  %v2259_v13 = vpop.f32.mrb[147].mxu1 }
 0x263   : > { %v8325_v26 = vpop.f32.mrb[132].mxu0  ;;  %5468 = vrot.lane.b32.xlu0 %v1924_v6, %s9430_s21  ;;  %8498 = vmatprep.mubr.f32.mxu1 %v7214_v23  ;;  %v9105_v6 = vpack.c.bf16 %v7525_v39, %v7524_v56  ;;  %v7527_v13 = vld [vmem:[%s9575_s16 + $0x6a8] sm:$0xff]  ;;  %v7530_v56 = vld [vmem:[%s9575_s16 + $0x6c0] sm:$0xff] }
 0x264   : > { %v1939_v22 = vadd.f32 %v8325_v26, %v10640_v47  ;;  %v1933_v10 = vpop.f32.mrb[133].mxu0  ;;  %3170 = vmatmul.mubr.f32.gmra.mrb[238].mxu0 %v7239_v0  ;;  %9097 = vmatpush1.bf16.msra.mxu1 %v9096_v34  ;;  %v7246_v47 = vld [vmem:[%s9563_s15 + $0xfe0] sm:$0xff]  ;;  %v7232_v34 = vld [vmem:[%s9563_s15 + $0xf70] sm:$0xff]  ;;  %v7531_v39 = vld [vmem:[%s9575_s16 + $0x6c8] sm:$0xff] }
 0x265   : > { %v1934_v62 = vadd.f32 %v1933_v10, %v10630_v63  ;;  %3174 = vmatprep.mubr.f32.mxu0 %v7243_v31  ;;  %v10795_v42 = vpop.f32.mrb[148].mxu1  ;;  %9098 = vmatprep.subr.bf16.mxu1 %v12425_v25  ;;  %v7223_v63 = vld [vmem:[%s9563_s15 + $0xf28] sm:$0xff]  ;;  %v7526_v31 = vld [vmem:[%s9575_s16 + $0x6a0] sm:$0xff] }
 0x266   : > { %8499 = vmatmul.mubr.f32.gmra.mrb[254].mxu1 %v7217_v14  ;;  %5470 = vrot.lane.b32.xlu1 %v1929_v50, %s9430_s21  ;;  %v2264_v58 = vpop.f32.mrb[149].mxu1 }
 0x267   : > { %v8328_v54 = vpop.f32.mrb[134].mxu0  ;;  %5472 = vrot.lane.b32.xlu0 %v1934_v62, %s9430_s21  ;;  %8501 = vmatprep.mubr.f32.mxu1 %v7220_v29  ;;  %v7238_v29 = vld [vmem:[%s9563_s15 + $0xfa0] sm:$0xff] }
 0x268   : > { %v1949_v16 = vadd.f32 %v8328_v54, %v10662_v15  ;;  %v1943_v28 = vpop.f32.mrb[135].mxu0  ;;  %3175 = vmatmul.mubr.f32.gmra.mrb[240].mxu0 %v7242_v48  ;;  %9100 = vmatpush1.bf16.msra.mxu1 %v9099_v5  ;;  %v7249_v15 = vld [vmem:[%s9563_s15 + $0xff8] sm:$0xff]  ;;  %v9108_v5 = vpack.c.bf16 %v7527_v13, %v7526_v31  ;;  %v7251_v48 = vld [vmem:[%s9563_s15 + $0x1008] sm:$0xff] }
 0x269   : > { %v1944_v4 = vadd.f32 %v1943_v28, %v10652_v17  ;;  %3179 = vmatprep.mubr.f32.mxu0 %v7246_v47  ;;  %v10808_v11 = vpop.f32.mrb[150].mxu1  ;;  %9101 = vmatprep.subr.bf16.mxu1 %v12425_v25  ;;  %v7229_v17 = vld [vmem:[%s9563_s15 + $0xf58] sm:$0xff]  ;;  %v7244_v28 = vld [vmem:[%s9563_s15 + $0xfd0] sm:$0xff] }
 0x26a   : > { %8502 = vmatmul.mubr.f32.gmra.mrb[0].mxu1 %v7223_v63  ;;  %5474 = vrot.lane.b32.xlu1 %v1939_v22, %s9430_s21  ;;  %v2269_v61 = vpop.f32.mrb[151].mxu1  ;;  %v7529_v47 = vld [vmem:[%s9575_s16 + $0x6b8] sm:$0xff] }
 0x26b   : > { %v8331_v50 = vpop.f32.mrb[136].mxu0  ;;  %5476 = vrot.lane.b32.xlu0 %v1944_v4, %s9430_s21  ;;  %8504 = vmatprep.mubr.f32.mxu1 %v7226_v18  ;;  %v9111_v18 = vpack.c.bf16 %v7529_v47, %v7528_v52  ;;  %v7254_v4 = vld [vmem:[%s9563_s15 + $0x1020] sm:$0xff]  ;;  %v7533_v31 = vld [vmem:[%s9575_s16 + $0x6d8] sm:$0xff] }
 0x26c   : > { %v1959_v2 = vadd.f32 %v8331_v50, %v10683_v12  ;;  %v1953_v23 = vpop.f32.mrb[137].mxu0  ;;  %3180 = vmatmul.mubr.f32.gmra.mrb[242].mxu0 %v7245_v1  ;;  %9103 = vmatpush1.bf16.msra.mxu1 %v9102_v33  ;;  %v7252_v12 = vld [vmem:[%s9563_s15 + $0x1010] sm:$0xff] }
 0x26d   : > { %v1954_v0 = vadd.f32 %v1953_v23, %v10673_v57  ;;  %3184 = vmatprep.mubr.f32.mxu0 %v7249_v15  ;;  %v10821_v8 = vpop.f32.mrb[152].mxu1  ;;  %9104 = vmatprep.subr.bf16.mxu1 %v12425_v25  ;;  %v7235_v57 = vld [vmem:[%s9563_s15 + $0xf88] sm:$0xff]  ;;  %v9114_v23 = vpack.c.bf16 %v7531_v39, %v7530_v56  ;;  %v7730_v56 = vld [vmem:[%s9575_s16 + $0x880] sm:$0xff] }
 0x26e   : > { %8505 = vmatmul.mubr.f32.gmra.mrb[2].mxu1 %v7229_v17  ;;  %5478 = vrot.lane.b32.xlu1 %v1949_v16, %s9430_s21  ;;  %v2274_v26 = vpop.f32.mrb[153].mxu1  ;;  %v7731_v39 = vld [vmem:[%s9575_s16 + $0x888] sm:$0xff] }
 0x26f   : > { %v8334_v14 = vpop.f32.mrb[138].mxu0  ;;  %5480 = vrot.lane.b32.xlu0 %v1954_v0, %s9430_s21  ;;  %8507 = vmatprep.mubr.f32.mxu1 %v7232_v34 }
 0x270   : > { %v1969_v22 = vadd.f32 %v8334_v14, %v10705_v9  ;;  %v1963_v10 = vpop.f32.mrb[139].mxu0  ;;  %3185 = vmatmul.mubr.f32.gmra.mrb[244].mxu0 %v7248_v41  ;;  %9106 = vmatpush1.bf16.msra.mxu1 %v9105_v6  ;;  %v7255_v9 = vld [vmem:[%s9563_s15 + $0x1028] sm:$0xff]  ;;  %v7257_v6 = vld [vmem:[%s9563_s15 + $0x1038] sm:$0xff]  ;;  %v7532_v41 = vld [vmem:[%s9575_s16 + $0x6d0] sm:$0xff] }
 0x271   : > { %v1964_v62 = vadd.f32 %v1963_v10, %v10693_v37  ;;  %3189 = vmatprep.mubr.f32.mxu0 %v7252_v12  ;;  %v10834_v55 = vpop.f32.mrb[154].mxu1  ;;  %9107 = vmatprep.subr.bf16.mxu1 %v12425_v25  ;;  %v7241_v37 = vld [vmem:[%s9563_s15 + $0xfb8] sm:$0xff] }
 0x272   : > { %8508 = vmatmul.mubr.f32.gmra.mrb[4].mxu1 %v7235_v57  ;;  %5482 = vrot.lane.b32.xlu1 %v1959_v2, %s9430_s21  ;;  %v2279_v58 = vpop.f32.mrb[155].mxu1  ;;  %v7250_v2 = vld [vmem:[%s9563_s15 + $0x1000] sm:$0xff]  ;;  %v7256_v57 = vld [vmem:[%s9563_s15 + $0x1030] sm:$0xff] }
 0x273   : > { %v8337_v54 = vpop.f32.mrb[140].mxu0  ;;  %5484 = vrot.lane.b32.xlu0 %v1964_v62, %s9430_s21  ;;  %8510 = vmatprep.mubr.f32.mxu1 %v7238_v29  ;;  %v7260_v29 = vld [vmem:[%s9563_s15 + $0x1050] sm:$0xff]  ;;  %v7534_v62 = vld [vmem:[%s9575_s16 + $0x6e0] sm:$0xff] }
 0x274   : > { %v1979_v63 = vadd.f32 %v8337_v54, %v10730_v45  ;;  %v1973_v16 = vpop.f32.mrb[141].mxu0  ;;  %3190 = vmatmul.mubr.f32.gmra.mrb[246].mxu0 %v7251_v48  ;;  %9109 = vmatpush1.bf16.msra.mxu1 %v9108_v5  ;;  %v7258_v45 = vld [vmem:[%s9563_s15 + $0x1040] sm:$0xff]  ;;  %v7535_v48 = vld [vmem:[%s9575_s16 + $0x6e8] sm:$0xff] }
 0x275   : > { %v1974_v33 = vadd.f32 %v1973_v16, %v10717_v44  ;;  %3194 = vmatprep.mubr.f32.mxu0 %v7255_v9  ;;  %v10847_v1 = vpop.f32.mrb[156].mxu1  ;;  %9110 = vmatprep.subr.bf16.mxu1 %v12425_v25  ;;  %v7247_v44 = vld [vmem:[%s9563_s15 + $0xfe8] sm:$0xff]  ;;  %v7262_v54 = vld [vmem:[%s9563_s15 + $0x1060] sm:$0xff] }
 0x276   : > { %8511 = vmatmul.mubr.f32.gmra.mrb[6].mxu1 %v7241_v37  ;;  %5486 = vrot.lane.b32.xlu1 %v1969_v22, %s9430_s21  ;;  %v2284_v15 = vpop.f32.mrb[157].mxu1  ;;  %v9117_v22 = vpack.c.bf16 %v7533_v31, %v7532_v41  ;;  %v9120_v37 = vpack.c.bf16 %v7535_v48, %v7534_v62  ;;  %v7263_v16 = vld [vmem:[%s9563_s15 + $0x1068] sm:$0xff] }
 0x277   : > { %v8340_v61 = vpop.f32.mrb[142].mxu0  ;;  %5488 = vrot.lane.b32.xlu0 %v1974_v33, %s9430_s21  ;;  %8513 = vmatprep.mubr.f32.mxu1 %v7244_v28  ;;  %v7267_v33 = vld [vmem:[%s9563_s15 + $0x1088] sm:$0xff]  ;;  %v7265_v15 = vld [vmem:[%s9563_s15 + $0x1078] sm:$0xff] }
 0x278   : > { %v1989_v50 = vadd.f32 %v8340_v61, %v10756_v30  ;;  %v1983_v17 = vpop.f32.mrb[143].mxu0  ;;  %3195 = vmatmul.mubr.f32.gmra.mrb[248].mxu0 %v7254_v4  ;;  %9112 = vmatpush1.bf16.msra.mxu1 %v9111_v18  ;;  %v7261_v30 = vld [vmem:[%s9563_s15 + $0x1058] sm:$0xff]  ;;  %v7536_v18 = vld [vmem:[%s9575_s16 + $0x6f0] sm:$0xff]  ;;  %v7271_v31 = vld [vmem:[%s9563_s15 + $0x10a8] sm:$0xff] }
 0x279   : > { %v1984_v34 = vadd.f32 %v1983_v17, %v10743_v7  ;;  %3199 = vmatprep.mubr.f32.mxu0 %v7258_v45  ;;  %v10860_v0 = vpop.f32.mrb[158].mxu1  ;;  %9113 = vmatprep.subr.bf16.mxu1 %v12425_v25  ;;  %v7253_v7 = vld [vmem:[%s9563_s15 + $0x1018] sm:$0xff] }
 0x27a   : > { %8514 = vmatmul.mubr.f32.gmra.mrb[8].mxu1 %v7247_v44  ;;  %5490 = vrot.lane.b32.xlu1 %v1979_v63, %s9430_s21  ;;  %v2289_v13 = vpop.f32.mrb[159].mxu1  ;;  %v7268_v44 = vld [vmem:[%s9563_s15 + $0x1090] sm:$0xff] }
 0x27b   : > { %v8375_v12 = vpop.f32.mrb[144].mxu0  ;;  %5492 = vrot.lane.b32.xlu0 %v1984_v34, %s9430_s21  ;;  %8516 = vmatprep.mubr.f32.mxu1 %v7250_v2  ;;  %v7266_v2 = vld [vmem:[%s9563_s15 + $0x1080] sm:$0xff]  ;;  %v10909_v34 = vpack.c.bf16 %v7731_v39, %v7730_v56  ;;  %v7275_v56 = vld [vmem:[%s9563_s15 + $0x10c8] sm:$0xff] }
 0x27c   : > { %v10870_v26 = vadd.f32 %v8375_v12, %v10782_v36  ;;  %v2557_v14 = vpop.f32.mrb[145].mxu0  ;;  %3200 = vmatmul.mubr.f32.gmra.mrb[250].mxu0 %v7257_v6  ;;  %9115 = vmatpush1.bf16.msra.mxu1 %v9114_v23  ;;  %v7264_v36 = vld [vmem:[%s9563_s15 + $0x1070] sm:$0xff]  ;;  %v7274_v13 = vld [vmem:[%s9563_s15 + $0x10c0] sm:$0xff] }
 0x27d   : > { %v10874_v10 = vadd.f32 %v2557_v14, %v10769_v27  ;;  %3204 = vmatprep.mubr.f32.mxu0 %v7261_v30  ;;  %v10877_v5 = vpop.f32.mrb[160].mxu1  ;;  %9116 = vmatprep.subr.bf16.mxu1 %v12425_v25  ;;  %v7259_v27 = vld [vmem:[%s9563_s15 + $0x1048] sm:$0xff] }
 0x27e   : > { %8517 = vmatmul.mubr.f32.gmra.mrb[10].mxu1 %v7253_v7  ;;  %5494 = vrot.lane.b32.xlu1 %v1989_v50, %s9430_s21  ;;  %v2294_v52 = vpop.f32.mrb[161].mxu1  ;;  %v7269_v7 = vld [vmem:[%s9563_s15 + $0x1098] sm:$0xff] }
 0x27f   : > { %v8378_v47 = vpop.f32.mrb[146].mxu0  ;;  %8519 = vmatprep.mubr.f32.mxu1 %v7256_v57  ;;  %v7273_v57 = vld [vmem:[%s9563_s15 + $0x10b8] sm:$0xff]  ;;  %v7272_v52 = vld [vmem:[%s9563_s15 + $0x10b0] sm:$0xff] }
 0x280   : > { %v10886_v9 = vadd.f32 %v8378_v47, %v10808_v11  ;;  %v2567_v58 = vpop.f32.mrb[147].mxu0  ;;  %3205 = vmatmul.mubr.f32.gmra.mrb[252].mxu0 %v7260_v29  ;;  %9118 = vmatpush1.bf16.msra.mxu1 %v9117_v22  ;;  %v7537_v11 = vld [vmem:[%s9575_s16 + $0x6f8] sm:$0xff] }
 0x281   : > { %v10890_v63 = vadd.f32 %v2567_v58, %v10795_v42  ;;  %3209 = vmatprep.mubr.f32.mxu0 %v7264_v36  ;;  %v2297_v28 = vpop.f32.mrb[162].mxu1  ;;  %9119 = vmatprep.subr.bf16.mxu1 %v12425_v25  ;;  %v9123_v50 = vpack.c.bf16 %v7537_v11, %v7536_v18  ;;  %v7277_v29 = vld [vmem:[%s9563_s15 + $0x10d8] sm:$0xff]  ;;  %v7276_v58 = vld [vmem:[%s9563_s15 + $0x10d0] sm:$0xff] }
 0x282   : > { %8520 = vmatmul.mubr.f32.gmra.mrb[12].mxu1 %v7259_v27  ;;  %v2299_v4 = vpop.f32.mrb[163].mxu1 }
 0x283   : > { %v8381_v45 = vpop.f32.mrb[148].mxu0  ;;  %8522 = vmatprep.mubr.f32.mxu1 %v7262_v54 }
 0x284   : > { %v10901_v42 = vadd.f32 %v8381_v45, %v10834_v55  ;;  %v2577_v61 = vpop.f32.mrb[149].mxu0  ;;  %3210 = vmatmul.mubr.f32.gmra.mrb[254].mxu0 %v7263_v16  ;;  %9121 = vmatpush1.bf16.msra.mxu1 %v9120_v37  ;;  %v7270_v55 = vld [vmem:[%s9563_s15 + $0x10a0] sm:$0xff]  ;;  %v7283_v37 = vld [vmem:[%s9563_s15 + $0x1108] sm:$0xff] }
 0x285   : > { %v10905_v17 = vadd.f32 %v2577_v61, %v10821_v8  ;;  %3214 = vmatprep.mubr.f32.mxu0 %v7267_v33  ;;  %v2302_v23 = vpop.f32.mrb[164].mxu1  ;;  %9122 = vmatprep.subr.bf16.mxu1 %v12425_v25  ;;  %v7279_v45 = vld [vmem:[%s9563_s15 + $0x10e8] sm:$0xff]  ;;  %v7289_v61 = vld [vmem:[%s9563_s15 + $0x1138] sm:$0xff] }
 0x286   : > { %8523 = vmatmul.mubr.f32.gmra.mrb[14].mxu1 %v7265_v15  ;;  %v2304_v6 = vpop.f32.mrb[165].mxu1 }
 0x287   : > { %v8384_v41 = vpop.f32.mrb[150].mxu0  ;;  %8525 = vmatprep.mubr.f32.mxu1 %v7268_v44 }
 0x288   : > { %v10914_v30 = vadd.f32 %v8384_v41, %v10860_v0  ;;  %v2587_v8 = vpop.f32.mrb[151].mxu0  ;;  %3215 = vmatmul.mubr.f32.gmra.mrb[0].mxu0 %v7266_v2  ;;  %9124 = vmatpush1.bf16.msra.mxu1 %v9123_v50  ;;  %v7292_v2 = vld [vmem:[%s9563_s15 + $0x1150] sm:$0xff] }
 0x289   : > { %v10918_v12 = vadd.f32 %v2587_v8, %v10847_v1  ;;  %3219 = vmatprep.mubr.f32.mxu0 %v7270_v55  ;;  %v2307_v14 = vpop.f32.mrb[166].mxu1  ;;  %9206 = vmatprep.subr.bf16.mxu1 %v10909_v34  ;;  %v7280_v1 = vld [vmem:[%s9563_s15 + $0x10f0] sm:$0xff] }
 0x28a   : > { %8526 = vmatmul.mubr.f32.gmra.mrb[16].mxu1 %v7271_v31  ;;  %v2309_v22 = vpop.f32.mrb[167].mxu1  ;;  %v7278_v31 = vld [vmem:[%s9563_s15 + $0x10e0] sm:$0xff] }
 0x28b   : > { %v8387_v0 = vpop.f32.mrb[152].mxu0  ;;  %8528 = vmatprep.mubr.f32.mxu1 %v7274_v13 }
 0x28c   : > { %v10925_v62 = vadd.f32 %v8387_v0, %v2297_v28  ;;  %v2597_v48 = vpop.f32.mrb[153].mxu0  ;;  %3220 = vmatmul.mubr.f32.gmra.mrb[2].mxu0 %v7269_v7  ;;  %v7282_v7 = vld [vmem:[%s9563_s15 + $0x1100] sm:$0xff] }
 0x28d   : > { %v10929_v36 = vadd.f32 %v2597_v48, %v10877_v5  ;;  %3224 = vmatprep.mubr.f32.mxu0 %v7273_v57  ;;  %v2312_v47 = vpop.f32.mrb[168].mxu1  ;;  %v7286_v5 = vld [vmem:[%s9563_s15 + $0x1120] sm:$0xff] }
 0x28e   : > { %8529 = vmatmul.mubr.f32.gmra.mrb[18].mxu1 %v7277_v29  ;;  %v2314_v27 = vpop.f32.mrb[169].mxu1  ;;  %v7298_v0 = vld [vmem:[%s9563_s15 + $0x1180] sm:$0xff] }
 0x28f   : > { %v8390_v54 = vpop.f32.mrb[154].mxu0  ;;  %8531 = vmatprep.mubr.f32.mxu1 %v7280_v1 }
 0x290   : > { %v10934_v16 = vadd.f32 %v8390_v54, %v2307_v14  ;;  %3225 = vmatmul.mubr.f32.gmra.mrb[4].mxu0 %v7272_v52  ;;  %v5403_v28 = vpop.permute.xlu0 %5402  ;;  %v2607_v18 = vpop.f32.mrb[155].mxu0  ;;  %v7281_v52 = vld [vmem:[%s9563_s15 + $0x10f8] sm:$0xff] }
 0x291   : > { %v5930_v11 = vsel %vm5928_vm0, %v10053_v46, %v5403_v28  ;;  %v10939_v33 = vadd.f32 %v2607_v18, %v2302_v23  ;;  %3229 = vmatprep.mubr.f32.mxu0 %v7276_v58  ;;  %v2317_v4 = vpop.f32.mrb[170].mxu1  ;;  %v7285_v54 = vld [vmem:[%s9563_s15 + $0x1118] sm:$0xff] }
 0x292   : > { %6511 = vst [vmem:[%s10942_s19 + $0x18] sm:$0xff] %v5930_v11  ;;  %8532 = vmatmul.mubr.f32.gmra.mrb[20].mxu1 %v7283_v37  ;;  %v2319_v39 = vpop.f32.mrb[171].mxu1 }
 0x293   : > { %v8393_v15 = vpop.f32.mrb[156].mxu0  ;;  %8534 = vmatprep.mubr.f32.mxu1 %v7286_v5  ;;  %v7304_v5 = vld [vmem:[%s9563_s15 + $0x11b0] sm:$0xff] }
 0x294   : > { %v10947_v46 = vadd.f32 %v8393_v15, %v2317_v4  ;;  %3230 = vmatmul.mubr.f32.gmra.mrb[6].mxu0 %v7275_v56  ;;  %v5407_v44 = vpop.permute.xlu1 %5406  ;;  %v2617_v50 = vpop.f32.mrb[157].mxu0 }
 0x295   : > { %v5932_v23 = vsel %vm5928_vm0, %v10076_v3, %v5407_v44  ;;  %v10952_v55 = vadd.f32 %v2617_v50, %v2312_v47  ;;  %v5401_v6 = vpop.permute.xlu0 %5400  ;;  %v2322_v41 = vpop.f32.mrb[172].mxu1  ;;  %3234 = vmatprep.mubr.f32.mxu0 %v7279_v45  ;;  %v7295_v3 = vld [vmem:[%s9563_s15 + $0x1168] sm:$0xff] }
 0x296   : > { %6517 = vst [vmem:[%s10942_s19 + $0x48] sm:$0xff] %v5932_v23  ;;  %v5929_v8 = vsel %vm5928_vm0, %v10042_v35, %v5401_v6  ;;  %8535 = vmatmul.mubr.f32.gmra.mrb[22].mxu1 %v7289_v61  ;;  %v2324_v13 = vpop.f32.mrb[173].mxu1  ;;  %v7288_v61 = vld [vmem:[%s9563_s15 + $0x1130] sm:$0xff]  ;;  %v7310_v23 = vld [vmem:[%s9563_s15 + $0x11e0] sm:$0xff] }
 0x297   : > { %6508 = vst [vmem:[%s10942_s19] sm:$0xff] %v5929_v8  ;;  %v8396_v14 = vpop.f32.mrb[158].mxu0  ;;  %8537 = vmatprep.mubr.f32.mxu1 %v7292_v2 }
 0x298   : > { %v2627_v57 = vpop.f32.mrb[159].mxu0  ;;  %3235 = vmatmul.mubr.f32.gmra.mrb[8].mxu0 %v7278_v31  ;;  %v5405_v22 = vpop.permute.xlu1 %5404 }
 0x299   : > { %v2327_v29 = vpop.f32.mrb[174].mxu1  ;;  %v10962_v48 = vadd.f32 %v2627_v57, %v2322_v41  ;;  %v5931_v35 = vsel %vm5928_vm0, %v10064_v51, %v5405_v22  ;;  %v5409_v1 = vpop.permute.xlu0 %5408  ;;  %3239 = vmatprep.mubr.f32.mxu0 %v7282_v7  ;;  %v7301_v51 = vld [vmem:[%s9563_s15 + $0x1198] sm:$0xff] }
 0x29a   : > { %v10967_v47 = vadd.f32 %v8396_v14, %v2327_v29  ;;  %6514 = vst [vmem:[%s10942_s19 + $0x30] sm:$0xff] %v5931_v35  ;;  %8538 = vmatmul.mubr.f32.gmra.mrb[24].mxu1 %v7295_v3  ;;  %v5933_v27 = vsel %vm5928_vm0, %v10087_v32, %v5409_v1  ;;  %v2329_v58 = vpop.f32.mrb[175].mxu1  ;;  %v7284_v32 = vld [vmem:[%s9563_s15 + $0x1110] sm:$0xff]  ;;  %v7291_v14 = vld [vmem:[%s9563_s15 + $0x1148] sm:$0xff]  ;;  %v7290_v1 = vld [vmem:[%s9563_s15 + $0x1140] sm:$0xff] }
 0x29b   : > { %6520 = vst [vmem:[%s10942_s19 + $0x60] sm:$0xff] %v5933_v27  ;;  %v8399_v37 = vpop.f32.mrb[160].mxu0  ;;  %8540 = vmatprep.mubr.f32.mxu1 %v7298_v0  ;;  %v7363_v0 = vld [vmem:[%s9563_s15 + $0x1208] sm:$0xff]  ;;  %v7733_v27 = vld [vmem:[%s9575_s16 + $0x898] sm:$0xff] }
 0x29c   : > { %v2637_v28 = vpop.f32.mrb[161].mxu0  ;;  %3240 = vmatmul.mubr.f32.gmra.mrb[10].mxu0 %v7281_v52  ;;  %v5411_v18 = vpop.permute.xlu1 %5410  ;;  %v7732_v52 = vld [vmem:[%s9575_s16 + $0x890] sm:$0xff] }
 0x29d   : > { %v2332_v11 = vpop.f32.mrb[176].mxu1  ;;  %v5934_v4 = vsel %vm5928_vm0, %v10098_v43, %v5411_v18  ;;  %v5413_v56 = vpop.permute.xlu0 %5412  ;;  %3244 = vmatprep.mubr.f32.mxu0 %v7285_v54  ;;  %v7307_v43 = vld [vmem:[%s9563_s15 + $0x11c8] sm:$0xff] }
 0x29e   : > { %v10979_v39 = vadd.f32 %v2637_v28, %v2332_v11  ;;  %6523 = vst [vmem:[%s10942_s19 + $0x78] sm:$0xff] %v5934_v4  ;;  %8541 = vmatmul.mubr.f32.gmra.mrb[26].mxu1 %v7301_v51  ;;  %v5935_v45 = vsel %vm5928_vm0, %v10109_v40, %v5413_v56  ;;  %v2334_v15 = vpop.f32.mrb[177].mxu1  ;;  %v7287_v40 = vld [vmem:[%s9563_s15 + $0x1128] sm:$0xff]  ;;  %v7294_v51 = vld [vmem:[%s9563_s15 + $0x1160] sm:$0xff]  ;;  %v9209_v4 = vpack.c.bf16 %v7733_v27, %v7732_v52  ;;  %v7368_v27 = vld [vmem:[%s9563_s15 + $0x1230] sm:$0xff] }
 0x29f   : > { %6526 = vst [vmem:[%s10942_s19 + $0x90] sm:$0xff] %v5935_v45  ;;  %v8402_v44 = vpop.f32.mrb[162].mxu0  ;;  %8543 = vmatprep.mubr.f32.mxu1 %v7304_v5  ;;  %v7362_v28 = vld [vmem:[%s9563_s15 + $0x1200] sm:$0xff]  ;;  %v7293_v45 = vld [vmem:[%s9563_s15 + $0x1158] sm:$0xff] }
 0x2a0   : > { %v2647_v50 = vpop.f32.mrb[163].mxu0  ;;  %3245 = vmatmul.mubr.f32.gmra.mrb[12].mxu0 %v7284_v32  ;;  %v5415_v2 = vpop.permute.xlu1 %5414  ;;  %v7366_v11 = vld [vmem:[%s9563_s15 + $0x1220] sm:$0xff] }
 0x2a1   : > { %v2337_v6 = vpop.f32.mrb[178].mxu1  ;;  %v5936_v41 = vsel %vm5928_vm0, %v10120_v53, %v5415_v2  ;;  %v5417_v31 = vpop.permute.xlu0 %5416  ;;  %3249 = vmatprep.mubr.f32.mxu0 %v7288_v61  ;;  %v7313_v53 = vld [vmem:[%s9563_s15 + $0x11f8] sm:$0xff]  ;;  %v7734_v15 = vld [vmem:[%s9575_s16 + $0x8a0] sm:$0xff]  ;;  %v7735_v61 = vld [vmem:[%s9575_s16 + $0x8a8] sm:$0xff] }
 0x2a2   : > { %v10991_v8 = vadd.f32 %v8399_v37, %v2337_v6  ;;  %6529 = vst [vmem:[%s10942_s19 + $0xa8] sm:$0xff] %v5936_v41  ;;  %8544 = vmatmul.mubr.f32.gmra.mrb[28].mxu1 %v7307_v43  ;;  %v5937_v13 = vsel %vm5928_vm0, %v10131_v49, %v5417_v31  ;;  %v2339_v7 = vpop.f32.mrb[179].mxu1  ;;  %v7369_v31 = vld [vmem:[%s9563_s15 + $0x1238] sm:$0xff] }
 0x2a3   : > { %6532 = vst [vmem:[%s10942_s19 + $0xc0] sm:$0xff] %v5937_v13  ;;  %v10998_v3 = vpop.f32.mrb[164].mxu0  ;;  %8546 = vmatprep.mubr.f32.mxu1 %v7310_v23  ;;  %v7297_v23 = vld [vmem:[%s9563_s15 + $0x1178] sm:$0xff]  ;;  %v12451_v13 = vld [vmem:[#allocation9_spill] sm:$0xff] }
 0x2a4   : > { %v2657_v57 = vpop.f32.mrb[165].mxu0  ;;  %3250 = vmatmul.mubr.f32.gmra.mrb[14].mxu0 %v7287_v40  ;;  %v5419_v22 = vpop.permute.xlu1 %5418 }
 0x2a5   : > { %v2342_v29 = vpop.f32.mrb[180].mxu1  ;;  %v5938_v49 = vsel %vm5928_vm0, %v10142_v60, %v5419_v22  ;;  %v5421_v35 = vpop.permute.xlu0 %5420  ;;  %3254 = vmatprep.mubr.f32.mxu0 %v7291_v14  ;;  %v7736_v22 = vld [vmem:[%s9575_s16 + $0x8b0] sm:$0xff] }
 0x2a6   : > { %v11007_v58 = vadd.f32 %v2647_v50, %v2342_v29  ;;  %6535 = vst [vmem:[%s10942_s19 + $0xd8] sm:$0xff] %v5938_v49  ;;  %8547 = vmatmul.mubr.f32.gmra.mrb[30].mxu1 %v7313_v53  ;;  %v5939_v54 = vsel %vm5928_vm0, %v10153_v38, %v5421_v35  ;;  %v2344_v37 = vpop.f32.mrb[181].mxu1  ;;  %v7296_v53 = vld [vmem:[%s9563_s15 + $0x1170] sm:$0xff]  ;;  %v12452_v29 = vld [vmem:[#allocation10_spill] sm:$0xff] }
 0x2a7   : > { %6538 = vst [vmem:[%s10942_s19 + $0xf0] sm:$0xff] %v5939_v54  ;;  %v11014_v60 = vpop.f32.mrb[166].mxu0  ;;  %3858 = vmatprep.mubr.f32.mxu1 %v7363_v0  ;;  %v7372_v37 = vld [vmem:[%s9563_s15 + $0x1250] sm:$0xff] }
 0x2a8   : > { %v11017_v18 = vpop.f32.mrb[167].mxu0  ;;  %3255 = vmatmul.mubr.f32.gmra.mrb[16].mxu0 %v7290_v1  ;;  %v5423_v5 = vpop.permute.xlu1 %5422  ;;  %v7300_v1 = vld [vmem:[%s9563_s15 + $0x1190] sm:$0xff] }
 0x2a9   : > { %v2347_v38 = vpop.f32.mrb[182].mxu1  ;;  %v5940_v56 = vsel %vm5928_vm0, %v10166_v59, %v5423_v5  ;;  %v5425_v32 = vpop.permute.xlu0 %5424  ;;  %3259 = vmatprep.mubr.f32.mxu0 %v7294_v51  ;;  %v7365_v59 = vld [vmem:[%s9563_s15 + $0x1218] sm:$0xff]  ;;  %v12453_v5 = vld [vmem:[#allocation11_spill] sm:$0xff] }
 0x2aa   : > { %v11025_v43 = vadd.f32 %v8402_v44, %v2347_v38  ;;  %6541 = vst [vmem:[%s10942_s19 + $0x108] sm:$0xff] %v5940_v56  ;;  %3859 = vmatmul.mubr.f32.vlgmr.msra.gmra.mrb[32].mxu1 %v7362_v28  ;;  %v5941_v50 = vsel %vm5928_vm0, %v10180_v24, %v5425_v32  ;;  %v2349_v2 = vpop.f32.mrb[183].mxu1  ;;  %v9213_v24 = vpack.c.bf16 %v7735_v61, %v7734_v15  ;;  %v7299_v56 = vld [vmem:[%s9563_s15 + $0x1188] sm:$0xff]  ;;  %v7738_v32 = vld [vmem:[%s9575_s16 + $0x8c0] sm:$0xff]  ;;  %v12454_v15 = vld [vmem:[#allocation12_spill] sm:$0xff] }
 0x2ab   : > { %6544 = vst [vmem:[%s10942_s19 + $0x120] sm:$0xff] %v5941_v50  ;;  %v11032_v6 = vpop.f32.mrb[168].mxu0  ;;  %3863 = vmatprep.mubr.f32.mxu1 %v7366_v11  ;;  %9208 = vmatpush3.bf16.msra.mxu1 %v10909_v34  ;;  %v7737_v34 = vld [vmem:[%s9575_s16 + $0x8b8] sm:$0xff]  ;;  %v7303_v2 = vld [vmem:[%s9563_s15 + $0x11a8] sm:$0xff] }
 0x2ac   : > { %v11036_v44 = vpop.f32.mrb[169].mxu0  ;;  %3260 = vmatmul.mubr.f32.gmra.mrb[18].mxu0 %v7293_v45  ;;  %v5427_v41 = vpop.permute.xlu1 %5426  ;;  %9210 = vmatprep.subr.bf16.mxu1 %v9209_v4  ;;  %v9217_v51 = vpack.c.bf16 %v7737_v34, %v7736_v22  ;;  %v7302_v22 = vld [vmem:[%s9563_s15 + $0x11a0] sm:$0xff]  ;;  %v12456_v34 = vld [vmem:[#allocation14_spill] sm:$0xff] }
 0x2ad   : > { %v2352_v40 = vpop.f32.mrb[184].mxu1  ;;  %v5942_v7 = vsel %vm5928_vm0, %v12451_v13, %v5427_v41  ;;  %v5429_v14 = vpop.permute.xlu0 %5428  ;;  %3264 = vmatprep.mubr.f32.mxu0 %v7297_v23 }
 0x2ae   : > { %v11044_v0 = vadd.f32 %v2657_v57, %v2352_v40  ;;  %6547 = vst [vmem:[%s10942_s19 + $0x138] sm:$0xff] %v5942_v7  ;;  %3864 = vmatmul.mubr.f32.gmra.mrb[34].mxu1 %v7365_v59  ;;  %v5943_v49 = vsel %vm5928_vm0, %v12452_v29, %v5429_v14  ;;  %v2354_v35 = vpop.f32.mrb[185].mxu1  ;;  %v7371_v59 = vld [vmem:[%s9563_s15 + $0x1248] sm:$0xff]  ;;  %v12455_v7 = vld [vmem:[#allocation13_spill] sm:$0xff] }
 0x2af   : > { %6550 = vst [vmem:[%s10942_s19 + $0x150] sm:$0xff] %v5943_v49  ;;  %v11051_v52 = vpop.f32.mrb[170].mxu0  ;;  %3868 = vmatprep.mubr.f32.mxu1 %v7369_v31  ;;  %9212 = vmatpush3.bf16.msra.mxu1 %v9209_v4  ;;  %v7739_v4 = vld [vmem:[%s9575_s16 + $0x8c8] sm:$0xff]  ;;  %v7306_v35 = vld [vmem:[%s9563_s15 + $0x11c0] sm:$0xff] }
 0x2b0   : > { %v11054_v54 = vpop.f32.mrb[171].mxu0  ;;  %3265 = vmatmul.mubr.f32.gmra.mrb[20].mxu0 %v7296_v53  ;;  %v5431_v57 = vpop.permute.xlu1 %5430  ;;  %9214 = vmatprep.subr.bf16.mxu1 %v9213_v24  ;;  %v7375_v31 = vld [vmem:[%s9563_s15 + $0x1268] sm:$0xff]  ;;  %v9221_v40 = vpack.c.bf16 %v7739_v4, %v7738_v32 }
 0x2b1   : > { %v2357_v28 = vpop.f32.mrb[186].mxu1  ;;  %v5944_v11 = vsel %vm5928_vm0, %v12453_v5, %v5431_v57  ;;  %v5433_v38 = vpop.permute.xlu0 %5432  ;;  %3269 = vmatprep.mubr.f32.mxu0 %v7300_v1  ;;  %v12457_v5 = vld [vmem:[#allocation15_spill] sm:$0xff] }
 0x2b2   : > { %v11063_v45 = vadd.f32 %v10998_v3, %v2357_v28  ;;  %6553 = vst [vmem:[%s10942_s19 + $0x168] sm:$0xff] %v5944_v11  ;;  %3869 = vmatmul.mubr.f32.gmra.mrb[36].mxu1 %v7368_v27  ;;  %v5945_v61 = vsel %vm5928_vm0, %v12454_v15, %v5433_v38  ;;  %v2359_v50 = vpop.f32.mrb[187].mxu1  ;;  %v7374_v27 = vld [vmem:[%s9563_s15 + $0x1260] sm:$0xff] }
 0x2b3   : > { %6556 = vst [vmem:[%s10942_s19 + $0x180] sm:$0xff] %v5945_v61  ;;  %v11070_v23 = vpop.f32.mrb[172].mxu0  ;;  %3873 = vmatprep.mubr.f32.mxu1 %v7372_v37  ;;  %9216 = vmatpush3.bf16.msra.mxu1 %v9213_v24  ;;  %v7378_v37 = vld [vmem:[%s9563_s15 + $0x1280] sm:$0xff]  ;;  %v7309_v61 = vld [vmem:[%s9563_s15 + $0x11d8] sm:$0xff] }
 0x2b4   : > { %v11073_v41 = vpop.f32.mrb[173].mxu0  ;;  %3270 = vmatmul.mubr.f32.gmra.mrb[22].mxu0 %v7299_v56  ;;  %v5435_v3 = vpop.permute.xlu1 %5434  ;;  %9218 = vmatprep.subr.bf16.mxu1 %v9217_v51  ;;  %v7305_v56 = vld [vmem:[%s9563_s15 + $0x11b8] sm:$0xff] }
 0x2b5   : > { %v2362_v13 = vpop.f32.mrb[188].mxu1  ;;  %v5946_v14 = vsel %vm5928_vm0, %v12455_v7, %v5435_v3  ;;  %v5437_v53 = vpop.permute.xlu0 %5436  ;;  %3274 = vmatprep.mubr.f32.mxu0 %v7303_v2  ;;  %v7377_v2 = vld [vmem:[%s9563_s15 + $0x1278] sm:$0xff] }
 0x2b6   : > { %v11080_v24 = vadd.f32 %v11017_v18, %v2362_v13  ;;  %6559 = vst [vmem:[%s10942_s19 + $0x198] sm:$0xff] %v5946_v14  ;;  %3874 = vmatmul.mubr.f32.gmra.mrb[38].mxu1 %v7371_v59  ;;  %v5947_v29 = vsel %vm5928_vm0, %v12456_v34, %v5437_v53  ;;  %v2364_v49 = vpop.f32.mrb[189].mxu1  ;;  %v7381_v3 = vld [vmem:[%s9563_s15 + $0x1298] sm:$0xff]  ;;  %v12459_v13 = vld [vmem:[#allocation17_spill] sm:$0xff]  ;;  %v7308_v53 = vld [vmem:[%s9563_s15 + $0x11d0] sm:$0xff] }
 0x2b7   : > { %6562 = vst [vmem:[%s10942_s19 + $0x1b0] sm:$0xff] %v5947_v29  ;;  %v11087_v1 = vpop.f32.mrb[174].mxu0  ;;  %3878 = vmatprep.mubr.f32.mxu1 %v7375_v31  ;;  %9220 = vmatpush3.bf16.msra.mxu1 %v9217_v51  ;;  %v12458_v51 = vld [vmem:[#allocation16_spill] sm:$0xff]  ;;  %v7312_v49 = vld [vmem:[%s9563_s15 + $0x11f0] sm:$0xff] }
 0x2b8   : > { %v11090_v57 = vpop.f32.mrb[175].mxu0  ;;  %3275 = vmatmul.mubr.f32.gmra.mrb[24].mxu0 %v7302_v22  ;;  %v5439_v18 = vpop.permute.xlu1 %5438  ;;  %9222 = vmatprep.subr.bf16.mxu1 %v9221_v40 }
 0x2b9   : > { %v2367_v28 = vpop.f32.mrb[190].mxu1  ;;  %v5948_v11 = vsel %vm5928_vm0, %v12457_v5, %v5439_v18  ;;  %v5441_v38 = vpop.permute.xlu0 %5440  ;;  %3279 = vmatprep.mubr.f32.mxu0 %v7306_v35  ;;  %v7740_v18 = vld [vmem:[%s9575_s16 + $0x8d0] sm:$0xff] }
 0x2ba   : > { %v11097_v32 = vadd.f32 %v11014_v60, %v2367_v28  ;;  %6565 = vst [vmem:[%s10942_s19 + $0x1c8] sm:$0xff] %v5948_v11  ;;  %3879 = vmatmul.mubr.f32.gmra.mrb[40].mxu1 %v7374_v27  ;;  %v5949_v4 = vsel %vm5928_vm0, %v12458_v51, %v5441_v38  ;;  %v2369_v15 = vpop.f32.mrb[191].mxu1  ;;  %v7380_v27 = vld [vmem:[%s9563_s15 + $0x1290] sm:$0xff] }
 0x2bb   : > { %6568 = vst [vmem:[%s10942_s19 + $0x1e0] sm:$0xff] %v5949_v4  ;;  %v11104_v50 = vpop.f32.mrb[176].mxu0  ;;  %3883 = vmatprep.mubr.f32.mxu1 %v7378_v37  ;;  %9224 = vmatpush3.bf16.msra.mxu1 %v9221_v40  ;;  %v12461_v40 = vld [vmem:[#allocation18_spill] sm:$0xff]  ;;  %v7741_v37 = vld [vmem:[%s9575_s16 + $0x8d8] sm:$0xff]  ;;  %v7384_v5 = vld [vmem:[%s9563_s15 + $0x12b0] sm:$0xff] }
 0x2bc   : > { %v11107_v59 = vpop.f32.mrb[177].mxu0  ;;  %3280 = vmatmul.mubr.f32.gmra.mrb[26].mxu0 %v7305_v56  ;;  %v5443_v60 = vpop.permute.xlu1 %5442  ;;  %v9225_v11 = vpack.c.bf16 %v7741_v37, %v7740_v18  ;;  %v12462_v56 = vld [vmem:[#allocation19_spill] sm:$0xff]  ;;  %v7311_v15 = vld [vmem:[%s9563_s15 + $0x11e8] sm:$0xff] }
 0x2bd   : > { %v2372_v31 = vpop.f32.mrb[192].mxu1  ;;  %v5950_v7 = vsel %vm5928_vm0, %v12459_v13, %v5443_v60  ;;  %v5445_v14 = vpop.permute.xlu0 %5444  ;;  %3284 = vmatprep.mubr.f32.mxu0 %v7309_v61  ;;  %v7698_v13 = vld [vmem:[%s9575_s16 + $0x780] sm:$0xff]  ;;  %v7367_v37 = vld [vmem:[%s9563_s15 + $0x1228] sm:$0xff] }
 0x2be   : > { %v11114_v22 = vadd.f32 %v11036_v44, %v2372_v31  ;;  %6571 = vst [vmem:[%s10942_s19 + $0x1f8] sm:$0xff] %v5950_v7  ;;  %3884 = vmatmul.mubr.f32.gmra.mrb[42].mxu1 %v7377_v2  ;;  %v5951_v34 = vsel %vm5928_vm0, %v12461_v40, %v5445_v14  ;;  %v2374_v29 = vpop.f32.mrb[193].mxu1  ;;  %v12464_v2 = vld [vmem:[#allocation20_spill] sm:$0xff]  ;;  %v7364_v31 = vld [vmem:[%s9563_s15 + $0x1210] sm:$0xff]  ;;  %v7699_v7 = vld [vmem:[%s9575_s16 + $0x788] sm:$0xff]  ;;  %9226 = vmatprep.subr.bf16.mxu1 %v9225_v11 }
 0x2bf   : > { %6574 = vst [vmem:[%s10942_s19 + $0x210] sm:$0xff] %v5951_v34  ;;  %v11121_v35 = vpop.f32.mrb[178].mxu0  ;;  %3888 = vmatprep.mubr.f32.mxu1 %v7381_v3  ;;  %9228 = vmatpush3.bf16.msra.mxu1 %v9225_v11  ;;  %v7387_v34 = vld [vmem:[%s9563_s15 + $0x12c8] sm:$0xff] }
 0x2c0   : > { %12460 = vst [vmem:[#allocation9_spill] sm:$0xff] %v11114_v22  ;;  %v11126_v28 = vpop.f32.mrb[179].mxu0  ;;  %3285 = vmatmul.mubr.f32.gmra.mrb[28].mxu0 %v7308_v53  ;;  %v5447_v44 = vpop.permute.xlu1 %5446  ;;  %v7383_v53 = vld [vmem:[%s9563_s15 + $0x12a8] sm:$0xff] }
 0x2c1   : > { %v2377_v38 = vpop.f32.mrb[194].mxu1  ;;  %v5952_v51 = vsel %vm5928_vm0, %v12462_v56, %v5447_v44  ;;  %v5449_v4 = vpop.permute.xlu0 %5448  ;;  %3289 = vmatprep.mubr.f32.mxu0 %v7312_v49  ;;  %v12465_v49 = vld [vmem:[#allocation21_spill] sm:$0xff]  ;;  %v9158_v44 = vpack.c.bf16 %v7699_v7, %v7698_v13  ;;  %v12467_v11 = vld [vmem:[#allocation22_spill] sm:$0xff]  ;;  %v12468_v7 = vld [vmem:[#allocation23_spill] sm:$0xff] }
 0x2c2   : > { %v11133_v61 = vadd.f32 %v11032_v6, %v2377_v38  ;;  %6577 = vst [vmem:[%s10942_s19 + $0x228] sm:$0xff] %v5952_v51  ;;  %3889 = vmatmul.mubr.f32.gmra.mrb[44].mxu1 %v7380_v27  ;;  %v5953_v60 = vsel %vm5928_vm0, %v12464_v2, %v5449_v4  ;;  %v2379_v3 = vpop.f32.mrb[195].mxu1  ;;  %v7370_v51 = vld [vmem:[%s9563_s15 + $0x1240] sm:$0xff]  ;;  %v7700_v4 = vld [vmem:[%s9575_s16 + $0x790] sm:$0xff] }
 0x2c3   : > { %6580 = vst [vmem:[%s10942_s19 + $0x240] sm:$0xff] %v5953_v60  ;;  %v11142_v14 = vpop.f32.mrb[180].mxu0  ;;  %3893 = vmatprep.mubr.f32.mxu1 %v7384_v5  ;;  %v7386_v60 = vld [vmem:[%s9563_s15 + $0x12c0] sm:$0xff] }
 0x2c4   : > { %12463 = vst [vmem:[#allocation10_spill] sm:$0xff] %v11133_v61  ;;  %v11145_v6 = vpop.f32.mrb[181].mxu0  ;;  %3290 = vmatmul.mubr.f32.gmra.mrb[30].mxu0 %v7311_v15  ;;  %v5451_v40 = vpop.permute.xlu1 %5450  ;;  %v7701_v15 = vld [vmem:[%s9575_s16 + $0x798] sm:$0xff]  ;;  %v7400_v61 = vld [vmem:[%s9563_s15 + $0x1330] sm:$0xff] }
 0x2c5   : > { %v2382_v29 = vpop.f32.mrb[196].mxu1  ;;  %v5954_v27 = vsel %vm5928_vm0, %v12465_v49, %v5451_v40  ;;  %v5453_v18 = vpop.permute.xlu0 %5452  ;;  %8581 = vmatprep.mubr.f32.mxu0 %v7364_v31  ;;  %v7390_v31 = vld [vmem:[%s9563_s15 + $0x12e0] sm:$0xff] }
 0x2c6   : > { %v11152_v5 = vadd.f32 %v11054_v54, %v2382_v29  ;;  %6583 = vst [vmem:[%s10942_s19 + $0x258] sm:$0xff] %v5954_v27  ;;  %3894 = vmatmul.mubr.f32.gmra.mrb[46].mxu1 %v7383_v53  ;;  %v5955_v38 = vsel %vm5928_vm0, %v12467_v11, %v5453_v18  ;;  %v2384_v56 = vpop.f32.mrb[197].mxu1  ;;  %v7373_v29 = vld [vmem:[%s9563_s15 + $0x1258] sm:$0xff]  ;;  %v7376_v11 = vld [vmem:[%s9563_s15 + $0x1270] sm:$0xff] }
 0x2c7   : > { %6586 = vst [vmem:[%s10942_s19 + $0x270] sm:$0xff] %v5955_v38  ;;  %v11161_v2 = vpop.f32.mrb[182].mxu0  ;;  %3898 = vmatprep.mubr.f32.mxu1 %v7387_v34  ;;  %v9161_v34 = vpack.c.bf16 %v7701_v15, %v7700_v4  ;;  %v12470_v27 = vld [vmem:[#allocation24_spill] sm:$0xff]  ;;  %v7703_v38 = vld [vmem:[%s9575_s16 + $0x7a8] sm:$0xff] }
 0x2c8   : > { %12466 = vst [vmem:[#allocation11_spill] sm:$0xff] %v11152_v5  ;;  %v11164_v3 = vpop.f32.mrb[183].mxu0  ;;  %8582 = vmatmul.mubr.f32.vlgmr.msra.gmra.mrb[32].mxu0 %v7367_v37  ;;  %v5455_v54 = vpop.permute.xlu1 %5454  ;;  %v7393_v15 = vld [vmem:[%s9563_s15 + $0x12f8] sm:$0xff]  ;;  %v7388_v5 = vld [vmem:[%s9563_s15 + $0x12d0] sm:$0xff] }
 0x2c9   : > { %v2387_v13 = vpop.f32.mrb[198].mxu1  ;;  %v5956_v53 = vsel %vm5928_vm0, %v12468_v7, %v5455_v54  ;;  %9159 = vmatpush1.bf16.msra.mxu0 %v9158_v44  ;;  %v5457_v40 = vpop.permute.xlu0 %5456  ;;  %8584 = vmatprep.mubr.f32.mxu0 %v7370_v51  ;;  %v7702_v44 = vld [vmem:[%s9575_s16 + $0x7a0] sm:$0xff] }
 0x2ca   : > { %v11171_v49 = vadd.f32 %v11051_v52, %v2387_v13  ;;  %6589 = vst [vmem:[%s10942_s19 + $0x288] sm:$0xff] %v5956_v53  ;;  %3899 = vmatmul.mubr.f32.gmra.mrb[48].mxu1 %v7386_v60  ;;  %v5957_v18 = vsel %vm5928_vm0, %v12470_v27, %v5457_v40  ;;  %v2389_v37 = vpop.f32.mrb[199].mxu1  ;;  %9160 = vmatprep.subr.bf16.mxu0 %v12425_v25  ;;  %v7389_v52 = vld [vmem:[%s9563_s15 + $0x12d8] sm:$0xff]  ;;  %v12471_v54 = vld [vmem:[#allocation25_spill] sm:$0xff]  ;;  %v7379_v53 = vld [vmem:[%s9563_s15 + $0x1288] sm:$0xff] }
 0x2cb   : > { %6592 = vst [vmem:[%s10942_s19 + $0x2a0] sm:$0xff] %v5957_v18  ;;  %v11181_v56 = vpop.f32.mrb[184].mxu0  ;;  %3903 = vmatprep.mubr.f32.mxu1 %v7390_v31  ;;  %v9164_v31 = vpack.c.bf16 %v7703_v38, %v7702_v44  ;;  %v7382_v37 = vld [vmem:[%s9563_s15 + $0x12a0] sm:$0xff] }
 0x2cc   : > { %12469 = vst [vmem:[#allocation12_spill] sm:$0xff] %v11171_v49  ;;  %v11184_v51 = vpop.f32.mrb[185].mxu0  ;;  %8585 = vmatmul.mubr.f32.gmra.mrb[34].mxu0 %v7373_v29  ;;  %v5459_v4 = vpop.permute.xlu1 %5458  ;;  %v12473_v29 = vld [vmem:[#allocation26_spill] sm:$0xff]  ;;  %v7394_v49 = vld [vmem:[%s9563_s15 + $0x1300] sm:$0xff] }
 0x2cd   : > { %v2392_v60 = vpop.f32.mrb[200].mxu1  ;;  %v5958_v13 = vsel %vm5928_vm0, %v12471_v54, %v5459_v4  ;;  %v5461_v7 = vpop.permute.xlu0 %5460  ;;  %8587 = vmatprep.mubr.f32.mxu0 %v7376_v11  ;;  %9162 = vmatpush1.bf16.msra.mxu0 %v9161_v34  ;;  %v7704_v4 = vld [vmem:[%s9575_s16 + $0x7b0] sm:$0xff]  ;;  %v7705_v11 = vld [vmem:[%s9575_s16 + $0x7b8] sm:$0xff] }
 0x2ce   : > { %v11191_v40 = vadd.f32 %v11073_v41, %v2392_v60  ;;  %6595 = vst [vmem:[%s10942_s19 + $0x2b8] sm:$0xff] %v5958_v13  ;;  %3904 = vmatmul.mubr.f32.gmra.mrb[50].mxu1 %v7389_v52  ;;  %v5959_v27 = vsel %vm5928_vm0, %v12473_v29, %v5461_v7  ;;  %v2394_v18 = vpop.f32.mrb[201].mxu1  ;;  %9163 = vmatprep.subr.bf16.mxu0 %v12425_v25  ;;  %v7392_v41 = vld [vmem:[%s9563_s15 + $0x12f0] sm:$0xff]  ;;  %v7385_v29 = vld [vmem:[%s9563_s15 + $0x12b8] sm:$0xff] }
 0x2cf   : > { %6598 = vst [vmem:[%s10942_s19 + $0x2d0] sm:$0xff] %v5959_v27  ;;  %v11201_v34 = vpop.f32.mrb[186].mxu0  ;;  %3908 = vmatprep.mubr.f32.mxu1 %v7393_v15  ;;  %v7396_v52 = vld [vmem:[%s9563_s15 + $0x1310] sm:$0xff]  ;;  %v9167_v15 = vpack.c.bf16 %v7705_v11, %v7704_v4 }
 0x2d0   : > { %12472 = vst [vmem:[#allocation13_spill] sm:$0xff] %v11191_v40  ;;  %v11204_v44 = vpop.f32.mrb[187].mxu0  ;;  %8588 = vmatmul.mubr.f32.gmra.mrb[36].mxu0 %v7379_v53  ;;  %v5463_v38 = vpop.permute.xlu1 %5462  ;;  %v12474_v54 = vld [vmem:[#allocation27_spill] sm:$0xff]  ;;  %v12476_v53 = vld [vmem:[#allocation28_spill] sm:$0xff] }
 0x2d1   : > { %v2397_v60 = vpop.f32.mrb[202].mxu1  ;;  %v5960_v13 = vsel %vm5928_vm0, %v12474_v54, %v5463_v38  ;;  %v5465_v7 = vpop.permute.xlu0 %5464  ;;  %8590 = vmatprep.mubr.f32.mxu0 %v7382_v37  ;;  %9165 = vmatpush1.bf16.msra.mxu0 %v9164_v31  ;;  %v7706_v38 = vld [vmem:[%s9575_s16 + $0x7c0] sm:$0xff]  ;;  %v7707_v37 = vld [vmem:[%s9575_s16 + $0x7c8] sm:$0xff] }
 0x2d2   : > { %v11211_v27 = vadd.f32 %v11070_v23, %v2397_v60  ;;  %6601 = vst [vmem:[%s10942_s19 + $0x2e8] sm:$0xff] %v5960_v13  ;;  %3909 = vmatmul.mubr.f32.gmra.mrb[52].mxu1 %v7392_v41  ;;  %v5961_v18 = vsel %vm5928_vm0, %v12476_v53, %v5465_v7  ;;  %v2399_v40 = vpop.f32.mrb[203].mxu1  ;;  %9166 = vmatprep.subr.bf16.mxu0 %v12425_v25  ;;  %v7395_v23 = vld [vmem:[%s9563_s15 + $0x1308] sm:$0xff]  ;;  %v12477_v60 = vld [vmem:[#allocation29_spill] sm:$0xff] }
 0x2d3   : > { %6604 = vst [vmem:[%s10942_s19 + $0x300] sm:$0xff] %v5961_v18  ;;  %v11221_v31 = vpop.f32.mrb[188].mxu0  ;;  %3913 = vmatprep.mubr.f32.mxu1 %v7396_v52  ;;  %v7399_v41 = vld [vmem:[%s9563_s15 + $0x1328] sm:$0xff]  ;;  %v9170_v52 = vpack.c.bf16 %v7707_v37, %v7706_v38  ;;  %v7398_v38 = vld [vmem:[%s9563_s15 + $0x1320] sm:$0xff] }
 0x2d4   : > { %12475 = vst [vmem:[#allocation14_spill] sm:$0xff] %v11211_v27  ;;  %v11224_v4 = vpop.f32.mrb[189].mxu0  ;;  %8591 = vmatmul.mubr.f32.gmra.mrb[38].mxu0 %v7385_v29  ;;  %v5467_v11 = vpop.permute.xlu1 %5466  ;;  %v7391_v7 = vld [vmem:[%s9563_s15 + $0x12e8] sm:$0xff] }
 0x2d5   : > { %v2402_v40 = vpop.f32.mrb[204].mxu1  ;;  %v5962_v54 = vsel %vm5928_vm0, %v12477_v60, %v5467_v11  ;;  %v5469_v13 = vpop.permute.xlu0 %5468  ;;  %8593 = vmatprep.mubr.f32.mxu0 %v7388_v5  ;;  %9168 = vmatpush1.bf16.msra.mxu0 %v9167_v15  ;;  %v12479_v29 = vld [vmem:[#allocation30_spill] sm:$0xff]  ;;  %v7708_v5 = vld [vmem:[%s9575_s16 + $0x7d0] sm:$0xff]  ;;  %v7709_v11 = vld [vmem:[%s9575_s16 + $0x7d8] sm:$0xff] }
 0x2d6   : > { %v11231_v53 = vadd.f32 %v11090_v57, %v2402_v40  ;;  %6607 = vst [vmem:[%s10942_s19 + $0x318] sm:$0xff] %v5962_v54  ;;  %3914 = vmatmul.mubr.f32.gmra.mrb[54].mxu1 %v7395_v23  ;;  %v5963_v18 = vsel %vm5928_vm0, %v12479_v29, %v5469_v13  ;;  %v2404_v27 = vpop.f32.mrb[205].mxu1  ;;  %9169 = vmatprep.subr.bf16.mxu0 %v12425_v25  ;;  %v7742_v57 = vld [vmem:[%s9575_s16 + $0x8e0] sm:$0xff]  ;;  %v7743_v37 = vld [vmem:[%s9575_s16 + $0x8e8] sm:$0xff]  ;;  %v12480_v13 = vld [vmem:[#allocation31_spill] sm:$0xff] }
 0x2d7   : > { %6610 = vst [vmem:[%s10942_s19 + $0x330] sm:$0xff] %v5963_v18  ;;  %v11241_v15 = vpop.f32.mrb[190].mxu0  ;;  %3918 = vmatprep.mubr.f32.mxu1 %v7399_v41  ;;  %v7402_v27 = vld [vmem:[%s9563_s15 + $0x1340] sm:$0xff]  ;;  %v9229_v60 = vpack.c.bf16 %v7743_v37, %v7742_v57  ;;  %v7397_v41 = vld [vmem:[%s9563_s15 + $0x1318] sm:$0xff] }
 0x2d8   : > { %12478 = vst [vmem:[#allocation15_spill] sm:$0xff] %v11231_v53  ;;  %v11246_v23 = vpop.f32.mrb[191].mxu0  ;;  %8594 = vmatmul.mubr.f32.gmra.mrb[40].mxu0 %v7391_v7  ;;  %v5471_v40 = vpop.permute.xlu1 %5470  ;;  %v9173_v53 = vpack.c.bf16 %v7709_v11, %v7708_v5  ;;  %v12481_v7 = vld [vmem:[#allocation32_spill] sm:$0xff] }
 0x2d9   : > { %v2407_v54 = vpop.f32.mrb[206].mxu1  ;;  %v5964_v29 = vsel %vm5928_vm0, %v12480_v13, %v5471_v40  ;;  %v5473_v18 = vpop.permute.xlu0 %5472  ;;  %8596 = vmatprep.mubr.f32.mxu0 %v7394_v49  ;;  %9171 = vmatpush1.bf16.msra.mxu0 %v9170_v52  ;;  %v7710_v40 = vld [vmem:[%s9575_s16 + $0x7e0] sm:$0xff]  ;;  %v7711_v49 = vld [vmem:[%s9575_s16 + $0x7e8] sm:$0xff]  ;;  %v7405_v11 = vld [vmem:[%s9563_s15 + $0x1358] sm:$0xff] }
 0x2da   : > { %v11253_v22 = vadd.f32 %v11087_v1, %v2407_v54  ;;  %6613 = vst [vmem:[%s10942_s19 + $0x348] sm:$0xff] %v5964_v29  ;;  %3919 = vmatmul.mubr.f32.gmra.mrb[56].mxu1 %v7398_v38  ;;  %v5965_v57 = vsel %vm5928_vm0, %v12481_v7, %v5473_v18  ;;  %v2409_v37 = vpop.f32.mrb[207].mxu1  ;;  %9172 = vmatprep.subr.bf16.mxu0 %v12425_v25  ;;  %v7401_v1 = vld [vmem:[%s9563_s15 + $0x1338] sm:$0xff]  ;;  %v12482_v54 = vld [vmem:[#allocation33_spill] sm:$0xff] }
 0x2db   : > { %6616 = vst [vmem:[%s10942_s19 + $0x360] sm:$0xff] %v5965_v57  ;;  %v11263_v13 = vpop.f32.mrb[192].mxu0  ;;  %3923 = vmatprep.mubr.f32.mxu1 %v7402_v27  ;;  %9230 = vmatprep.subr.bf16.mxu1 %v9229_v60  ;;  %v7403_v27 = vld [vmem:[%s9563_s15 + $0x1348] sm:$0xff]  ;;  %v9176_v7 = vpack.c.bf16 %v7711_v49, %v7710_v40 }
 0x2dc   : > { %v3058_v52 = vpop.f32.mrb[193].mxu0  ;;  %8597 = vmatmul.mubr.f32.gmra.mrb[42].mxu0 %v7397_v41  ;;  %v5475_v5 = vpop.permute.xlu1 %5474  ;;  %9232 = vmatpush3.bf16.msra.mxu1 %v9229_v60  ;;  %v12484_v41 = vld [vmem:[#allocation34_spill] sm:$0xff] }
 0x2dd   : > { %v2412_v38 = vpop.f32.mrb[208].mxu1  ;;  %v5966_v29 = vsel %vm5928_vm0, %v12482_v54, %v5475_v5  ;;  %v5477_v18 = vpop.permute.xlu0 %5476  ;;  %8599 = vmatprep.mubr.f32.mxu0 %v7400_v61  ;;  %9174 = vmatpush1.bf16.msra.mxu0 %v9173_v53  ;;  %v7406_v52 = vld [vmem:[%s9563_s15 + $0x1360] sm:$0xff]  ;;  %v7712_v5 = vld [vmem:[%s9575_s16 + $0x7f0] sm:$0xff]  ;;  %v7713_v61 = vld [vmem:[%s9575_s16 + $0x7f8] sm:$0xff] }
 0x2de   : > { %v11271_v57 = vadd.f32 %v11107_v59, %v2412_v38  ;;  %6619 = vst [vmem:[%s10942_s19 + $0x378] sm:$0xff] %v5966_v29  ;;  %3924 = vmatmul.mubr.f32.gmra.mrb[58].mxu1 %v7401_v1  ;;  %v5967_v60 = vsel %vm5928_vm0, %v12484_v41, %v5477_v18  ;;  %v2414_v37 = vpop.f32.mrb[209].mxu1  ;;  %9175 = vmatprep.subr.bf16.mxu0 %v12425_v25  ;;  %v7404_v59 = vld [vmem:[%s9563_s15 + $0x1350] sm:$0xff]  ;;  %v7409_v41 = vld [vmem:[%s9563_s15 + $0x1378] sm:$0xff] }
 0x2df   : > { %6622 = vst [vmem:[%s10942_s19 + $0x390] sm:$0xff] %v5967_v60  ;;  %v11281_v53 = vpop.f32.mrb[194].mxu0  ;;  %3928 = vmatprep.mubr.f32.mxu1 %v7405_v11  ;;  %v7408_v1 = vld [vmem:[%s9563_s15 + $0x1370] sm:$0xff]  ;;  %v9179_v11 = vpack.c.bf16 %v7713_v61, %v7712_v5  ;;  %v7407_v5 = vld [vmem:[%s9563_s15 + $0x1368] sm:$0xff]  ;;  %v7745_v61 = vld [vmem:[%s9575_s16 + $0x8f8] sm:$0xff] }
 0x2e0   : > { %12483 = vst [vmem:[#allocation16_spill] sm:$0xff] %v11271_v57  ;;  %v3063_v40 = vpop.f32.mrb[195].mxu0  ;;  %8600 = vmatmul.mubr.f32.gmra.mrb[44].mxu0 %v7403_v27  ;;  %v5479_v49 = vpop.permute.xlu1 %5478  ;;  %v12485_v54 = vld [vmem:[#allocation35_spill] sm:$0xff]  ;;  %v12487_v27 = vld [vmem:[#allocation36_spill] sm:$0xff] }
 0x2e1   : > { %v2417_v38 = vpop.f32.mrb[210].mxu1  ;;  %v5968_v29 = vsel %vm5928_vm0, %v12485_v54, %v5479_v49  ;;  %v5481_v18 = vpop.permute.xlu0 %5480  ;;  %8602 = vmatprep.mubr.f32.mxu0 %v7406_v52  ;;  %9177 = vmatpush1.bf16.msra.mxu0 %v9176_v7  ;;  %v7412_v57 = vld [vmem:[%s9563_s15 + $0x1390] sm:$0xff]  ;;  %v7714_v52 = vld [vmem:[%s9575_s16 + $0x800] sm:$0xff]  ;;  %v7715_v49 = vld [vmem:[%s9575_s16 + $0x808] sm:$0xff] }
 0x2e2   : > { %v11289_v60 = vadd.f32 %v11104_v50, %v2417_v38  ;;  %6625 = vst [vmem:[%s10942_s19 + $0x3a8] sm:$0xff] %v5968_v29  ;;  %3929 = vmatmul.mubr.f32.gmra.mrb[60].mxu1 %v7404_v59  ;;  %v5969_v37 = vsel %vm5928_vm0, %v12487_v27, %v5481_v18  ;;  %v2419_v40 = vpop.f32.mrb[211].mxu1  ;;  %9178 = vmatprep.subr.bf16.mxu0 %v12425_v25  ;;  %v7744_v50 = vld [vmem:[%s9575_s16 + $0x8f0] sm:$0xff]  ;;  %v7411_v54 = vld [vmem:[%s9563_s15 + $0x1388] sm:$0xff]  ;;  %v12488_v27 = vld [vmem:[#allocation37_spill] sm:$0xff] }
 0x2e3   : > { %6628 = vst [vmem:[%s10942_s19 + $0x3c0] sm:$0xff] %v5969_v37  ;;  %v11299_v7 = vpop.f32.mrb[196].mxu0  ;;  %3933 = vmatprep.mubr.f32.mxu1 %v7408_v1  ;;  %v9233_v29 = vpack.c.bf16 %v7745_v61, %v7744_v50  ;;  %v7415_v1 = vld [vmem:[%s9563_s15 + $0x13a8] sm:$0xff]  ;;  %v7418_v61 = vld [vmem:[%s9563_s15 + $0x13c0] sm:$0xff] }
 0x2e4   : > { %12486 = vst [vmem:[#allocation17_spill] sm:$0xff] %v11289_v60  ;;  %v3068_v59 = vpop.f32.mrb[197].mxu0  ;;  %8603 = vmatmul.mubr.f32.gmra.mrb[46].mxu0 %v7409_v41  ;;  %v5483_v38 = vpop.permute.xlu1 %5482  ;;  %v9182_v60 = vpack.c.bf16 %v7715_v49, %v7714_v52  ;;  %v7414_v49 = vld [vmem:[%s9563_s15 + $0x13a0] sm:$0xff] }
 0x2e5   : > { %v2422_v18 = vpop.f32.mrb[212].mxu1  ;;  %v5970_v37 = vsel %vm5928_vm0, %v12488_v27, %v5483_v38  ;;  %v5485_v40 = vpop.permute.xlu0 %5484  ;;  %8605 = vmatprep.mubr.f32.mxu0 %v7412_v57  ;;  %9180 = vmatpush1.bf16.msra.mxu0 %v9179_v11  ;;  %v7716_v38 = vld [vmem:[%s9575_s16 + $0x810] sm:$0xff]  ;;  %v7717_v57 = vld [vmem:[%s9575_s16 + $0x818] sm:$0xff] }
 0x2e6   : > { %v11309_v59 = vadd.f32 %v11126_v28, %v2422_v18  ;;  %6631 = vst [vmem:[%s10942_s19 + $0x3d8] sm:$0xff] %v5970_v37  ;;  %3934 = vmatmul.mubr.f32.gmra.mrb[62].mxu1 %v7407_v5  ;;  %v5971_v41 = vsel %vm5928_vm0, %v10523_v19, %v5485_v40  ;;  %v2424_v50 = vpop.f32.mrb[213].mxu1  ;;  %9181 = vmatprep.subr.bf16.mxu0 %v12425_v25  ;;  %v7410_v28 = vld [vmem:[%s9563_s15 + $0x1380] sm:$0xff]  ;;  %v12489_v5 = vld [vmem:[#allocation38_spill] sm:$0xff] }
 0x2e7   : > { %6634 = vst [vmem:[%s10942_s19 + $0x3f0] sm:$0xff] %v5971_v41  ;;  %v11319_v27 = vpop.f32.mrb[198].mxu0  ;;  %3938 = vmatprep.mubr.f32.mxu1 %v7411_v54  ;;  %9234 = vmatprep.subr.bf16.mxu1 %v9233_v29  ;;  %v7421_v54 = vld [vmem:[%s9563_s15 + $0x13d8] sm:$0xff]  ;;  %v9185_v40 = vpack.c.bf16 %v7717_v57, %v7716_v38 }
 0x2e8   : > { %v3073_v11 = vpop.f32.mrb[199].mxu0  ;;  %8606 = vmatmul.mubr.f32.gmra.mrb[48].mxu0 %v7415_v1  ;;  %v5487_v52 = vpop.permute.xlu1 %5486  ;;  %9236 = vmatpush3.bf16.msra.mxu1 %v9233_v29  ;;  %v12490_v1 = vld [vmem:[#allocation39_spill] sm:$0xff] }
 0x2e9   : > { %v2427_v19 = vpop.f32.mrb[214].mxu1  ;;  %v5972_v18 = vsel %vm5928_vm0, %v12489_v5, %v5487_v52  ;;  %v5489_v37 = vpop.permute.xlu0 %5488  ;;  %8608 = vmatprep.mubr.f32.mxu0 %v7418_v61  ;;  %9183 = vmatpush1.bf16.msra.mxu0 %v9182_v60  ;;  %v7424_v11 = vld [vmem:[%s9563_s15 + $0x13f0] sm:$0xff]  ;;  %v7718_v52 = vld [vmem:[%s9575_s16 + $0x820] sm:$0xff]  ;;  %v7719_v61 = vld [vmem:[%s9575_s16 + $0x828] sm:$0xff] }
 0x2ea   : > { %v11327_v41 = vadd.f32 %v11121_v35, %v2427_v19  ;;  %6637 = vst [vmem:[%s10942_s19 + $0x408] sm:$0xff] %v5972_v18  ;;  %3939 = vmatmul.mubr.f32.gmra.mrb[64].mxu1 %v7410_v28  ;;  %v5973_v29 = vsel %vm5928_vm0, %v12490_v1, %v5489_v37  ;;  %v2429_v50 = vpop.f32.mrb[215].mxu1  ;;  %9184 = vmatprep.subr.bf16.mxu0 %v12425_v25  ;;  %v7413_v35 = vld [vmem:[%s9563_s15 + $0x1398] sm:$0xff]  ;;  %v7427_v1 = vld [vmem:[%s9563_s15 + $0x1408] sm:$0xff] }
 0x2eb   : > { %6640 = vst [vmem:[%s10942_s19 + $0x420] sm:$0xff] %v5973_v29  ;;  %v11337_v60 = vpop.f32.mrb[200].mxu0  ;;  %3943 = vmatprep.mubr.f32.mxu1 %v7414_v49  ;;  %v7417_v28 = vld [vmem:[%s9563_s15 + $0x13b8] sm:$0xff]  ;;  %v9188_v29 = vpack.c.bf16 %v7719_v61, %v7718_v52 }
 0x2ec   : > { %v3078_v38 = vpop.f32.mrb[201].mxu0  ;;  %8609 = vmatmul.mubr.f32.gmra.mrb[50].mxu0 %v7421_v54  ;;  %v5491_v57 = vpop.permute.xlu1 %5490  ;;  %v12491_v5 = vld [vmem:[#allocation40_spill] sm:$0xff] }
 0x2ed   : > { %v2432_v19 = vpop.f32.mrb[216].mxu1  ;;  %v5974_v18 = vsel %vm5928_vm0, %v12491_v5, %v5491_v57  ;;  %v5493_v37 = vpop.permute.xlu0 %5492  ;;  %8611 = vmatprep.mubr.f32.mxu0 %v7424_v11  ;;  %9186 = vmatpush1.bf16.msra.mxu0 %v9185_v40  ;;  %v7430_v38 = vld [vmem:[%s9563_s15 + $0x1420] sm:$0xff]  ;;  %v7720_v57 = vld [vmem:[%s9575_s16 + $0x830] sm:$0xff]  ;;  %v7721_v11 = vld [vmem:[%s9575_s16 + $0x838] sm:$0xff] }
 0x2ee   : > { %v11345_v49 = vadd.f32 %v11145_v6, %v2432_v19  ;;  %6643 = vst [vmem:[%s10942_s19 + $0x438] sm:$0xff] %v5974_v18  ;;  %3944 = vmatmul.mubr.f32.gmra.mrb[66].mxu1 %v7413_v35  ;;  %v5975_v54 = vsel %vm5928_vm0, %v10568_v21, %v5493_v37  ;;  %v2434_v50 = vpop.f32.mrb[217].mxu1  ;;  %9187 = vmatprep.subr.bf16.mxu0 %v12425_v25  ;;  %v7416_v6 = vld [vmem:[%s9563_s15 + $0x13b0] sm:$0xff]  ;;  %v7433_v5 = vld [vmem:[%s9563_s15 + $0x1438] sm:$0xff] }
 0x2ef   : > { %6646 = vst [vmem:[%s10942_s19 + $0x450] sm:$0xff] %v5975_v54  ;;  %v11355_v40 = vpop.f32.mrb[202].mxu0  ;;  %3948 = vmatprep.mubr.f32.mxu1 %v7417_v28  ;;  %v7420_v21 = vld [vmem:[%s9563_s15 + $0x13d0] sm:$0xff]  ;;  %v9191_v18 = vpack.c.bf16 %v7721_v11, %v7720_v57  ;;  %v7722_v54 = vld [vmem:[%s9575_s16 + $0x840] sm:$0xff]  ;;  %v7723_v50 = vld [vmem:[%s9575_s16 + $0x848] sm:$0xff] }
 0x2f0   : > { %v3083_v52 = vpop.f32.mrb[203].mxu0  ;;  %8612 = vmatmul.mubr.f32.gmra.mrb[52].mxu0 %v7427_v1  ;;  %v5495_v61 = vpop.permute.xlu1 %5494  ;;  %v7436_v1 = vld [vmem:[%s9563_s15 + $0x1450] sm:$0xff]  ;;  %v7439_v57 = vld [vmem:[%s9563_s15 + $0x1468] sm:$0xff]  ;;  %v9194_v11 = vpack.c.bf16 %v7723_v50, %v7722_v54  ;;  %v7445_v54 = vld [vmem:[%s9563_s15 + $0x1498] sm:$0xff] }
 0x2f1   : > { %v2437_v35 = vpop.f32.mrb[218].mxu1  ;;  %v5976_v19 = vsel %vm5928_vm0, %v10577_v20, %v5495_v61  ;;  %8614 = vmatprep.mubr.f32.mxu0 %v7430_v38  ;;  %9189 = vmatpush1.bf16.msra.mxu0 %v9188_v29  ;;  %v7419_v20 = vld [vmem:[%s9563_s15 + $0x13c8] sm:$0xff] }
 0x2f2   : > { %v11363_v28 = vadd.f32 %v11142_v14, %v2437_v35  ;;  %6649 = vst [vmem:[%s10942_s19 + $0x468] sm:$0xff] %v5976_v19  ;;  %3949 = vmatmul.mubr.f32.gmra.mrb[68].mxu1 %v7416_v6  ;;  %v2439_v37 = vpop.f32.mrb[219].mxu1  ;;  %9190 = vmatprep.subr.bf16.mxu0 %v12425_v25  ;;  %v7423_v14 = vld [vmem:[%s9563_s15 + $0x13e8] sm:$0xff]  ;;  %v7442_v35 = vld [vmem:[%s9563_s15 + $0x1480] sm:$0xff]  ;;  %v7725_v19 = vld [vmem:[%s9575_s16 + $0x858] sm:$0xff] }
 0x2f3   : > { %v11370_v52 = vpop.f32.mrb[204].mxu0  ;;  %3953 = vmatprep.mubr.f32.mxu1 %v7420_v21  ;;  %v7724_v21 = vld [vmem:[%s9575_s16 + $0x850] sm:$0xff]  ;;  %v7422_v37 = vld [vmem:[%s9563_s15 + $0x13e0] sm:$0xff] }
 0x2f4   : > { %v3088_v29 = vpop.f32.mrb[205].mxu0  ;;  %8615 = vmatmul.mubr.f32.gmra.mrb[54].mxu0 %v7433_v5  ;;  %v9197_v50 = vpack.c.bf16 %v7725_v19, %v7724_v21  ;;  %v7429_v21 = vld [vmem:[%s9563_s15 + $0x1418] sm:$0xff]  ;;  %v7451_v19 = vld [vmem:[%s9563_s15 + $0x14c8] sm:$0xff] }
 0x2f5   : > { %v2442_v38 = vpop.f32.mrb[220].mxu1  ;;  %8617 = vmatprep.mubr.f32.mxu0 %v7436_v1  ;;  %9192 = vmatpush1.bf16.msra.mxu0 %v9191_v18  ;;  %v7426_v1 = vld [vmem:[%s9563_s15 + $0x1400] sm:$0xff] }
 0x2f6   : > { %v11376_v6 = vadd.f32 %v11164_v3, %v2442_v38  ;;  %3954 = vmatmul.mubr.f32.gmra.mrb[70].mxu1 %v7419_v20  ;;  %v2444_v61 = vpop.f32.mrb[221].mxu1  ;;  %9193 = vmatprep.subr.bf16.mxu0 %v12425_v25  ;;  %v7448_v38 = vld [vmem:[%s9563_s15 + $0x14b0] sm:$0xff] }
 0x2f7   : > { %v11382_v5 = vpop.f32.mrb[206].mxu0  ;;  %3958 = vmatprep.mubr.f32.mxu1 %v7423_v14  ;;  %v7726_v14 = vld [vmem:[%s9575_s16 + $0x860] sm:$0xff] }
 0x2f8   : > { %v3093_v18 = vpop.f32.mrb[207].mxu0  ;;  %8618 = vmatmul.mubr.f32.gmra.mrb[56].mxu0 %v7439_v57  ;;  %v7727_v57 = vld [vmem:[%s9575_s16 + $0x868] sm:$0xff] }
 0x2f9   : > { %v2447_v3 = vpop.f32.mrb[222].mxu1  ;;  %8620 = vmatprep.mubr.f32.mxu0 %v7442_v35  ;;  %9195 = vmatpush1.bf16.msra.mxu0 %v9194_v11  ;;  %v7425_v35 = vld [vmem:[%s9563_s15 + $0x13f8] sm:$0xff] }
 0x2fa   : > { %v11388_v20 = vadd.f32 %v11161_v2, %v2447_v3  ;;  %3959 = vmatmul.mubr.f32.gmra.mrb[72].mxu1 %v7422_v37  ;;  %v2449_v29 = vpop.f32.mrb[223].mxu1  ;;  %9196 = vmatprep.subr.bf16.mxu0 %v12425_v25  ;;  %v9200_v37 = vpack.c.bf16 %v7727_v57, %v7726_v14 }
 0x2fb   : > { %v11394_v61 = vpop.f32.mrb[208].mxu0  ;;  %3963 = vmatprep.mubr.f32.mxu1 %v7426_v1  ;;  %v7454_v29 = vld [vmem:[%s9563_s15 + $0x14e0] sm:$0xff]  ;;  %v7728_v1 = vld [vmem:[%s9575_s16 + $0x870] sm:$0xff] }
 0x2fc   : > { %12492 = vst [vmem:[#allocation18_spill] sm:$0xff] %v11388_v20  ;;  %v3098_v11 = vpop.f32.mrb[209].mxu0  ;;  %8621 = vmatmul.mubr.f32.gmra.mrb[58].mxu0 %v7445_v54  ;;  %v7729_v54 = vld [vmem:[%s9575_s16 + $0x878] sm:$0xff] }
 0x2fd   : > { %v2452_v2 = vpop.f32.mrb[224].mxu1  ;;  %8623 = vmatprep.mubr.f32.mxu0 %v7448_v38  ;;  %9198 = vmatpush1.bf16.msra.mxu0 %v9197_v50  ;;  %v7428_v38 = vld [vmem:[%s9563_s15 + $0x1410] sm:$0xff]  ;;  %v9203_v57 = vpack.c.bf16 %v7729_v54, %v7728_v1  ;;  %v7466_v54 = vld [vmem:[%s9563_s15 + $0x1540] sm:$0xff] }
 0x2fe   : > { %v11400_v18 = vadd.f32 %v11184_v51, %v2452_v2  ;;  %3964 = vmatmul.mubr.f32.gmra.mrb[74].mxu1 %v7425_v35  ;;  %v2454_v3 = vpop.f32.mrb[225].mxu1  ;;  %9199 = vmatprep.subr.bf16.mxu0 %v12425_v25  ;;  %v7432_v50 = vld [vmem:[%s9563_s15 + $0x1430] sm:$0xff]  ;;  %v7457_v51 = vld [vmem:[%s9563_s15 + $0x14f8] sm:$0xff] }
 0x2ff   : > { %v11406_v11 = vpop.f32.mrb[210].mxu0  ;;  %3968 = vmatprep.mubr.f32.mxu1 %v7429_v21  ;;  %v7460_v3 = vld [vmem:[%s9563_s15 + $0x1510] sm:$0xff] }
 0x300   : > { %v3103_v20 = vpop.f32.mrb[211].mxu0  ;;  %8624 = vmatmul.mubr.f32.gmra.mrb[60].mxu0 %v7451_v19 }
 0x301   : > { %v2457_v14 = vpop.f32.mrb[226].mxu1  ;;  %8626 = vmatprep.mubr.f32.mxu0 %v7454_v29  ;;  %9201 = vmatpush1.bf16.msra.mxu0 %v9200_v37  ;;  %v7431_v20 = vld [vmem:[%s9563_s15 + $0x1428] sm:$0xff] }
 0x302   : > { %v11412_v35 = vadd.f32 %v11181_v56, %v2457_v14  ;;  %3969 = vmatmul.mubr.f32.gmra.mrb[76].mxu1 %v7428_v38  ;;  %v2459_v2 = vpop.f32.mrb[227].mxu1  ;;  %9202 = vmatprep.subr.bf16.mxu0 %v12425_v25  ;;  %v7435_v29 = vld [vmem:[%s9563_s15 + $0x1448] sm:$0xff] }
 0x303   : > { %v11416_v21 = vpop.f32.mrb[212].mxu0  ;;  %3973 = vmatprep.mubr.f32.mxu1 %v7432_v50  ;;  %v7463_v56 = vld [vmem:[%s9563_s15 + $0x1528] sm:$0xff]  ;;  %v7434_v50 = vld [vmem:[%s9563_s15 + $0x1440] sm:$0xff] }
 0x304   : > { %v3108_v19 = vpop.f32.mrb[213].mxu0  ;;  %8627 = vmatmul.mubr.f32.gmra.mrb[62].mxu0 %v7457_v51  ;;  %v7438_v51 = vld [vmem:[%s9563_s15 + $0x1460] sm:$0xff] }
 0x305   : > { %v2462_v37 = vpop.f32.mrb[228].mxu1  ;;  %8629 = vmatprep.mubr.f32.mxu0 %v7460_v3  ;;  %9204 = vmatpush1.bf16.msra.mxu0 %v9203_v57  ;;  %v7469_v57 = vld [vmem:[%s9563_s15 + $0x1558] sm:$0xff] }
 0x306   : > { %v11422_v1 = vadd.f32 %v11204_v44, %v2462_v37  ;;  %3974 = vmatmul.mubr.f32.gmra.mrb[78].mxu1 %v7431_v20  ;;  %v2464_v25 = vpop.f32.mrb[229].mxu1  ;;  %v7472_v20 = vld [vmem:[%s9563_s15 + $0x1570] sm:$0xff] }
 0x307   : > { %v11425_v38 = vpop.f32.mrb[214].mxu0  ;;  %3978 = vmatprep.mubr.f32.mxu1 %v7435_v29  ;;  %v7437_v29 = vld [vmem:[%s9563_s15 + $0x1458] sm:$0xff] }
 0x308   : > { %v3113_v14 = vpop.f32.mrb[215].mxu0  ;;  %8630 = vmatmul.mubr.f32.gmra.mrb[64].mxu0 %v7463_v56  ;;  %v7441_v56 = vld [vmem:[%s9563_s15 + $0x1478] sm:$0xff] }
 0x309   : > { %v2467_v2 = vpop.f32.mrb[230].mxu1  ;;  %8632 = vmatprep.mubr.f32.mxu0 %v7466_v54  ;;  %v7475_v54 = vld [vmem:[%s9563_s15 + $0x1588] sm:$0xff]  ;;  %v7478_v14 = vld [vmem:[%s9563_s15 + $0x15a0] sm:$0xff] }
 0x30a   : > { %v11431_v44 = vadd.f32 %v11201_v34, %v2467_v2  ;;  %3979 = vmatmul.mubr.f32.gmra.mrb[80].mxu1 %v7434_v50  ;;  %v2469_v3 = vpop.f32.mrb[231].mxu1 }
 0x30b   : > { %v11434_v19 = vpop.f32.mrb[216].mxu0  ;;  %3983 = vmatprep.mubr.f32.mxu1 %v7438_v51  ;;  %v7440_v51 = vld [vmem:[%s9563_s15 + $0x1470] sm:$0xff] }
 0x30c   : > { %v3118_v37 = vpop.f32.mrb[217].mxu0  ;;  %8633 = vmatmul.mubr.f32.gmra.mrb[66].mxu0 %v7469_v57  ;;  %v7444_v57 = vld [vmem:[%s9563_s15 + $0x1490] sm:$0xff] }
 0x30d   : > { %v2472_v25 = vpop.f32.mrb[232].mxu1  ;;  %8635 = vmatprep.mubr.f32.mxu0 %v7472_v20  ;;  %v7481_v20 = vld [vmem:[%s9563_s15 + $0x15b8] sm:$0xff] }
 0x30e   : > { %v11440_v34 = vadd.f32 %v11224_v4, %v2472_v25  ;;  %3984 = vmatmul.mubr.f32.gmra.mrb[82].mxu1 %v7437_v29  ;;  %v2474_v50 = vpop.f32.mrb[233].mxu1  ;;  %v7484_v25 = vld [vmem:[%s9563_s15 + $0x15d0] sm:$0xff] }
 0x30f   : > { %v11443_v2 = vpop.f32.mrb[218].mxu0  ;;  %3988 = vmatprep.mubr.f32.mxu1 %v7441_v56  ;;  %v7443_v56 = vld [vmem:[%s9563_s15 + $0x1488] sm:$0xff] }
 0x310   : > { %12493 = vst [vmem:[#allocation19_spill] sm:$0xff] %v11440_v34  ;;  %v3123_v3 = vpop.f32.mrb[219].mxu0  ;;  %8636 = vmatmul.mubr.f32.gmra.mrb[68].mxu0 %v7475_v54  ;;  %v7447_v54 = vld [vmem:[%s9563_s15 + $0x14a8] sm:$0xff] }
 0x311   : > { %v2477_v37 = vpop.f32.mrb[234].mxu1  ;;  %8638 = vmatprep.mubr.f32.mxu0 %v7478_v14  ;;  %v7487_v14 = vld [vmem:[%s9563_s15 + $0x15e8] sm:$0xff] }
 0x312   : > { %v11449_v4 = vadd.f32 %v11221_v31, %v2477_v37  ;;  %3989 = vmatmul.mubr.f32.gmra.mrb[84].mxu1 %v7440_v51  ;;  %v2479_v29 = vpop.f32.mrb[235].mxu1  ;;  %v7490_v37 = vld [vmem:[%s9563_s15 + $0x1600] sm:$0xff] }
 0x313   : > { %v11452_v50 = vpop.f32.mrb[220].mxu0  ;;  %3993 = vmatprep.mubr.f32.mxu1 %v7444_v57  ;;  %v7446_v57 = vld [vmem:[%s9563_s15 + $0x14a0] sm:$0xff] }
 0x314   : > { %12494 = vst [vmem:[#allocation20_spill] sm:$0xff] %v11449_v4  ;;  %v3128_v3 = vpop.f32.mrb[221].mxu0  ;;  %8639 = vmatmul.mubr.f32.gmra.mrb[70].mxu0 %v7481_v20  ;;  %v7450_v20 = vld [vmem:[%s9563_s15 + $0x14c0] sm:$0xff] }
 0x315   : > { %v2482_v34 = vpop.f32.mrb[236].mxu1  ;;  %8641 = vmatprep.mubr.f32.mxu0 %v7484_v25  ;;  %v7493_v25 = vld [vmem:[%s9563_s15 + $0x1618] sm:$0xff] }
 0x316   : > { %v11458_v31 = vadd.f32 %v11246_v23, %v2482_v34  ;;  %3994 = vmatmul.mubr.f32.gmra.mrb[86].mxu1 %v7443_v56  ;;  %v2484_v51 = vpop.f32.mrb[237].mxu1  ;;  %v7496_v56 = vld [vmem:[%s9563_s15 + $0x1630] sm:$0xff] }
 0x317   : > { %v11461_v29 = vpop.f32.mrb[222].mxu0  ;;  %3998 = vmatprep.mubr.f32.mxu1 %v7447_v54  ;;  %v7449_v54 = vld [vmem:[%s9563_s15 + $0x14b8] sm:$0xff] }
 0x318   : > { %12495 = vst [vmem:[#allocation21_spill] sm:$0xff] %v11458_v31  ;;  %v3133_v3 = vpop.f32.mrb[223].mxu0  ;;  %8642 = vmatmul.mubr.f32.gmra.mrb[72].mxu0 %v7487_v14  ;;  %v7453_v14 = vld [vmem:[%s9563_s15 + $0x14d8] sm:$0xff] }
 0x319   : > { %v2487_v4 = vpop.f32.mrb[238].mxu1  ;;  %8644 = vmatprep.mubr.f32.mxu0 %v7490_v37  ;;  %v7499_v37 = vld [vmem:[%s9563_s15 + $0x1648] sm:$0xff] }
 0x31a   : > { %v11467_v23 = vadd.f32 %v11241_v15, %v2487_v4  ;;  %3999 = vmatmul.mubr.f32.gmra.mrb[88].mxu1 %v7446_v57  ;;  %v2489_v34 = vpop.f32.mrb[239].mxu1  ;;  %v7502_v57 = vld [vmem:[%s9563_s15 + $0x1660] sm:$0xff] }
 0x31b   : > { %v11470_v51 = vpop.f32.mrb[224].mxu0  ;;  %4003 = vmatprep.mubr.f32.mxu1 %v7450_v20  ;;  %v7452_v20 = vld [vmem:[%s9563_s15 + $0x14d0] sm:$0xff] }
 0x31c   : > { %12496 = vst [vmem:[#allocation22_spill] sm:$0xff] %v11467_v23  ;;  %v3138_v31 = vpop.f32.mrb[225].mxu0  ;;  %8645 = vmatmul.mubr.f32.gmra.mrb[74].mxu0 %v7493_v25  ;;  %v7456_v25 = vld [vmem:[%s9563_s15 + $0x14f0] sm:$0xff] }
 0x31d   : > { %v8479_v3 = vpop.f32.mrb[240].mxu1  ;;  %8647 = vmatprep.mubr.f32.mxu0 %v7496_v56 }
 0x31e   : > { %v3367_v15 = vadd.f32 %v8479_v3, %v11281_v53  ;;  %v3361_v4 = vpop.f32.mrb[241].mxu1  ;;  %4004 = vmatmul.mubr.f32.gmra.mrb[90].mxu1 %v7449_v54  ;;  %v7505_v53 = vld [vmem:[%s9563_s15 + $0x1678] sm:$0xff]  ;;  %v7555_v3 = vld [vmem:[%s9563_s15 + $0x1688] sm:$0xff] }
 0x31f   : > { %v3362_v34 = vadd.f32 %v3361_v4, %v11263_v13  ;;  %v11478_v23 = vpop.f32.mrb[226].mxu0  ;;  %4008 = vmatprep.mubr.f32.mxu1 %v7453_v14 }
 0x320   : > { %5594 = vrot.lane.b32.xlu1 %v3367_v15, %s9430_s21  ;;  %v3143_v31 = vpop.f32.mrb[227].mxu0  ;;  %8648 = vmatmul.mubr.f32.gmra.mrb[76].mxu0 %v7499_v37  ;;  %v7455_v37 = vld [vmem:[%s9563_s15 + $0x14e8] sm:$0xff] }
 0x321   : > { %v8482_v56 = vpop.f32.mrb[242].mxu1  ;;  %5592 = vrot.lane.b32.xlu0 %v3362_v34, %s9430_s21  ;;  %8650 = vmatprep.mubr.f32.mxu0 %v7502_v57  ;;  %v7459_v57 = vld [vmem:[%s9563_s15 + $0x1508] sm:$0xff]  ;;  %v7558_v31 = vld [vmem:[%s9563_s15 + $0x16a0] sm:$0xff] }
 0x322   : > { %v3377_v54 = vadd.f32 %v8482_v56, %v11319_v27  ;;  %v3371_v13 = vpop.f32.mrb[243].mxu1  ;;  %4009 = vmatmul.mubr.f32.gmra.mrb[92].mxu1 %v7452_v20  ;;  %v7554_v27 = vld [vmem:[%s9563_s15 + $0x1680] sm:$0xff] }
 0x323   : > { %v3372_v14 = vadd.f32 %v3371_v13, %v11299_v7  ;;  %v11488_v4 = vpop.f32.mrb[228].mxu0  ;;  %4013 = vmatprep.mubr.f32.mxu1 %v7456_v25  ;;  %v7462_v13 = vld [vmem:[%s9563_s15 + $0x1520] sm:$0xff] }
 0x324   : > { %5598 = vrot.lane.b32.xlu1 %v3377_v54, %s9430_s21  ;;  %v3148_v15 = vpop.f32.mrb[229].mxu0  ;;  %8651 = vmatmul.mubr.f32.gmra.mrb[78].mxu0 %v7505_v53  ;;  %v7458_v53 = vld [vmem:[%s9563_s15 + $0x1500] sm:$0xff] }
 0x325   : > { %v8485_v34 = vpop.f32.mrb[244].mxu1  ;;  %5596 = vrot.lane.b32.xlu0 %v3372_v14, %s9430_s21  ;;  %4662 = vmatprep.mubr.f32.mxu0 %v7555_v3 }
 0x326   : > { %v3387_v20 = vadd.f32 %v8485_v34, %v11355_v40  ;;  %v3381_v7 = vpop.f32.mrb[245].mxu1  ;;  %4014 = vmatmul.mubr.f32.gmra.mrb[94].mxu1 %v7455_v37  ;;  %v7557_v40 = vld [vmem:[%s9563_s15 + $0x1698] sm:$0xff] }
 0x327   : > { %v3382_v25 = vadd.f32 %v3381_v7, %v11337_v60  ;;  %v11498_v56 = vpop.f32.mrb[230].mxu0  ;;  %4018 = vmatprep.mubr.f32.mxu1 %v7459_v57  ;;  %v7561_v37 = vld [vmem:[%s9563_s15 + $0x16b8] sm:$0xff] }
 0x328   : > { %5602 = vrot.lane.b32.xlu1 %v3387_v20, %s9430_s21  ;;  %v3153_v54 = vpop.f32.mrb[231].mxu0  ;;  %4663 = vmatmul.mubr.f32.vlgmr.msra.gmra.mrb[80].mxu0 %v7554_v27  ;;  %v7461_v34 = vld [vmem:[%s9563_s15 + $0x1518] sm:$0xff] }
 0x329   : > { %v8488_v3 = vpop.f32.mrb[246].mxu1  ;;  %5600 = vrot.lane.b32.xlu0 %v3382_v25, %s9430_s21  ;;  %4667 = vmatprep.mubr.f32.mxu0 %v7558_v31  ;;  %v7465_v20 = vld [vmem:[%s9563_s15 + $0x1538] sm:$0xff]  ;;  %v7564_v25 = vld [vmem:[%s9563_s15 + $0x16d0] sm:$0xff] }
 0x32a   : > { %v3397_v14 = vadd.f32 %v8488_v3, %v11382_v5  ;;  %v3391_v60 = vpop.f32.mrb[247].mxu1  ;;  %4019 = vmatmul.mubr.f32.gmra.mrb[96].mxu1 %v7458_v53  ;;  %v7560_v5 = vld [vmem:[%s9563_s15 + $0x16b0] sm:$0xff] }
 0x32b   : > { %v3392_v15 = vadd.f32 %v3391_v60, %v11370_v52  ;;  %v11508_v57 = vpop.f32.mrb[232].mxu0  ;;  %4023 = vmatprep.mubr.f32.mxu1 %v7462_v13  ;;  %v7464_v13 = vld [vmem:[%s9563_s15 + $0x1530] sm:$0xff] }
 0x32c   : > { %5606 = vrot.lane.b32.xlu1 %v3397_v14, %s9430_s21  ;;  %v3158_v27 = vpop.f32.mrb[233].mxu0  ;;  %4668 = vmatmul.mubr.f32.gmra.mrb[82].mxu0 %v7557_v40  ;;  %v7468_v40 = vld [vmem:[%s9563_s15 + $0x1550] sm:$0xff] }
 0x32d   : > { %v8491_v7 = vpop.f32.mrb[248].mxu1  ;;  %5604 = vrot.lane.b32.xlu0 %v3392_v15, %s9430_s21  ;;  %4672 = vmatprep.mubr.f32.mxu0 %v7561_v37  ;;  %v7567_v37 = vld [vmem:[%s9563_s15 + $0x16e8] sm:$0xff] }
 0x32e   : > { %v3407_v31 = vadd.f32 %v8491_v7, %v11406_v11  ;;  %v3401_v52 = vpop.f32.mrb[249].mxu1  ;;  %4024 = vmatmul.mubr.f32.gmra.mrb[98].mxu1 %v7461_v34  ;;  %v7563_v11 = vld [vmem:[%s9563_s15 + $0x16c8] sm:$0xff] }
 0x32f   : > { %v3402_v53 = vadd.f32 %v3401_v52, %v11394_v61  ;;  %v11518_v54 = vpop.f32.mrb[234].mxu0  ;;  %4028 = vmatprep.mubr.f32.mxu1 %v7465_v20  ;;  %v7467_v27 = vld [vmem:[%s9563_s15 + $0x1548] sm:$0xff]  ;;  %v7570_v52 = vld [vmem:[%s9563_s15 + $0x1700] sm:$0xff] }
 0x330   : > { %5610 = vrot.lane.b32.xlu1 %v3407_v31, %s9430_s21  ;;  %v3163_v3 = vpop.f32.mrb[235].mxu0  ;;  %4673 = vmatmul.mubr.f32.gmra.mrb[84].mxu0 %v7560_v5  ;;  %v7471_v7 = vld [vmem:[%s9563_s15 + $0x1568] sm:$0xff] }
 0x331   : > { %v8494_v14 = vpop.f32.mrb[250].mxu1  ;;  %5608 = vrot.lane.b32.xlu0 %v3402_v53, %s9430_s21  ;;  %4677 = vmatprep.mubr.f32.mxu0 %v7564_v25 }
 0x332   : > { %v3417_v60 = vadd.f32 %v8494_v14, %v11425_v38  ;;  %v3411_v61 = vpop.f32.mrb[251].mxu1  ;;  %4029 = vmatmul.mubr.f32.gmra.mrb[100].mxu1 %v7464_v13  ;;  %v7566_v38 = vld [vmem:[%s9563_s15 + $0x16e0] sm:$0xff] }
 0x333   : > { %v3412_v15 = vadd.f32 %v3411_v61, %v11416_v21  ;;  %v11528_v34 = vpop.f32.mrb[236].mxu0  ;;  %4033 = vmatprep.mubr.f32.mxu1 %v7468_v40  ;;  %v7470_v13 = vld [vmem:[%s9563_s15 + $0x1560] sm:$0xff] }
 0x334   : > { %5614 = vrot.lane.b32.xlu1 %v3417_v60, %s9430_s21  ;;  %v3168_v20 = vpop.f32.mrb[237].mxu0  ;;  %4678 = vmatmul.mubr.f32.gmra.mrb[86].mxu0 %v7563_v11  ;;  %v7474_v40 = vld [vmem:[%s9563_s15 + $0x1580] sm:$0xff]  ;;  %v7573_v60 = vld [vmem:[%s9563_s15 + $0x1718] sm:$0xff] }
 0x335   : > { %v8497_v5 = vpop.f32.mrb[252].mxu1  ;;  %5612 = vrot.lane.b32.xlu0 %v3412_v15, %s9430_s21  ;;  %4682 = vmatprep.mubr.f32.mxu0 %v7567_v37  ;;  %v7473_v15 = vld [vmem:[%s9563_s15 + $0x1578] sm:$0xff] }
 0x336   : > { %v3427_v31 = vadd.f32 %v8497_v5, %v11443_v2  ;;  %v3421_v21 = vpop.f32.mrb[253].mxu1  ;;  %4034 = vmatmul.mubr.f32.gmra.mrb[102].mxu1 %v7467_v27  ;;  %v7569_v2 = vld [vmem:[%s9563_s15 + $0x16f8] sm:$0xff] }
 0x337   : > { %v3422_v25 = vadd.f32 %v3421_v21, %v11434_v19  ;;  %v11538_v53 = vpop.f32.mrb[238].mxu0  ;;  %4038 = vmatprep.mubr.f32.mxu1 %v7471_v7  ;;  %v7477_v20 = vld [vmem:[%s9563_s15 + $0x1598] sm:$0xff] }
 0x338   : > { %5618 = vrot.lane.b32.xlu1 %v3427_v31, %s9430_s21  ;;  %v3173_v3 = vpop.f32.mrb[239].mxu0  ;;  %4683 = vmatmul.mubr.f32.gmra.mrb[88].mxu0 %v7566_v38  ;;  %v7576_v38 = vld [vmem:[%s9563_s15 + $0x1730] sm:$0xff] }
 0x339   : > { %v8500_v14 = vpop.f32.mrb[254].mxu1  ;;  %5616 = vrot.lane.b32.xlu0 %v3422_v25, %s9430_s21  ;;  %4687 = vmatprep.mubr.f32.mxu0 %v7570_v52  ;;  %v7476_v52 = vld [vmem:[%s9563_s15 + $0x1590] sm:$0xff] }
 0x33a   : > { %v3437_v11 = vadd.f32 %v8500_v14, %v11461_v29  ;;  %v3431_v19 = vpop.f32.mrb[255].mxu1  ;;  %4039 = vmatmul.mubr.f32.gmra.mrb[104].mxu1 %v7470_v13  ;;  %v7572_v29 = vld [vmem:[%s9563_s15 + $0x1710] sm:$0xff] }
 0x33b   : > { %v3432_v61 = vadd.f32 %v3431_v19, %v11452_v50  ;;  %v11548_v37 = vpop.f32.mrb[240].mxu0  ;;  %4043 = vmatprep.mubr.f32.mxu1 %v7474_v40  ;;  %v7480_v13 = vld [vmem:[%s9563_s15 + $0x15b0] sm:$0xff]  ;;  %v7479_v19 = vld [vmem:[%s9563_s15 + $0x15a8] sm:$0xff] }
 0x33c   : > { %5622 = vrot.lane.b32.xlu1 %v3437_v11, %s9430_s21  ;;  %v3178_v27 = vpop.f32.mrb[241].mxu0  ;;  %4688 = vmatmul.mubr.f32.gmra.mrb[90].mxu0 %v7569_v2 }
 0x33d   : > { %v8503_v7 = vpop.f32.mrb[0].mxu1  ;;  %5620 = vrot.lane.b32.xlu0 %v3432_v61, %s9430_s21  ;;  %4692 = vmatprep.mubr.f32.mxu0 %v7573_v60  ;;  %v7483_v61 = vld [vmem:[%s9563_s15 + $0x15c8] sm:$0xff] }
 0x33e   : > { %v3447_v5 = vadd.f32 %v8503_v7, %v11478_v23  ;;  %v3441_v50 = vpop.f32.mrb[1].mxu1  ;;  %4044 = vmatmul.mubr.f32.gmra.mrb[106].mxu1 %v7473_v15  ;;  %v7575_v23 = vld [vmem:[%s9563_s15 + $0x1728] sm:$0xff] }
 0x33f   : > { %v3442_v31 = vadd.f32 %v3441_v50, %v11470_v51  ;;  %v3181_v21 = vpop.f32.mrb[242].mxu0  ;;  %4048 = vmatprep.mubr.f32.mxu1 %v7477_v20  ;;  %v7579_v51 = vld [vmem:[%s9563_s15 + $0x1748] sm:$0xff]  ;;  %v7582_v20 = vld [vmem:[%s9563_s15 + $0x1760] sm:$0xff] }
 0x340   : > { %5626 = vrot.lane.b32.xlu1 %v3447_v5, %s9430_s21  ;;  %v3183_v25 = vpop.f32.mrb[243].mxu0  ;;  %4693 = vmatmul.mubr.f32.gmra.mrb[92].mxu0 %v7572_v29  ;;  %v7482_v5 = vld [vmem:[%s9563_s15 + $0x15c0] sm:$0xff] }
 0x341   : > { %v8506_v3 = vpop.f32.mrb[2].mxu1  ;;  %5624 = vrot.lane.b32.xlu0 %v3442_v31, %s9430_s21  ;;  %4697 = vmatprep.mubr.f32.mxu0 %v7576_v38  ;;  %v7486_v38 = vld [vmem:[%s9563_s15 + $0x15e0] sm:$0xff] }
 0x342   : > { %v3457_v40 = vadd.f32 %v8506_v3, %v11498_v56  ;;  %v3451_v14 = vpop.f32.mrb[3].mxu1  ;;  %4049 = vmatmul.mubr.f32.gmra.mrb[108].mxu1 %v7476_v52  ;;  %v7578_v56 = vld [vmem:[%s9563_s15 + $0x1740] sm:$0xff] }
 0x343   : > { %v3452_v2 = vadd.f32 %v3451_v14, %v11488_v4  ;;  %v11566_v11 = vpop.f32.mrb[244].mxu0  ;;  %4053 = vmatprep.mubr.f32.mxu1 %v7480_v13  ;;  %v7489_v14 = vld [vmem:[%s9563_s15 + $0x15f8] sm:$0xff] }
 0x344   : > { %5630 = vrot.lane.b32.xlu1 %v3457_v40, %s9430_s21  ;;  %v3188_v60 = vpop.f32.mrb[245].mxu0  ;;  %4698 = vmatmul.mubr.f32.gmra.mrb[94].mxu0 %v7575_v23  ;;  %v7485_v23 = vld [vmem:[%s9563_s15 + $0x15d8] sm:$0xff] }
 0x345   : > { %v8509_v15 = vpop.f32.mrb[4].mxu1  ;;  %5628 = vrot.lane.b32.xlu0 %v3452_v2, %s9430_s21  ;;  %4702 = vmatprep.mubr.f32.mxu0 %v7579_v51 }
 0x346   : > { %v3467_v27 = vadd.f32 %v8509_v15, %v11518_v54  ;;  %v3461_v4 = vpop.f32.mrb[5].mxu1  ;;  %4054 = vmatmul.mubr.f32.gmra.mrb[110].mxu1 %v7479_v19  ;;  %v7581_v54 = vld [vmem:[%s9563_s15 + $0x1758] sm:$0xff]  ;;  %v7488_v15 = vld [vmem:[%s9563_s15 + $0x15f0] sm:$0xff] }
 0x347   : > { %v3462_v7 = vadd.f32 %v3461_v4, %v11508_v57  ;;  %v3191_v29 = vpop.f32.mrb[246].mxu0  ;;  %4058 = vmatprep.mubr.f32.mxu1 %v7483_v61  ;;  %v7585_v57 = vld [vmem:[%s9563_s15 + $0x1778] sm:$0xff] }
 0x348   : > { %5634 = vrot.lane.b32.xlu1 %v3467_v27, %s9430_s21  ;;  %v3193_v50 = vpop.f32.mrb[247].mxu0  ;;  %4703 = vmatmul.mubr.f32.gmra.mrb[96].mxu0 %v7578_v56  ;;  %v7492_v27 = vld [vmem:[%s9563_s15 + $0x1610] sm:$0xff] }
 0x349   : > { %v8512_v31 = vpop.f32.mrb[6].mxu1  ;;  %5632 = vrot.lane.b32.xlu0 %v3462_v7, %s9430_s21  ;;  %4707 = vmatprep.mubr.f32.mxu0 %v7582_v20 }
 0x34a   : > { %v3477_v52 = vadd.f32 %v8512_v31, %v11538_v53  ;;  %v3471_v25 = vpop.f32.mrb[7].mxu1  ;;  %4059 = vmatmul.mubr.f32.gmra.mrb[112].mxu1 %v7482_v5  ;;  %v7584_v53 = vld [vmem:[%s9563_s15 + $0x1770] sm:$0xff] }
 0x34b   : > { %v3472_v13 = vadd.f32 %v3471_v25, %v11528_v34  ;;  %v3196_v3 = vpop.f32.mrb[248].mxu0  ;;  %4063 = vmatprep.mubr.f32.mxu1 %v7486_v38  ;;  %v7588_v34 = vld [vmem:[%s9563_s15 + $0x1790] sm:$0xff]  ;;  %v7491_v38 = vld [vmem:[%s9563_s15 + $0x1608] sm:$0xff] }
 0x34c   : > { %5638 = vrot.lane.b32.xlu1 %v3477_v52, %s9430_s21  ;;  %v3198_v40 = vpop.f32.mrb[249].mxu0  ;;  %4708 = vmatmul.mubr.f32.gmra.mrb[98].mxu0 %v7581_v54  ;;  %v7495_v54 = vld [vmem:[%s9563_s15 + $0x1628] sm:$0xff] }
 0x34d   : > { %v8515_v51 = vpop.f32.mrb[8].mxu1  ;;  %5636 = vrot.lane.b32.xlu0 %v3472_v13, %s9430_s21  ;;  %4712 = vmatprep.mubr.f32.mxu0 %v7585_v57  ;;  %v7494_v40 = vld [vmem:[%s9563_s15 + $0x1620] sm:$0xff] }
 0x34e   : > { %v3487_v2 = vadd.f32 %v8515_v51, %v3181_v21  ;;  %v3481_v19 = vpop.f32.mrb[9].mxu1  ;;  %4064 = vmatmul.mubr.f32.gmra.mrb[114].mxu1 %v7485_v23  ;;  %v7587_v21 = vld [vmem:[%s9563_s15 + $0x1788] sm:$0xff]  ;;  %v7498_v51 = vld [vmem:[%s9563_s15 + $0x1640] sm:$0xff] }
 0x34f   : > { %v3482_v60 = vadd.f32 %v3481_v19, %v11548_v37  ;;  %v3201_v61 = vpop.f32.mrb[250].mxu0  ;;  %4068 = vmatprep.mubr.f32.mxu1 %v7489_v14  ;;  %v7591_v37 = vld [vmem:[%s9563_s15 + $0x17a8] sm:$0xff] }
 0x350   : > { %5642 = vrot.lane.b32.xlu1 %v3487_v2, %s9430_s21  ;;  %v3203_v56 = vpop.f32.mrb[251].mxu0  ;;  %4713 = vmatmul.mubr.f32.gmra.mrb[100].mxu0 %v7584_v53  ;;  %v7593_v2 = vld [vmem:[%s9563_s15 + $0x17b8] sm:$0xff] }
 0x351   : > { %v8518_v4 = vpop.f32.mrb[10].mxu1  ;;  %5640 = vrot.lane.b32.xlu0 %v3482_v60, %s9430_s21  ;;  %4717 = vmatprep.mubr.f32.mxu0 %v7588_v34 }
 0x352   : > { %v3497_v20 = vadd.f32 %v8518_v4, %v3191_v29  ;;  %v3491_v7 = vpop.f32.mrb[11].mxu1  ;;  %4069 = vmatmul.mubr.f32.gmra.mrb[116].mxu1 %v7488_v15  ;;  %v7590_v29 = vld [vmem:[%s9563_s15 + $0x17a0] sm:$0xff]  ;;  %v7497_v15 = vld [vmem:[%s9563_s15 + $0x1638] sm:$0xff] }
 0x353   : > { %v3492_v5 = vadd.f32 %v3491_v7, %v11566_v11  ;;  %v3206_v50 = vpop.f32.mrb[252].mxu0  ;;  %4073 = vmatprep.mubr.f32.mxu1 %v7492_v27  ;;  %v7594_v11 = vld [vmem:[%s9563_s15 + $0x17c0] sm:$0xff]  ;;  %v7501_v27 = vld [vmem:[%s9563_s15 + $0x1658] sm:$0xff]  ;;  %v7600_v7 = vld [vmem:[%s9563_s15 + $0x17f0] sm:$0xff] }
 0x354   : > { %5646 = vrot.lane.b32.xlu1 %v3497_v20, %s9430_s21  ;;  %v3208_v31 = vpop.f32.mrb[253].mxu0  ;;  %4718 = vmatmul.mubr.f32.gmra.mrb[102].mxu0 %v7587_v21  ;;  %v7596_v21 = vld [vmem:[%s9563_s15 + $0x17d0] sm:$0xff] }
 0x355   : > { %v8521_v52 = vpop.f32.mrb[12].mxu1  ;;  %5644 = vrot.lane.b32.xlu0 %v3492_v5, %s9430_s21  ;;  %4722 = vmatprep.mubr.f32.mxu0 %v7591_v37 }
 0x356   : > { %v3507_v25 = vadd.f32 %v8521_v52, %v3201_v61  ;;  %v3501_v57 = vpop.f32.mrb[13].mxu1  ;;  %4074 = vmatmul.mubr.f32.gmra.mrb[118].mxu1 %v7491_v38 }
 0x357   : > { %v3502_v13 = vadd.f32 %v3501_v57, %v3196_v3  ;;  %v3211_v23 = vpop.f32.mrb[254].mxu0  ;;  %4078 = vmatprep.mubr.f32.mxu1 %v7495_v54  ;;  %v7597_v3 = vld [vmem:[%s9563_s15 + $0x17d8] sm:$0xff]  ;;  %v7504_v54 = vld [vmem:[%s9563_s15 + $0x1670] sm:$0xff]  ;;  %v7603_v57 = vld [vmem:[%s9563_s15 + $0x1808] sm:$0xff] }
 0x358   : > { %5650 = vrot.lane.b32.xlu1 %v3507_v25, %s9430_s21  ;;  %v3213_v14 = vpop.f32.mrb[255].mxu0  ;;  %4723 = vmatmul.mubr.f32.gmra.mrb[104].mxu0 %v7590_v29  ;;  %v7599_v29 = vld [vmem:[%s9563_s15 + $0x17e8] sm:$0xff] }
 0x359   : > { %v8524_v53 = vpop.f32.mrb[14].mxu1  ;;  %5648 = vrot.lane.b32.xlu0 %v3502_v13, %s9430_s21  ;;  %4727 = vmatprep.mubr.f32.mxu0 %v7594_v11  ;;  %v7503_v13 = vld [vmem:[%s9563_s15 + $0x1668] sm:$0xff]  ;;  %v7556_v14 = vld [vmem:[%s9563_s15 + $0x1690] sm:$0xff] }
 0x35a   : > { %v3517_v19 = vadd.f32 %v8524_v53, %v3211_v23  ;;  %v3511_v34 = vpop.f32.mrb[15].mxu1  ;;  %4079 = vmatmul.mubr.f32.gmra.mrb[120].mxu1 %v7494_v40 }
 0x35b   : > { %v3512_v60 = vadd.f32 %v3511_v34, %v3206_v50  ;;  %v3216_v61 = vpop.f32.mrb[0].mxu0  ;;  %4083 = vmatprep.mubr.f32.mxu1 %v7498_v51  ;;  %v7500_v50 = vld [vmem:[%s9563_s15 + $0x1650] sm:$0xff]  ;;  %v7602_v51 = vld [vmem:[%s9563_s15 + $0x1800] sm:$0xff] }
 0x35c   : > { %5654 = vrot.lane.b32.xlu1 %v3517_v19, %s9430_s21  ;;  %v3218_v56 = vpop.f32.mrb[1].mxu0  ;;  %4728 = vmatmul.mubr.f32.gmra.mrb[106].mxu0 %v7593_v2  ;;  %v7606_v19 = vld [vmem:[%s9563_s15 + $0x1820] sm:$0xff] }
 0x35d   : > { %v8527_v4 = vpop.f32.mrb[16].mxu1  ;;  %5652 = vrot.lane.b32.xlu0 %v3512_v60, %s9430_s21  ;;  %4732 = vmatprep.mubr.f32.mxu0 %v7597_v3  ;;  %v7559_v3 = vld [vmem:[%s9563_s15 + $0x16a8] sm:$0xff]  ;;  %v7605_v56 = vld [vmem:[%s9563_s15 + $0x1818] sm:$0xff] }
 0x35e   : > { %v3521_v20 = vpop.f32.mrb[17].mxu1  ;;  %4084 = vmatmul.mubr.f32.gmra.mrb[122].mxu1 %v7497_v15  ;;  %v7562_v15 = vld [vmem:[%s9563_s15 + $0x16c0] sm:$0xff] }
 0x35f   : > { %v3522_v37 = vadd.f32 %v3521_v20, %v3216_v61  ;;  %v3221_v5 = vpop.f32.mrb[2].mxu0  ;;  %4088 = vmatprep.mubr.f32.mxu1 %v7501_v27 }
 0x360   : > { %v3527_v38 = vadd.f32 %v8527_v4, %v3221_v5  ;;  %v3223_v31 = vpop.f32.mrb[3].mxu0  ;;  %4733 = vmatmul.mubr.f32.gmra.mrb[108].mxu0 %v7596_v21  ;;  %v7609_v4 = vld [vmem:[%s9563_s15 + $0x1838] sm:$0xff] }
 0x361   : > { %5656 = vrot.lane.b32.xlu0 %v3522_v37, %s9430_s21  ;;  %v8530_v52 = vpop.f32.mrb[18].mxu1  ;;  %4737 = vmatprep.mubr.f32.mxu0 %v7600_v7  ;;  %v7565_v7 = vld [vmem:[%s9563_s15 + $0x16d8] sm:$0xff] }
 0x362   : > { %4089 = vmatmul.mubr.f32.gmra.mrb[124].mxu1 %v7500_v50  ;;  %5658 = vrot.lane.b32.xlu1 %v3527_v38, %s9430_s21  ;;  %v3531_v25 = vpop.f32.mrb[19].mxu1  ;;  %v7568_v50 = vld [vmem:[%s9563_s15 + $0x16f0] sm:$0xff] }
 0x363   : > { %v3226_v11 = vpop.f32.mrb[4].mxu0  ;;  %4093 = vmatprep.mubr.f32.mxu1 %v7504_v54  ;;  %v7608_v38 = vld [vmem:[%s9563_s15 + $0x1830] sm:$0xff] }
 0x364   : > { %v3532_v23 = vadd.f32 %v3531_v25, %v3226_v11  ;;  %v3228_v40 = vpop.f32.mrb[5].mxu0  ;;  %4738 = vmatmul.mubr.f32.gmra.mrb[110].mxu0 %v7599_v29  ;;  %v7612_v54 = vld [vmem:[%s9563_s15 + $0x1850] sm:$0xff]  ;;  %v7571_v25 = vld [vmem:[%s9563_s15 + $0x1708] sm:$0xff] }
 0x365   : > { %4742 = vmatprep.mubr.f32.mxu0 %v7603_v57  ;;  %v8533_v53 = vpop.f32.mrb[20].mxu1 }
 0x366   : > { %4094 = vmatmul.mubr.f32.gmra.mrb[126].mxu1 %v7503_v13  ;;  %5660 = vrot.lane.b32.xlu0 %v3532_v23, %s9430_s21  ;;  %v3541_v2 = vpop.f32.mrb[21].mxu1  ;;  %v7574_v13 = vld [vmem:[%s9563_s15 + $0x1720] sm:$0xff]  ;;  %v7611_v23 = vld [vmem:[%s9563_s15 + $0x1848] sm:$0xff] }
 0x367   : > { %v3231_v34 = vpop.f32.mrb[6].mxu0  ;;  %8685 = vmatprep.mubr.f32.mxu1 %v7556_v14  ;;  %v7615_v14 = vld [vmem:[%s9563_s15 + $0x1868] sm:$0xff] }
 0x368   : > { %v3537_v60 = vadd.f32 %v8530_v52, %v3231_v34  ;;  %v3233_v61 = vpop.f32.mrb[7].mxu0  ;;  %4743 = vmatmul.mubr.f32.gmra.mrb[112].mxu0 %v7602_v51 }
 0x369   : > { %4747 = vmatprep.mubr.f32.mxu0 %v7606_v19  ;;  %v8536_v27 = vpop.f32.mrb[22].mxu1  ;;  %v7577_v19 = vld [vmem:[%s9563_s15 + $0x1738] sm:$0xff] }
 0x36a   : > { %8686 = vmatmul.mubr.f32.vlgmr.msra.gmra.mrb[128].mxu1 %v7559_v3  ;;  %5662 = vrot.lane.b32.xlu1 %v3537_v60, %s9430_s21  ;;  %v3551_v21 = vpop.f32.mrb[23].mxu1  ;;  %v7580_v3 = vld [vmem:[%s9563_s15 + $0x1750] sm:$0xff]  ;;  %v7614_v60 = vld [vmem:[%s9563_s15 + $0x1860] sm:$0xff] }
 0x36b   : > { %v3236_v20 = vpop.f32.mrb[8].mxu0  ;;  %8688 = vmatprep.mubr.f32.mxu1 %v7562_v15  ;;  %v7618_v15 = vld [vmem:[%s9563_s15 + $0x1880] sm:$0xff] }
 0x36c   : > { %v3542_v37 = vadd.f32 %v3541_v2, %v3236_v20  ;;  %v3238_v5 = vpop.f32.mrb[9].mxu0  ;;  %4748 = vmatmul.mubr.f32.gmra.mrb[114].mxu0 %v7605_v56 }
 0x36d   : > { %4752 = vmatprep.mubr.f32.mxu0 %v7609_v4  ;;  %v11635_v31 = vpop.f32.mrb[24].mxu1  ;;  %v7617_v5 = vld [vmem:[%s9563_s15 + $0x1878] sm:$0xff] }
 0x36e   : > { %8689 = vmatmul.mubr.f32.gmra.mrb[130].mxu1 %v7565_v7  ;;  %5664 = vrot.lane.b32.xlu0 %v3542_v37, %s9430_s21  ;;  %v3561_v52 = vpop.f32.mrb[25].mxu1  ;;  %v7586_v37 = vld [vmem:[%s9563_s15 + $0x1780] sm:$0xff] }
 0x36f   : > { %v3241_v29 = vpop.f32.mrb[10].mxu0  ;;  %8691 = vmatprep.mubr.f32.mxu1 %v7568_v50 }
 0x370   : > { %v3547_v57 = vadd.f32 %v8533_v53, %v3241_v29  ;;  %v3243_v11 = vpop.f32.mrb[11].mxu0  ;;  %4753 = vmatmul.mubr.f32.gmra.mrb[116].mxu0 %v7608_v38  ;;  %v7621_v38 = vld [vmem:[%s9563_s15 + $0x1898] sm:$0xff] }
 0x371   : > { %4757 = vmatprep.mubr.f32.mxu0 %v7612_v54  ;;  %v11642_v40 = vpop.f32.mrb[26].mxu1  ;;  %v7592_v11 = vld [vmem:[%s9563_s15 + $0x17b0] sm:$0xff] }
 0x372   : > { %8692 = vmatmul.mubr.f32.gmra.mrb[132].mxu1 %v7571_v25  ;;  %5666 = vrot.lane.b32.xlu1 %v3547_v57, %s9430_s21  ;;  %v3571_v51 = vpop.f32.mrb[27].mxu1 }
 0x373   : > { %v3246_v2 = vpop.f32.mrb[12].mxu0  ;;  %8694 = vmatprep.mubr.f32.mxu1 %v7574_v13  ;;  %v7620_v13 = vld [vmem:[%s9563_s15 + $0x1890] sm:$0xff] }
 0x374   : > { %v3552_v53 = vadd.f32 %v3551_v21, %v3246_v2  ;;  %v3248_v34 = vpop.f32.mrb[13].mxu0  ;;  %4758 = vmatmul.mubr.f32.gmra.mrb[118].mxu0 %v7611_v23  ;;  %v7583_v21 = vld [vmem:[%s9563_s15 + $0x1768] sm:$0xff] }
 0x375   : > { %4762 = vmatprep.mubr.f32.mxu0 %v7615_v14  ;;  %v11649_v61 = vpop.f32.mrb[28].mxu1  ;;  %v7624_v14 = vld [vmem:[%s9563_s15 + $0x18b0] sm:$0xff] }
 0x376   : > { %8695 = vmatmul.mubr.f32.gmra.mrb[134].mxu1 %v7577_v19  ;;  %5668 = vrot.lane.b32.xlu0 %v3552_v53, %s9430_s21  ;;  %v11653_v56 = vpop.f32.mrb[29].mxu1  ;;  %v7595_v53 = vld [vmem:[%s9563_s15 + $0x17c8] sm:$0xff] }
 0x377   : > { %v3251_v4 = vpop.f32.mrb[14].mxu0  ;;  %8697 = vmatprep.mubr.f32.mxu1 %v7580_v3  ;;  %v7598_v3 = vld [vmem:[%s9563_s15 + $0x17e0] sm:$0xff] }
 0x378   : > { %v3557_v20 = vadd.f32 %v8536_v27, %v3251_v4  ;;  %v3253_v7 = vpop.f32.mrb[15].mxu0  ;;  %4763 = vmatmul.mubr.f32.gmra.mrb[120].mxu0 %v7614_v60  ;;  %v7589_v27 = vld [vmem:[%s9563_s15 + $0x1798] sm:$0xff]  ;;  %v7623_v60 = vld [vmem:[%s9563_s15 + $0x18a8] sm:$0xff] }
 0x379   : > { %4767 = vmatprep.mubr.f32.mxu0 %v7618_v15  ;;  %v11658_v50 = vpop.f32.mrb[30].mxu1  ;;  %v7627_v4 = vld [vmem:[%s9563_s15 + $0x18c8] sm:$0xff]  ;;  %v7601_v7 = vld [vmem:[%s9563_s15 + $0x17f8] sm:$0xff] }
 0x37a   : > { %8698 = vmatmul.mubr.f32.gmra.mrb[136].mxu1 %v7583_v21  ;;  %5670 = vrot.lane.b32.xlu1 %v3557_v20, %s9430_s21  ;;  %v11662_v54 = vpop.f32.mrb[31].mxu1 }
 0x37b   : > { %v3256_v29 = vpop.f32.mrb[16].mxu0  ;;  %8700 = vmatprep.mubr.f32.mxu1 %v7586_v37 }
 0x37c   : > { %v3562_v25 = vadd.f32 %v3561_v52, %v3256_v29  ;;  %v3258_v57 = vpop.f32.mrb[17].mxu0  ;;  %4768 = vmatmul.mubr.f32.gmra.mrb[122].mxu0 %v7617_v5  ;;  %v7604_v5 = vld [vmem:[%s9563_s15 + $0x1810] sm:$0xff] }
 0x37d   : > { %4772 = vmatprep.mubr.f32.mxu0 %v7621_v38  ;;  %v11667_v23 = vpop.f32.mrb[32].mxu1  ;;  %v7626_v38 = vld [vmem:[%s9563_s15 + $0x18c0] sm:$0xff] }
 0x37e   : > { %8701 = vmatmul.mubr.f32.gmra.mrb[138].mxu1 %v7589_v27  ;;  %5672 = vrot.lane.b32.xlu0 %v3562_v25, %s9430_s21  ;;  %v3862_v2 = vpop.f32.mrb[33].mxu1  ;;  %v7630_v27 = vld [vmem:[%s9563_s15 + $0x18e0] sm:$0xff] }
 0x37f   : > { %v3261_v19 = vpop.f32.mrb[18].mxu0  ;;  %8703 = vmatprep.mubr.f32.mxu1 %v7592_v11  ;;  %v7607_v11 = vld [vmem:[%s9563_s15 + $0x1828] sm:$0xff]  ;;  %v7629_v2 = vld [vmem:[%s9563_s15 + $0x18d8] sm:$0xff] }
 0x380   : > { %v3567_v52 = vadd.f32 %v11635_v31, %v3261_v19  ;;  %v3263_v34 = vpop.f32.mrb[19].mxu0  ;;  %4773 = vmatmul.mubr.f32.gmra.mrb[124].mxu0 %v7620_v13 }
 0x381   : > { %4777 = vmatprep.mubr.f32.mxu0 %v7624_v14  ;;  %v11675_v15 = vpop.f32.mrb[34].mxu1  ;;  %v7610_v14 = vld [vmem:[%s9563_s15 + $0x1840] sm:$0xff] }
 0x382   : > { %8704 = vmatmul.mubr.f32.gmra.mrb[140].mxu1 %v7595_v53  ;;  %5674 = vrot.lane.b32.xlu1 %v3567_v52, %s9430_s21  ;;  %v3867_v21 = vpop.f32.mrb[35].mxu1  ;;  %v7633_v53 = vld [vmem:[%s9563_s15 + $0x18f8] sm:$0xff] }
 0x383   : > { %v3266_v20 = vpop.f32.mrb[20].mxu0  ;;  %8706 = vmatprep.mubr.f32.mxu1 %v7598_v3  ;;  %v7613_v3 = vld [vmem:[%s9563_s15 + $0x1858] sm:$0xff]  ;;  %v7632_v21 = vld [vmem:[%s9563_s15 + $0x18f0] sm:$0xff] }
 0x384   : > { %v3572_v31 = vadd.f32 %v3571_v51, %v3266_v20  ;;  %v3268_v37 = vpop.f32.mrb[21].mxu0  ;;  %4778 = vmatmul.mubr.f32.gmra.mrb[126].mxu0 %v7623_v60 }
 0x385   : > { %4782 = vmatprep.mubr.f32.mxu0 %v7627_v4  ;;  %v11682_v29 = vpop.f32.mrb[36].mxu1  ;;  %v7616_v4 = vld [vmem:[%s9563_s15 + $0x1870] sm:$0xff] }
 0x386   : > { %8707 = vmatmul.mubr.f32.gmra.mrb[142].mxu1 %v7601_v7  ;;  %5676 = vrot.lane.b32.xlu0 %v3572_v31, %s9430_s21  ;;  %v3872_v25 = vpop.f32.mrb[37].mxu1  ;;  %v7636_v7 = vld [vmem:[%s9563_s15 + $0x1910] sm:$0xff] }
 0x387   : > { %v3271_v57 = vpop.f32.mrb[22].mxu0  ;;  %8709 = vmatprep.mubr.f32.mxu1 %v7604_v5  ;;  %v7619_v5 = vld [vmem:[%s9563_s15 + $0x1888] sm:$0xff] }
 0x388   : > { %v3577_v51 = vadd.f32 %v11642_v40, %v3271_v57  ;;  %v3273_v13 = vpop.f32.mrb[23].mxu0  ;;  %4783 = vmatmul.mubr.f32.gmra.mrb[128].mxu0 %v7626_v38  ;;  %v7635_v25 = vld [vmem:[%s9563_s15 + $0x1908] sm:$0xff] }
 0x389   : > { %4787 = vmatprep.mubr.f32.mxu0 %v7630_v27  ;;  %v11690_v19 = vpop.f32.mrb[38].mxu1  ;;  %v7622_v27 = vld [vmem:[%s9563_s15 + $0x18a0] sm:$0xff] }
 0x38a   : > { %8710 = vmatmul.mubr.f32.gmra.mrb[144].mxu1 %v7607_v11  ;;  %5678 = vrot.lane.b32.xlu1 %v3577_v51, %s9430_s21  ;;  %v3877_v52 = vpop.f32.mrb[39].mxu1  ;;  %v7639_v51 = vld [vmem:[%s9563_s15 + $0x1928] sm:$0xff] }
 0x38b   : > { %v3276_v34 = vpop.f32.mrb[24].mxu0  ;;  %8712 = vmatprep.mubr.f32.mxu1 %v7610_v14 }
 0x38c   : > { %v3582_v40 = vadd.f32 %v11653_v56, %v3276_v34  ;;  %v3278_v60 = vpop.f32.mrb[25].mxu0  ;;  %4788 = vmatmul.mubr.f32.gmra.mrb[130].mxu0 %v7629_v2 }
 0x38d   : > { %4792 = vmatprep.mubr.f32.mxu0 %v7633_v53  ;;  %v11698_v20 = vpop.f32.mrb[40].mxu1  ;;  %v7625_v53 = vld [vmem:[%s9563_s15 + $0x18b8] sm:$0xff]  ;;  %v7638_v60 = vld [vmem:[%s9563_s15 + $0x1920] sm:$0xff] }
 0x38e   : > { %8713 = vmatmul.mubr.f32.gmra.mrb[146].mxu1 %v7613_v3  ;;  %5680 = vrot.lane.b32.xlu0 %v3582_v40, %s9430_s21  ;;  %v3882_v31 = vpop.f32.mrb[41].mxu1  ;;  %v7628_v40 = vld [vmem:[%s9563_s15 + $0x18d0] sm:$0xff] }
 0x38f   : > { %v3281_v37 = vpop.f32.mrb[26].mxu0  ;;  %8715 = vmatprep.mubr.f32.mxu1 %v7616_v4 }
 0x390   : > { %v3587_v56 = vadd.f32 %v11649_v61, %v3281_v37  ;;  %v3283_v38 = vpop.f32.mrb[27].mxu0  ;;  %4793 = vmatmul.mubr.f32.gmra.mrb[132].mxu0 %v7632_v21  ;;  %v7631_v37 = vld [vmem:[%s9563_s15 + $0x18e8] sm:$0xff] }
 0x391   : > { %4797 = vmatprep.mubr.f32.mxu0 %v7636_v7  ;;  %v11706_v57 = vpop.f32.mrb[42].mxu1 }
 0x392   : > { %8716 = vmatmul.mubr.f32.gmra.mrb[148].mxu1 %v7619_v5  ;;  %v5595_v11 = vpop.permute.xlu1 %5594  ;;  %5682 = vrot.lane.b32.xlu1 %v3587_v56, %s9430_s21  ;;  %v3887_v13 = vpop.f32.mrb[43].mxu1 }
 0x393   : > { %v5978_v61 = vsel %vm5928_vm0, %v10870_v26, %v5595_v11  ;;  %v5593_v14 = vpop.permute.xlu0 %5592  ;;  %v3286_v2 = vpop.f32.mrb[28].mxu0  ;;  %8718 = vmatprep.mubr.f32.mxu1 %v7622_v27  ;;  %v7634_v27 = vld [vmem:[%s9563_s15 + $0x1900] sm:$0xff] }
 0x394   : > { %6512 = vst [vmem:[%s10942_s19 + $0x20] sm:$0xff] %v5978_v61  ;;  %v5977_v52 = vsel %vm5928_vm0, %v10874_v10, %v5593_v14  ;;  %v3592_v34 = vadd.f32 %v11662_v54, %v3286_v2  ;;  %v3288_v3 = vpop.f32.mrb[29].mxu0  ;;  %4798 = vmatmul.mubr.f32.gmra.mrb[134].mxu0 %v7635_v25  ;;  %v7642_v10 = vld [vmem:[%s9563_s15 + $0x1940] sm:$0xff]  ;;  %v7641_v25 = vld [vmem:[%s9563_s15 + $0x1938] sm:$0xff] }
 0x395   : > { %6509 = vst [vmem:[%s10942_s19 + $0x8] sm:$0xff] %v5977_v52  ;;  %4802 = vmatprep.mubr.f32.mxu0 %v7639_v51  ;;  %v11720_v26 = vpop.f32.mrb[44].mxu1  ;;  %v7645_v51 = vld [vmem:[%s9563_s15 + $0x1958] sm:$0xff]  ;;  %v7644_v3 = vld [vmem:[%s9563_s15 + $0x1950] sm:$0xff] }
 0x396   : > { %8719 = vmatmul.mubr.f32.gmra.mrb[150].mxu1 %v7625_v53  ;;  %v5599_v4 = vpop.permute.xlu1 %5598  ;;  %5684 = vrot.lane.b32.xlu0 %v3592_v34, %s9430_s21  ;;  %v3892_v21 = vpop.f32.mrb[45].mxu1  ;;  %v7637_v14 = vld [vmem:[%s9563_s15 + $0x1918] sm:$0xff]  ;;  %v7640_v34 = vld [vmem:[%s9563_s15 + $0x1930] sm:$0xff] }
 0x397   : > { %v5980_v54 = vsel %vm5928_vm0, %v10886_v9, %v5599_v4  ;;  %v5597_v7 = vpop.permute.xlu0 %5596  ;;  %v3291_v31 = vpop.f32.mrb[30].mxu0  ;;  %8721 = vmatprep.mubr.f32.mxu1 %v7628_v40 }
 0x398   : > { %6518 = vst [vmem:[%s10942_s19 + $0x50] sm:$0xff] %v5980_v54  ;;  %v5979_v5 = vsel %vm5928_vm0, %v10890_v63, %v5597_v7  ;;  %v3597_v56 = vadd.f32 %v11658_v50, %v3291_v31  ;;  %v3293_v38 = vpop.f32.mrb[31].mxu0  ;;  %4803 = vmatmul.mubr.f32.gmra.mrb[136].mxu0 %v7638_v60  ;;  %v7648_v60 = vld [vmem:[%s9563_s15 + $0x1970] sm:$0xff] }
 0x399   : > { %6515 = vst [vmem:[%s10942_s19 + $0x38] sm:$0xff] %v5979_v5  ;;  %4807 = vmatprep.mubr.f32.mxu0 %v7642_v10  ;;  %v11734_v9 = vpop.f32.mrb[46].mxu1  ;;  %v7647_v5 = vld [vmem:[%s9563_s15 + $0x1968] sm:$0xff] }
 0x39a   : > { %8722 = vmatmul.mubr.f32.gmra.mrb[152].mxu1 %v7631_v37  ;;  %v5603_v11 = vpop.permute.xlu1 %5602  ;;  %5686 = vrot.lane.b32.xlu1 %v3597_v56, %s9430_s21  ;;  %v3897_v63 = vpop.f32.mrb[47].mxu1  ;;  %v7646_v37 = vld [vmem:[%s9563_s15 + $0x1960] sm:$0xff] }
 0x39b   : > { %v5982_v50 = vsel %vm5928_vm0, %v10901_v42, %v5603_v11  ;;  %v5601_v13 = vpop.permute.xlu0 %5600  ;;  %v8583_v61 = vpop.f32.mrb[32].mxu0  ;;  %8724 = vmatprep.mubr.f32.mxu1 %v7634_v27 }
 0x39c   : > { %6524 = vst [vmem:[%s10942_s19 + $0x80] sm:$0xff] %v5982_v50  ;;  %v5981_v2 = vsel %vm5928_vm0, %v10905_v17, %v5601_v13  ;;  %v11745_v53 = vadd.f32 %v8583_v61, %v11675_v15  ;;  %v4165_v52 = vpop.f32.mrb[33].mxu0  ;;  %4808 = vmatmul.mubr.f32.gmra.mrb[138].mxu0 %v7641_v25  ;;  %v7652_v13 = vld [vmem:[%s9563_s15 + $0x1990] sm:$0xff]  ;;  %v7650_v61 = vld [vmem:[%s9563_s15 + $0x1980] sm:$0xff] }
 0x39d   : > { %6521 = vst [vmem:[%s10942_s19 + $0x68] sm:$0xff] %v5981_v2  ;;  %v11750_v42 = vadd.f32 %v4165_v52, %v11667_v23  ;;  %4812 = vmatprep.mubr.f32.mxu0 %v7645_v51  ;;  %v11753_v40 = vpop.f32.mrb[48].mxu1  ;;  %v7643_v23 = vld [vmem:[%s9563_s15 + $0x1948] sm:$0xff]  ;;  %v7649_v51 = vld [vmem:[%s9563_s15 + $0x1978] sm:$0xff] }
 0x39e   : > { %8725 = vmatmul.mubr.f32.gmra.mrb[154].mxu1 %v7637_v14  ;;  %v5607_v17 = vpop.permute.xlu1 %5606  ;;  %v3902_v15 = vpop.f32.mrb[49].mxu1 }
 0x39f   : > { %v5984_v4 = vsel %vm5928_vm0, %v10914_v30, %v5607_v17  ;;  %v5605_v10 = vpop.permute.xlu0 %5604  ;;  %v8586_v21 = vpop.f32.mrb[34].mxu0  ;;  %8727 = vmatprep.mubr.f32.mxu1 %v7640_v34  ;;  %v7655_v17 = vld [vmem:[%s9563_s15 + $0x19a8] sm:$0xff] }
 0x3a0   : > { %6530 = vst [vmem:[%s10942_s19 + $0xb0] sm:$0xff] %v5984_v4  ;;  %v5983_v54 = vsel %vm5928_vm0, %v10918_v12, %v5605_v10  ;;  %v11763_v7 = vadd.f32 %v8586_v21, %v11690_v19  ;;  %v4175_v31 = vpop.f32.mrb[35].mxu0  ;;  %4813 = vmatmul.mubr.f32.gmra.mrb[140].mxu0 %v7644_v3  ;;  %v7651_v12 = vld [vmem:[%s9563_s15 + $0x1988] sm:$0xff]  ;;  %v7658_v4 = vld [vmem:[%s9563_s15 + $0x19c0] sm:$0xff]  ;;  %v7653_v10 = vld [vmem:[%s9563_s15 + $0x1998] sm:$0xff] }
 0x3a1   : > { %6527 = vst [vmem:[%s10942_s19 + $0x98] sm:$0xff] %v5983_v54  ;;  %v11768_v30 = vadd.f32 %v4175_v31, %v11682_v29  ;;  %4817 = vmatprep.mubr.f32.mxu0 %v7648_v60  ;;  %v3905_v56 = vpop.f32.mrb[50].mxu1 }
 0x3a2   : > { %8728 = vmatmul.mubr.f32.gmra.mrb[156].mxu1 %v7643_v23  ;;  %v5611_v38 = vpop.permute.xlu1 %5610  ;;  %v3907_v19 = vpop.f32.mrb[51].mxu1 }
 0x3a3   : > { %v5986_v27 = vsel %vm5928_vm0, %v10925_v62, %v5611_v38  ;;  %v5609_v25 = vpop.permute.xlu0 %5608  ;;  %v8589_v11 = vpop.f32.mrb[36].mxu0  ;;  %8730 = vmatprep.mubr.f32.mxu1 %v7646_v37  ;;  %v7664_v19 = vld [vmem:[%s9563_s15 + $0x19f0] sm:$0xff] }
 0x3a4   : > { %6536 = vst [vmem:[%s10942_s19 + $0xe0] sm:$0xff] %v5986_v27  ;;  %v5985_v29 = vsel %vm5928_vm0, %v10929_v36, %v5609_v25  ;;  %v11779_v63 = vadd.f32 %v8589_v11, %v11706_v57  ;;  %v4185_v50 = vpop.f32.mrb[37].mxu0  ;;  %4818 = vmatmul.mubr.f32.gmra.mrb[142].mxu0 %v7647_v5  ;;  %v7654_v36 = vld [vmem:[%s9563_s15 + $0x19a0] sm:$0xff]  ;;  %v7661_v5 = vld [vmem:[%s9563_s15 + $0x19d8] sm:$0xff] }
 0x3a5   : > { %6533 = vst [vmem:[%s10942_s19 + $0xc8] sm:$0xff] %v5985_v29  ;;  %v11784_v62 = vadd.f32 %v4185_v50, %v11698_v20  ;;  %4822 = vmatprep.mubr.f32.mxu0 %v7651_v12  ;;  %v3910_v14 = vpop.f32.mrb[52].mxu1 }
 0x3a6   : > { %8731 = vmatmul.mubr.f32.gmra.mrb[158].mxu1 %v7649_v51  ;;  %v5615_v2 = vpop.permute.xlu1 %5614  ;;  %v3912_v57 = vpop.f32.mrb[53].mxu1 }
 0x3a7   : > { %v5988_v52 = vsel %vm5928_vm0, %v10934_v16, %v5615_v2  ;;  %v5613_v34 = vpop.permute.xlu0 %5612  ;;  %v8592_v3 = vpop.f32.mrb[38].mxu0  ;;  %8733 = vmatprep.mubr.f32.mxu1 %v7652_v13  ;;  %v7667_v13 = vld [vmem:[%s9563_s15 + $0x1a08] sm:$0xff] }
 0x3a8   : > { %6542 = vst [vmem:[%s10942_s19 + $0x110] sm:$0xff] %v5988_v52  ;;  %v5987_v20 = vsel %vm5928_vm0, %v10939_v33, %v5613_v34  ;;  %v11795_v60 = vadd.f32 %v8592_v3, %v11734_v9  ;;  %v4195_v15 = vpop.f32.mrb[39].mxu0  ;;  %4823 = vmatmul.mubr.f32.gmra.mrb[144].mxu0 %v7650_v61  ;;  %v7657_v33 = vld [vmem:[%s9563_s15 + $0x19b8] sm:$0xff]  ;;  %v7659_v52 = vld [vmem:[%s9563_s15 + $0x19c8] sm:$0xff] }
 0x3a9   : > { %6539 = vst [vmem:[%s10942_s19 + $0xf8] sm:$0xff] %v5987_v20  ;;  %v11800_v16 = vadd.f32 %v4195_v15, %v11720_v26  ;;  %4827 = vmatprep.mubr.f32.mxu0 %v7654_v36  ;;  %v3915_v21 = vpop.f32.mrb[54].mxu1  ;;  %v7670_v36 = vld [vmem:[%s9563_s15 + $0x1a20] sm:$0xff] }
 0x3aa   : > { %8734 = vmatmul.mubr.f32.gmra.mrb[160].mxu1 %v7655_v17  ;;  %v5619_v23 = vpop.permute.xlu1 %5618  ;;  %v3917_v9 = vpop.f32.mrb[55].mxu1  ;;  %v7663_v17 = vld [vmem:[%s9563_s15 + $0x19e8] sm:$0xff] }
 0x3ab   : > { %v5990_v54 = vsel %vm5928_vm0, %v10947_v46, %v5619_v23  ;;  %v5617_v31 = vpop.permute.xlu0 %5616  ;;  %v8595_v37 = vpop.f32.mrb[40].mxu0  ;;  %8736 = vmatprep.mubr.f32.mxu1 %v7658_v4  ;;  %v7656_v46 = vld [vmem:[%s9563_s15 + $0x19b0] sm:$0xff]  ;;  %v7673_v4 = vld [vmem:[%s9563_s15 + $0x1a38] sm:$0xff]  ;;  %v7662_v9 = vld [vmem:[%s9563_s15 + $0x19e0] sm:$0xff] }
 0x3ac   : > { %6548 = vst [vmem:[%s10942_s19 + $0x140] sm:$0xff] %v5990_v54  ;;  %v5989_v26 = vsel %vm5928_vm0, %v10952_v55, %v5617_v31  ;;  %v11810_v38 = vadd.f32 %v8595_v37, %v3905_v56  ;;  %v4205_v12 = vpop.f32.mrb[41].mxu0  ;;  %4828 = vmatmul.mubr.f32.gmra.mrb[146].mxu0 %v7653_v10  ;;  %v7660_v55 = vld [vmem:[%s9563_s15 + $0x19d0] sm:$0xff]  ;;  %v7666_v37 = vld [vmem:[%s9563_s15 + $0x1a00] sm:$0xff] }
 0x3ad   : > { %6545 = vst [vmem:[%s10942_s19 + $0x128] sm:$0xff] %v5989_v26  ;;  %v11815_v27 = vadd.f32 %v4205_v12, %v11753_v40  ;;  %4832 = vmatprep.mubr.f32.mxu0 %v7657_v33  ;;  %v3920_v25 = vpop.f32.mrb[56].mxu1  ;;  %v7676_v23 = vld [vmem:[%s9563_s15 + $0x1a50] sm:$0xff]  ;;  %v7679_v12 = vld [vmem:[%s9563_s15 + $0x1a68] sm:$0xff] }
 0x3ae   : > { %v5623_v11 = vpop.permute.xlu1 %5622  ;;  %8737 = vmatmul.mubr.f32.gmra.mrb[162].mxu1 %v7661_v5  ;;  %v3922_v51 = vpop.f32.mrb[57].mxu1 }
 0x3af   : > { %v5992_v56 = vsel %vm5928_vm0, %v10967_v47, %v5623_v11  ;;  %v5621_v29 = vpop.permute.xlu0 %5620  ;;  %v8598_v50 = vpop.f32.mrb[42].mxu0  ;;  %8739 = vmatprep.mubr.f32.mxu1 %v7664_v19 }
 0x3b0   : > { %6554 = vst [vmem:[%s10942_s19 + $0x170] sm:$0xff] %v5992_v56  ;;  %v5991_v40 = vsel %vm5928_vm0, %v10962_v48, %v5621_v29  ;;  %v11825_v61 = vadd.f32 %v8598_v50, %v3915_v21  ;;  %v4215_v2 = vpop.f32.mrb[43].mxu0  ;;  %4833 = vmatmul.mubr.f32.gmra.mrb[148].mxu0 %v7656_v46  ;;  %v7669_v50 = vld [vmem:[%s9563_s15 + $0x1a18] sm:$0xff] }
 0x3b1   : > { %6551 = vst [vmem:[%s10942_s19 + $0x158] sm:$0xff] %v5991_v40  ;;  %v11829_v57 = vadd.f32 %v4215_v2, %v3910_v14  ;;  %4837 = vmatprep.mubr.f32.mxu0 %v7660_v55  ;;  %v3925_v47 = vpop.f32.mrb[58].mxu1  ;;  %v7685_v2 = vld [vmem:[%s9563_s15 + $0x1a98] sm:$0xff] }
 0x3b2   : > { %v5627_v34 = vpop.permute.xlu1 %5626  ;;  %v3927_v3 = vpop.f32.mrb[59].mxu1  ;;  %8740 = vmatmul.mubr.f32.gmra.mrb[164].mxu1 %v7667_v13 }
 0x3b3   : > { %v5994_v48 = vsel %vm5928_vm0, %v10991_v8, %v5627_v34  ;;  %v5625_v20 = vpop.permute.xlu0 %5624  ;;  %v8601_v15 = vpop.f32.mrb[44].mxu0  ;;  %8742 = vmatprep.mubr.f32.mxu1 %v7670_v36  ;;  %v7668_v3 = vld [vmem:[%s9563_s15 + $0x1a10] sm:$0xff] }
 0x3b4   : > { %6560 = vst [vmem:[%s10942_s19 + $0x1a0] sm:$0xff] %v5994_v48  ;;  %v5993_v14 = vsel %vm5928_vm0, %v10979_v39, %v5625_v20  ;;  %v11839_v10 = vadd.f32 %v8601_v15, %v3925_v47  ;;  %v4225_v21 = vpop.f32.mrb[45].mxu0  ;;  %4838 = vmatmul.mubr.f32.gmra.mrb[150].mxu0 %v7659_v52  ;;  %v7688_v52 = vld [vmem:[%s9563_s15 + $0x1ab0] sm:$0xff] }
 0x3b5   : > { %6557 = vst [vmem:[%s10942_s19 + $0x188] sm:$0xff] %v5993_v14  ;;  %v11843_v33 = vadd.f32 %v4225_v21, %v3920_v25  ;;  %v3930_v8 = vpop.f32.mrb[60].mxu1  ;;  %4842 = vmatprep.mubr.f32.mxu0 %v7663_v17  ;;  %v7682_v25 = vld [vmem:[%s9563_s15 + $0x1a80] sm:$0xff]  ;;  %v7672_v20 = vld [vmem:[%s9563_s15 + $0x1a30] sm:$0xff]  ;;  %v7691_v14 = vld [vmem:[%s9563_s15 + $0x1ac8] sm:$0xff] }
 0x3b6   : > { %v5631_v54 = vpop.permute.xlu1 %5630  ;;  %v3932_v31 = vpop.f32.mrb[61].mxu1  ;;  %8743 = vmatmul.mubr.f32.gmra.mrb[166].mxu1 %v7673_v4 }
 0x3b7   : > { %v5996_v39 = vsel %vm5928_vm0, %v11025_v43, %v5631_v54  ;;  %v5629_v5 = vpop.permute.xlu0 %5628  ;;  %v8604_v26 = vpop.f32.mrb[46].mxu0  ;;  %8745 = vmatprep.mubr.f32.mxu1 %v7676_v23  ;;  %v7665_v43 = vld [vmem:[%s9563_s15 + $0x19f8] sm:$0xff]  ;;  %v7671_v54 = vld [vmem:[%s9563_s15 + $0x1a28] sm:$0xff] }
 0x3b8   : > { %6566 = vst [vmem:[%s10942_s19 + $0x1d0] sm:$0xff] %v5996_v39  ;;  %v5995_v19 = vsel %vm5928_vm0, %v11007_v58, %v5629_v5  ;;  %v4235_v46 = vpop.f32.mrb[47].mxu0  ;;  %4843 = vmatmul.mubr.f32.gmra.mrb[152].mxu0 %v7662_v9  ;;  %v7675_v39 = vld [vmem:[%s9563_s15 + $0x1a48] sm:$0xff] }
 0x3b9   : > { %6563 = vst [vmem:[%s10942_s19 + $0x1b8] sm:$0xff] %v5995_v19  ;;  %v3935_v11 = vpop.f32.mrb[62].mxu1  ;;  %v11855_v51 = vadd.f32 %v4235_v46, %v3930_v8  ;;  %4847 = vmatprep.mubr.f32.mxu0 %v7666_v37  ;;  %v7694_v8 = vld [vmem:[%s9563_s15 + $0x1ae0] sm:$0xff]  ;;  %v12497_v5 = vld [vmem:[#allocation10_spill] sm:$0xff]  ;;  %v7697_v19 = vld [vmem:[%s9563_s15 + $0x1af8] sm:$0xff] }
 0x3ba   : > { %v11858_v55 = vadd.f32 %v8604_v26, %v3935_v11  ;;  %v5635_v56 = vpop.permute.xlu1 %5634  ;;  %v3937_v29 = vpop.f32.mrb[63].mxu1  ;;  %8746 = vmatmul.mubr.f32.gmra.mrb[168].mxu1 %v7679_v12  ;;  %v12498_v46 = vld [vmem:[#allocation9_spill] sm:$0xff] }
 0x3bb   : > { %v5998_v58 = vsel %vm5928_vm0, %v11063_v45, %v5635_v56  ;;  %v5633_v13 = vpop.permute.xlu0 %5632  ;;  %v8607_v40 = vpop.f32.mrb[48].mxu0  ;;  %8748 = vmatprep.mubr.f32.mxu1 %v7682_v25  ;;  %v7674_v56 = vld [vmem:[%s9563_s15 + $0x1a40] sm:$0xff] }
 0x3bc   : > { %6572 = vst [vmem:[%s10942_s19 + $0x200] sm:$0xff] %v5998_v58  ;;  %v5997_v36 = vsel %vm5928_vm0, %v11044_v0, %v5633_v13  ;;  %v4245_v47 = vpop.f32.mrb[49].mxu0  ;;  %4848 = vmatmul.mubr.f32.gmra.mrb[154].mxu0 %v7665_v43  ;;  %v7678_v13 = vld [vmem:[%s9563_s15 + $0x1a60] sm:$0xff] }
 0x3bd   : > { %6569 = vst [vmem:[%s10942_s19 + $0x1e8] sm:$0xff] %v5997_v36  ;;  %v3940_v34 = vpop.f32.mrb[64].mxu1  ;;  %4852 = vmatprep.mubr.f32.mxu0 %v7669_v50 }
 0x3be   : > { %v11870_v45 = vadd.f32 %v4245_v47, %v3940_v34  ;;  %v5639_v17 = vpop.permute.xlu1 %5638  ;;  %v3942_v48 = vpop.f32.mrb[65].mxu1  ;;  %8749 = vmatmul.mubr.f32.gmra.mrb[170].mxu1 %v7685_v2 }
 0x3bf   : > { %v6000_v0 = vsel %vm5928_vm0, %v11097_v32, %v5639_v17  ;;  %v5637_v15 = vpop.permute.xlu0 %5636  ;;  %v8610_v4 = vpop.f32.mrb[50].mxu0  ;;  %8751 = vmatprep.mubr.f32.mxu1 %v7688_v52  ;;  %v12500_v52 = vld [vmem:[#allocation11_spill] sm:$0xff]  ;;  %v7677_v48 = vld [vmem:[%s9563_s15 + $0x1a58] sm:$0xff] }
 0x3c0   : > { %6578 = vst [vmem:[%s10942_s19 + $0x230] sm:$0xff] %v6000_v0  ;;  %v5999_v21 = vsel %vm5928_vm0, %v11080_v24, %v5637_v15  ;;  %v4255_v23 = vpop.f32.mrb[51].mxu0  ;;  %4853 = vmatmul.mubr.f32.gmra.mrb[156].mxu0 %v7668_v3 }
 0x3c1   : > { %6575 = vst [vmem:[%s10942_s19 + $0x218] sm:$0xff] %v5999_v21  ;;  %v3945_v9 = vpop.f32.mrb[66].mxu1  ;;  %4857 = vmatprep.mubr.f32.mxu0 %v7672_v20  ;;  %v12501_v21 = vld [vmem:[#allocation14_spill] sm:$0xff] }
 0x3c2   : > { %v11882_v32 = vadd.f32 %v8607_v40, %v3945_v9  ;;  %v5643_v31 = vpop.permute.xlu1 %5642  ;;  %v3947_v37 = vpop.f32.mrb[67].mxu1  ;;  %8752 = vmatmul.mubr.f32.gmra.mrb[172].mxu1 %v7691_v14  ;;  %v12499_v40 = vld [vmem:[#allocation12_spill] sm:$0xff] }
 0x3c3   : > { %v6002_v24 = vsel %vm5928_vm0, %v12497_v5, %v5643_v31  ;;  %v5641_v26 = vpop.permute.xlu0 %5640  ;;  %v8613_v12 = vpop.f32.mrb[52].mxu0  ;;  %8754 = vmatprep.mubr.f32.mxu1 %v7694_v8  ;;  %v7681_v14 = vld [vmem:[%s9563_s15 + $0x1a78] sm:$0xff] }
 0x3c4   : > { %6584 = vst [vmem:[%s10942_s19 + $0x260] sm:$0xff] %v6002_v24  ;;  %v6001_v25 = vsel %vm5928_vm0, %v12498_v46, %v5641_v26  ;;  %v4265_v11 = vpop.f32.mrb[53].mxu0  ;;  %4858 = vmatmul.mubr.f32.gmra.mrb[158].mxu0 %v7671_v54  ;;  %v12502_v54 = vld [vmem:[#allocation13_spill] sm:$0xff] }
 0x3c5   : > { %6581 = vst [vmem:[%s10942_s19 + $0x248] sm:$0xff] %v6001_v25  ;;  %v3950_v43 = vpop.f32.mrb[68].mxu1  ;;  %4862 = vmatprep.mubr.f32.mxu0 %v7675_v39  ;;  %v7680_v39 = vld [vmem:[%s9563_s15 + $0x1a70] sm:$0xff] }
 0x3c6   : > { %v11893_v29 = vadd.f32 %v4255_v23, %v3950_v43  ;;  %v5647_v50 = vpop.permute.xlu1 %5646  ;;  %v3952_v58 = vpop.f32.mrb[69].mxu1  ;;  %8755 = vmatmul.mubr.f32.gmra.mrb[174].mxu1 %v7697_v19  ;;  %v7684_v19 = vld [vmem:[%s9563_s15 + $0x1a90] sm:$0xff] }
 0x3c7   : > { %v6004_v2 = vsel %vm5928_vm0, %v12499_v40, %v5647_v50  ;;  %v5645_v36 = vpop.permute.xlu0 %5644  ;;  %v11898_v47 = vpop.f32.mrb[54].mxu0 }
 0x3c8   : > { %6590 = vst [vmem:[%s10942_s19 + $0x290] sm:$0xff] %v6004_v2  ;;  %v6003_v34 = vsel %vm5928_vm0, %v12500_v52, %v5645_v36  ;;  %v4275_v3 = vpop.f32.mrb[55].mxu0  ;;  %4863 = vmatmul.mubr.f32.gmra.mrb[160].mxu0 %v7674_v56  ;;  %v12503_v56 = vld [vmem:[#allocation15_spill] sm:$0xff]  ;;  %v7687_v2 = vld [vmem:[%s9563_s15 + $0x1aa8] sm:$0xff] }
 0x3c9   : > { %6587 = vst [vmem:[%s10942_s19 + $0x278] sm:$0xff] %v6003_v34  ;;  %v3955_v17 = vpop.f32.mrb[70].mxu1  ;;  %4867 = vmatprep.mubr.f32.mxu0 %v7678_v13  ;;  %v7683_v13 = vld [vmem:[%s9563_s15 + $0x1a88] sm:$0xff]  ;;  %v12504_v34 = vld [vmem:[#allocation16_spill] sm:$0xff] }
 0x3ca   : > { %v11905_v20 = vadd.f32 %v8610_v4, %v3955_v17  ;;  %v5651_v0 = vpop.permute.xlu1 %5650  ;;  %v3957_v15 = vpop.f32.mrb[71].mxu1 }
 0x3cb   : > { %v6006_v23 = vsel %vm5928_vm0, %v12501_v21, %v5651_v0  ;;  %v5649_v8 = vpop.permute.xlu0 %5648  ;;  %v11910_v9 = vpop.f32.mrb[56].mxu0  ;;  %v7686_v21 = vld [vmem:[%s9563_s15 + $0x1aa0] sm:$0xff] }
 0x3cc   : > { %6596 = vst [vmem:[%s10942_s19 + $0x2c0] sm:$0xff] %v6006_v23  ;;  %v6005_v31 = vsel %vm5928_vm0, %v12502_v54, %v5649_v8  ;;  %v4285_v37 = vpop.f32.mrb[57].mxu0  ;;  %4868 = vmatmul.mubr.f32.gmra.mrb[162].mxu0 %v7677_v48  ;;  %v7690_v54 = vld [vmem:[%s9563_s15 + $0x1ac0] sm:$0xff] }
 0x3cd   : > { %6593 = vst [vmem:[%s10942_s19 + $0x2a8] sm:$0xff] %v6005_v31  ;;  %v3960_v4 = vpop.f32.mrb[72].mxu1  ;;  %4872 = vmatprep.mubr.f32.mxu0 %v7681_v14  ;;  %v12505_v14 = vld [vmem:[#allocation17_spill] sm:$0xff] }
 0x3ce   : > { %v11917_v5 = vadd.f32 %v4265_v11, %v3960_v4  ;;  %v5655_v24 = vpop.permute.xlu1 %5654  ;;  %v3962_v26 = vpop.f32.mrb[73].mxu1 }
 0x3cf   : > { %v6008_v46 = vsel %vm5928_vm0, %v11253_v22, %v5655_v24  ;;  %v5653_v25 = vpop.permute.xlu0 %5652  ;;  %v11922_v43 = vpop.f32.mrb[58].mxu0 }
 0x3d0   : > { %6602 = vst [vmem:[%s10942_s19 + $0x2f0] sm:$0xff] %v6008_v46  ;;  %v6007_v50 = vsel %vm5928_vm0, %v12503_v56, %v5653_v25  ;;  %v11927_v58 = vpop.f32.mrb[59].mxu0  ;;  %4873 = vmatmul.mubr.f32.gmra.mrb[164].mxu0 %v7680_v39  ;;  %v7693_v25 = vld [vmem:[%s9563_s15 + $0x1ad8] sm:$0xff] }
 0x3d1   : > { %6599 = vst [vmem:[%s10942_s19 + $0x2d8] sm:$0xff] %v6007_v50  ;;  %v3965_v11 = vpop.f32.mrb[74].mxu1  ;;  %4877 = vmatprep.mubr.f32.mxu0 %v7684_v19  ;;  %v7689_v19 = vld [vmem:[%s9563_s15 + $0x1ab8] sm:$0xff] }
 0x3d2   : > { %v11931_v40 = vadd.f32 %v8613_v12, %v3965_v11  ;;  %v3967_v22 = vpop.f32.mrb[75].mxu1 }
 0x3d3   : > { %v5657_v36 = vpop.permute.xlu0 %5656  ;;  %v11934_v52 = vpop.f32.mrb[60].mxu0  ;;  %v7692_v22 = vld [vmem:[%s9563_s15 + $0x1ad0] sm:$0xff] }
 0x3d4   : > { %v6009_v17 = vsel %vm5928_vm0, %v12504_v34, %v5657_v36  ;;  %v11938_v48 = vpop.f32.mrb[61].mxu0  ;;  %4878 = vmatmul.mubr.f32.gmra.mrb[166].mxu0 %v7683_v13  ;;  %v5659_v0 = vpop.permute.xlu1 %5658  ;;  %v7696_v36 = vld [vmem:[%s9563_s15 + $0x1af0] sm:$0xff] }
 0x3d5   : > { %6605 = vst [vmem:[%s10942_s19 + $0x308] sm:$0xff] %v6009_v17  ;;  %v3970_v15 = vpop.f32.mrb[76].mxu1  ;;  %v6010_v12 = vsel %vm5928_vm0, %v12505_v14, %v5659_v0  ;;  %4882 = vmatprep.mubr.f32.mxu0 %v7687_v2 }
 0x3d6   : > { %v11944_v23 = vadd.f32 %v4275_v3, %v3970_v15  ;;  %6608 = vst [vmem:[%s10942_s19 + $0x320] sm:$0xff] %v6010_v12  ;;  %v3972_v8 = vpop.f32.mrb[77].mxu1 }
 0x3d7   : > { %v11948_v31 = vpop.f32.mrb[62].mxu0 }
 0x3d8   : > { %v11950_v4 = vpop.f32.mrb[63].mxu0  ;;  %4883 = vmatmul.mubr.f32.gmra.mrb[168].mxu0 %v7686_v21  ;;  %v5661_v39 = vpop.permute.xlu0 %5660 }
 0x3d9   : > { %v3975_v24 = vpop.f32.mrb[78].mxu1  ;;  %v6011_v26 = vsel %vm5928_vm0, %v11309_v59, %v5661_v39  ;;  %4887 = vmatprep.mubr.f32.mxu0 %v7690_v54 }
 0x3da   : > { %v11956_v3 = vadd.f32 %v11898_v47, %v3975_v24  ;;  %6611 = vst [vmem:[%s10942_s19 + $0x338] sm:$0xff] %v6011_v26  ;;  %v3977_v46 = vpop.f32.mrb[79].mxu1 }
 0x3db   : > { %v11960_v56 = vpop.f32.mrb[64].mxu0 }
 0x3dc   : > { %v11962_v50 = vpop.f32.mrb[65].mxu0  ;;  %4888 = vmatmul.mubr.f32.gmra.mrb[170].mxu0 %v7689_v19  ;;  %v5663_v11 = vpop.permute.xlu1 %5662 }
 0x3dd   : > { %v3980_v13 = vpop.f32.mrb[80].mxu1  ;;  %v6012_v59 = vsel %vm5928_vm0, %v11327_v41, %v5663_v11  ;;  %4892 = vmatprep.mubr.f32.mxu0 %v7693_v25  ;;  %v7695_v41 = vld [vmem:[%s9563_s15 + $0x1ae8] sm:$0xff]  ;;  %s9348_s15 = scalar_lea.vmem %s9347_s8, 36864 }
 0x3de   : > { %v11967_v2 = vadd.f32 %v4285_v37, %v3980_v13  ;;  %6614 = vst [vmem:[%s10942_s19 + $0x350] sm:$0xff] %v6012_v59  ;;  %v3982_v47 = vpop.f32.mrb[81].mxu1  ;;  %p9350_p1 = scmp.lt.s32.totalorder %s9348_s15, %s9342_s3 }
 0x3df   : > { %v11971_v34 = vpop.f32.mrb[66].mxu0 }
 0x3e0   : > { %v11973_v17 = vpop.f32.mrb[67].mxu0  ;;  %4893 = vmatmul.mubr.f32.gmra.mrb[172].mxu0 %v7692_v22  ;;  %v5665_v0 = vpop.permute.xlu0 %5664  ;;  %p9351_p3 = por %p9350_p1, %p9349_p13 }
 0x3e1   : > { %v3985_v15 = vpop.f32.mrb[82].mxu1  ;;  %v6013_v14 = vsel %vm5928_vm0, %v11345_v49, %v5665_v0  ;;  %4897 = vmatprep.mubr.f32.mxu0 %v7696_v36  ;;  %v12506_v36 = vld [vmem:[#allocation18_spill] sm:$0xff] }
 0x3e2   : > { %v11979_v12 = vadd.f32 %v11910_v9, %v3985_v15  ;;  %6617 = vst [vmem:[%s10942_s19 + $0x368] sm:$0xff] %v6013_v14  ;;  %v3987_v37 = vpop.f32.mrb[83].mxu1  ;;  %p9352_p5 = pnand %p9351_p3, %p9345_p10 }
 0x3e3   : > { %v11982_v21 = vpop.f32.mrb[68].mxu0 }
 0x3e4   : > { %v11984_v8 = vpop.f32.mrb[69].mxu0  ;;  %4898 = vmatmul.mubr.f32.gmra.mrb[174].mxu0 %v7695_v41  ;;  %v5667_v54 = vpop.permute.xlu1 %5666 }
 0x3e5   : > { %v3990_v39 = vpop.f32.mrb[84].mxu1  ;;  %v6014_v24 = vsel %vm5928_vm0, %v11363_v28, %v5667_v54 }
 0x3e6   : > { %v11989_v49 = vadd.f32 %v11927_v58, %v3990_v39  ;;  %6620 = vst [vmem:[%s10942_s19 + $0x380] sm:$0xff] %v6014_v24  ;;  %v3992_v9 = vpop.f32.mrb[85].mxu1 }
 0x3e7   : > { %v11992_v26 = vpop.f32.mrb[70].mxu0 }
 0x3e8   : > { %v11994_v19 = vpop.f32.mrb[71].mxu0  ;;  %v5669_v46 = vpop.permute.xlu0 %5668 }
 0x3e9   : > { %v3995_v25 = vpop.f32.mrb[86].mxu1  ;;  %v6015_v11 = vsel %vm5928_vm0, %v11376_v6, %v5669_v46 }
 0x3ea   : > { %v11999_v13 = vadd.f32 %v11922_v43, %v3995_v25  ;;  %6623 = vst [vmem:[%s10942_s19 + $0x398] sm:$0xff] %v6015_v11  ;;  %v3997_v28 = vpop.f32.mrb[87].mxu1 }
 0x3eb   : > { %v12002_v58 = vpop.f32.mrb[72].mxu0 }
 0x3ec   : > { %v12004_v59 = vpop.f32.mrb[73].mxu0  ;;  %v5671_v22 = vpop.permute.xlu1 %5670 }
 0x3ed   : > { %v4000_v47 = vpop.f32.mrb[88].mxu1  ;;  %v6016_v0 = vsel %vm5928_vm0, %v12506_v36, %v5671_v22 }
 0x3ee   : > { %v12009_v15 = vadd.f32 %v11938_v48, %v4000_v47  ;;  %6626 = vst [vmem:[%s10942_s19 + $0x3b0] sm:$0xff] %v6016_v0  ;;  %v4002_v6 = vpop.f32.mrb[89].mxu1 }
 0x3ef   : > { %v12012_v43 = vpop.f32.mrb[74].mxu0 }
 0x3f0   : > { %v12014_v14 = vpop.f32.mrb[75].mxu0  ;;  %v5673_v41 = vpop.permute.xlu0 %5672 }
 0x3f1   : > { %v4005_v37 = vpop.f32.mrb[90].mxu1  ;;  %v6017_v54 = vsel %vm5928_vm0, %v11400_v18, %v5673_v41 }
 0x3f2   : > { %v12019_v39 = vadd.f32 %v11934_v52, %v4005_v37  ;;  %6629 = vst [vmem:[%s10942_s19 + $0x3c8] sm:$0xff] %v6017_v54  ;;  %v4007_v24 = vpop.f32.mrb[91].mxu1 }
 0x3f3   : > { %v12022_v48 = vpop.f32.mrb[76].mxu0 }
 0x3f4   : > { %v12024_v9 = vpop.f32.mrb[77].mxu0  ;;  %v5675_v46 = vpop.permute.xlu1 %5674 }
 0x3f5   : > { %v4010_v25 = vpop.f32.mrb[92].mxu1  ;;  %v6018_v11 = vsel %vm5928_vm0, %v11412_v35, %v5675_v46 }
 0x3f6   : > { %v12029_v28 = vadd.f32 %v11950_v4, %v4010_v25  ;;  %6632 = vst [vmem:[%s10942_s19 + $0x3e0] sm:$0xff] %v6018_v11  ;;  %v4012_v18 = vpop.f32.mrb[93].mxu1 }
 0x3f7   : > { %v12032_v52 = vpop.f32.mrb[78].mxu0 }
 0x3f8   : > { %v12034_v22 = vpop.f32.mrb[79].mxu0  ;;  %v5677_v47 = vpop.permute.xlu0 %5676 }
 0x3f9   : > { %v4015_v36 = vpop.f32.mrb[94].mxu1  ;;  %v6019_v0 = vsel %vm5928_vm0, %v11422_v1, %v5677_v47  ;;  %v12508_v47 = vld [vmem:[#allocation19_spill] sm:$0xff] }
 0x3fa   : > { %v12039_v6 = vadd.f32 %v11948_v31, %v4015_v36  ;;  %6635 = vst [vmem:[%s10942_s19 + $0x3f8] sm:$0xff] %v6019_v0  ;;  %v4017_v35 = vpop.f32.mrb[95].mxu1 }
 0x3fb   : > { %v12042_v4 = vpop.f32.mrb[80].mxu0 }
 0x3fc   : > { %v4666_v41 = vpop.f32.mrb[81].mxu0  ;;  %v5679_v37 = vpop.permute.xlu1 %5678 }
 0x3fd   : > { %v4020_v54 = vpop.f32.mrb[96].mxu1  ;;  %v6020_v24 = vsel %vm5928_vm0, %v11431_v44, %v5679_v37 }
 0x3fe   : > { %v12047_v46 = vadd.f32 %v11962_v50, %v4020_v54  ;;  %6638 = vst [vmem:[%s10942_s19 + $0x410] sm:$0xff] %v6020_v24  ;;  %v4022_v1 = vpop.f32.mrb[97].mxu1  ;;  %v12510_v54 = vld [vmem:[#allocation20_spill] sm:$0xff] }
 0x3ff   : > { %v12050_v25 = vpop.f32.mrb[82].mxu0 }
 0x400   : > { %12507 = vst [vmem:[#allocation23_spill] sm:$0xff] %v12047_v46  ;;  %v4671_v31 = vpop.f32.mrb[83].mxu0  ;;  %v5681_v11 = vpop.permute.xlu0 %5680 }
 0x401   : > { %v4025_v18 = vpop.f32.mrb[98].mxu1  ;;  %v6021_v36 = vsel %vm5928_vm0, %v12508_v47, %v5681_v11 }
 0x402   : > { %v12055_v0 = vadd.f32 %v11960_v56, %v4025_v18  ;;  %6641 = vst [vmem:[%s10942_s19 + $0x428] sm:$0xff] %v6021_v36  ;;  %v4027_v44 = vpop.f32.mrb[99].mxu1  ;;  %v12512_v36 = vld [vmem:[#allocation21_spill] sm:$0xff] }
 0x403   : > { %v12058_v35 = vpop.f32.mrb[84].mxu0 }
 0x404   : > { %12509 = vst [vmem:[#allocation24_spill] sm:$0xff] %v12055_v0  ;;  %v4676_v50 = vpop.f32.mrb[85].mxu0  ;;  %v5683_v41 = vpop.permute.xlu1 %5682 }
 0x405   : > { %v4030_v37 = vpop.f32.mrb[100].mxu1  ;;  %v6022_v24 = vsel %vm5928_vm0, %v12510_v54, %v5683_v41 }
 0x406   : > { %v12063_v1 = vadd.f32 %v11973_v17, %v4030_v37  ;;  %6644 = vst [vmem:[%s10942_s19 + $0x440] sm:$0xff] %v6022_v24  ;;  %v4032_v31 = vpop.f32.mrb[101].mxu1  ;;  %v12514_v24 = vld [vmem:[#allocation22_spill] sm:$0xff] }
 0x407   : > { %v12066_v11 = vpop.f32.mrb[86].mxu0 }
 0x408   : > { %12511 = vst [vmem:[#allocation25_spill] sm:$0xff] %v12063_v1  ;;  %v4681_v56 = vpop.f32.mrb[87].mxu0  ;;  %v5685_v18 = vpop.permute.xlu0 %5684 }
 0x409   : > { %v4035_v47 = vpop.f32.mrb[102].mxu1  ;;  %v6023_v44 = vsel %vm5928_vm0, %v12512_v36, %v5685_v18 }
 0x40a   : > { %v12071_v50 = vadd.f32 %v11971_v34, %v4035_v47  ;;  %6647 = vst [vmem:[%s10942_s19 + $0x458] sm:$0xff] %v6023_v44  ;;  %v4037_v0 = vpop.f32.mrb[103].mxu1 }
 0x40b   : > { %v12074_v41 = vpop.f32.mrb[88].mxu0 }
 0x40c   : > { %12513 = vst [vmem:[#allocation26_spill] sm:$0xff] %v12071_v50  ;;  %v4686_v17 = vpop.f32.mrb[89].mxu0  ;;  %v5687_v37 = vpop.permute.xlu1 %5686 }
 0x40d   : > { %v4040_v54 = vpop.f32.mrb[104].mxu1  ;;  %v6024_v31 = vsel %vm5928_vm0, %v12514_v24, %v5687_v37 }
 0x40e   : > { %v12079_v56 = vadd.f32 %v11984_v8, %v4040_v54  ;;  %6650 = vst [vmem:[%s10942_s19 + $0x470] sm:$0xff] %v6024_v31  ;;  %v4042_v1 = vpop.f32.mrb[105].mxu1 }
 0x40f   : > { %v12082_v46 = vpop.f32.mrb[90].mxu0 }
 0x410   : > { %v4691_v18 = vpop.f32.mrb[91].mxu0 }
 0x411   : > { %v4045_v34 = vpop.f32.mrb[106].mxu1 }
 0x412   : > { %v12085_v47 = vadd.f32 %v11982_v21, %v4045_v34  ;;  %v4047_v0 = vpop.f32.mrb[107].mxu1 }
 0x413   : > { %v12087_v36 = vpop.f32.mrb[92].mxu0 }
 0x414   : > { %12515 = vst [vmem:[#allocation27_spill] sm:$0xff] %v12085_v47  ;;  %v4696_v44 = vpop.f32.mrb[93].mxu0 }
 0x415   : > { %v4050_v17 = vpop.f32.mrb[108].mxu1 }
 0x416   : > { %v12090_v50 = vadd.f32 %v11994_v19, %v4050_v17  ;;  %v4052_v37 = vpop.f32.mrb[109].mxu1 }
 0x417   : > { %v12092_v8 = vpop.f32.mrb[94].mxu0 }
 0x418   : > { %12516 = vst [vmem:[#allocation28_spill] sm:$0xff] %v12090_v50  ;;  %v4701_v54 = vpop.f32.mrb[95].mxu0 }
 0x419   : > { %v4055_v1 = vpop.f32.mrb[110].mxu1 }
 0x41a   : > { %v12095_v24 = vadd.f32 %v11992_v26, %v4055_v1  ;;  %v4057_v31 = vpop.f32.mrb[111].mxu1 }
 0x41b   : > { %v12097_v18 = vpop.f32.mrb[96].mxu0 }
 0x41c   : > { %12517 = vst [vmem:[#allocation29_spill] sm:$0xff] %v12095_v24  ;;  %v4706_v21 = vpop.f32.mrb[97].mxu0 }
 0x41d   : > { %v4060_v34 = vpop.f32.mrb[112].mxu1 }
 0x41e   : > { %v12100_v0 = vadd.f32 %v12004_v59, %v4060_v34  ;;  %v4062_v44 = vpop.f32.mrb[113].mxu1 }
 0x41f   : > { %v12102_v47 = vpop.f32.mrb[98].mxu0 }
 0x420   : > { %12518 = vst [vmem:[#allocation30_spill] sm:$0xff] %v12100_v0  ;;  %v4711_v19 = vpop.f32.mrb[99].mxu0 }
 0x421   : > { %v4065_v17 = vpop.f32.mrb[114].mxu1 }
 0x422   : > { %v12105_v37 = vadd.f32 %v12002_v58, %v4065_v17  ;;  %v4067_v54 = vpop.f32.mrb[115].mxu1 }
 0x423   : > { %v12107_v50 = vpop.f32.mrb[100].mxu0 }
 0x424   : > { %12519 = vst [vmem:[#allocation31_spill] sm:$0xff] %v12105_v37  ;;  %v4716_v26 = vpop.f32.mrb[101].mxu0 }
 0x425   : > { %v4070_v1 = vpop.f32.mrb[116].mxu1 }
 0x426   : > { %v12110_v31 = vadd.f32 %v12014_v14, %v4070_v1  ;;  %v4072_v21 = vpop.f32.mrb[117].mxu1 }
 0x427   : > { %v12112_v24 = vpop.f32.mrb[102].mxu0 }
 0x428   : > { %12520 = vst [vmem:[#allocation32_spill] sm:$0xff] %v12110_v31  ;;  %v4721_v59 = vpop.f32.mrb[103].mxu0 }
 0x429   : > { %v4075_v34 = vpop.f32.mrb[118].mxu1 }
 0x42a   : > { %v12115_v44 = vadd.f32 %v12012_v43, %v4075_v34  ;;  %v4077_v19 = vpop.f32.mrb[119].mxu1 }
 0x42b   : > { %v12117_v0 = vpop.f32.mrb[104].mxu0 }
 0x42c   : > { %12521 = vst [vmem:[#allocation33_spill] sm:$0xff] %v12115_v44  ;;  %v4726_v58 = vpop.f32.mrb[105].mxu0 }
 0x42d   : > { %v4080_v17 = vpop.f32.mrb[120].mxu1 }
 0x42e   : > { %v12120_v54 = vadd.f32 %v12024_v9, %v4080_v17  ;;  %v4082_v26 = vpop.f32.mrb[121].mxu1 }
 0x42f   : > { %v12122_v37 = vpop.f32.mrb[106].mxu0 }
 0x430   : > { %12522 = vst [vmem:[#allocation34_spill] sm:$0xff] %v12120_v54  ;;  %v4731_v14 = vpop.f32.mrb[107].mxu0 }
 0x431   : > { %v4085_v1 = vpop.f32.mrb[122].mxu1 }
 0x432   : > { %v12125_v21 = vadd.f32 %v12022_v48, %v4085_v1  ;;  %v4087_v59 = vpop.f32.mrb[123].mxu1 }
 0x433   : > { %v12127_v31 = vpop.f32.mrb[108].mxu0 }
 0x434   : > { %12523 = vst [vmem:[#allocation35_spill] sm:$0xff] %v12125_v21  ;;  %v4736_v43 = vpop.f32.mrb[109].mxu0 }
 0x435   : > { %v4090_v34 = vpop.f32.mrb[124].mxu1 }
 0x436   : > { %v12130_v19 = vadd.f32 %v12034_v22, %v4090_v34  ;;  %v4092_v58 = vpop.f32.mrb[125].mxu1 }
 0x437   : > { %v12132_v44 = vpop.f32.mrb[110].mxu0 }
 0x438   : > { %v4741_v9 = vpop.f32.mrb[111].mxu0 }
 0x439   : > { %v4095_v17 = vpop.f32.mrb[126].mxu1 }
 0x43a   : > { %v12135_v26 = vadd.f32 %v12032_v52, %v4095_v17  ;;  %v4097_v14 = vpop.f32.mrb[127].mxu1 }
 0x43b   : > { %v12137_v54 = vpop.f32.mrb[112].mxu0 }
 0x43c   : > { %v4746_v48 = vpop.f32.mrb[113].mxu0 }
 0x43d   : > { %v8687_v1 = vpop.f32.mrb[128].mxu1 }
 0x43e   : > { %v4975_v59 = vadd.f32 %v8687_v1, %v12050_v25  ;;  %v4969_v43 = vpop.f32.mrb[129].mxu1 }
 0x43f   : > { %v4970_v21 = vadd.f32 %v4969_v43, %v12042_v4  ;;  %v4749_v22 = vpop.f32.mrb[114].mxu0 }
 0x440   : > { %5786 = vrot.lane.b32.xlu1 %v4975_v59, %s9430_s21  ;;  %v4751_v34 = vpop.f32.mrb[115].mxu0 }
 0x441   : > { %v8690_v58 = vpop.f32.mrb[130].mxu1  ;;  %5784 = vrot.lane.b32.xlu0 %v4970_v21, %s9430_s21 }
 0x442   : > { %v4985_v52 = vadd.f32 %v8690_v58, %v12066_v11  ;;  %v4979_v9 = vpop.f32.mrb[131].mxu1 }
 0x443   : > { %v4980_v17 = vadd.f32 %v4979_v9, %v12058_v35  ;;  %v12145_v14 = vpop.f32.mrb[116].mxu0 }
 0x444   : > { %5790 = vrot.lane.b32.xlu1 %v4985_v52, %s9430_s21  ;;  %v4756_v25 = vpop.f32.mrb[117].mxu0 }
 0x445   : > { %v8693_v48 = vpop.f32.mrb[132].mxu1  ;;  %5788 = vrot.lane.b32.xlu0 %v4980_v17, %s9430_s21 }
 0x446   : > { %v4995_v4 = vadd.f32 %v8693_v48, %v12082_v46  ;;  %v4989_v1 = vpop.f32.mrb[133].mxu1 }
 0x447   : > { %v4990_v59 = vadd.f32 %v4989_v1, %v12074_v41  ;;  %v4759_v43 = vpop.f32.mrb[118].mxu0 }
 0x448   : > { %5794 = vrot.lane.b32.xlu1 %v4995_v4, %s9430_s21  ;;  %v4761_v11 = vpop.f32.mrb[119].mxu0 }
 0x449   : > { %v8696_v21 = vpop.f32.mrb[134].mxu1  ;;  %5792 = vrot.lane.b32.xlu0 %v4990_v59, %s9430_s21 }
 0x44a   : > { %v5005_v35 = vadd.f32 %v8696_v21, %v12092_v8  ;;  %v4999_v34 = vpop.f32.mrb[135].mxu1 }
 0x44b   : > { %v5000_v58 = vadd.f32 %v4999_v34, %v12087_v36  ;;  %v4764_v52 = vpop.f32.mrb[120].mxu0 }
 0x44c   : > { %5798 = vrot.lane.b32.xlu1 %v5005_v35, %s9430_s21  ;;  %v4766_v9 = vpop.f32.mrb[121].mxu0 }
 0x44d   : > { %v8699_v46 = vpop.f32.mrb[136].mxu1  ;;  %5796 = vrot.lane.b32.xlu0 %v5000_v58, %s9430_s21 }
 0x44e   : > { %v5015_v41 = vadd.f32 %v8699_v46, %v12102_v47  ;;  %v5009_v17 = vpop.f32.mrb[137].mxu1 }
 0x44f   : > { %v5010_v25 = vadd.f32 %v5009_v17, %v12097_v18  ;;  %v4769_v48 = vpop.f32.mrb[122].mxu0 }
 0x450   : > { %5802 = vrot.lane.b32.xlu1 %v5015_v41, %s9430_s21  ;;  %v4771_v4 = vpop.f32.mrb[123].mxu0 }
 0x451   : > { %v8702_v8 = vpop.f32.mrb[138].mxu1  ;;  %5800 = vrot.lane.b32.xlu0 %v5010_v25, %s9430_s21 }
 0x452   : > { %v5025_v36 = vadd.f32 %v8702_v8, %v12112_v24  ;;  %v5019_v1 = vpop.f32.mrb[139].mxu1 }
 0x453   : > { %v5020_v59 = vadd.f32 %v5019_v1, %v12107_v50  ;;  %v4774_v11 = vpop.f32.mrb[124].mxu0 }
 0x454   : > { %5806 = vrot.lane.b32.xlu1 %v5025_v36, %s9430_s21  ;;  %v4776_v21 = vpop.f32.mrb[125].mxu0 }
 0x455   : > { %v8705_v47 = vpop.f32.mrb[140].mxu1  ;;  %5804 = vrot.lane.b32.xlu0 %v5020_v59, %s9430_s21 }
 0x456   : > { %v5035_v18 = vadd.f32 %v8705_v47, %v12122_v37  ;;  %v5029_v35 = vpop.f32.mrb[141].mxu1 }
 0x457   : > { %v5030_v34 = vadd.f32 %v5029_v35, %v12117_v0  ;;  %v4779_v58 = vpop.f32.mrb[126].mxu0 }
 0x458   : > { %5810 = vrot.lane.b32.xlu1 %v5035_v18, %s9430_s21  ;;  %v4781_v9 = vpop.f32.mrb[127].mxu0 }
 0x459   : > { %v8708_v24 = vpop.f32.mrb[142].mxu1  ;;  %5808 = vrot.lane.b32.xlu0 %v5030_v34, %s9430_s21 }
 0x45a   : > { %v5045_v50 = vadd.f32 %v8708_v24, %v12132_v44  ;;  %v5039_v46 = vpop.f32.mrb[143].mxu1 }
 0x45b   : > { %v5040_v41 = vadd.f32 %v5039_v46, %v12127_v31  ;;  %v4784_v17 = vpop.f32.mrb[128].mxu0 }
 0x45c   : > { %5814 = vrot.lane.b32.xlu1 %v5045_v50, %s9430_s21  ;;  %v4786_v25 = vpop.f32.mrb[129].mxu0 }
 0x45d   : > { %v8711_v37 = vpop.f32.mrb[144].mxu1  ;;  %5812 = vrot.lane.b32.xlu0 %v5040_v41, %s9430_s21 }
 0x45e   : > { %v5055_v0 = vadd.f32 %v8711_v37, %v4749_v22  ;;  %v5049_v4 = vpop.f32.mrb[145].mxu1 }
 0x45f   : > { %v5050_v8 = vadd.f32 %v5049_v4, %v12137_v54  ;;  %v4789_v36 = vpop.f32.mrb[130].mxu0 }
 0x460   : > { %5818 = vrot.lane.b32.xlu1 %v5055_v0, %s9430_s21  ;;  %v4791_v1 = vpop.f32.mrb[131].mxu0 }
 0x461   : > { %v8714_v59 = vpop.f32.mrb[146].mxu1  ;;  %5816 = vrot.lane.b32.xlu0 %v5050_v8, %s9430_s21 }
 0x462   : > { %v5065_v44 = vadd.f32 %v8714_v59, %v4759_v43  ;;  %v5059_v31 = vpop.f32.mrb[147].mxu1 }
 0x463   : > { %v5060_v21 = vadd.f32 %v5059_v31, %v12145_v14  ;;  %v4794_v47 = vpop.f32.mrb[132].mxu0 }
 0x464   : > { %5822 = vrot.lane.b32.xlu1 %v5065_v44, %s9430_s21  ;;  %v4796_v18 = vpop.f32.mrb[133].mxu0 }
 0x465   : > { %v8717_v35 = vpop.f32.mrb[148].mxu1  ;;  %5820 = vrot.lane.b32.xlu0 %v5060_v21, %s9430_s21 }
 0x466   : > { %v5075_v22 = vadd.f32 %v8717_v35, %v4769_v48  ;;  %v5069_v54 = vpop.f32.mrb[149].mxu1 }
 0x467   : > { %v5070_v34 = vadd.f32 %v5069_v54, %v4764_v52  ;;  %v4799_v9 = vpop.f32.mrb[134].mxu0 }
 0x468   : > { %5826 = vrot.lane.b32.xlu1 %v5075_v22, %s9430_s21  ;;  %v4801_v24 = vpop.f32.mrb[135].mxu0 }
 0x469   : > { %v8720_v50 = vpop.f32.mrb[150].mxu1  ;;  %5824 = vrot.lane.b32.xlu0 %v5070_v34, %s9430_s21 }
 0x46a   : > { %v5085_v43 = vadd.f32 %v8720_v50, %v4779_v58  ;;  %v5079_v46 = vpop.f32.mrb[151].mxu1 }
 0x46b   : > { %v5080_v14 = vadd.f32 %v5079_v46, %v4774_v11  ;;  %v4804_v41 = vpop.f32.mrb[136].mxu0 }
 0x46c   : > { %5830 = vrot.lane.b32.xlu1 %v5085_v43, %s9430_s21  ;;  %v4806_v25 = vpop.f32.mrb[137].mxu0 }
 0x46d   : > { %v8723_v37 = vpop.f32.mrb[152].mxu1  ;;  %5828 = vrot.lane.b32.xlu0 %v5080_v14, %s9430_s21 }
 0x46e   : > { %v5095_v48 = vadd.f32 %v8723_v37, %v4789_v36  ;;  %v5089_v0 = vpop.f32.mrb[153].mxu1 }
 0x46f   : > { %v5090_v52 = vadd.f32 %v5089_v0, %v4784_v17  ;;  %v4809_v4 = vpop.f32.mrb[138].mxu0 }
 0x470   : > { %5834 = vrot.lane.b32.xlu1 %v5095_v48, %s9430_s21  ;;  %v4811_v8 = vpop.f32.mrb[139].mxu0 }
 0x471   : > { %v8726_v1 = vpop.f32.mrb[154].mxu1  ;;  %5832 = vrot.lane.b32.xlu0 %v5090_v52, %s9430_s21 }
 0x472   : > { %v5105_v58 = vadd.f32 %v8726_v1, %v4799_v9  ;;  %v5099_v59 = vpop.f32.mrb[155].mxu1 }
 0x473   : > { %v5100_v11 = vadd.f32 %v5099_v59, %v4794_v47  ;;  %v4814_v44 = vpop.f32.mrb[140].mxu0 }
 0x474   : > { %5838 = vrot.lane.b32.xlu1 %v5105_v58, %s9430_s21  ;;  %v4816_v31 = vpop.f32.mrb[141].mxu0 }
 0x475   : > { %v8729_v21 = vpop.f32.mrb[156].mxu1  ;;  %5836 = vrot.lane.b32.xlu0 %v5100_v11, %s9430_s21 }
 0x476   : > { %v5115_v36 = vadd.f32 %v8729_v21, %v4809_v4  ;;  %v5109_v18 = vpop.f32.mrb[157].mxu1 }
 0x477   : > { %v5110_v17 = vadd.f32 %v5109_v18, %v4804_v41  ;;  %v4819_v35 = vpop.f32.mrb[142].mxu0 }
 0x478   : > { %5842 = vrot.lane.b32.xlu1 %v5115_v36, %s9430_s21  ;;  %v4821_v22 = vpop.f32.mrb[143].mxu0 }
 0x479   : > { %v8732_v54 = vpop.f32.mrb[158].mxu1  ;;  %5840 = vrot.lane.b32.xlu0 %v5110_v17, %s9430_s21 }
 0x47a   : > { %v5125_v34 = vadd.f32 %v8732_v54, %v4819_v35  ;;  %v5119_v9 = vpop.f32.mrb[159].mxu1 }
 0x47b   : > { %v5120_v47 = vadd.f32 %v5119_v9, %v4814_v44  ;;  %v4824_v24 = vpop.f32.mrb[144].mxu0 }
 0x47c   : > { %5846 = vrot.lane.b32.xlu1 %v5125_v34, %s9430_s21  ;;  %v4826_v50 = vpop.f32.mrb[145].mxu0 }
 0x47d   : > { %v8735_v43 = vpop.f32.mrb[160].mxu1  ;;  %5844 = vrot.lane.b32.xlu0 %v5120_v47, %s9430_s21 }
 0x47e   : > { %v5129_v46 = vpop.f32.mrb[161].mxu1 }
 0x47f   : > { %v5130_v14 = vadd.f32 %v5129_v46, %v4824_v24  ;;  %v4829_v41 = vpop.f32.mrb[146].mxu0 }
 0x480   : > { %v5135_v25 = vadd.f32 %v8735_v43, %v4829_v41  ;;  %v4831_v37 = vpop.f32.mrb[147].mxu0 }
 0x481   : > { %5848 = vrot.lane.b32.xlu0 %v5130_v14, %s9430_s21  ;;  %v8738_v48 = vpop.f32.mrb[162].mxu1 }
 0x482   : > { %5850 = vrot.lane.b32.xlu1 %v5135_v25, %s9430_s21  ;;  %v5139_v0 = vpop.f32.mrb[163].mxu1 }
 0x483   : > { %v4834_v52 = vpop.f32.mrb[148].mxu0 }
 0x484   : > { %v5140_v4 = vadd.f32 %v5139_v0, %v4834_v52  ;;  %v4836_v8 = vpop.f32.mrb[149].mxu0 }
 0x485   : > { %v8741_v1 = vpop.f32.mrb[164].mxu1 }
 0x486   : > { %5852 = vrot.lane.b32.xlu0 %v5140_v4, %s9430_s21  ;;  %v5149_v58 = vpop.f32.mrb[165].mxu1 }
 0x487   : > { %v4839_v59 = vpop.f32.mrb[150].mxu0 }
 0x488   : > { %v5145_v11 = vadd.f32 %v8738_v48, %v4839_v59  ;;  %v4841_v44 = vpop.f32.mrb[151].mxu0 }
 0x489   : > { %v8744_v31 = vpop.f32.mrb[166].mxu1 }
 0x48a   : > { %5854 = vrot.lane.b32.xlu1 %v5145_v11, %s9430_s21  ;;  %v5159_v21 = vpop.f32.mrb[167].mxu1 }
 0x48b   : > { %v4844_v36 = vpop.f32.mrb[152].mxu0 }
 0x48c   : > { %v5150_v18 = vadd.f32 %v5149_v58, %v4844_v36  ;;  %v4846_v17 = vpop.f32.mrb[153].mxu0 }
 0x48d   : > { %v8747_v35 = vpop.f32.mrb[168].mxu1 }
 0x48e   : > { %5856 = vrot.lane.b32.xlu0 %v5150_v18, %s9430_s21  ;;  %v5169_v22 = vpop.f32.mrb[169].mxu1 }
 0x48f   : > { %v4849_v54 = vpop.f32.mrb[154].mxu0 }
 0x490   : > { %v5155_v34 = vadd.f32 %v8741_v1, %v4849_v54  ;;  %v4851_v9 = vpop.f32.mrb[155].mxu0 }
 0x491   : > { %v8750_v47 = vpop.f32.mrb[170].mxu1 }
 0x492   : > { %5858 = vrot.lane.b32.xlu1 %v5155_v34, %s9430_s21  ;;  %v5179_v24 = vpop.f32.mrb[171].mxu1 }
 0x493   : > { %v4854_v50 = vpop.f32.mrb[156].mxu0 }
 0x494   : > { %v5160_v43 = vadd.f32 %v5159_v21, %v4854_v50  ;;  %v4856_v46 = vpop.f32.mrb[157].mxu0 }
 0x495   : > { %v8753_v14 = vpop.f32.mrb[172].mxu1 }
 0x496   : > { %5860 = vrot.lane.b32.xlu0 %v5160_v43, %s9430_s21  ;;  %v5189_v41 = vpop.f32.mrb[173].mxu1 }
 0x497   : > { %v4859_v25 = vpop.f32.mrb[158].mxu0 }
 0x498   : > { %v5165_v37 = vadd.f32 %v8744_v31, %v4859_v25  ;;  %v4861_v48 = vpop.f32.mrb[159].mxu0 }
 0x499   : > { %v8756_v0 = vpop.f32.mrb[174].mxu1 }
 0x49a   : > { %5862 = vrot.lane.b32.xlu1 %v5165_v37, %s9430_s21  ;;  %v5199_v52 = vpop.f32.mrb[175].mxu1 }
 0x49b   : > { %v4864_v4 = vpop.f32.mrb[160].mxu0 }
 0x49c   : > { %v5170_v8 = vadd.f32 %v5169_v22, %v4864_v4  ;;  %v4866_v1 = vpop.f32.mrb[161].mxu0 }
 0x49e   : > { %5864 = vrot.lane.b32.xlu0 %v5170_v8, %s9430_s21 }
 0x49f   : > { %v4869_v58 = vpop.f32.mrb[162].mxu0 }
 0x4a0   : > { %v5175_v59 = vadd.f32 %v8747_v35, %v4869_v58  ;;  %v4871_v11 = vpop.f32.mrb[163].mxu0 }
 0x4a2   : > { %5866 = vrot.lane.b32.xlu1 %v5175_v59, %s9430_s21 }
 0x4a3   : > { %v4874_v44 = vpop.f32.mrb[164].mxu0 }
 0x4a4   : > { %v5180_v21 = vadd.f32 %v5179_v24, %v4874_v44  ;;  %v4876_v36 = vpop.f32.mrb[165].mxu0 }
 0x4a6   : > { %5868 = vrot.lane.b32.xlu0 %v5180_v21, %s9430_s21 }
 0x4a7   : > { %v4879_v31 = vpop.f32.mrb[166].mxu0 }
 0x4a8   : > { %v5185_v18 = vadd.f32 %v8750_v47, %v4879_v31  ;;  %v4881_v17 = vpop.f32.mrb[167].mxu0 }
 0x4aa   : > { %5870 = vrot.lane.b32.xlu1 %v5185_v18, %s9430_s21 }
 0x4ab   : > { %v4884_v22 = vpop.f32.mrb[168].mxu0 }
 0x4ac   : > { %v5190_v54 = vadd.f32 %v5189_v41, %v4884_v22  ;;  %v4886_v34 = vpop.f32.mrb[169].mxu0 }
 0x4ae   : > { %5872 = vrot.lane.b32.xlu0 %v5190_v54, %s9430_s21 }
 0x4af   : > { %v4889_v35 = vpop.f32.mrb[170].mxu0 }
 0x4b0   : > { %v5195_v9 = vadd.f32 %v8753_v14, %v4889_v35  ;;  %v4891_v50 = vpop.f32.mrb[171].mxu0 }
 0x4b2   : > { %v5787_v24 = vpop.permute.xlu1 %5786  ;;  %5874 = vrot.lane.b32.xlu1 %v5195_v9, %s9430_s21 }
 0x4b3   : > { %v6026_v43 = vsel %vm5928_vm0, %v11745_v53, %v5787_v24  ;;  %v5785_v47 = vpop.permute.xlu0 %5784  ;;  %v4894_v46 = vpop.f32.mrb[172].mxu0 }
 0x4b4   : > { %6513 = vst [vmem:[%s10942_s19 + $0x28] sm:$0xff] %v6026_v43  ;;  %v6025_v41 = vsel %vm5928_vm0, %v11750_v42, %v5785_v47  ;;  %v5200_v25 = vadd.f32 %v5199_v52, %v4894_v46  ;;  %v4896_v37 = vpop.f32.mrb[173].mxu0 }
 0x4b5   : > { %6510 = vst [vmem:[%s10942_s19 + $0x10] sm:$0xff] %v6025_v41 }
 0x4b6   : > { %v5791_v14 = vpop.permute.xlu1 %5790  ;;  %5876 = vrot.lane.b32.xlu0 %v5200_v25, %s9430_s21 }
 0x4b7   : > { %v6028_v48 = vsel %vm5928_vm0, %v11763_v7, %v5791_v14  ;;  %v5789_v4 = vpop.permute.xlu0 %5788  ;;  %v4899_v53 = vpop.f32.mrb[174].mxu0 }
 0x4b8   : > { %6519 = vst [vmem:[%s10942_s19 + $0x58] sm:$0xff] %v6028_v48  ;;  %v6027_v8 = vsel %vm5928_vm0, %v11768_v30, %v5789_v4  ;;  %v5205_v42 = vadd.f32 %v8756_v0, %v4899_v53  ;;  %v4901_v52 = vpop.f32.mrb[175].mxu0 }
 0x4b9   : > { %6516 = vst [vmem:[%s10942_s19 + $0x40] sm:$0xff] %v6027_v8  ;;  %v12524_v52 = vld [vmem:[#allocation23_spill] sm:$0xff] }
 0x4ba   : > { %v5795_v1 = vpop.permute.xlu1 %5794  ;;  %5878 = vrot.lane.b32.xlu1 %v5205_v42, %s9430_s21 }
 0x4bb   : > { %v6030_v58 = vsel %vm5928_vm0, %v11779_v63, %v5795_v1  ;;  %v5793_v7 = vpop.permute.xlu0 %5792 }
 0x4bc   : > { %6525 = vst [vmem:[%s10942_s19 + $0x88] sm:$0xff] %v6030_v58  ;;  %v6029_v59 = vsel %vm5928_vm0, %v11784_v62, %v5793_v7  ;;  %v12525_v58 = vld [vmem:[#allocation24_spill] sm:$0xff] }
 0x4bd   : > { %6522 = vst [vmem:[%s10942_s19 + $0x70] sm:$0xff] %v6029_v59  ;;  %v12526_v59 = vld [vmem:[#allocation25_spill] sm:$0xff] }
 0x4be   : > { %v5799_v30 = vpop.permute.xlu1 %5798 }
 0x4bf   : > { %v6032_v0 = vsel %vm5928_vm0, %v11795_v60, %v5799_v30  ;;  %v5797_v11 = vpop.permute.xlu0 %5796 }
 0x4c0   : > { %6531 = vst [vmem:[%s10942_s19 + $0xb8] sm:$0xff] %v6032_v0  ;;  %v6031_v44 = vsel %vm5928_vm0, %v11800_v16, %v5797_v11  ;;  %v12527_v0 = vld [vmem:[#allocation26_spill] sm:$0xff] }
 0x4c1   : > { %6528 = vst [vmem:[%s10942_s19 + $0xa0] sm:$0xff] %v6031_v44 }
 0x4c2   : > { %v5803_v63 = vpop.permute.xlu1 %5802 }
 0x4c3   : > { %v6034_v21 = vsel %vm5928_vm0, %v11810_v38, %v5803_v63  ;;  %v5801_v62 = vpop.permute.xlu0 %5800 }
 0x4c4   : > { %6537 = vst [vmem:[%s10942_s19 + $0xe8] sm:$0xff] %v6034_v21  ;;  %v6033_v36 = vsel %vm5928_vm0, %v11815_v27, %v5801_v62  ;;  %v12528_v62 = vld [vmem:[#allocation27_spill] sm:$0xff] }
 0x4c5   : > { %6534 = vst [vmem:[%s10942_s19 + $0xd0] sm:$0xff] %v6033_v36 }
 0x4c6   : > { %v5807_v60 = vpop.permute.xlu1 %5806 }
 0x4c7   : > { %v6036_v31 = vsel %vm5928_vm0, %v11825_v61, %v5807_v60  ;;  %v5805_v16 = vpop.permute.xlu0 %5804 }
 0x4c8   : > { %6543 = vst [vmem:[%s10942_s19 + $0x118] sm:$0xff] %v6036_v31  ;;  %v6035_v18 = vsel %vm5928_vm0, %v11829_v57, %v5805_v16  ;;  %v12529_v31 = vld [vmem:[#allocation28_spill] sm:$0xff] }
 0x4c9   : > { %6540 = vst [vmem:[%s10942_s19 + $0x100] sm:$0xff] %v6035_v18 }
 0x4ca   : > { %v5811_v38 = vpop.permute.xlu1 %5810 }
 0x4cb   : > { %v6038_v17 = vsel %vm5928_vm0, %v11839_v10, %v5811_v38  ;;  %v5809_v27 = vpop.permute.xlu0 %5808  ;;  %v12530_v38 = vld [vmem:[#allocation29_spill] sm:$0xff] }
 0x4cc   : > { %6549 = vst [vmem:[%s10942_s19 + $0x148] sm:$0xff] %v6038_v17  ;;  %v6037_v22 = vsel %vm5928_vm0, %v11843_v33, %v5809_v27  ;;  %v12531_v27 = vld [vmem:[#allocation30_spill] sm:$0xff] }
 0x4cd   : > { %6546 = vst [vmem:[%s10942_s19 + $0x130] sm:$0xff] %v6037_v22 }
 0x4ce   : > { %v5815_v61 = vpop.permute.xlu1 %5814 }
 0x4cf   : > { %v6040_v54 = vsel %vm5928_vm0, %v11858_v55, %v5815_v61  ;;  %v5813_v57 = vpop.permute.xlu0 %5812 }
 0x4d0   : > { %6555 = vst [vmem:[%s10942_s19 + $0x178] sm:$0xff] %v6040_v54  ;;  %v6039_v34 = vsel %vm5928_vm0, %v11855_v51, %v5813_v57  ;;  %v12532_v54 = vld [vmem:[#allocation31_spill] sm:$0xff] }
 0x4d1   : > { %6552 = vst [vmem:[%s10942_s19 + $0x160] sm:$0xff] %v6039_v34 }
 0x4d2   : > { %v5819_v10 = vpop.permute.xlu1 %5818 }
 0x4d3   : > { %v6042_v35 = vsel %vm5928_vm0, %v11882_v32, %v5819_v10  ;;  %v5817_v33 = vpop.permute.xlu0 %5816  ;;  %v12533_v10 = vld [vmem:[#allocation32_spill] sm:$0xff] }
 0x4d4   : > { %6561 = vst [vmem:[%s10942_s19 + $0x1a8] sm:$0xff] %v6042_v35  ;;  %v6041_v9 = vsel %vm5928_vm0, %v11870_v45, %v5817_v33 }
 0x4d5   : > { %6558 = vst [vmem:[%s10942_s19 + $0x190] sm:$0xff] %v6041_v9  ;;  %v12534_v9 = vld [vmem:[#allocation33_spill] sm:$0xff] }
 0x4d6   : > { %v5823_v55 = vpop.permute.xlu1 %5822 }
 0x4d7   : > { %v6044_v50 = vsel %vm5928_vm0, %v11905_v20, %v5823_v55  ;;  %v5821_v51 = vpop.permute.xlu0 %5820 }
 0x4d8   : > { %6567 = vst [vmem:[%s10942_s19 + $0x1d8] sm:$0xff] %v6044_v50  ;;  %v6043_v24 = vsel %vm5928_vm0, %v11893_v29, %v5821_v51  ;;  %v12535_v51 = vld [vmem:[#allocation34_spill] sm:$0xff] }
 0x4d9   : > { %6564 = vst [vmem:[%s10942_s19 + $0x1c0] sm:$0xff] %v6043_v24 }
 0x4da   : > { %v5827_v32 = vpop.permute.xlu1 %5826 }
 0x4db   : > { %v6046_v43 = vsel %vm5928_vm0, %v11931_v40, %v5827_v32  ;;  %v5825_v45 = vpop.permute.xlu0 %5824 }
 0x4dc   : > { %6573 = vst [vmem:[%s10942_s19 + $0x208] sm:$0xff] %v6046_v43  ;;  %v6045_v47 = vsel %vm5928_vm0, %v11917_v5, %v5825_v45  ;;  %v12536_v43 = vld [vmem:[#allocation35_spill] sm:$0xff] }
 0x4dd   : > { %6570 = vst [vmem:[%s10942_s19 + $0x1f0] sm:$0xff] %v6045_v47 }
 0x4de   : > { %v5831_v20 = vpop.permute.xlu1 %5830 }
 0x4df   : > { %v6048_v46 = vsel %vm5928_vm0, %v11956_v3, %v5831_v20  ;;  %v5829_v29 = vpop.permute.xlu0 %5828 }
 0x4e0   : > { %6579 = vst [vmem:[%s10942_s19 + $0x238] sm:$0xff] %v6048_v46  ;;  %v6047_v41 = vsel %vm5928_vm0, %v11944_v23, %v5829_v29 }
 0x4e1   : > { %6576 = vst [vmem:[%s10942_s19 + $0x220] sm:$0xff] %v6047_v41 }
 0x4e2   : > { %v5835_v40 = vpop.permute.xlu1 %5834 }
 0x4e3   : > { %v6050_v25 = vsel %vm5928_vm0, %v11979_v12, %v5835_v40  ;;  %v5833_v5 = vpop.permute.xlu0 %5832 }
 0x4e4   : > { %6585 = vst [vmem:[%s10942_s19 + $0x268] sm:$0xff] %v6050_v25  ;;  %v6049_v37 = vsel %vm5928_vm0, %v11967_v2, %v5833_v5 }
 0x4e5   : > { %6582 = vst [vmem:[%s10942_s19 + $0x250] sm:$0xff] %v6049_v37 }
 0x4e6   : > { %v5839_v3 = vpop.permute.xlu1 %5838 }
 0x4e7   : > { %v6052_v14 = vsel %vm5928_vm0, %v11999_v13, %v5839_v3  ;;  %v5837_v23 = vpop.permute.xlu0 %5836 }
 0x4e8   : > { %6591 = vst [vmem:[%s10942_s19 + $0x298] sm:$0xff] %v6052_v14  ;;  %v6051_v48 = vsel %vm5928_vm0, %v11989_v49, %v5837_v23 }
 0x4e9   : > { %6588 = vst [vmem:[%s10942_s19 + $0x280] sm:$0xff] %v6051_v48 }
 0x4ea   : > { %v5843_v12 = vpop.permute.xlu1 %5842 }
 0x4eb   : > { %v6054_v4 = vsel %vm5928_vm0, %v12019_v39, %v5843_v12  ;;  %v5841_v2 = vpop.permute.xlu0 %5840 }
 0x4ec   : > { %6597 = vst [vmem:[%s10942_s19 + $0x2c8] sm:$0xff] %v6054_v4  ;;  %v6053_v53 = vsel %vm5928_vm0, %v12009_v15, %v5841_v2 }
 0x4ed   : > { %6594 = vst [vmem:[%s10942_s19 + $0x2b0] sm:$0xff] %v6053_v53 }
 0x4ee   : > { %v5847_v13 = vpop.permute.xlu1 %5846 }
 0x4ef   : > { %v6056_v8 = vsel %vm5928_vm0, %v12039_v6, %v5847_v13  ;;  %v5845_v49 = vpop.permute.xlu0 %5844 }
 0x4f0   : > { %6603 = vst [vmem:[%s10942_s19 + $0x2f8] sm:$0xff] %v6056_v8  ;;  %v6055_v42 = vsel %vm5928_vm0, %v12029_v28, %v5845_v49 }
 0x4f1   : > { %6600 = vst [vmem:[%s10942_s19 + $0x2e0] sm:$0xff] %v6055_v42 }
 0x4f3   : > { %v5849_v39 = vpop.permute.xlu0 %5848 }
 0x4f4   : > { %v6057_v1 = vsel %vm5928_vm0, %v12524_v52, %v5849_v39  ;;  %v5851_v15 = vpop.permute.xlu1 %5850 }
 0x4f5   : > { %6606 = vst [vmem:[%s10942_s19 + $0x310] sm:$0xff] %v6057_v1  ;;  %v6058_v7 = vsel %vm5928_vm0, %v12525_v58, %v5851_v15 }
 0x4f6   : > { %6609 = vst [vmem:[%s10942_s19 + $0x328] sm:$0xff] %v6058_v7 }
 0x4f8   : > { %v5853_v6 = vpop.permute.xlu0 %5852 }
 0x4f9   : > { %v6059_v30 = vsel %vm5928_vm0, %v12526_v59, %v5853_v6 }
 0x4fa   : > { %6612 = vst [vmem:[%s10942_s19 + $0x340] sm:$0xff] %v6059_v30 }
 0x4fc   : > { %v5855_v28 = vpop.permute.xlu1 %5854 }
 0x4fd   : > { %v6060_v11 = vsel %vm5928_vm0, %v12527_v0, %v5855_v28 }
 0x4fe   : > { %6615 = vst [vmem:[%s10942_s19 + $0x358] sm:$0xff] %v6060_v11 }
 0x500   : > { %v5857_v44 = vpop.permute.xlu0 %5856 }
 0x501   : > { %v6061_v63 = vsel %vm5928_vm0, %v12079_v56, %v5857_v44 }
 0x502   : > { %6618 = vst [vmem:[%s10942_s19 + $0x370] sm:$0xff] %v6061_v63 }
 0x504   : > { %v5859_v21 = vpop.permute.xlu1 %5858 }
 0x505   : > { %v6062_v36 = vsel %vm5928_vm0, %v12528_v62, %v5859_v21 }
 0x506   : > { %6621 = vst [vmem:[%s10942_s19 + $0x388] sm:$0xff] %v6062_v36 }
 0x508   : > { %v5861_v60 = vpop.permute.xlu0 %5860 }
 0x509   : > { %v6063_v16 = vsel %vm5928_vm0, %v12529_v31, %v5861_v60 }
 0x50a   : > { %6624 = vst [vmem:[%s10942_s19 + $0x3a0] sm:$0xff] %v6063_v16 }
 0x50c   : > { %v5863_v18 = vpop.permute.xlu1 %5862 }
 0x50d   : > { %v6064_v17 = vsel %vm5928_vm0, %v12530_v38, %v5863_v18 }
 0x50e   : > { %6627 = vst [vmem:[%s10942_s19 + $0x3b8] sm:$0xff] %v6064_v17 }
 0x510   : > { %v5865_v56 = vpop.permute.xlu0 %5864 }
 0x511   : > { %v6065_v22 = vsel %vm5928_vm0, %v12531_v27, %v5865_v56 }
 0x512   : > { %6630 = vst [vmem:[%s10942_s19 + $0x3d0] sm:$0xff] %v6065_v22 }
 0x514   : > { %v5867_v61 = vpop.permute.xlu1 %5866 }
 0x515   : > { %v6066_v57 = vsel %vm5928_vm0, %v12532_v54, %v5867_v61 }
 0x516   : > { %6633 = vst [vmem:[%s10942_s19 + $0x3e8] sm:$0xff] %v6066_v57 }
 0x518   : > { %v5869_v34 = vpop.permute.xlu0 %5868 }
 0x519   : > { %v6067_v35 = vsel %vm5928_vm0, %v12533_v10, %v5869_v34 }
 0x51a   : > { %6636 = vst [vmem:[%s10942_s19 + $0x400] sm:$0xff] %v6067_v35 }
 0x51c   : > { %v5871_v33 = vpop.permute.xlu1 %5870 }
 0x51d   : > { %v6068_v55 = vsel %vm5928_vm0, %v12534_v9, %v5871_v33 }
 0x51e   : > { %6639 = vst [vmem:[%s10942_s19 + $0x418] sm:$0xff] %v6068_v55 }
 0x520   : > { %v5873_v50 = vpop.permute.xlu0 %5872 }
 0x521   : > { %v6069_v24 = vsel %vm5928_vm0, %v12535_v51, %v5873_v50 }
 0x522   : > { %6642 = vst [vmem:[%s10942_s19 + $0x430] sm:$0xff] %v6069_v24 }
 0x524   : > { %v5875_v32 = vpop.permute.xlu1 %5874 }
 0x525   : > { %v6070_v45 = vsel %vm5928_vm0, %v12536_v43, %v5875_v32 }
 0x526   : > { %6645 = vst [vmem:[%s10942_s19 + $0x448] sm:$0xff] %v6070_v45 }
 0x528   : > { %v5877_v47 = vpop.permute.xlu0 %5876 }
 0x529   : > { %v6071_v20 = vsel %vm5928_vm0, %v12130_v19, %v5877_v47 }
 0x52a   : > { %6648 = vst [vmem:[%s10942_s19 + $0x460] sm:$0xff] %v6071_v20 }
 0x52c   : > { %v5879_v46 = vpop.permute.xlu1 %5878 }
 0x52d   : > { %v6072_v29 = vsel %vm5928_vm0, %v12135_v26, %v5879_v46 }
 0x52e   : > { %6651 = vst [vmem:[%s10942_s19 + $0x478] sm:$0xff] %v6072_v29 }
 0x52f   : > { %9355 = shalt.err (!%p9352_p5)
}
 0x530   : > { %s9356_s27 = scalar_lea.hbm %s12353_s29, 18432  ;;  %s9360_s6 = scalar_lea.hbm %s12409_s2, 36864 }
 0x531   : > { %p9357_p6 = scmp.ne.s32.totalorder %s12353_s29, %s9356_s27  ;;  %p9361_p2 = scmp.lt.u32.totalorder %s12353_s29, %s12409_s2 }
 0x532   : > { %p9362_p4 = scmp.lt.u32.totalorder %s9360_s6, %s9356_s27  ;;  %p9364_p8 = scmp.lt.u32.totalorder %s9356_s27, %s12353_s29 }
 0x533   : > { %p9358_p7 = pnand %p9357_p6, %p12537_p11 }
 0x534   : > { %p9363_p9 = por %p9362_p4, %p9361_p2 }
 0x535   : > { %p9359_p12 = pneg %p9358_p7 }
 0x536   : > { %p9365_p0 = por %p9364_p8, %p9363_p9 }
 0x538   : > { %p9366_p10 = pnand %p9365_p0, %p9359_p12 }
 0x53a   : > { %9369 = shalt.err (!%p9366_p10)
}
 0x53b   : > { %s9432_s18 = smov 384   ;;  %s9433_s19 = smov 24  }
 0x53c   : > { %9245 = dma.vmem_to_hbm [thread:$0]  (%p12537_p11), %s12355_s25, 18432, %s12353_s29, %s6653_s12, %s9432_s18, %s9432_s18, %s9433_s19  }
 0x53d PF: > { %s6684_s20 = sand.u32 1, %s9404_s9   ;;  %p12538_p13 = scmp.ne.s32.totalorder %s12416_s24, 0 }
 0x53e   : > { %p12539_p1 = scmp.ge.s32.totalorder %s9424_s14, 2  ;;  %s6685_s26 = scalar_lea.sflag [#allocation5], %s6684_s20 }
 0x540   : > { %p9252_p3 = pnand %p12539_p1, %p12538_p13 }
 0x542   : > { %9399 = dma.done.wait (!%p9252_p3), %s6685_s26, 18432  }
 0x543   : > { %9401 = vsyncadd (!%p9252_p3), %s6685_s26, 4294948864  ;;  %s18_s14 = sadd.s32 1, %s9424_s14   ;;  %s12540_s9 = smov %s9408_s10 }
 0x544   : > { %p15_p5 = scmp.ge.s32.totalorder %s18_s14, 4   ;;  %s12541_s10 = smov %s9412_s11 }
 0x545   : > { %s12542_s11 = smov %s9505_s23  ;;  %s12543_s12 = smov %s9420_s13 }
 0x546   : > { %s12544_s13 = smov %s12546_s17  ;;  %17 = sbr.rel (!%p15_p5) target bundleno = 6 (0x6), region = 94 }
 0x54d   :  { %6690 = vsyncpa [#allocation4], 1 }
 0x54e   :  { %6692 = vsyncpa [#allocation4 + $0x1], 1 }
 0x54f   :  { %6693 = vsyncpa [#allocation5], 1 }
 0x550   :  { %6695 = vsyncpa [#allocation5 + $0x1], 1 }

</bundles_post_ra>
